<compile_context>
chip_gen: v7x
topology: tpu7x:2x2x1
jax: 0.10.0
libtpu: 0.0.40
codegen_flags: <defaults>
</compile_context>

<pallas_src>
from functools import partial

import jax
import jax.numpy as jnp
from jax import lax
from jax.experimental import pallas as pl
from jax.experimental.pallas import tpu as pltpu

POOL_KS = (5, 9, 13)
BN_EPS = 1e-5
COMPUTE_DTYPE = jnp.bfloat16      # MXU operand / intermediate-activation dtype (f32 accum)


def _derive_vmem_limit():
    try:
        info = pltpu.get_tpu_info()
        cap = int(getattr(info, "vmem_capacity_bytes", 0)) or 64 * 1024 * 1024
    except Exception:
        cap = 64 * 1024 * 1024
    # ~half of physical VMEM: 32 MiB on 64-MiB (v7x) parts, 64 MiB on 128-MiB (v5e/v6e).
    return max(32 * 1024 * 1024, min(cap // 2, 96 * 1024 * 1024))


VMEM_LIMIT = _derive_vmem_limit()


def _hardswish(y):
    # x * relu6(x + 3) / 6
    return y * jnp.clip(y + 3.0, 0.0, 6.0) * (1.0 / 6.0)


# -----------------------------------------------------------------------------
# Fused SPP kernel: cv1 (1x1 conv + folded BN + Hardswish) -> SPPF pool cascade
# (k = 5, 9, 13 via three chained 5x5 pools) -> cv2 (concat fused into 4
# accumulated matmuls) + bias + Hardswish.  One grid step per image; the only
# HBM traffic is reading x and the weights and writing the final output.
# -----------------------------------------------------------------------------
def _spp_fused_kernel(x_ref, w1_ref, b1_ref, w2t_ref, b2_ref, o_ref, pad_ref, *, H, W):
    # x_ref:   (1, C1, H*W)  bf16, channel-major
    # w1_ref:  (C1, c_)      bf16 (BN scale pre-folded)
    # b1_ref:  (1, c_)       f32
    # w2t_ref: (4, c2, c_)   bf16 (BN scale pre-folded, blocks pre-transposed)
    # b2_ref:  (c2, 1)       f32
    # o_ref:   (1, c2, H*W)  out dtype, channel-major
    # pad_ref: (H+4, W+10, c_) bf16 scratch (interior at [2:2+H, 8:8+W])
    c_ = w1_ref.shape[1]
    HW = H * W

    # ---------------- cv1: 1x1 conv + bias + Hardswish ----------------
    # Contract over the leading C1 axis of the channel-major block; output is already
    # channels-last (HW, c_), so no NCHW->NHWC transpose ever hits HBM.
    y = lax.dot_general(x_ref[0], w1_ref[...], (((0,), (0,)), ((), ())),
                        preferred_element_type=jnp.float32)          # (HW, c_)
    y = _hardswish(y + b1_ref[...]).astype(COMPUTE_DTYPE)

    # ---------------- SPPF cascade: pool5 o pool5 o pool5 == k = 5, 9, 13 ----------------
    # Halo-only -inf fill; the interior is fully overwritten by every pool pass.
    neg_rows = jnp.full((2, W + 10, c_), -jnp.inf, COMPUTE_DTYPE)
    neg_cols = jnp.full((H, 2, c_), -jnp.inf, COMPUTE_DTYPE)
    pad_ref[0:2, :, :] = neg_rows                     # top halo rows
    pad_ref[H + 2:H + 4, :, :] = neg_rows             # bottom halo rows
    pad_ref[2:2 + H, 6:8, :] = neg_cols               # left halo cols
    pad_ref[2:2 + H, 8 + W:10 + W, :] = neg_cols      # right halo cols

    def pool5(src):
        # src: (H, W, c_) values; 5x5 stride-1 "same" max pool with -inf padding
        # (PyTorch MaxPool2d semantics).  Channels stay on lanes; interior store is at
        # sublane offset 8 (aligned).  Log-tree max: 3 shifts + 3 maxes per axis.
        pad_ref[2:2 + H, 8:8 + W, :] = src
        # H pass (leading axis).
        t1 = jnp.maximum(pad_ref[0:H + 2, :, :], pad_ref[1:H + 3, :, :])
        rows = jnp.maximum(jnp.maximum(t1[0:H, :, :], t1[2:H + 2, :, :]),
                           pad_ref[4:H + 4, :, :])                    # (H, W+10, c_)
        # W pass (sublane axis).
        cA = jnp.maximum(rows[:, 6:8 + W, :], rows[:, 7:9 + W, :])    # (H, W+2, c_)
        return jnp.maximum(jnp.maximum(cA[:, 0:W, :], cA[:, 2:W + 2, :]),
                           rows[:, 10:10 + W, :])                     # (H, W, c_)

    p5 = pool5(y.reshape(H, W, c_))
    p9 = pool5(p5)
    p13 = pool5(p9)

    # ---------------- cv2: channel concat fused into 4 accumulated matmuls ----------------
    # Each dot is the standard A @ B.T form producing a channel-major (c2, HW) block, so
    # the output is written directly in NCHW order (no final transpose).
    def matT(k, act2d):
        return lax.dot_general(w2t_ref[k], act2d, (((1,), (1,)), ((), ())),
                               preferred_element_type=jnp.float32)    # (c2, HW)

    acc = matT(0, y)
    acc = acc + matT(1, p5.reshape(HW, c_))
    acc = acc + matT(2, p9.reshape(HW, c_))
    acc = acc + matT(3, p13.reshape(HW, c_))
    o_ref[0] = _hardswish(acc + b2_ref[...]).astype(o_ref.dtype)


# -----------------------------------------------------------------------------
# SPP forward
# -----------------------------------------------------------------------------
@jax.jit
def spp_forward(x_nchw, params):
    N, C1, H, W = x_nchw.shape
    c_ = params["w1"].shape[1]
    c2 = params["w2"].shape[1]
    HW = H * W

    # Fold eval-mode BN scale into the conv weights; biases are added in-kernel.
    w1f = (params["w1"] * params["scale1"]).astype(COMPUTE_DTYPE)          # (C1, c_)
    w2f = (params["w2"] * params["scale2"]).astype(COMPUTE_DTYPE)          # (4*c_, c2)
    # Split cv2's weight into the 4 concat blocks (same order as
    # torch.cat([x, m5(x), m9(x), m13(x)], 1)) and pre-transpose each to (c2, c_).
    w2t = jnp.transpose(w2f.reshape(4, c_, c2), (0, 2, 1))                 # (4, c2, c_)
    b1 = params["bias1"]                                                   # (1, c_)
    b2 = params["bias2"].reshape(c2, 1)                                    # (c2, 1)

    # Only host-side layout op: flatten the spatial dims (no transpose) and cast to bf16.
    x2 = x_nchw.reshape(N, C1, HW).astype(COMPUTE_DTYPE)

    kernel = partial(_spp_fused_kernel, H=H, W=W)
    out = pl.pallas_call(
        kernel,
        out_shape=jax.ShapeDtypeStruct((N, c2, HW), x_nchw.dtype),
        grid=(N,),
        in_specs=[
            pl.BlockSpec((1, C1, HW), lambda n: (n, 0, 0)),
            pl.BlockSpec((C1, c_), lambda n: (0, 0)),
            pl.BlockSpec((1, c_), lambda n: (0, 0)),
            pl.BlockSpec((4, c2, c_), lambda n: (0, 0, 0)),
            pl.BlockSpec((c2, 1), lambda n: (0, 0)),
        ],
        out_specs=pl.BlockSpec((1, c2, HW), lambda n: (n, 0, 0)),
        scratch_shapes=[pltpu.VMEM((H + 4, W + 10, c_), COMPUTE_DTYPE)],
        compiler_params=pltpu.CompilerParams(
            dimension_semantics=("parallel",),
            vmem_limit_bytes=VMEM_LIMIT),
    )(x2, w1f, b1, w2t, b2)
    return out.reshape(N, c2, H, W)


# -----------------------------------------------------------------------------
# Deterministic parameter construction (synthetic weights, BN folded for eval)
# -----------------------------------------------------------------------------
def make_params(key, c1, c2):
    c_ = c1 // 2
    ks = jax.random.split(key, 10)

    def bn_fold(kg, kb, km, kv, c):
        gamma = 1.0 + 0.1 * jax.random.normal(kg, (c,), jnp.float32)
        beta = 0.1 * jax.random.normal(kb, (c,), jnp.float32)
        mean = 0.1 * jax.random.normal(km, (c,), jnp.float32)
        var = jnp.abs(jax.random.normal(kv, (c,), jnp.float32)) + 0.5
        scale = gamma / jnp.sqrt(var + BN_EPS)
        bias = beta - mean * scale
        return scale.reshape(1, c), bias.reshape(1, c)

    # PyTorch conv weight shapes: (c_, c1, 1, 1) and (c2, 4*c_, 1, 1);
    # stored here transposed as (Cin, Cout) matrices for the matmul kernels.
    w1 = 0.1 * jax.random.normal(ks[0], (c1, c_), jnp.float32)
    s1, b1 = bn_fold(ks[1], ks[2], ks[3], ks[4], c_)
    w2 = 0.1 * jax.random.normal(ks[5], (c_ * (len(POOL_KS) + 1), c2), jnp.float32)
    s2, b2 = bn_fold(ks[6], ks[7], ks[8], ks[9], c2)
    return dict(w1=w1, scale1=s1, bias1=b1, w2=w2, scale2=s2, bias2=b2)


# -----------------------------------------------------------------------------
# Pure-JAX reference (for a correctness sanity check)
# -----------------------------------------------------------------------------
def spp_reference(x, params):
    def conv_bn_hsw(x, w, scale, bias):
        y = jnp.einsum("nchw,co->nohw", x, w)
        y = y * scale.reshape(1, -1, 1, 1) + bias.reshape(1, -1, 1, 1)
        return y * jnp.clip(y + 3.0, 0.0, 6.0) / 6.0

    y = conv_bn_hsw(x, params["w1"], params["scale1"], params["bias1"])
    pools = [y]
    for k in POOL_KS:
        p = k // 2
        pools.append(
            lax.reduce_window(
                y, -jnp.inf, lax.max,
                (1, 1, k, k), (1, 1, 1, 1),
                [(0, 0), (0, 0), (p, p), (p, p)],
            )
        )
    cat = jnp.concatenate(pools, axis=1)
    return conv_bn_hsw(cat, params["w2"], params["scale2"], params["bias2"])


if __name__ == "__main__":
    key = jax.random.PRNGKey(0)
    k_x, k_p = jax.random.split(key)

    N, C1, H, W = 2, 4, 16, 16
    C2 = 8
    x = jax.random.normal(k_x, (N, C1, H, W), jnp.float32)
    params = make_params(k_p, C1, C2)

    out = jax.block_until_ready(spp_forward(x, params))
    assert out.shape == (N, C2, H, W), out.shape

    ref = jax.block_until_ready(spp_reference(x, params))
    # bf16 MXU operands -> relaxed tolerance (max pooling itself is exact in any dtype).
    assert jnp.allclose(out, ref, atol=2e-2, rtol=2e-2), (
        float(jnp.max(jnp.abs(out - ref)))
    )

    print("KERNEL_OK")
</pallas_src>

<mosaic_0001>
module attributes {stable_mosaic.version = 11 : i64} {
  func.func @_spp_fused_kernel(%arg0: i32, %arg1: memref<1x4x256xbf16, #tpu.memory_space<vmem>>, %arg2: memref<4x2xbf16, #tpu.memory_space<vmem>>, %arg3: memref<1x2xf32, #tpu.memory_space<vmem>>, %arg4: memref<4x8x2xbf16, #tpu.memory_space<vmem>>, %arg5: memref<8x1xf32, #tpu.memory_space<vmem>>, %arg6: memref<1x8x256xf32, #tpu.memory_space<vmem>>, %arg7: memref<20x26x2xbf16, #tpu.memory_space<vmem>>) attributes {dimension_semantics = [#tpu.dimension_semantics<parallel>], iteration_bounds = array<i64: 2>, scalar_prefetch = 0 : i64, scratch_operands = 1 : i64, tpu.core_type = #tpu.core_type<tc>, window_params = [{transform_indices = @transform_0, window_bounds = array<i64: 1, 4, 256>}, {pipeline_mode = #tpu.pipeline_mode<synchronous>, transform_indices = @transform_1, window_bounds = array<i64: 4, 2>}, {pipeline_mode = #tpu.pipeline_mode<synchronous>, transform_indices = @transform_2, window_bounds = array<i64: 1, 2>}, {pipeline_mode = #tpu.pipeline_mode<synchronous>, transform_indices = @transform_3, window_bounds = array<i64: 4, 8, 2>}, {pipeline_mode = #tpu.pipeline_mode<synchronous>, transform_indices = @transform_4, window_bounds = array<i64: 8, 1>}, {transform_indices = @transform_5, window_bounds = array<i64: 1, 8, 256>}]} {
    %c0 = arith.constant 0 : index
    %c0_0 = arith.constant 0 : index
    %c0_1 = arith.constant 0 : index
    %0 = vector.load %arg1[%c0, %c0_0, %c0_1] : memref<1x4x256xbf16, #tpu.memory_space<vmem>>, vector<1x4x256xbf16>
    %1 = vector.shape_cast %0 : vector<1x4x256xbf16> to vector<4x256xbf16>
    %c0_2 = arith.constant 0 : index
    %c0_3 = arith.constant 0 : index
    %2 = vector.load %arg2[%c0_2, %c0_3] : memref<4x2xbf16, #tpu.memory_space<vmem>>, vector<4x2xbf16>
    %cst = arith.constant dense<0.000000e+00> : vector<256x2xf32>
    %3 = tpu.matmul %1, %2, %cst {dimension_numbers = #tpu.dot_dimension_numbers<[0], [0], [1], [1], [0, 1, 1, 1], [], []>} : vector<4x256xbf16>, vector<4x2xbf16>, vector<256x2xf32> -> vector<256x2xf32>
    %c0_4 = arith.constant 0 : index
    %c0_5 = arith.constant 0 : index
    %4 = vector.load %arg3[%c0_4, %c0_5] : memref<1x2xf32, #tpu.memory_space<vmem>>, vector<1x2xf32>
    %5 = vector.broadcast %4 : vector<1x2xf32> to vector<256x2xf32>
    %6 = arith.addf %3, %5 : vector<256x2xf32>
    %cst_6 = arith.constant 3.000000e+00 : f32
    %7 = vector.broadcast %cst_6 : f32 to vector<256x2xf32>
    %8 = arith.addf %6, %7 : vector<256x2xf32>
    %cst_7 = arith.constant 0.000000e+00 : f32
    %cst_8 = arith.constant 6.000000e+00 : f32
    %9 = vector.broadcast %cst_7 : f32 to vector<256x2xf32>
    %10 = arith.maximumf %9, %8 : vector<256x2xf32>
    %11 = vector.broadcast %cst_8 : f32 to vector<256x2xf32>
    %12 = arith.minimumf %11, %10 : vector<256x2xf32>
    %13 = arith.mulf %6, %12 : vector<256x2xf32>
    %cst_9 = arith.constant 0.166666672 : f32
    %14 = vector.broadcast %cst_9 : f32 to vector<256x2xf32>
    %15 = arith.mulf %13, %14 : vector<256x2xf32>
    %16 = arith.truncf %15 : vector<256x2xf32> to vector<256x2xbf16>
    %cst_10 = arith.constant 0xFF80 : bf16
    %17 = vector.broadcast %cst_10 : bf16 to vector<2x26x2xbf16>
    %cst_11 = arith.constant 0xFF80 : bf16
    %18 = vector.broadcast %cst_11 : bf16 to vector<16x2x2xbf16>
    %c0_12 = arith.constant 0 : index
    %c0_13 = arith.constant 0 : index
    %c0_14 = arith.constant 0 : index
    %19 = vector.load %arg7[%c0_12, %c0_13, %c0_14] : memref<20x26x2xbf16, #tpu.memory_space<vmem>>, vector<2x26x2xbf16>
    tpu.vector_store %arg7[%c0_12, %c0_13, %c0_14], %17 {strides = array<i32>} : memref<20x26x2xbf16, #tpu.memory_space<vmem>>, vector<2x26x2xbf16>,
    %c18 = arith.constant 18 : index
    %c0_15 = arith.constant 0 : index
    %c0_16 = arith.constant 0 : index
    %20 = vector.load %arg7[%c18, %c0_15, %c0_16] : memref<20x26x2xbf16, #tpu.memory_space<vmem>>, vector<2x26x2xbf16>
    tpu.vector_store %arg7[%c18, %c0_15, %c0_16], %17 {strides = array<i32>} : memref<20x26x2xbf16, #tpu.memory_space<vmem>>, vector<2x26x2xbf16>,
    %c2 = arith.constant 2 : index
    %c6 = arith.constant 6 : index
    %c0_17 = arith.constant 0 : index
    %21 = vector.load %arg7[%c2, %c6, %c0_17] : memref<20x26x2xbf16, #tpu.memory_space<vmem>>, vector<16x2x2xbf16>
    tpu.vector_store %arg7[%c2, %c6, %c0_17], %18 {strides = array<i32>} : memref<20x26x2xbf16, #tpu.memory_space<vmem>>, vector<16x2x2xbf16>,
    %c2_18 = arith.constant 2 : index
    %c24 = arith.constant 24 : index
    %c0_19 = arith.constant 0 : index
    %22 = vector.load %arg7[%c2_18, %c24, %c0_19] : memref<20x26x2xbf16, #tpu.memory_space<vmem>>, vector<16x2x2xbf16>
    tpu.vector_store %arg7[%c2_18, %c24, %c0_19], %18 {strides = array<i32>} : memref<20x26x2xbf16, #tpu.memory_space<vmem>>, vector<16x2x2xbf16>,
    %23 = vector.shape_cast %16 : vector<256x2xbf16> to vector<16x16x2xbf16>
    %c2_20 = arith.constant 2 : index
    %c8 = arith.constant 8 : index
    %c0_21 = arith.constant 0 : index
    %24 = vector.load %arg7[%c2_20, %c8, %c0_21] : memref<20x26x2xbf16, #tpu.memory_space<vmem>>, vector<16x16x2xbf16>
    tpu.vector_store %arg7[%c2_20, %c8, %c0_21], %23 {strides = array<i32>} : memref<20x26x2xbf16, #tpu.memory_space<vmem>>, vector<16x16x2xbf16>,
    %c0_22 = arith.constant 0 : index
    %c0_23 = arith.constant 0 : index
    %c0_24 = arith.constant 0 : index
    %25 = vector.load %arg7[%c0_22, %c0_23, %c0_24] : memref<20x26x2xbf16, #tpu.memory_space<vmem>>, vector<18x26x2xbf16>
    %c1 = arith.constant 1 : index
    %c0_25 = arith.constant 0 : index
    %c0_26 = arith.constant 0 : index
    %26 = vector.load %arg7[%c1, %c0_25, %c0_26] : memref<20x26x2xbf16, #tpu.memory_space<vmem>>, vector<18x26x2xbf16>
    %27 = arith.maximumf %25, %26 : vector<18x26x2xbf16>
    %28 = vector.extract_strided_slice %27 {offsets = [0, 0, 0], sizes = [16, 26, 2], strides = [1, 1, 1]} : vector<18x26x2xbf16> to vector<16x26x2xbf16>
    %29 = vector.extract_strided_slice %27 {offsets = [2, 0, 0], sizes = [16, 26, 2], strides = [1, 1, 1]} : vector<18x26x2xbf16> to vector<16x26x2xbf16>
    %30 = arith.maximumf %28, %29 : vector<16x26x2xbf16>
    %c4 = arith.constant 4 : index
    %c0_27 = arith.constant 0 : index
    %c0_28 = arith.constant 0 : index
    %31 = vector.load %arg7[%c4, %c0_27, %c0_28] : memref<20x26x2xbf16, #tpu.memory_space<vmem>>, vector<16x26x2xbf16>
    %32 = arith.maximumf %30, %31 : vector<16x26x2xbf16>
    %33 = vector.extract_strided_slice %32 {offsets = [0, 6, 0], sizes = [16, 18, 2], strides = [1, 1, 1]} : vector<16x26x2xbf16> to vector<16x18x2xbf16>
    %34 = vector.extract_strided_slice %32 {offsets = [0, 7, 0], sizes = [16, 18, 2], strides = [1, 1, 1]} : vector<16x26x2xbf16> to vector<16x18x2xbf16>
    %35 = arith.maximumf %33, %34 : vector<16x18x2xbf16>
    %36 = vector.extract_strided_slice %35 {offsets = [0, 0, 0], sizes = [16, 16, 2], strides = [1, 1, 1]} : vector<16x18x2xbf16> to vector<16x16x2xbf16>
    %37 = vector.extract_strided_slice %35 {offsets = [0, 2, 0], sizes = [16, 16, 2], strides = [1, 1, 1]} : vector<16x18x2xbf16> to vector<16x16x2xbf16>
    %38 = arith.maximumf %36, %37 : vector<16x16x2xbf16>
    %39 = vector.extract_strided_slice %32 {offsets = [0, 10, 0], sizes = [16, 16, 2], strides = [1, 1, 1]} : vector<16x26x2xbf16> to vector<16x16x2xbf16>
    %40 = arith.maximumf %38, %39 : vector<16x16x2xbf16>
    %c2_29 = arith.constant 2 : index
    %c8_30 = arith.constant 8 : index
    %c0_31 = arith.constant 0 : index
    %41 = vector.load %arg7[%c2_29, %c8_30, %c0_31] : memref<20x26x2xbf16, #tpu.memory_space<vmem>>, vector<16x16x2xbf16>
    tpu.vector_store %arg7[%c2_29, %c8_30, %c0_31], %40 {strides = array<i32>} : memref<20x26x2xbf16, #tpu.memory_space<vmem>>, vector<16x16x2xbf16>,
    %c0_32 = arith.constant 0 : index
    %c0_33 = arith.constant 0 : index
    %c0_34 = arith.constant 0 : index
    %42 = vector.load %arg7[%c0_32, %c0_33, %c0_34] : memref<20x26x2xbf16, #tpu.memory_space<vmem>>, vector<18x26x2xbf16>
    %c1_35 = arith.constant 1 : index
    %c0_36 = arith.constant 0 : index
    %c0_37 = arith.constant 0 : index
    %43 = vector.load %arg7[%c1_35, %c0_36, %c0_37] : memref<20x26x2xbf16, #tpu.memory_space<vmem>>, vector<18x26x2xbf16>
    %44 = arith.maximumf %42, %43 : vector<18x26x2xbf16>
    %45 = vector.extract_strided_slice %44 {offsets = [0, 0, 0], sizes = [16, 26, 2], strides = [1, 1, 1]} : vector<18x26x2xbf16> to vector<16x26x2xbf16>
    %46 = vector.extract_strided_slice %44 {offsets = [2, 0, 0], sizes = [16, 26, 2], strides = [1, 1, 1]} : vector<18x26x2xbf16> to vector<16x26x2xbf16>
    %47 = arith.maximumf %45, %46 : vector<16x26x2xbf16>
    %c4_38 = arith.constant 4 : index
    %c0_39 = arith.constant 0 : index
    %c0_40 = arith.constant 0 : index
    %48 = vector.load %arg7[%c4_38, %c0_39, %c0_40] : memref<20x26x2xbf16, #tpu.memory_space<vmem>>, vector<16x26x2xbf16>
    %49 = arith.maximumf %47, %48 : vector<16x26x2xbf16>
    %50 = vector.extract_strided_slice %49 {offsets = [0, 6, 0], sizes = [16, 18, 2], strides = [1, 1, 1]} : vector<16x26x2xbf16> to vector<16x18x2xbf16>
    %51 = vector.extract_strided_slice %49 {offsets = [0, 7, 0], sizes = [16, 18, 2], strides = [1, 1, 1]} : vector<16x26x2xbf16> to vector<16x18x2xbf16>
    %52 = arith.maximumf %50, %51 : vector<16x18x2xbf16>
    %53 = vector.extract_strided_slice %52 {offsets = [0, 0, 0], sizes = [16, 16, 2], strides = [1, 1, 1]} : vector<16x18x2xbf16> to vector<16x16x2xbf16>
    %54 = vector.extract_strided_slice %52 {offsets = [0, 2, 0], sizes = [16, 16, 2], strides = [1, 1, 1]} : vector<16x18x2xbf16> to vector<16x16x2xbf16>
    %55 = arith.maximumf %53, %54 : vector<16x16x2xbf16>
    %56 = vector.extract_strided_slice %49 {offsets = [0, 10, 0], sizes = [16, 16, 2], strides = [1, 1, 1]} : vector<16x26x2xbf16> to vector<16x16x2xbf16>
    %57 = arith.maximumf %55, %56 : vector<16x16x2xbf16>
    %c2_41 = arith.constant 2 : index
    %c8_42 = arith.constant 8 : index
    %c0_43 = arith.constant 0 : index
    %58 = vector.load %arg7[%c2_41, %c8_42, %c0_43] : memref<20x26x2xbf16, #tpu.memory_space<vmem>>, vector<16x16x2xbf16>
    tpu.vector_store %arg7[%c2_41, %c8_42, %c0_43], %57 {strides = array<i32>} : memref<20x26x2xbf16, #tpu.memory_space<vmem>>, vector<16x16x2xbf16>,
    %c0_44 = arith.constant 0 : index
    %c0_45 = arith.constant 0 : index
    %c0_46 = arith.constant 0 : index
    %59 = vector.load %arg7[%c0_44, %c0_45, %c0_46] : memref<20x26x2xbf16, #tpu.memory_space<vmem>>, vector<18x26x2xbf16>
    %c1_47 = arith.constant 1 : index
    %c0_48 = arith.constant 0 : index
    %c0_49 = arith.constant 0 : index
    %60 = vector.load %arg7[%c1_47, %c0_48, %c0_49] : memref<20x26x2xbf16, #tpu.memory_space<vmem>>, vector<18x26x2xbf16>
    %61 = arith.maximumf %59, %60 : vector<18x26x2xbf16>
    %62 = vector.extract_strided_slice %61 {offsets = [0, 0, 0], sizes = [16, 26, 2], strides = [1, 1, 1]} : vector<18x26x2xbf16> to vector<16x26x2xbf16>
    %63 = vector.extract_strided_slice %61 {offsets = [2, 0, 0], sizes = [16, 26, 2], strides = [1, 1, 1]} : vector<18x26x2xbf16> to vector<16x26x2xbf16>
    %64 = arith.maximumf %62, %63 : vector<16x26x2xbf16>
    %c4_50 = arith.constant 4 : index
    %c0_51 = arith.constant 0 : index
    %c0_52 = arith.constant 0 : index
    %65 = vector.load %arg7[%c4_50, %c0_51, %c0_52] : memref<20x26x2xbf16, #tpu.memory_space<vmem>>, vector<16x26x2xbf16>
    %66 = arith.maximumf %64, %65 : vector<16x26x2xbf16>
    %67 = vector.extract_strided_slice %66 {offsets = [0, 6, 0], sizes = [16, 18, 2], strides = [1, 1, 1]} : vector<16x26x2xbf16> to vector<16x18x2xbf16>
    %68 = vector.extract_strided_slice %66 {offsets = [0, 7, 0], sizes = [16, 18, 2], strides = [1, 1, 1]} : vector<16x26x2xbf16> to vector<16x18x2xbf16>
    %69 = arith.maximumf %67, %68 : vector<16x18x2xbf16>
    %70 = vector.extract_strided_slice %69 {offsets = [0, 0, 0], sizes = [16, 16, 2], strides = [1, 1, 1]} : vector<16x18x2xbf16> to vector<16x16x2xbf16>
    %71 = vector.extract_strided_slice %69 {offsets = [0, 2, 0], sizes = [16, 16, 2], strides = [1, 1, 1]} : vector<16x18x2xbf16> to vector<16x16x2xbf16>
    %72 = arith.maximumf %70, %71 : vector<16x16x2xbf16>
    %73 = vector.extract_strided_slice %66 {offsets = [0, 10, 0], sizes = [16, 16, 2], strides = [1, 1, 1]} : vector<16x26x2xbf16> to vector<16x16x2xbf16>
    %74 = arith.maximumf %72, %73 : vector<16x16x2xbf16>
    %c0_53 = arith.constant 0 : index
    %c0_54 = arith.constant 0 : index
    %c0_55 = arith.constant 0 : index
    %75 = vector.load %arg4[%c0_53, %c0_54, %c0_55] : memref<4x8x2xbf16, #tpu.memory_space<vmem>>, vector<1x8x2xbf16>
    %76 = vector.shape_cast %75 : vector<1x8x2xbf16> to vector<8x2xbf16>
    %cst_56 = arith.constant dense<0.000000e+00> : vector<8x256xf32>
    %77 = tpu.matmul %76, %16, %cst_56 {dimension_numbers = #tpu.dot_dimension_numbers<[1], [1], [0], [0], [0, 0, 1, 0], [], []>} : vector<8x2xbf16>, vector<256x2xbf16>, vector<8x256xf32> -> vector<8x256xf32>
    %78 = vector.shape_cast %40 : vector<16x16x2xbf16> to vector<256x2xbf16>
    %c1_57 = arith.constant 1 : index
    %c0_58 = arith.constant 0 : index
    %c0_59 = arith.constant 0 : index
    %79 = vector.load %arg4[%c1_57, %c0_58, %c0_59] : memref<4x8x2xbf16, #tpu.memory_space<vmem>>, vector<1x8x2xbf16>
    %80 = vector.shape_cast %79 : vector<1x8x2xbf16> to vector<8x2xbf16>
    %cst_60 = arith.constant dense<0.000000e+00> : vector<8x256xf32>
    %81 = tpu.matmul %80, %78, %cst_60 {dimension_numbers = #tpu.dot_dimension_numbers<[1], [1], [0], [0], [0, 0, 1, 0], [], []>} : vector<8x2xbf16>, vector<256x2xbf16>, vector<8x256xf32> -> vector<8x256xf32>
    %82 = arith.addf %77, %81 : vector<8x256xf32>
    %83 = vector.shape_cast %57 : vector<16x16x2xbf16> to vector<256x2xbf16>
    %c2_61 = arith.constant 2 : index
    %c0_62 = arith.constant 0 : index
    %c0_63 = arith.constant 0 : index
    %84 = vector.load %arg4[%c2_61, %c0_62, %c0_63] : memref<4x8x2xbf16, #tpu.memory_space<vmem>>, vector<1x8x2xbf16>
    %85 = vector.shape_cast %84 : vector<1x8x2xbf16> to vector<8x2xbf16>
    %cst_64 = arith.constant dense<0.000000e+00> : vector<8x256xf32>
    %86 = tpu.matmul %85, %83, %cst_64 {dimension_numbers = #tpu.dot_dimension_numbers<[1], [1], [0], [0], [0, 0, 1, 0], [], []>} : vector<8x2xbf16>, vector<256x2xbf16>, vector<8x256xf32> -> vector<8x256xf32>
    %87 = arith.addf %82, %86 : vector<8x256xf32>
    %88 = vector.shape_cast %74 : vector<16x16x2xbf16> to vector<256x2xbf16>
    %c3 = arith.constant 3 : index
    %c0_65 = arith.constant 0 : index
    %c0_66 = arith.constant 0 : index
    %89 = vector.load %arg4[%c3, %c0_65, %c0_66] : memref<4x8x2xbf16, #tpu.memory_space<vmem>>, vector<1x8x2xbf16>
    %90 = vector.shape_cast %89 : vector<1x8x2xbf16> to vector<8x2xbf16>
    %cst_67 = arith.constant dense<0.000000e+00> : vector<8x256xf32>
    %91 = tpu.matmul %90, %88, %cst_67 {dimension_numbers = #tpu.dot_dimension_numbers<[1], [1], [0], [0], [0, 0, 1, 0], [], []>} : vector<8x2xbf16>, vector<256x2xbf16>, vector<8x256xf32> -> vector<8x256xf32>
    %92 = arith.addf %87, %91 : vector<8x256xf32>
    %c0_68 = arith.constant 0 : index
    %c0_69 = arith.constant 0 : index
    %93 = vector.load %arg5[%c0_68, %c0_69] : memref<8x1xf32, #tpu.memory_space<vmem>>, vector<8x1xf32>
    %94 = vector.broadcast %93 : vector<8x1xf32> to vector<8x256xf32>
    %95 = arith.addf %92, %94 : vector<8x256xf32>
    %cst_70 = arith.constant 3.000000e+00 : f32
    %96 = vector.broadcast %cst_70 : f32 to vector<8x256xf32>
    %97 = arith.addf %95, %96 : vector<8x256xf32>
    %cst_71 = arith.constant 0.000000e+00 : f32
    %cst_72 = arith.constant 6.000000e+00 : f32
    %98 = vector.broadcast %cst_71 : f32 to vector<8x256xf32>
    %99 = arith.maximumf %98, %97 : vector<8x256xf32>
    %100 = vector.broadcast %cst_72 : f32 to vector<8x256xf32>
    %101 = arith.minimumf %100, %99 : vector<8x256xf32>
    %102 = arith.mulf %95, %101 : vector<8x256xf32>
    %cst_73 = arith.constant 0.166666672 : f32
    %103 = vector.broadcast %cst_73 : f32 to vector<8x256xf32>
    %104 = arith.mulf %102, %103 : vector<8x256xf32>
    %c0_74 = arith.constant 0 : index
    %c0_75 = arith.constant 0 : index
    %c0_76 = arith.constant 0 : index
    %105 = vector.load %arg6[%c0_74, %c0_75, %c0_76] : memref<1x8x256xf32, #tpu.memory_space<vmem>>, vector<1x8x256xf32>
    %106 = vector.shape_cast %105 : vector<1x8x256xf32> to vector<8x256xf32>
    %107 = vector.shape_cast %104 : vector<8x256xf32> to vector<1x8x256xf32>
    tpu.vector_store %arg6[%c0_74, %c0_75, %c0_76], %107 {strides = array<i32>} : memref<1x8x256xf32, #tpu.memory_space<vmem>>, vector<1x8x256xf32>,
    return
  }
  func.func @transform_0(%arg0: i32) -> (i32, i32, i32) {
    %c0_i32 = arith.constant 0 : i32
    %c0_i32_0 = arith.constant 0 : i32
    %c0_i32_1 = arith.constant 0 : i32
    return %arg0, %c0_i32, %c0_i32_0 : i32, i32, i32
  }
  func.func @transform_1(%arg0: i32) -> (i32, i32) {
    %c0_i32 = arith.constant 0 : i32
    %c0_i32_0 = arith.constant 0 : i32
    %c0_i32_1 = arith.constant 0 : i32
    return %c0_i32, %c0_i32_0 : i32, i32
  }
  func.func @transform_2(%arg0: i32) -> (i32, i32) {
    %c0_i32 = arith.constant 0 : i32
    %c0_i32_0 = arith.constant 0 : i32
    %c0_i32_1 = arith.constant 0 : i32
    return %c0_i32, %c0_i32_0 : i32, i32
  }
  func.func @transform_3(%arg0: i32) -> (i32, i32, i32) {
    %c0_i32 = arith.constant 0 : i32
    %c0_i32_0 = arith.constant 0 : i32
    %c0_i32_1 = arith.constant 0 : i32
    %c0_i32_2 = arith.constant 0 : i32
    return %c0_i32, %c0_i32_0, %c0_i32_1 : i32, i32, i32
  }
  func.func @transform_4(%arg0: i32) -> (i32, i32) {
    %c0_i32 = arith.constant 0 : i32
    %c0_i32_0 = arith.constant 0 : i32
    %c0_i32_1 = arith.constant 0 : i32
    return %c0_i32, %c0_i32_0 : i32, i32
  }
  func.func @transform_5(%arg0: i32) -> (i32, i32, i32) {
    %c0_i32 = arith.constant 0 : i32
    %c0_i32_0 = arith.constant 0 : i32
    %c0_i32_1 = arith.constant 0 : i32
    return %arg0, %c0_i32, %c0_i32_0 : i32, i32, i32
  }
}

</mosaic_0001>

<bundles_post_ra>
// kernel: spp_forward.1
= control target key start
LH: loop header
LB: loop body
LE: loop exit
PB: predicated region body
PF: predicated region fallthrough
CT: control target
= control target key end

     0   :  { %s6887_s18 = smov 0   ;;  %s9811_s0 = inlined_call_operand.vmem [shape: bf16[2,4,256], index: 0, kind: input, shape index: {}]   ;;  %s9812_s1 = inlined_call_operand.vmem [shape: bf16[4,2], index: 1, kind: input, shape index: {}]   ;;  %s9813_s2 = inlined_call_operand.vmem [shape: f32[1,2], index: 2, kind: input, shape index: {}]   ;;  %s9814_s3 = inlined_call_operand.vmem [shape: bf16[4,8,2], index: 3, kind: input, shape index: {}]   ;;  %s9815_s4 = inlined_call_operand.vmem [shape: f32[8,1], index: 4, kind: input, shape index: {}]   ;;  %s9816_s5 = inlined_call_operand.vmem [shape: f32[2,8,256], index: 5, kind: output, shape index: {}]  }
   0x1 LB: > { %s6431_s19 = sadd.s32 4294967295, %s6853_s18   ;;  %p6435_p0 = scmp.ge.s32.totalorder %s6853_s18, 1  ;;  %s6853_s18 = sphi %s6887_s18, %s15_s18  }
   0x2   : > { %p187_p1 = scmp.lt.s32.totalorder %s6853_s18, 3 }
   0x4   : > { %p188_p2 = pnand %p6435_p0, %p187_p1 }
   0x6   : > { %191 = sbr.rel (%p188_p2) target bundleno = 1359 (0x54f), region = 40 }
   0xd   : > { %p215_p3 = scmp.lt.s32.totalorder %s6431_s19, 1  ;;  %v228_v0 = vld [vmem:[%s9812_s1] sm:$0x3]  ;;  %vm328_vm0 = vcmask 1041408   ;;  %vm279_vm1 = vcmask 31744   ;;  %vm669_vm2 = vcmask 11264  }
   0xe   : > { %6800 = vmatprep.subr.msk.bf16.mxu0 %vm328_vm0, %v228_v0  ;;  %v330_v1 = vsel %vm328_vm0, %v228_v0, 0  ;;  %v6855_v20 = vmov 4286644096   ;;  %vm689_vm3 = vcmask 11267   ;;  %vm673_vm4 = vcmask 8192  }
   0xf   : > { %s10064_s19 = smov (!%p215_p3, %s6431_s19), 1  ;;  %6767 = vmatpush3.bf16.msra.mxu0 %v330_v1  ;;  %670 = vst.msk [vmem:[#allocation2] sm:$0xf] %vm669_vm2, %v6855_v20  ;;  %671 = vst.msk [vmem:[#allocation2 + $0x4] sm:$0xf] %vm669_vm2, %v6855_v20  ;;  %vm5723_vm5 = vcmask 15360  }
  0x10   : > { %s6643_s22 = sshll.u32 %s10064_s19, 2  ;;  %672 = vst.msk [vmem:[#allocation2 + $0x8] sm:$0xf] %vm669_vm2, %v6855_v20  ;;  %675 = vst.msk [vmem:[#allocation2 + $0x10] sm:$0xf] %vm669_vm2, %v6855_v20  ;;  %vm2115_vm8 = vcmask 1045508  }
  0x11   : > { %s219_s25 = scalar_lea.vmem %s9811_s0, %s6643_s22  ;;  %676 = vst.msk [vmem:[#allocation2 + $0x14] sm:$0xf] %vm669_vm2, %v6855_v20  ;;  %677 = vst.msk [vmem:[#allocation2 + $0x18] sm:$0xf] %vm669_vm2, %v6855_v20  ;;  %vm1276_vm6 = vsmask.f32 3328 }
  0x12   : > { %v6441_v2 = vld.sshfl [vmem:[%s219_s25] sm:$0x33 pattern:$0x76325410]  ;;  %680 = vst.msk [vmem:[#allocation2 + $0x120] sm:$0xf] %vm669_vm2, %v6855_v20  ;;  %vm7327_vm12 = vmor %vm328_vm0, %vm2115_vm8 }
  0x13   : > { %247 = vxpose.xlu0.c.b16.start.end [1/1] (short) %v6441_v2, 128  ;;  %v244_v3 = vcombine.high %v6441_v2, %v6441_v2  ;;  %681 = vst.msk [vmem:[#allocation2 + $0x124] sm:$0xf] %vm669_vm2, %v6855_v20  ;;  %682 = vst.msk [vmem:[#allocation2 + $0x128] sm:$0xf] %vm669_vm2, %v6855_v20  ;;  %vm1277_vm7 = vsmask.f32 7440 }
  0x14   : > { %684 = vst.msk [vmem:[#allocation2 + $0x130] sm:$0xf] %vm669_vm2, %v6855_v20  ;;  %685 = vst.msk [vmem:[#allocation2 + $0x134] sm:$0xf] %vm669_vm2, %v6855_v20  ;;  %vm1887_vm10 = vcmask 1042432   ;;  %vm1888_vm11 = vcmask 1046532  }
  0x15   : > { %686 = vst.msk [vmem:[#allocation2 + $0x138] sm:$0xf] %vm669_vm2, %v6855_v20  ;;  %vm7311_vm9 = vmor %vm1276_vm6, %vm1277_vm7  ;;  %vm2373_vm13 = vcmask 1040384   ;;  %vm2374_vm14 = vcmask 1044484   ;;  %s6644_s17 = sshll.u32 %s10064_s19, 4 }
  0x16   : > { %696 = vst.msk [vmem:[#allocation2 + $0x80] sm:$0x8] %vm689_vm3, %v6855_v20  ;;  %697 = vst.msk [vmem:[#allocation2 + $0x90] sm:$0x8] %vm689_vm3, %v6855_v20  ;;  %v866_v26 = vld [vmem:[#allocation2] sm:$0xf]  ;;  %s224_s22 = scalar_lea.vmem %s9816_s5, %s6644_s17 }
  0x17   : > { %698 = vst.msk [vmem:[#allocation2 + $0xa0] sm:$0x8] %vm689_vm3, %v6855_v20  ;;  %699 = vst.msk [vmem:[#allocation2 + $0xb0] sm:$0x8] %vm689_vm3, %v6855_v20  ;;  %v939_v28 = vld [vmem:[#allocation2 + $0x10] sm:$0xf] }
  0x18   : > { %700 = vst.msk [vmem:[#allocation2 + $0xc0] sm:$0x8] %vm689_vm3, %v6855_v20  ;;  %701 = vst.msk [vmem:[#allocation2 + $0xd0] sm:$0x8] %vm689_vm3, %v6855_v20  ;;  %v870_v39 = vld [vmem:[#allocation2 + $0x10] sm:$0xf]  ;;  %v1011_v46 = vmax.bf16 %v939_v28, %v866_v26 }
  0x19   : > { %690 = vst.msk [vmem:[#allocation2 + $0x20] sm:$0x8] %vm689_vm3, %v6855_v20  ;;  %691 = vst.msk [vmem:[#allocation2 + $0x30] sm:$0x8] %vm689_vm3, %v6855_v20 }
  0x1a   : > { %692 = vst.msk [vmem:[#allocation2 + $0x40] sm:$0x8] %vm689_vm3, %v6855_v20  ;;  %693 = vst.msk [vmem:[#allocation2 + $0x50] sm:$0x8] %vm689_vm3, %v6855_v20 }
  0x1b   : > { %694 = vst.msk [vmem:[#allocation2 + $0x60] sm:$0x8] %vm689_vm3, %v6855_v20  ;;  %695 = vst.msk [vmem:[#allocation2 + $0x70] sm:$0x8] %vm689_vm3, %v6855_v20 }
  0x1c   : > { %702 = vst.msk [vmem:[#allocation2 + $0xe0] sm:$0x8] %vm689_vm3, %v6855_v20  ;;  %703 = vst.msk [vmem:[#allocation2 + $0xf0] sm:$0x8] %vm689_vm3, %v6855_v20 }
  0x1d   : > { %704 = vst.msk [vmem:[#allocation2 + $0x100] sm:$0x8] %vm689_vm3, %v6855_v20  ;;  %705 = vst.msk [vmem:[#allocation2 + $0x110] sm:$0x8] %vm689_vm3, %v6855_v20  ;;  %v898_v37 = vld [vmem:[#allocation2 + $0x80] sm:$0xf] }
  0x1e   : > { %712 = vst.msk [vmem:[#allocation2 + $0x8c] sm:$0x1] %vm673_vm4, %v6855_v20  ;;  %713 = vst.msk [vmem:[#allocation2 + $0x9c] sm:$0x1] %vm673_vm4, %v6855_v20  ;;  %v906_v30 = vld [vmem:[#allocation2 + $0xa0] sm:$0xf] }
  0x1f   : > { %714 = vst.msk [vmem:[#allocation2 + $0xac] sm:$0x1] %vm673_vm4, %v6855_v20  ;;  %715 = vst.msk [vmem:[#allocation2 + $0xbc] sm:$0x1] %vm673_vm4, %v6855_v20  ;;  %v979_v31 = vld [vmem:[#allocation2 + $0xb0] sm:$0xf] }
  0x20   : > { %716 = vst.msk [vmem:[#allocation2 + $0xcc] sm:$0x1] %vm673_vm4, %v6855_v20  ;;  %717 = vst.msk [vmem:[#allocation2 + $0xdc] sm:$0x1] %vm673_vm4, %v6855_v20  ;;  %v874_v27 = vld [vmem:[#allocation2 + $0x20] sm:$0xf]  ;;  %v6974_v40 = vmax.bf16 %v979_v31, %v906_v30 }
  0x21   : > { %674 = vst.msk [vmem:[#allocation2 + $0xc] sm:$0x1] %vm673_vm4, %v6855_v20  ;;  %678 = vst.msk [vmem:[#allocation2 + $0x1c] sm:$0x1] %vm673_vm4, %v6855_v20  ;;  %v947_v29 = vld [vmem:[#allocation2 + $0x30] sm:$0xf] }
  0x22   : > { %683 = vst.msk [vmem:[#allocation2 + $0x12c] sm:$0x1] %vm673_vm4, %v6855_v20  ;;  %687 = vst.msk [vmem:[#allocation2 + $0x13c] sm:$0x1] %vm673_vm4, %v6855_v20  ;;  %v971_v38 = vld [vmem:[#allocation2 + $0x90] sm:$0xf]  ;;  %v6978_v48 = vmax.bf16 %v947_v29, %v874_v27 }
  0x23   : > { %706 = vst.msk [vmem:[#allocation2 + $0x2c] sm:$0x1] %vm673_vm4, %v6855_v20  ;;  %707 = vst.msk [vmem:[#allocation2 + $0x3c] sm:$0x1] %vm673_vm4, %v6855_v20  ;;  %v878_v42 = vld [vmem:[#allocation2 + $0x30] sm:$0xf]  ;;  %v6982_v52 = vmax.bf16 %v971_v38, %v898_v37 }
  0x24   : > { %708 = vst.msk [vmem:[#allocation2 + $0x4c] sm:$0x1] %vm673_vm4, %v6855_v20  ;;  %709 = vst.msk [vmem:[#allocation2 + $0x5c] sm:$0x1] %vm673_vm4, %v6855_v20  ;;  %v943_v43 = vld [vmem:[#allocation2 + $0x20] sm:$0xf] }
  0x25   : > { %710 = vst.msk [vmem:[#allocation2 + $0x6c] sm:$0x1] %vm673_vm4, %v6855_v20  ;;  %711 = vst.msk [vmem:[#allocation2 + $0x7c] sm:$0x1] %vm673_vm4, %v6855_v20  ;;  %v901_v23 = vld [vmem:[#allocation2 + $0x8c] sm:$0x1]  ;;  %v1015_v61 = vmax.bf16 %v943_v43, %v870_v39  ;;  %v1115_v63 = vmax.bf16 %v6974_v40, %v6982_v52 }
  0x26   : > { %718 = vst.msk [vmem:[#allocation2 + $0xec] sm:$0x1] %vm673_vm4, %v6855_v20  ;;  %719 = vst.msk [vmem:[#allocation2 + $0xfc] sm:$0x1] %vm673_vm4, %v6855_v20  ;;  %v909_v21 = vld [vmem:[#allocation2 + $0xac] sm:$0x1] }
  0x27   : > { %720 = vst.msk [vmem:[#allocation2 + $0x10c] sm:$0x1] %vm673_vm4, %v6855_v20  ;;  %721 = vst.msk [vmem:[#allocation2 + $0x11c] sm:$0x1] %vm673_vm4, %v6855_v20  ;;  %v982_v22 = vld [vmem:[#allocation2 + $0xbc] sm:$0x1] }
  0x28   : > { %v974_v24 = vld [vmem:[#allocation2 + $0x9c] sm:$0x1]  ;;  %v6970_v25 = vmax.bf16 %v982_v22, %v909_v21  ;;  %v869_v32 = vld [vmem:[#allocation2 + $0xc] sm:$0x1]  ;;  %v951_v44 = vld [vmem:[#allocation2 + $0x40] sm:$0xf] }
  0x29   : > { %v6972_v33 = vmax.bf16 %v974_v24, %v901_v23  ;;  %v942_v35 = vld [vmem:[#allocation2 + $0x1c] sm:$0x1]  ;;  %v1183_v45 = vld [vmem:[#allocation2 + $0xcc] sm:$0x1]  ;;  %9887 = vst [vmem:[#allocation5_spill] sm:$0xff] %v6982_v52  ;;  %v6984_v62 = vmax.bf16 %v951_v44, %v878_v42  ;;  %vm7386_vm15 = vmor %vm1887_vm10, %vm1888_vm11 }
  0x2a   : > { %9885 = vst [vmem:[#allocation3_spill] sm:$0xff] %v6970_v25  ;;  %v877_v34 = vld [vmem:[#allocation2 + $0x2c] sm:$0x1]  ;;  %v950_v36 = vld [vmem:[#allocation2 + $0x3c] sm:$0x1]  ;;  %v1014_v47 = vmax.bf16 %v942_v35, %v869_v32  ;;  %vm7422_vm0 = vmor %vm2373_vm13, %vm2374_vm14 }
  0x2b   : > { %9886 = vst [vmem:[#allocation4_spill] sm:$0xff] %v6972_v33  ;;  %v1118_v41 = vmax.bf16 %v6970_v25, %v6972_v33  ;;  %v6980_v49 = vmax.bf16 %v950_v36, %v877_v34  ;;  %v873_v50 = vld [vmem:[#allocation2 + $0x1c] sm:$0x1]  ;;  %v910_v53 = vld [vmem:[#allocation2 + $0xb0] sm:$0xf]  ;;  %9888 = vst [vmem:[#allocation6_spill] sm:$0xff] %v6984_v62  ;;  %v1087_v21 = vmax.bf16 %v6984_v62, %v1015_v61 }
  0x2c   : > { %v881_v51 = vld [vmem:[#allocation2 + $0x3c] sm:$0x1]  ;;  %v946_v54 = vld [vmem:[#allocation2 + $0x2c] sm:$0x1]  ;;  %v914_v56 = vld [vmem:[#allocation2 + $0xc0] sm:$0xf] }
  0x2d   : > { %v954_v55 = vld [vmem:[#allocation2 + $0x4c] sm:$0x1]  ;;  %v987_v57 = vld [vmem:[#allocation2 + $0xd0] sm:$0xf]  ;;  %v913_v58 = vld [vmem:[#allocation2 + $0xbc] sm:$0x1]  ;;  %v6988_v1 = vmax.bf16 %v1183_v45, %v1118_v41 }
  0x2e   : > { %v983_v59 = vld [vmem:[#allocation2 + $0xc0] sm:$0xf]  ;;  %v986_v60 = vld [vmem:[#allocation2 + $0xcc] sm:$0x1]  ;;  %v7005_v20 = vld [vmem:[#allocation2 + $0x18] sm:$0xf]  ;;  %v7008_v22 = vmax.bf16 %v987_v57, %v914_v56 }
  0x2f   : > { %v1180_v0 = vld [vmem:[#allocation2 + $0xc0] sm:$0xf]  ;;  %v1152_v27 = vld [vmem:[#allocation2 + $0x50] sm:$0xf]  ;;  %v885_v28 = vld [vmem:[#allocation2 + $0x4c] sm:$0x1] }
  0x30   : > { %263 = vxpose.xlu0.c.b16.start.end [1/1] (short) %v244_v3, 128  ;;  %v1148_v2 = vld [vmem:[#allocation2 + $0x40] sm:$0xf]  ;;  %v902_v3 = vld [vmem:[#allocation2 + $0x90] sm:$0xf]  ;;  %9892 = vst [vmem:[#allocation10_spill] sm:$0xff] %v7008_v22  ;;  %v7010_v23 = vmax.bf16 %v1180_v0, %v1115_v63 }
  0x31   : > { %v958_v29 = vld [vmem:[#allocation2 + $0x5c] sm:$0x1]  ;;  %v917_v30 = vld [vmem:[#allocation2 + $0xcc] sm:$0x1]  ;;  %v7026_v37 = vld [vmem:[%s9813_s2] ss:$0 sm:$0xff] }
  0x32   : > { %v990_v31 = vld [vmem:[#allocation2 + $0xdc] sm:$0x1]  ;;  %v1184_v45 = vld [vmem:[#allocation2 + $0xd0] sm:$0xf] }
  0x33   : > { %v1155_v42 = vld [vmem:[#allocation2 + $0x5c] sm:$0x1] }
  0x79   : > { %v255_v4 = vpop.trf.xlu0 }
  0x7a   : > { %6768 = vmatprep.mubr.msk.bf16.mxu0 %vm279_vm1, %v255_v4  ;;  %v6990_v4 = vld [vmem:[#allocation2 + $0x4] sm:$0xf] }
  0x7d   : > { %v256_v5 = vpop.trf.xlu0 }
  0x7e   : > { %6769 = vmatmul.mubr.msk.bf16.vlgmr.msra.gmra.mrb[0].mxu0 %vm279_vm1, %v256_v5  ;;  %v6992_v5 = vld [vmem:[#allocation2 + $0x14] sm:$0xf] }
  0x81   : > { %v257_v6 = vpop.trf.xlu0 }
  0x82   : > { %6772 = vmatprep.mubr.msk.bf16.mxu0 %vm279_vm1, %v257_v6  ;;  %v1083_v6 = vmax.bf16 %v6978_v48, %v1011_v46  ;;  %v1187_v46 = vld [vmem:[#allocation2 + $0xdc] sm:$0x1] }
  0x84   : > { %v7016_v32 = vmax.bf16 %v1148_v2, %v1083_v6 }
  0x85   : > { %v258_v7 = vpop.trf.xlu0 }
  0x86   : > { %6773 = vmatmul.mubr.msk.bf16.gmra.mrb[4].mxu0 %vm279_vm1, %v258_v7  ;;  %v1086_v7 = vmax.bf16 %v6980_v49, %v1014_v47  ;;  %v7037_v47 = vmax.bf16 %v1152_v27, %v1087_v21 }
  0x88   : > { %9896 = vst [vmem:[#allocation14_spill] sm:$0xff] %v7037_v47 }
  0x89   : > { %v259_v8 = vpop.trf.xlu0 }
  0x8a   : > { %6776 = vmatprep.mubr.msk.bf16.mxu0 %vm279_vm1, %v259_v8  ;;  %v905_v8 = vld [vmem:[#allocation2 + $0x9c] sm:$0x1] }
  0x8d   : > { %v260_v9 = vpop.trf.xlu0 }
  0x8e   : > { %6777 = vmatmul.mubr.msk.bf16.gmra.mrb[8].mxu0 %vm279_vm1, %v260_v9  ;;  %v975_v9 = vld [vmem:[#allocation2 + $0xa0] sm:$0xf] }
  0x8f   : > { %v7012_v24 = vmax.bf16 %v975_v9, %v902_v3  ;;  %v1156_v3 = vld [vmem:[#allocation2 + $0x60] sm:$0xf] }
  0x91   : > { %v261_v10 = vpop.trf.xlu0  ;;  %9893 = vst [vmem:[#allocation11_spill] sm:$0xff] %v7012_v24 }
  0x92   : > { %6780 = vmatprep.mubr.msk.bf16.mxu0 %vm279_vm1, %v261_v10  ;;  %v978_v10 = vld [vmem:[#allocation2 + $0xac] sm:$0x1] }
  0x93   : > { %v7014_v26 = vmax.bf16 %v978_v10, %v905_v8 }
  0x95   : > { %v262_v11 = vpop.trf.xlu0  ;;  %9894 = vst [vmem:[#allocation12_spill] sm:$0xff] %v7014_v26 }
  0x96   : > { %6781 = vmatmul.mubr.msk.bf16.gmra.mrb[12].mxu0 %vm279_vm1, %v262_v11  ;;  %v1018_v11 = vmax.bf16 %v946_v54, %v873_v50  ;;  %v7039_v50 = vmax.bf16 %v958_v29, %v885_v28 }
  0x98   : > { %9897 = vst [vmem:[#allocation15_spill] sm:$0xff] %v7039_v50 }
  0x99   : > { %v271_v12 = vpop.trf.xlu0 }
  0x9a   : > { %6784 = vmatprep.mubr.msk.bf16.mxu0 %vm279_vm1, %v271_v12  ;;  %v6996_v12 = vmax.bf16 %v954_v55, %v881_v51  ;;  %v7041_v51 = vmax.bf16 %v990_v31, %v917_v30 }
  0x9c   : > { %9889 = vst [vmem:[#allocation7_spill] sm:$0xff] %v6996_v12  ;;  %v1090_v35 = vmax.bf16 %v6996_v12, %v1018_v11 }
  0x9d   : > { %v272_v13 = vpop.trf.xlu0 }
  0x9e   : > { %6785 = vmatmul.mubr.msk.bf16.gmra.mrb[16].mxu0 %vm279_vm1, %v272_v13  ;;  %v1151_v13 = vld [vmem:[#allocation2 + $0x4c] sm:$0x1] }
  0x9f   : > { %v7018_v34 = vmax.bf16 %v1151_v13, %v1086_v7 }
  0xa1   : > { %v273_v14 = vpop.trf.xlu0  ;;  %v1305_v44 = vshll.u32 %v7018_v34, 16 }
  0xa2   : > { %6788 = vmatprep.mubr.msk.bf16.mxu0 %vm279_vm1, %v273_v14  ;;  %v6998_v14 = vmax.bf16 %v983_v59, %v910_v53  ;;  %v1123_v53 = vmax.bf16 %v7008_v22, %v6974_v40  ;;  %v7050_v59 = vmax.bf16 %v1155_v42, %v1090_v35  ;;  %v1188_v42 = vld [vmem:[#allocation2 + $0xe0] sm:$0xf] }
  0xa3   : > { %v7061_v8 = vrot.slane %v1305_v44, 5 }
  0xa4   : > { %9890 = vst [vmem:[#allocation8_spill] sm:$0xff] %v6998_v14  ;;  %v1119_v39 = vmax.bf16 %v6998_v14, %v7012_v24  ;;  %9898 = vst [vmem:[#allocation16_spill] sm:$0xff] %v7050_v59 }
  0xa5   : > { %v274_v15 = vpop.trf.xlu0 }
  0xa6   : > { %6789 = vmatmul.mubr.msk.bf16.gmra.mrb[20].mxu0 %vm279_vm1, %v274_v15  ;;  %v7000_v15 = vmax.bf16 %v986_v60, %v913_v58  ;;  %v7056_v40 = vmax.bf16 %v1184_v45, %v1119_v39  ;;  %v886_v45 = vld [vmem:[#allocation2 + $0x50] sm:$0xf] }
  0xa8   : > { %9891 = vst [vmem:[#allocation9_spill] sm:$0xff] %v7000_v15  ;;  %v1122_v41 = vmax.bf16 %v7000_v15, %v7014_v26 }
  0xa9   : > { %v275_v16 = vpop.trf.xlu0 }
  0xaa   : > { %6792 = vmatprep.mubr.msk.bf16.mxu0 %vm279_vm1, %v275_v16  ;;  %v882_v16 = vld [vmem:[#allocation2 + $0x40] sm:$0xf]  ;;  %v7058_v2 = vmax.bf16 %v1187_v46, %v1122_v41 }
  0xab   : > { %v959_v46 = vld [vmem:[#allocation2 + $0x60] sm:$0xf] }
  0xad   : > { %v276_v17 = vpop.trf.xlu0 }
  0xae   : > { %6793 = vmatmul.mubr.msk.bf16.gmra.mrb[24].mxu0 %vm279_vm1, %v276_v17  ;;  %v955_v17 = vld [vmem:[#allocation2 + $0x50] sm:$0xf] }
  0xaf   : > { %v7021_v36 = vmax.bf16 %v955_v17, %v882_v16  ;;  %v1575_v16 = vshll.u32 %v7058_v2, 16  ;;  %v1335_v17 = vshll.u32 %v7050_v59, 16 }
  0xb1   : > { %v277_v18 = vpop.trf.xlu0  ;;  %9895 = vst [vmem:[#allocation13_spill] sm:$0xff] %v7021_v36  ;;  %v1091_v60 = vmax.bf16 %v7021_v36, %v6978_v48  ;;  %v1094_v48 = vmax.bf16 %v7039_v50, %v6980_v49  ;;  %v7086_v49 = vmax.bf16 %v959_v46, %v886_v45 }
  0xb2   : > { %6796 = vmatprep.mubr.msk.bf16.mxu0 %vm279_vm1, %v277_v18  ;;  %v1545_v18 = vshll.u32 %v6988_v1, 16 }
  0xb3   : > { %v7071_v29 = vmax.bf16 %v1156_v3, %v1091_v60  ;;  %v7079_v60 = vrot.slane %v1575_v16, 5  ;;  %v7081_v3 = vrot.slane %v1335_v17, 5  ;;  %9902 = vst [vmem:[#allocation20_spill] sm:$0xff] %v7086_v49 }
  0xb4   : > { %v7047_v57 = vrot.slane %v1545_v18, 5  ;;  %v1159_v18 = vld [vmem:[#allocation2 + $0x6c] sm:$0x1] }
  0xb5   : > { %v278_v19 = vpop.trf.xlu0  ;;  %9899 = vst [vmem:[#allocation17_spill] sm:$0xff] %v7071_v29  ;;  %v7077_v44 = vmax.bf16 %v1159_v18, %v1094_v48  ;;  %9901 = vst [vmem:[#allocation19_spill] sm:$0xff] %v7081_v3 }
  0xb6   : > { %6797 = vmatmul.mubr.msk.bf16.gmra.mrb[28].mxu0 %vm279_vm1, %v278_v19  ;;  %v7003_v19 = vld [vmem:[#allocation2 + $0x8] sm:$0xf] }
  0xb7   : > { %9900 = vst [vmem:[#allocation18_spill] sm:$0xff] %v7077_v44 }
 0x151   : > { %v6770_v56 = vpop.f32.mrb[0].mxu0 }
 0x152   : > { %v375_v61 = vadd.f32 %v6770_v56, %v7026_v37  ;;  %v366_v63 = vpop.f32.mrb[1].mxu0 }
 0x153   : > { %v367_v6 = vadd.f32 %v7026_v37, %v366_v63  ;;  %v6771_v7 = vpop.f32.mrb[2].mxu0 }
 0x154   : > { %v495_v10 = vadd.f32 3.0, %v375_v61  ;;  %v378_v11 = vadd.f32 %v6771_v7, %v7026_v37  ;;  %v369_v13 = vpop.f32.mrb[3].mxu0 }
 0x155   : > { %v493_v21 = vadd.f32 3.0, %v367_v6  ;;  %v370_v27 = vadd.f32 %v7026_v37, %v369_v13 }
 0x156   : > { %v527_v30 = vmax.f32 %v495_v10, 0.0  ;;  %v496_v31 = vadd.f32 3.0, %v378_v11 }
 0x157   : > { %v525_v39 = vmax.f32 %v493_v21, 0.0  ;;  %v494_v41 = vadd.f32 3.0, %v370_v27 }
 0x158   : > { %v559_v56 = vmin.f32 %v527_v30, 6.0  ;;  %v528_v63 = vmax.f32 %v496_v31, 0.0 }
 0x159   : > { %v557_v7 = vmin.f32 %v525_v39, 6.0  ;;  %v526_v10 = vmax.f32 %v494_v41, 0.0  ;;  %v6774_v13 = vpop.f32.mrb[4].mxu0  ;;  %v7089_v39 = vmax.bf16 %v1188_v42, %v1123_v53 }
 0x15a   : > { %v591_v9 = vmul.f32 %v559_v56, %v375_v61  ;;  %v560_v35 = vmin.f32 %v528_v63, 6.0  ;;  %v391_v48 = vadd.f32 %v6774_v13, %v7026_v37  ;;  %v382_v18 = vpop.f32.mrb[5].mxu0 }
 0x15b   : > { %v589_v30 = vmul.f32 %v557_v7, %v367_v6  ;;  %v558_v16 = vmin.f32 %v526_v10, 6.0  ;;  %v383_v17 = vadd.f32 %v7026_v37, %v382_v18  ;;  %v6775_v31 = vpop.f32.mrb[6].mxu0  ;;  %9903 = vst [vmem:[#allocation21_spill] sm:$0xff] %v7089_v39 }
 0x15c   : > { %v623_v41 = vmul.f32 0.16666667, %v591_v9  ;;  %v592_v0 = vmul.f32 %v560_v35, %v378_v11  ;;  %v499_v21 = vadd.f32 3.0, %v391_v48  ;;  %v394_v28 = vadd.f32 %v6775_v31, %v7026_v37  ;;  %v385_v61 = vpop.f32.mrb[7].mxu0 }
 0x15d   : > { %v621_v56 = vmul.f32 0.16666667, %v589_v30  ;;  %v590_v63 = vmul.f32 %v558_v16, %v370_v27  ;;  %v497_v13 = vadd.f32 3.0, %v383_v17  ;;  %v386_v58 = vadd.f32 %v7026_v37, %v385_v61 }
 0x15e   : > { %v6647_v45 = vpack.c.bf16 %v623_v41, %v623_v41  ;;  %v624_v46 = vmul.f32 0.16666667, %v592_v0  ;;  %v531_v6 = vmax.f32 %v499_v21, 0.0  ;;  %v500_v7 = vadd.f32 3.0, %v394_v28 }
 0x15f   : > { %v6645_v10 = vpack.c.bf16 %v621_v56, %v621_v56  ;;  %v622_v18 = vmul.f32 0.16666667, %v590_v63  ;;  %v529_v55 = vmax.f32 %v497_v13, 0.0  ;;  %v498_v53 = vadd.f32 3.0, %v386_v58 }
 0x160   : > { %836 = vst.msk [vmem:[#allocation2 + $0x34] sm:$0xf] %vm669_vm2, %v6647_v45  ;;  %v654_v9 = vpack.c.bf16 %v624_v46, %v623_v41  ;;  %v6648_v11 = vpack.c.bf16 %v624_v46, %v624_v46  ;;  %v563_v35 = vmin.f32 %v531_v6, 6.0  ;;  %v532_v42 = vmax.f32 %v500_v7, 0.0 }
 0x161   : > { %834 = vst.msk [vmem:[#allocation2 + $0x24] sm:$0xf] %vm669_vm2, %v6645_v10  ;;  %v653_v27 = vpack.c.bf16 %v622_v18, %v621_v56  ;;  %v6646_v30 = vpack.c.bf16 %v622_v18, %v622_v18  ;;  %v561_v16 = vmin.f32 %v529_v55, 6.0  ;;  %v530_v31 = vmax.f32 %v498_v53, 0.0  ;;  %v6778_v61 = vpop.f32.mrb[8].mxu0 }
 0x162   : > { %837 = vst.msk [vmem:[#allocation2 + $0x38] sm:$0xf] %vm669_vm2, %v6648_v11  ;;  %v595_v0 = vmul.f32 %v563_v35, %v391_v48  ;;  %v564_v21 = vmin.f32 %v532_v42, 6.0  ;;  %v407_v63 = vadd.f32 %v6778_v61, %v7026_v37  ;;  %v398_v13 = vpop.f32.mrb[9].mxu0  ;;  %v7098_v45 = vsel %vm5723_vm5, %v654_v9, 0 }
 0x163   : > { %835 = vst.msk [vmem:[#allocation2 + $0x28] sm:$0xf] %vm669_vm2, %v6646_v30  ;;  %v593_v41 = vmul.f32 %v561_v16, %v383_v17  ;;  %v562_v46 = vmin.f32 %v530_v31, 6.0  ;;  %v399_v56 = vadd.f32 %v7026_v37, %v398_v13  ;;  %v6779_v6 = vpop.f32.mrb[10].mxu0  ;;  %v7103_v55 = vsel %vm5723_vm5, %v653_v27, 0 }
 0x164   : > { %v627_v7 = vmul.f32 0.16666667, %v595_v0  ;;  %v596_v10 = vmul.f32 %v564_v21, %v394_v28  ;;  %v503_v48 = vadd.f32 3.0, %v407_v63  ;;  %v410_v18 = vadd.f32 %v6779_v6, %v7026_v37  ;;  %v401_v53 = vpop.f32.mrb[11].mxu0 }
 0x165   : > { %v625_v11 = vmul.f32 0.16666667, %v593_v41  ;;  %v594_v35 = vmul.f32 %v562_v46, %v386_v58  ;;  %v501_v9 = vadd.f32 3.0, %v399_v56  ;;  %v402_v42 = vadd.f32 %v7026_v37, %v401_v53 }
 0x166   : > { %v6651_v30 = vpack.c.bf16 %v627_v7, %v627_v7  ;;  %v628_v17 = vmul.f32 0.16666667, %v596_v10  ;;  %v535_v16 = vmax.f32 %v503_v48, 0.0  ;;  %v504_v31 = vadd.f32 3.0, %v410_v18 }
 0x167   : > { %v6649_v61 = vpack.c.bf16 %v625_v11, %v625_v11  ;;  %v626_v13 = vmul.f32 0.16666667, %v594_v35  ;;  %v533_v54 = vmax.f32 %v501_v9, 0.0  ;;  %v502_v27 = vadd.f32 3.0, %v402_v42 }
 0x168   : > { %840 = vst.msk [vmem:[#allocation2 + $0x54] sm:$0xf] %vm669_vm2, %v6651_v30  ;;  %v656_v28 = vpack.c.bf16 %v628_v17, %v627_v7  ;;  %v6652_v0 = vpack.c.bf16 %v628_v17, %v628_v17  ;;  %v567_v21 = vmin.f32 %v535_v16, 6.0  ;;  %v536_v6 = vmax.f32 %v504_v31, 0.0 }
 0x169   : > { %838 = vst.msk [vmem:[#allocation2 + $0x44] sm:$0xf] %vm669_vm2, %v6649_v61  ;;  %v655_v58 = vpack.c.bf16 %v626_v13, %v625_v11  ;;  %v6650_v41 = vpack.c.bf16 %v626_v13, %v626_v13  ;;  %v565_v46 = vmin.f32 %v533_v54, 6.0  ;;  %v534_v53 = vmax.f32 %v502_v27, 0.0  ;;  %v6782_v43 = vpop.f32.mrb[12].mxu0 }
 0x16a   : > { %841 = vst.msk [vmem:[#allocation2 + $0x58] sm:$0xf] %vm669_vm2, %v6652_v0  ;;  %v599_v10 = vmul.f32 %v567_v21, %v407_v63  ;;  %v568_v48 = vmin.f32 %v536_v6, 6.0  ;;  %v423_v35 = vadd.f32 %v6782_v43, %v7026_v37  ;;  %v414_v9 = vpop.f32.mrb[13].mxu0  ;;  %v7112_v30 = vsel %vm5723_vm5, %v656_v28, 0 }
 0x16b   : > { %839 = vst.msk [vmem:[#allocation2 + $0x48] sm:$0xf] %vm669_vm2, %v6650_v41  ;;  %v597_v7 = vmul.f32 %v565_v46, %v399_v56  ;;  %v566_v17 = vmin.f32 %v534_v53, 6.0  ;;  %v415_v11 = vadd.f32 %v7026_v37, %v414_v9  ;;  %v6783_v16 = vpop.f32.mrb[14].mxu0  ;;  %v7117_v54 = vsel %vm5723_vm5, %v655_v58, 0 }
 0x16c   : > { %v631_v31 = vmul.f32 0.16666667, %v599_v10  ;;  %v600_v61 = vmul.f32 %v568_v48, %v410_v18  ;;  %v507_v63 = vadd.f32 3.0, %v423_v35  ;;  %v426_v13 = vadd.f32 %v6783_v16, %v7026_v37  ;;  %v417_v43 = vpop.f32.mrb[15].mxu0 }
 0x16d   : > { %v629_v27 = vmul.f32 0.16666667, %v597_v7  ;;  %v598_v0 = vmul.f32 %v566_v17, %v402_v42  ;;  %v505_v28 = vadd.f32 3.0, %v415_v11  ;;  %v418_v21 = vadd.f32 %v7026_v37, %v417_v43 }
 0x16e   : > { %v6655_v6 = vpack.c.bf16 %v631_v31, %v631_v31  ;;  %v632_v56 = vmul.f32 0.16666667, %v600_v61  ;;  %v539_v41 = vmax.f32 %v507_v63, 0.0  ;;  %v508_v46 = vadd.f32 3.0, %v426_v13 }
 0x16f   : > { %v6653_v53 = vpack.c.bf16 %v629_v27, %v629_v27  ;;  %v630_v9 = vmul.f32 0.16666667, %v598_v0  ;;  %v537_v38 = vmax.f32 %v505_v28, 0.0  ;;  %v506_v58 = vadd.f32 3.0, %v418_v21 }
 0x170   : > { %844 = vst.msk [vmem:[#allocation2 + $0x74] sm:$0xf] %vm669_vm2, %v6655_v6  ;;  %v658_v18 = vpack.c.bf16 %v632_v56, %v631_v31  ;;  %v6656_v10 = vpack.c.bf16 %v632_v56, %v632_v56  ;;  %v571_v48 = vmin.f32 %v539_v41, 6.0  ;;  %v540_v16 = vmax.f32 %v508_v46, 0.0 }
 0x171   : > { %842 = vst.msk [vmem:[#allocation2 + $0x64] sm:$0xf] %vm669_vm2, %v6653_v53  ;;  %v657_v42 = vpack.c.bf16 %v630_v9, %v629_v27  ;;  %v6654_v7 = vpack.c.bf16 %v630_v9, %v630_v9  ;;  %v569_v17 = vmin.f32 %v537_v38, 6.0  ;;  %v538_v43 = vmax.f32 %v506_v58, 0.0  ;;  %v6786_v26 = vpop.f32.mrb[16].mxu0 }
 0x172   : > { %845 = vst.msk [vmem:[#allocation2 + $0x78] sm:$0xf] %vm669_vm2, %v6656_v10  ;;  %v603_v61 = vmul.f32 %v571_v48, %v423_v35  ;;  %v572_v63 = vmin.f32 %v540_v16, 6.0  ;;  %v439_v0 = vadd.f32 %v6786_v26, %v7026_v37  ;;  %v430_v28 = vpop.f32.mrb[17].mxu0  ;;  %v7126_v6 = vsel %vm5723_vm5, %v658_v18, 0 }
 0x173   : > { %843 = vst.msk [vmem:[#allocation2 + $0x68] sm:$0xf] %vm669_vm2, %v6654_v7  ;;  %v601_v31 = vmul.f32 %v569_v17, %v415_v11  ;;  %v570_v56 = vmin.f32 %v538_v43, 6.0  ;;  %v431_v27 = vadd.f32 %v7026_v37, %v430_v28  ;;  %v6787_v41 = vpop.f32.mrb[18].mxu0  ;;  %v7131_v38 = vsel %vm5723_vm5, %v657_v42, 0 }
 0x174   : > { %v7133_v46 = vmul.f32 0.16666667, %v603_v61  ;;  %v604_v35 = vmul.f32 %v572_v63, %v426_v13  ;;  %v511_v53 = vadd.f32 3.0, %v439_v0  ;;  %v442_v26 = vadd.f32 %v6787_v41, %v7026_v37  ;;  %v433_v9 = vpop.f32.mrb[19].mxu0  ;;  %v7143_v17 = vld [vmem:[#allocation2 + $0x14] sm:$0xf] }
 0x175   : > { %v7136_v58 = vmul.f32 0.16666667, %v601_v31  ;;  %v602_v18 = vmul.f32 %v570_v56, %v418_v21  ;;  %v509_v10 = vadd.f32 3.0, %v431_v27  ;;  %v434_v11 = vadd.f32 %v7026_v37, %v433_v9  ;;  %v7149_v21 = vld [vmem:[#allocation2 + $0x24] sm:$0xf] }
 0x176   : > { %9904 = vst [vmem:[#allocation22_spill] sm:$0xff] %v7133_v46  ;;  %v6659_v48 = vpack.c.bf16 %v7133_v46, %v7133_v46  ;;  %v7141_v16 = vmul.f32 0.16666667, %v604_v35  ;;  %v543_v42 = vmax.f32 %v511_v53, 0.0  ;;  %v512_v7 = vadd.f32 3.0, %v442_v26 }
 0x177   : > { %v6657_v13 = vpack.c.bf16 %v7136_v58, %v7136_v58  ;;  %v7147_v43 = vmul.f32 0.16666667, %v602_v18  ;;  %v541_v61 = vmax.f32 %v509_v10, 0.0  ;;  %v510_v63 = vadd.f32 3.0, %v434_v11  ;;  %v7156_v35 = vld [vmem:[#allocation2 + $0x18] sm:$0xf] }
 0x178   : > { %9905 = vst [vmem:[#allocation23_spill] sm:$0xff] %v7141_v16  ;;  %848 = vst.msk [vmem:[#allocation2 + $0x94] sm:$0xf] %vm669_vm2, %v6659_v48  ;;  %v6660_v31 = vpack.c.bf16 %v7141_v16, %v7141_v16  ;;  %v575_v56 = vmin.f32 %v543_v42, 6.0  ;;  %v544_v41 = vmax.f32 %v512_v7, 0.0 }
 0x179   : > { %v7158_v53 = vld [vmem:[#allocation2 + $0x28] sm:$0xf]  ;;  %846 = vst.msk [vmem:[#allocation2 + $0x84] sm:$0xf] %vm669_vm2, %v6657_v13  ;;  %v6658_v18 = vpack.c.bf16 %v7147_v43, %v7147_v43  ;;  %v573_v10 = vmin.f32 %v541_v61, 6.0  ;;  %v542_v48 = vmax.f32 %v510_v63, 0.0 }
 0x17a   : > { %v6790_v28 = vpop.f32.mrb[20].mxu0  ;;  %849 = vst.msk [vmem:[#allocation2 + $0x98] sm:$0xf] %vm669_vm2, %v6660_v31  ;;  %v607_v24 = vmul.f32 %v575_v56, %v439_v0  ;;  %v576_v42 = vmin.f32 %v544_v41, 6.0 }
 0x17b   : > { %v455_v7 = vadd.f32 %v6790_v28, %v7026_v37  ;;  %v446_v33 = vpop.f32.mrb[21].mxu0  ;;  %847 = vst.msk [vmem:[#allocation2 + $0x88] sm:$0xf] %vm669_vm2, %v6658_v18  ;;  %v605_v13 = vmul.f32 %v573_v10, %v431_v27  ;;  %v574_v9 = vmin.f32 %v542_v48, 6.0 }
 0x17c   : > { %v447_v50 = vadd.f32 %v7026_v37, %v446_v33  ;;  %v6791_v36 = vpop.f32.mrb[22].mxu0  ;;  %v639_v63 = vmul.f32 0.16666667, %v607_v24  ;;  %v608_v31 = vmul.f32 %v576_v42, %v442_v26 }
 0x17d   : > { %v515_v0 = vadd.f32 3.0, %v455_v7  ;;  %v458_v56 = vadd.f32 %v6791_v36, %v7026_v37  ;;  %v449_v28 = vpop.f32.mrb[23].mxu0  ;;  %v637_v41 = vmul.f32 0.16666667, %v605_v13  ;;  %v606_v22 = vmul.f32 %v574_v9, %v434_v11 }
 0x17e   : > { %v513_v12 = vadd.f32 3.0, %v447_v50  ;;  %v450_v52 = vadd.f32 %v7026_v37, %v449_v28  ;;  %v6663_v18 = vpack.c.bf16 %v639_v63, %v639_v63  ;;  %v640_v27 = vmul.f32 0.16666667, %v608_v31 }
 0x17f   : > { %v547_v10 = vmax.f32 %v515_v0, 0.0  ;;  %v516_v48 = vadd.f32 3.0, %v458_v56  ;;  %v6661_v33 = vpack.c.bf16 %v637_v41, %v637_v41  ;;  %v638_v49 = vmul.f32 0.16666667, %v606_v22  ;;  %v972_v13 = vld [vmem:[#allocation2 + $0x94] sm:$0xf] }
 0x180   : > { %v545_v62 = vmax.f32 %v513_v12, 0.0  ;;  %v514_v15 = vadd.f32 3.0, %v450_v52  ;;  %852 = vst.msk [vmem:[#allocation2 + $0xb4] sm:$0xf] %vm669_vm2, %v6663_v18  ;;  %v662_v24 = vpack.c.bf16 %v640_v27, %v639_v63  ;;  %v6664_v26 = vpack.c.bf16 %v640_v27, %v640_v27  ;;  %v899_v61 = vld [vmem:[#allocation2 + $0x84] sm:$0xf] }
 0x181   : > { %v579_v42 = vmin.f32 %v547_v10, 6.0  ;;  %v548_v36 = vmax.f32 %v516_v48, 0.0  ;;  %850 = vst.msk [vmem:[#allocation2 + $0xa4] sm:$0xf] %vm669_vm2, %v6661_v33  ;;  %v661_v11 = vpack.c.bf16 %v638_v49, %v637_v41  ;;  %v6662_v9 = vpack.c.bf16 %v638_v49, %v638_v49  ;;  %v6794_v0 = vpop.f32.mrb[24].mxu0 }
 0x182   : > { %v577_v28 = vmin.f32 %v545_v62, 6.0  ;;  %v546_v31 = vmax.f32 %v514_v15, 0.0  ;;  %853 = vst.msk [vmem:[#allocation2 + $0xb8] sm:$0xf] %vm669_vm2, %v6664_v26  ;;  %v471_v14 = vadd.f32 %v6794_v0, %v7026_v37  ;;  %v462_v18 = vpop.f32.mrb[25].mxu0  ;;  %v7179_v10 = vmax.bf16 %v972_v13, %v899_v61 }
 0x183   : > { %v611_v22 = vmul.f32 %v579_v42, %v455_v7  ;;  %v580_v12 = vmin.f32 %v548_v36, 6.0  ;;  %v900_v63 = vld [vmem:[#allocation2 + $0x88] sm:$0xf]  ;;  %v973_v27 = vld [vmem:[#allocation2 + $0x98] sm:$0xf]  ;;  %v463_v49 = vadd.f32 %v7026_v37, %v462_v18  ;;  %v6795_v62 = vpop.f32.mrb[26].mxu0  ;;  %6809 = vmatprep.subr.msk.bf16.mxu0 %vm5723_vm5, %v661_v11 }
 0x184   : > { %9906 = vst [vmem:[#allocation24_spill] sm:$0xff] %v7179_v10  ;;  %851 = vst.msk [vmem:[#allocation2 + $0xa8] sm:$0xf] %vm669_vm2, %v6662_v9  ;;  %v609_v48 = vmul.f32 %v577_v28, %v447_v50  ;;  %v578_v33 = vmin.f32 %v546_v31, 6.0  ;;  %v7184_v15 = vmax.bf16 %v973_v27, %v900_v63  ;;  %v519_v26 = vadd.f32 3.0, %v471_v14  ;;  %v465_v36 = vpop.f32.mrb[27].mxu0  ;;  %6713 = vmatpush3.bf16.xpose.msra.mxu0 %v7103_v55 }
 0x185   : > { %v7186_v7 = vmul.f32 0.16666667, %v611_v22  ;;  %v612_v41 = vmul.f32 %v580_v12, %v458_v56  ;;  %v474_v42 = vadd.f32 %v6795_v62, %v7026_v37  ;;  %v517_v50 = vadd.f32 3.0, %v463_v49  ;;  %6810 = vmatprep.subr.msk.bf16.mxu0 %vm5723_vm5, %v662_v24  ;;  %v904_v44 = vld [vmem:[#allocation2 + $0x98] sm:$0xf] }
 0x186   : > { %9907 = vst [vmem:[#allocation25_spill] sm:$0xff] %v7184_v15  ;;  %v641_v61 = vmul.f32 0.16666667, %v609_v48  ;;  %v610_v13 = vmul.f32 %v578_v33, %v450_v52  ;;  %v466_v9 = vadd.f32 %v7026_v37, %v465_v36  ;;  %v551_v31 = vmax.f32 %v519_v26, 0.0  ;;  %v903_v36 = vld [vmem:[#allocation2 + $0x94] sm:$0xf] }
 0x187   : > { %v6667_v11 = vpack.c.bf16 %v7186_v7, %v7186_v7  ;;  %v7194_v28 = vmul.f32 0.16666667, %v612_v41  ;;  %v520_v56 = vadd.f32 3.0, %v474_v42  ;;  %v549_v12 = vmax.f32 %v517_v50, 0.0 }
 0x188   : > { %v6665_v0 = vpack.c.bf16 %v641_v61, %v641_v61  ;;  %v642_v22 = vmul.f32 0.16666667, %v610_v13  ;;  %v518_v18 = vadd.f32 3.0, %v466_v9  ;;  %v583_v24 = vmin.f32 %v551_v31, 6.0  ;;  %v976_v27 = vld [vmem:[#allocation2 + $0xa4] sm:$0xf] }
 0x189   : > { %856 = vst.msk [vmem:[#allocation2 + $0xd4] sm:$0xf] %vm669_vm2, %v6667_v11  ;;  %v6668_v55 = vpack.c.bf16 %v7194_v28, %v7194_v28  ;;  %v552_v63 = vmax.f32 %v520_v56, 0.0  ;;  %v581_v62 = vmin.f32 %v549_v12, 6.0  ;;  %v6798_v26 = vpop.f32.mrb[28].mxu0  ;;  %v7204_v31 = vmax.bf16 %v976_v27, %v903_v36 }
 0x18a   : > { %854 = vst.msk [vmem:[#allocation2 + $0xc4] sm:$0xf] %vm669_vm2, %v6665_v0  ;;  %v663_v48 = vpack.c.bf16 %v642_v22, %v641_v61  ;;  %v6666_v33 = vpack.c.bf16 %v642_v22, %v642_v22  ;;  %v550_v41 = vmax.f32 %v518_v18, 0.0  ;;  %v615_v13 = vmul.f32 %v583_v24, %v471_v14  ;;  %v478_v52 = vpop.f32.mrb[29].mxu0  ;;  %v980_v36 = vld [vmem:[#allocation2 + $0xb4] sm:$0xf] }
 0x18b   : > { %857 = vst.msk [vmem:[#allocation2 + $0xd8] sm:$0xf] %vm669_vm2, %v6668_v55  ;;  %v584_v50 = vmin.f32 %v552_v63, 6.0  ;;  %v487_v11 = vadd.f32 %v6798_v26, %v7026_v37  ;;  %v977_v29 = vld [vmem:[#allocation2 + $0xa8] sm:$0xf]  ;;  %v613_v56 = vmul.f32 %v581_v62, %v463_v49  ;;  %v479_v0 = vadd.f32 %v7026_v37, %v478_v52  ;;  %v6799_v22 = vpop.f32.mrb[30].mxu0 }
 0x18c   : > { %855 = vst.msk [vmem:[#allocation2 + $0xc8] sm:$0xf] %vm669_vm2, %v6666_v33  ;;  %v582_v61 = vmin.f32 %v550_v41, 6.0  ;;  %v7208_v12 = vmax.bf16 %v977_v29, %v904_v44  ;;  %v7210_v18 = vmul.f32 0.16666667, %v615_v13  ;;  %v490_v24 = vadd.f32 %v6799_v22, %v7026_v37  ;;  %v481_v63 = vpop.f32.mrb[31].mxu0  ;;  %6715 = vmatpush3.bf16.xpose.msra.mxu0 %v7098_v45 }
 0x18d   : > { %v616_v14 = vmul.f32 %v584_v50, %v474_v42  ;;  %v523_v55 = vadd.f32 3.0, %v487_v11  ;;  %v7214_v27 = vmul.f32 0.16666667, %v613_v56  ;;  %v521_v33 = vadd.f32 3.0, %v479_v0  ;;  %6811 = vmatprep.subr.msk.bf16.mxu0 %vm5723_vm5, %v663_v48  ;;  %v907_v52 = vld [vmem:[#allocation2 + $0xa4] sm:$0xf] }
 0x18e   : > { %9908 = vst [vmem:[#allocation26_spill] sm:$0xff] %v7208_v12  ;;  %v614_v26 = vmul.f32 %v582_v61, %v466_v9  ;;  %v482_v49 = vadd.f32 %v7026_v37, %v481_v63  ;;  %v908_v29 = vld [vmem:[#allocation2 + $0xa8] sm:$0xf]  ;;  %v6671_v44 = vpack.c.bf16 %v7210_v18, %v7210_v18  ;;  %v524_v41 = vadd.f32 3.0, %v490_v24  ;;  %v981_v37 = vld [vmem:[#allocation2 + $0xb8] sm:$0xf] }
 0x18f   : > { %v7220_v42 = vmul.f32 0.16666667, %v616_v14  ;;  %v555_v62 = vmax.f32 %v523_v55, 0.0  ;;  %v6669_v45 = vpack.c.bf16 %v7214_v27, %v7214_v27  ;;  %v553_v9 = vmax.f32 %v521_v33, 0.0  ;;  %v911_v14 = vld [vmem:[#allocation2 + $0xb4] sm:$0xf] }
 0x190   : > { %v7224_v13 = vmul.f32 0.16666667, %v614_v26  ;;  %v522_v50 = vadd.f32 3.0, %v482_v49  ;;  %860 = vst.msk [vmem:[#allocation2 + $0xf4] sm:$0xf] %vm669_vm2, %v6671_v44  ;;  %v556_v22 = vmax.f32 %v524_v41, 0.0  ;;  %v7237_v47 = vmax.bf16 %v980_v36, %v907_v52 }
 0x191   : > { %v6672_v56 = vpack.c.bf16 %v7220_v42, %v7220_v42  ;;  %v587_v61 = vmin.f32 %v555_v62, 6.0  ;;  %v912_v55 = vld [vmem:[#allocation2 + $0xb8] sm:$0xf]  ;;  %v984_v63 = vld [vmem:[#allocation2 + $0xc4] sm:$0xf]  ;;  %v585_v44 = vmin.f32 %v553_v9, 6.0  ;;  %v7239_v25 = vmax.bf16 %v981_v37, %v908_v29 }
 0x192   : > { %v988_v46 = vld [vmem:[#allocation2 + $0xd4] sm:$0xf]  ;;  %858 = vst.msk [vmem:[#allocation2 + $0xe4] sm:$0xf] %vm669_vm2, %v6669_v45  ;;  %v6670_v33 = vpack.c.bf16 %v7224_v13, %v7224_v13  ;;  %v554_v16 = vmax.f32 %v522_v50, 0.0  ;;  %v588_v41 = vmin.f32 %v556_v22, 6.0  ;;  %v7242_v50 = vmax.bf16 %v984_v63, %v911_v14 }
 0x193   : > { %v915_v48 = vld [vmem:[#allocation2 + $0xc4] sm:$0xf]  ;;  %v989_v3 = vld [vmem:[#allocation2 + $0xd8] sm:$0xf]  ;;  %861 = vst.msk [vmem:[#allocation2 + $0xf8] sm:$0xf] %vm669_vm2, %v6672_v56  ;;  %v619_v62 = vmul.f32 %v587_v61, %v487_v11  ;;  %v617_v45 = vmul.f32 %v585_v44, %v479_v0 }
 0x194   : > { %v916_v59 = vld [vmem:[#allocation2 + $0xc8] sm:$0xf]  ;;  %859 = vst.msk [vmem:[#allocation2 + $0xe8] sm:$0xf] %vm669_vm2, %v6670_v33  ;;  %v586_v9 = vmin.f32 %v554_v16, 6.0  ;;  %v620_v11 = vmul.f32 %v588_v41, %v490_v24  ;;  %6717 = vmatpush3.bf16.xpose.msra.mxu0 %v7117_v54  ;;  %v7249_v52 = vmax.bf16 %v988_v46, %v915_v48  ;;  %v9909_v16 = vpack.c.bf16 %v7194_v28, %v7186_v7 }
 0x195   : > { %v985_v39 = vld [vmem:[#allocation2 + $0xc8] sm:$0xf]  ;;  %v7246_v56 = vmul.f32 0.16666667, %v619_v62  ;;  %v7251_v29 = vmax.bf16 %v989_v3, %v916_v59  ;;  %v875_v36 = vld [vmem:[#allocation2 + $0x24] sm:$0xf]  ;;  %v1117_v54 = vmax.bf16 %v7239_v25, %v7184_v15 }
 0x196   : > { %v7244_v26 = vmax.bf16 %v985_v39, %v912_v55  ;;  %v948_v37 = vld [vmem:[#allocation2 + $0x34] sm:$0xf]  ;;  %v7253_v61 = vmul.f32 0.16666667, %v617_v45  ;;  %v618_v22 = vmul.f32 %v586_v9, %v482_v49  ;;  %6812 = vmatprep.subr.msk.bf16.mxu0 %vm5723_vm5, %v9909_v16  ;;  %v1116_v39 = vmax.bf16 %v7237_v47, %v7179_v10  ;;  %v1181_v46 = vld [vmem:[#allocation2 + $0xc4] sm:$0xf] }
 0x197   : > { %v1182_v0 = vld [vmem:[#allocation2 + $0xc8] sm:$0xf]  ;;  %v6675_v59 = vpack.c.bf16 %v7246_v56, %v7246_v56  ;;  %v7265_v3 = vmul.f32 0.16666667, %v620_v11  ;;  %v949_v49 = vld [vmem:[#allocation2 + $0x38] sm:$0xf]  ;;  %v7291_v63 = vmax.bf16 %v948_v37, %v875_v36 }
 0x198   : > { %v876_v28 = vld [vmem:[#allocation2 + $0x28] sm:$0xf]  ;;  %v6673_v48 = vpack.c.bf16 %v7253_v61, %v7253_v61  ;;  %v7273_v14 = vmul.f32 0.16666667, %v618_v22  ;;  %v956_v33 = vld [vmem:[#allocation2 + $0x54] sm:$0xf]  ;;  %v7284_v41 = vmax.bf16 %v1181_v46, %v1116_v39  ;;  %v1246_v45 = vmax.bf16 %v1182_v0, %v1117_v54 }
 0x199   : > { %864 = vst.msk [vmem:[#allocation2 + $0x114] sm:$0xf] %vm669_vm2, %v6675_v59  ;;  %v6676_v62 = vpack.c.bf16 %v7265_v3, %v7265_v3  ;;  %v883_v9 = vld [vmem:[#allocation2 + $0x44] sm:$0xf]  ;;  %v884_v11 = vld [vmem:[#allocation2 + $0x48] sm:$0xf]  ;;  %v7293_v55 = vmax.bf16 %v949_v49, %v876_v28 }
 0x19a   : > { %v957_v22 = vld [vmem:[#allocation2 + $0x58] sm:$0xf]  ;;  %862 = vst.msk [vmem:[#allocation2 + $0x104] sm:$0xf] %vm669_vm2, %v6673_v48  ;;  %v6674_v59 = vpack.c.bf16 %v7273_v14, %v7273_v14  ;;  %v1525_v39 = vshll.u32 %v7284_v41, 16  ;;  %v1529_v54 = vshrl.u32 %v7284_v41, 16  ;;  %v7300_v16 = vmax.bf16 %v956_v33, %v883_v9 }
 0x19b   : > { %865 = vst.msk [vmem:[#allocation2 + $0x118] sm:$0xf] %vm669_vm2, %v6676_v62  ;;  %v1535_v46 = vshll.u32 %v1246_v45, 16  ;;  %v1539_v0 = vshrl.u32 %v1246_v45, 16  ;;  %v9840_v48 = vrot.slane %v7284_v41, 6  ;;  %v2175_v44 = vrot.slane %v1246_v45, 6 }
 0x19c   : > { %863 = vst.msk [vmem:[#allocation2 + $0x108] sm:$0xf] %vm669_vm2, %v6674_v59  ;;  %v7302_v7 = vmax.bf16 %v957_v22, %v884_v11  ;;  %6719 = vmatpush3.bf16.xpose.msra.mxu0 %v7112_v30  ;;  %v1527_v36 = vrot.slane %v1525_v39, 5  ;;  %v1531_v37 = vrot.slane %v1529_v54, 4  ;;  %v9910_v62 = vpack.c.bf16 %v7224_v13, %v7214_v27  ;;  %v1149_v22 = vld [vmem:[#allocation2 + $0x44] sm:$0xf] }
 0x19d   : > { %v1537_v28 = vrot.slane %v1535_v46, 5  ;;  %v1541_v49 = vrot.slane %v1539_v0, 4  ;;  %v2174_v30 = vrot.slane %v9840_v48, 4  ;;  %v2177_v33 = vrot.slane %v2175_v44, 4  ;;  %v1150_v39 = vld [vmem:[#allocation2 + $0x48] sm:$0xf] }
 0x19e   : > { %6813 = vmatprep.subr.msk.bf16.mxu0 %vm5723_vm5, %v9910_v62  ;;  %v9913_v9 = vmax.bf16 %v6992_v5, %v6990_v4  ;;  %v9914_v27 = vmax.bf16 %v7005_v20, %v7003_v19  ;;  %v9917_v46 = vshrl.u32 %v7010_v23, 16  ;;  %v1532_v5 = vor.u32 %v1531_v37, %v1527_v36  ;;  %v952_v20 = vld [vmem:[#allocation2 + $0x44] sm:$0xf]  ;;  %v1185_v15 = vld [vmem:[#allocation2 + $0xd4] sm:$0xf] }
 0x19f   : > { %v1542_v0 = vor.u32 %v1541_v49, %v1537_v28  ;;  %v1186_v10 = vld [vmem:[#allocation2 + $0xd8] sm:$0xf]  ;;  %v6846_v54 = vld [vmem:[%s9814_s3 + $0xc] sm:$0xf] }
 0x1a0   : > { %v1084_v11 = vmax.bf16 %v7291_v63, %v9913_v9  ;;  %v1085_v13 = vmax.bf16 %v7293_v55, %v9914_v27  ;;  %v1528_v4 = vsel %vm7311_vm9, %v9917_v46, %v1527_v36  ;;  %v2176_v9 = vsel %vm7327_vm12, %v2174_v30, %v2175_v44  ;;  %v879_v46 = vld [vmem:[#allocation2 + $0x34] sm:$0xf] }
 0x1a1   : > { %v1831_v62 = vmax.bf16 %v1528_v4, %v7010_v23  ;;  %v9918_v27 = vrot.slane %v6988_v1, 6  ;;  %v1533_v36 = vrot.slane %v1532_v5, 4  ;;  %v1543_v37 = vrot.slane %v1542_v0, 4 }
 0x1a2   : > { %v7346_v49 = vmax.bf16 %v1149_v22, %v1084_v11  ;;  %v1214_v19 = vmax.bf16 %v1150_v39, %v1085_v13  ;;  %v9919_v23 = vmax.bf16 %v7242_v50, %v7204_v31  ;;  %v9920_v1 = vmax.bf16 %v7244_v26, %v7208_v12 }
 0x1a3   : > { %v2179_v48 = vsel %vm7327_vm12, %v2177_v33, %v9918_v27  ;;  %v9921_v33 = vpack.c.bf16 %v7147_v43, %v7136_v58  ;;  %v7364_v11 = vmax.bf16 %v952_v20, %v879_v46  ;;  %v1538_v13 = vsel %vm7311_vm9, %v1533_v36, %v1537_v28 }
 0x1a4   : > { %v7351_v44 = vmax.bf16 %v1185_v15, %v9919_v23  ;;  %v7356_v30 = vmax.bf16 %v1186_v10, %v9920_v1  ;;  %v1548_v15 = vsel %vm7311_vm9, %v1543_v37, %v7047_v57  ;;  %v1285_v22 = vshll.u32 %v7346_v49, 16  ;;  %6721 = vmatpush3.bf16.xpose.msra.mxu0 %v7131_v38 }
 0x1a5   : > { %v7362_v4 = vsel %vm5723_vm5, %v9921_v33, 0  ;;  %v1289_v10 = vshrl.u32 %v7346_v49, 16  ;;  %v1832_v39 = vmax.bf16 %v1538_v13, %v7284_v41  ;;  %v1833_v5 = vmax.bf16 %v1548_v15, %v1246_v45 }
 0x1a6   : > { %v1295_v58 = vshll.u32 %v1214_v19, 16  ;;  %v1299_v43 = vshrl.u32 %v1214_v19, 16  ;;  %v1287_v0 = vrot.slane %v1285_v22, 5  ;;  %v2117_v28 = vrot.slane %v7346_v49, 6 }
 0x1a7   : > { %v1291_v20 = vrot.slane %v1289_v10, 4  ;;  %v2119_v27 = vrot.slane %v1214_v19, 6  ;;  %v9922_v57 = vpack.c.bf16 %v7220_v42, %v7210_v18  ;;  %v1930_v46 = vrot.slane %v1832_v39, 5 }
 0x1a8   : > { %v1932_v36 = vrot.slane %v1833_v5, 5  ;;  %v1297_v37 = vrot.slane %v1295_v58, 5  ;;  %v1301_v45 = vrot.slane %v1299_v43, 4  ;;  %v9923_v23 = vshrl.u32 %v7016_v32, 16 }
 0x1a9   : > { %6814 = vmatprep.subr.msk.bf16.mxu0 %vm5723_vm5, %v9922_v57  ;;  %v1292_v1 = vor.u32 %v1291_v20, %v1287_v0  ;;  %v2118_v33 = vrot.slane %v2117_v28, 4  ;;  %v2121_v13 = vrot.slane %v2119_v27, 4  ;;  %v1931_v15 = vrot.slane %v1930_v46, 4 }
 0x1aa   : > { %v1288_v38 = vsel %vm7311_vm9, %v9923_v23, %v1287_v0  ;;  %v1934_v22 = vrot.slane %v1932_v36, 4  ;;  %v2042_v10 = vmax.bf16 %v1930_v46, %v1831_v62  ;;  %v1302_v24 = vor.u32 %v1301_v45, %v1297_v37 }
 0x1ab   : > { %v1293_v42 = vrot.slane %v1292_v1, 4  ;;  %v1807_v58 = vmax.bf16 %v1288_v38, %v7016_v32  ;;  %v2120_v43 = vsel %vm7327_vm12, %v2118_v33, %v2119_v27  ;;  %v9926_v0 = vrot.slane %v7018_v34, 6 }
 0x1ac   : > { %v1933_v62 = vsel %vm7386_vm15, %v1931_v15, %v1932_v36  ;;  %v2044_v57 = vmax.bf16 %v1934_v22, %v1833_v5  ;;  %v9927_v46 = vrot.slane %v7284_v41, 6  ;;  %v1303_v23 = vrot.slane %v1302_v24, 4  ;;  %6723 = vmatpush3.bf16.xpose.msra.mxu0 %v7126_v6 }
 0x1ad   : > { %v2123_v20 = vsel %vm7327_vm12, %v2121_v13, %v9926_v0  ;;  %v2043_v12 = vmax.bf16 %v1933_v62, %v1832_v39  ;;  %v1298_v32 = vsel %vm7311_vm9, %v1293_v42, %v1297_v37  ;;  %v1555_v38 = vshll.u32 %v7351_v44, 16  ;;  %v7426_v0 = vld [vmem:[#allocation2 + $0xa4] sm:$0xf] }
 0x1ae   : > { %v2301_v45 = vmax.bf16 %v9927_v46, %v2042_v10  ;;  %v1559_v27 = vshrl.u32 %v7351_v44, 16  ;;  %v2303_v34 = vmax.bf16 %v2179_v48, %v2044_v57  ;;  %v1308_v33 = vsel %vm7311_vm9, %v1303_v23, %v7061_v8 }
 0x1af   : > { %v1808_v5 = vmax.bf16 %v1298_v32, %v7346_v49  ;;  %v2302_v41 = vmax.bf16 %v2176_v9, %v2043_v12  ;;  %v1809_v24 = vmax.bf16 %v1308_v33, %v1214_v19  ;;  %v1557_v39 = vrot.slane %v1555_v38, 5 }
 0x1b0   : > { %v6514_v1 = vrot.slane %v2301_v45, 11  ;;  %v1561_v36 = vrot.slane %v1559_v27, 4  ;;  %v9928_v37 = vpack.c.bf16 %v7273_v14, %v7253_v61  ;;  %v2437_v13 = vrot.slane %v2303_v34, 7 }
 0x1b1   : > { %v1890_v48 = vrot.slane %v1808_v5, 5  ;;  %v1565_v15 = vshll.u32 %v7356_v30, 16  ;;  %v1569_v22 = vshrl.u32 %v7356_v30, 16  ;;  %v2434_v8 = vrot.slane %v2302_v41, 7 }
 0x1b2   : > { %6815 = vmatprep.subr.msk.bf16.mxu0 %vm5723_vm5, %v9928_v37  ;;  %v1892_v10 = vrot.slane %v1809_v24, 5  ;;  %v9929_v49 = vshrl.u32 %v7056_v40, 16  ;;  %v1562_v12 = vor.u32 %v1561_v36, %v1557_v39  ;;  %v960_v36 = vld [vmem:[#allocation2 + $0x64] sm:$0xf] }
 0x1b3   : > { %v1891_v14 = vrot.slane %v1890_v48, 4  ;;  %v2018_v19 = vmax.bf16 %v1890_v48, %v1807_v58  ;;  %v1567_v9 = vrot.slane %v1565_v15, 5  ;;  %v1571_v42 = vrot.slane %v1569_v22, 4  ;;  %v7434_v58 = vld [vmem:[#allocation2 + $0xa8] sm:$0xf] }
 0x1b4   : > { %v1558_v6 = vsel %vm7311_vm9, %v9929_v49, %v1557_v39  ;;  %v2435_v62 = vsel %vm7422_vm0, %v6514_v1, %v2434_v8  ;;  %v2436_v57 = vrot.slane %v2434_v8, 4  ;;  %v1894_v46 = vrot.slane %v1892_v10, 4  ;;  %v953_v39 = vld [vmem:[#allocation2 + $0x48] sm:$0xf]  ;;  %6725 = vmatpush3.bf16.xpose.msra.mxu0 %v7362_v4 }
 0x1b5   : > { %v1563_v45 = vrot.slane %v1562_v12, 4  ;;  %2536 = vst.msk [vmem:[#allocation2 + $0xa4] sm:$0xf] %vm669_vm2, %v2435_v62  ;;  %v1893_v23 = vsel %vm7386_vm15, %v1891_v14, %v1892_v10  ;;  %v2277_v32 = vmax.bf16 %v2117_v28, %v2018_v19  ;;  %v1572_v38 = vor.u32 %v1571_v42, %v1567_v9 }
 0x1b6   : > { %v1834_v27 = vmax.bf16 %v1558_v6, %v7056_v40  ;;  %v2438_v34 = vsel %vm7422_vm0, %v2436_v57, %v2437_v13  ;;  %v2019_v33 = vmax.bf16 %v1893_v23, %v1808_v5  ;;  %v2020_v41 = vmax.bf16 %v1894_v46, %v1809_v24  ;;  %v880_v40 = vld [vmem:[#allocation2 + $0x38] sm:$0xf]  ;;  %v887_v24 = vld [vmem:[#allocation2 + $0x54] sm:$0xf]  ;;  %v961_v13 = vld [vmem:[#allocation2 + $0x68] sm:$0xf] }
 0x1b7   : > { %v1568_v1 = vsel %vm7311_vm9, %v1563_v45, %v1567_v9  ;;  %2537 = vst.msk [vmem:[#allocation2 + $0xa8] sm:$0xf] %vm669_vm2, %v2438_v34  ;;  %v6579_v37 = vcombine.low %v2435_v62, %v2438_v34  ;;  %v6506_v48 = vrot.slane %v2277_v32, 11  ;;  %v1573_v28 = vrot.slane %v1572_v38, 4  ;;  %v888_v9 = vld [vmem:[#allocation2 + $0x58] sm:$0xf] }
 0x1b8   : > { %v1835_v15 = vmax.bf16 %v1568_v1, %v7351_v44  ;;  %v2278_v22 = vmax.bf16 %v2120_v43, %v2019_v33  ;;  %v2279_v8 = vmax.bf16 %v2123_v20, %v2020_v41  ;;  %v2180_v10 = vrot.slane %v7351_v44, 6  ;;  %v1189_v41 = vld [vmem:[#allocation2 + $0xe4] sm:$0xf] }
 0x1b9   : > { %v2182_v5 = vrot.slane %v7356_v30, 6  ;;  %6801 = vmatprep.subr.msk.bf16.mxu1 %vm5723_vm5, %v6579_v37  ;;  %v1578_v49 = vsel %vm7311_vm9, %v1573_v28, %v7079_v60  ;;  %v9932_v12 = vpack.c.bf16 %v7265_v3, %v7246_v56  ;;  %v7453_v43 = vmax.bf16 %v953_v39, %v880_v40  ;;  %v1190_v37 = vld [vmem:[#allocation2 + $0xe8] sm:$0xf]  ;;  %v1153_v28 = vld [vmem:[#allocation2 + $0x54] sm:$0xf] }
 0x1ba   : > { %v1935_v6 = vrot.slane %v1835_v15, 5  ;;  %v7455_v44 = vmax.bf16 %v960_v36, %v887_v24  ;;  %v2378_v20 = vrot.slane %v2278_v22, 7  ;;  %v2381_v4 = vrot.slane %v2279_v8, 7  ;;  %v1154_v40 = vld [vmem:[#allocation2 + $0x58] sm:$0xf] }
 0x1bb   : > { %6816 = vmatprep.subr.msk.bf16.mxu0 %vm5723_vm5, %v9932_v12  ;;  %v1836_v14 = vmax.bf16 %v1578_v49, %v7356_v30  ;;  %v2181_v19 = vrot.slane %v2180_v10, 4  ;;  %v2184_v57 = vrot.slane %v2182_v5, 4  ;;  %v7458_v60 = vmax.bf16 %v961_v13, %v888_v9  ;;  %v9938_v12 = vld [vmem:[#allocation3_spill] sm:$0xff] }
 0x1bc   : > { %v1936_v42 = vrot.slane %v1935_v6, 4  ;;  %v2045_v62 = vmax.bf16 %v1935_v6, %v1834_v27  ;;  %v2379_v56 = vsel %vm7422_vm0, %v6506_v48, %v2378_v20  ;;  %v2380_v3 = vrot.slane %v2378_v20, 4 }
 0x1bd   : > { %v1937_v46 = vrot.slane %v1836_v14, 5  ;;  %v2183_v45 = vsel %vm7327_vm12, %v2181_v19, %v2182_v5  ;;  %2520 = vst.msk [vmem:[#allocation2 + $0x24] sm:$0xf] %vm669_vm2, %v2379_v56  ;;  %v9933_v23 = vrot.slane %v7058_v2, 6  ;;  %v9934_v38 = vmax.bf16 %v7149_v21, %v7143_v17  ;;  %v1191_v17 = vld [vmem:[#allocation2 + $0xec] sm:$0x1] }
 0x1be   : > { %v2304_v32 = vmax.bf16 %v2180_v10, %v2045_v62  ;;  %v9935_v34 = vmax.bf16 %v7158_v53, %v7156_v35  ;;  %v2382_v1 = vsel %vm7422_vm0, %v2380_v3, %v2381_v4  ;;  %v1096_v36 = vmax.bf16 %v7455_v44, %v7364_v11 }
 0x1bf   : > { %v2186_v30 = vsel %vm7327_vm12, %v2184_v57, %v9933_v23  ;;  %v1088_v27 = vmax.bf16 %v7364_v11, %v9934_v38  ;;  %v1938_v2 = vsel %vm7386_vm15, %v1936_v42, %v1937_v46  ;;  %v1939_v39 = vrot.slane %v1937_v46, 4  ;;  %2521 = vst.msk [vmem:[#allocation2 + $0x28] sm:$0xf] %vm669_vm2, %v2382_v1  ;;  %v7507_v23 = vld [vmem:[#allocation2 + $0xb4] sm:$0xf] }
 0x1c0   : > { %v1089_v33 = vmax.bf16 %v7453_v43, %v9935_v34  ;;  %v6571_v21 = vcombine.low %v2379_v56, %v2382_v1  ;;  %v2046_v48 = vmax.bf16 %v1938_v2, %v1835_v15  ;;  %v6515_v35 = vrot.slane %v2304_v32, 11  ;;  %v9940_v34 = vld [vmem:[#allocation14_spill] sm:$0xff] }
 0x1c1   : > { %v1097_v53 = vmax.bf16 %v7458_v60, %v7453_v43  ;;  %v2047_v22 = vmax.bf16 %v1939_v39, %v1836_v14  ;;  %v7486_v8 = vmax.bf16 %v1153_v28, %v1088_v27  ;;  %v9936_v5 = vmax.bf16 %v7249_v52, %v7237_v47  ;;  %v9942_v39 = vld [vmem:[#allocation21_spill] sm:$0xff] }
 0x1c2   : > { %v1218_v10 = vmax.bf16 %v1154_v40, %v1089_v33  ;;  %v5728_v13 = vsel %vm5723_vm5, %v6571_v21, 0  ;;  %v2305_v49 = vmax.bf16 %v2183_v45, %v2046_v48  ;;  %v9937_v15 = vmax.bf16 %v7251_v29, %v7239_v25 }
 0x1c3   : > { %v7491_v24 = vmax.bf16 %v1189_v41, %v9936_v5  ;;  %v9939_v20 = vmax.bf16 %v7041_v51, %v9938_v12  ;;  %6695 = vmatpush3.bf16.xpose.msra.mxu1 %v5728_v13  ;;  %v2306_v14 = vmax.bf16 %v2186_v30, %v2047_v22  ;;  %v1315_v19 = vshll.u32 %v7486_v8, 16  ;;  %v9943_v5 = vld [vmem:[#allocation16_spill] sm:$0xff] }
 0x1c4   : > { %v7497_v6 = vmax.bf16 %v1190_v37, %v9937_v15  ;;  %v1319_v47 = vshrl.u32 %v7486_v8, 16  ;;  %v1325_v9 = vshll.u32 %v1218_v10, 16  ;;  %v2441_v42 = vrot.slane %v2305_v49, 7 }
 0x1c5   : > { %v7502_v4 = vmax.bf16 %v1191_v17, %v9939_v20  ;;  %v1329_v62 = vshrl.u32 %v1218_v10, 16  ;;  %v2124_v57 = vrot.slane %v7486_v8, 6  ;;  %v2126_v56 = vrot.slane %v1218_v10, 6  ;;  %v7519_v17 = vld [vmem:[#allocation2 + $0xb8] sm:$0xf] }
 0x1c6   : > { %v2444_v25 = vrot.slane %v2306_v14, 7  ;;  %v1317_v3 = vrot.slane %v1315_v19, 5  ;;  %v1321_v46 = vrot.slane %v1319_v47, 4  ;;  %v1327_v45 = vrot.slane %v1325_v9, 5 }
 0x1c7   : > { %v2442_v32 = vsel %vm7422_vm0, %v6515_v35, %v2441_v42  ;;  %v2443_v30 = vrot.slane %v2441_v42, 4  ;;  %v1331_v38 = vrot.slane %v1329_v62, 4  ;;  %v2125_v27 = vrot.slane %v2124_v57, 4 }
 0x1c8   : > { %2538 = vst.msk [vmem:[#allocation2 + $0xb4] sm:$0xf] %vm669_vm2, %v2442_v32  ;;  %v9941_v33 = vshrl.u32 %v9940_v34, 16  ;;  %v1322_v1 = vor.u32 %v1321_v46, %v1317_v3  ;;  %v2128_v2 = vrot.slane %v2126_v56, 4  ;;  %v1580_v37 = vshrl.u32 %v9942_v39, 16 }
 0x1c9   : > { %v2445_v21 = vsel %vm7422_vm0, %v2443_v30, %v2444_v25  ;;  %v1332_v48 = vor.u32 %v1331_v38, %v1327_v45  ;;  %v2127_v28 = vsel %vm7327_vm12, %v2125_v27, %v2126_v56  ;;  %v9944_v13 = vrot.slane %v9943_v5, 6  ;;  %v9945_v56 = vld [vmem:[#allocation19_spill] sm:$0xff] }
 0x1ca   : > { %v1318_v41 = vsel %vm7311_vm9, %v9941_v33, %v1317_v3  ;;  %2539 = vst.msk [vmem:[#allocation2 + $0xb8] sm:$0xf] %vm669_vm2, %v2445_v21  ;;  %v6580_v40 = vcombine.low %v2442_v32, %v2445_v21  ;;  %v1323_v22 = vrot.slane %v1322_v1, 4  ;;  %v1585_v15 = vshll.u32 %v7491_v24, 16 }
 0x1cb   : > { %v1810_v35 = vmax.bf16 %v1318_v41, %v9940_v34  ;;  %v2130_v49 = vsel %vm7327_vm12, %v2128_v2, %v9944_v13  ;;  %v1333_v12 = vrot.slane %v1332_v48, 4  ;;  %v1589_v20 = vshrl.u32 %v7491_v24, 16 }
 0x1cc   : > { %v1595_v14 = vshll.u32 %v7497_v6, 16  ;;  %v1599_v19 = vshrl.u32 %v7497_v6, 16  ;;  %6802 = vmatprep.subr.msk.bf16.mxu1 %vm5723_vm5, %v6580_v40  ;;  %v1328_v47 = vsel %vm7311_vm9, %v1323_v22, %v1327_v45  ;;  %v1587_v9 = vrot.slane %v1585_v15, 5  ;;  %v1157_v22 = vld [vmem:[#allocation2 + $0x64] sm:$0xf] }
 0x1cd   : > { %v1605_v42 = vshll.u32 %v7502_v4, 16  ;;  %v2187_v62 = vrot.slane %v7491_v24, 6  ;;  %v1338_v25 = vsel %vm7311_vm9, %v1333_v12, %v9945_v56  ;;  %v1811_v3 = vmax.bf16 %v1328_v47, %v7486_v8  ;;  %v9946_v15 = vld [vmem:[#allocation23_spill] sm:$0xff]  ;;  %v9947_v12 = vld [vmem:[#allocation22_spill] sm:$0xff] }
 0x1ce   : > { %v1591_v46 = vrot.slane %v1589_v20, 4  ;;  %v1597_v32 = vrot.slane %v1595_v14, 5  ;;  %v1812_v30 = vmax.bf16 %v1338_v25, %v1218_v10  ;;  %v1588_v38 = vsel %vm7311_vm9, %v1580_v37, %v1587_v9 }
 0x1cf   : > { %v1601_v27 = vrot.slane %v1599_v19, 4  ;;  %v1607_v34 = vrot.slane %v1605_v42, 5  ;;  %v1895_v45 = vrot.slane %v1811_v3, 5  ;;  %v1837_v41 = vmax.bf16 %v1588_v38, %v9942_v39 }
 0x1d0   : > { %v1592_v33 = vor.u32 %v1591_v46, %v1587_v9  ;;  %v2188_v1 = vrot.slane %v2187_v62, 4  ;;  %v1897_v2 = vrot.slane %v1812_v30, 5  ;;  %v2189_v48 = vrot.slane %v7497_v6, 6  ;;  %v1158_v9 = vld [vmem:[#allocation2 + $0x68] sm:$0xf] }
 0x1d1   : > { %v1602_v21 = vor.u32 %v1601_v27, %v1597_v32  ;;  %v2192_v40 = vrot.slane %v7502_v4, 6  ;;  %v1896_v5 = vrot.slane %v1895_v45, 4  ;;  %v2021_v13 = vmax.bf16 %v1895_v45, %v1810_v35 }
 0x1d2   : > { %v1593_v10 = vrot.slane %v1592_v33, 4  ;;  %v9948_v37 = vpack.c.bf16 %v9946_v15, %v9947_v12  ;;  %v1899_v14 = vrot.slane %v1897_v2, 4  ;;  %v2190_v39 = vsel %vm7327_vm12, %v2188_v1, %v2189_v48 }
 0x1d3   : > { %v1603_v19 = vrot.slane %v1602_v21, 4  ;;  %v2191_v47 = vrot.slane %v2189_v48, 4  ;;  %v1898_v4 = vsel %vm7386_vm15, %v1896_v5, %v1897_v2  ;;  %v2280_v35 = vmax.bf16 %v2124_v57, %v2021_v13 }
 0x1d4   : > { %v5841_v20 = vsel %vm5723_vm5, %v9948_v37, 0  ;;  %v1598_v42 = vsel %vm7311_vm9, %v1593_v10, %v1597_v32  ;;  %v9949_v56 = vmax.bf16 %v7300_v16, %v7291_v63  ;;  %v2022_v46 = vmax.bf16 %v1898_v4, %v1811_v3 }
 0x1d5   : > { %6727 = vmatpush3.bf16.xpose.msra.mxu0 %v5841_v20  ;;  %v2023_v38 = vmax.bf16 %v1899_v14, %v1812_v30  ;;  %v1608_v27 = vsel %vm7311_vm9, %v1603_v19, %v1607_v34  ;;  %v1838_v45 = vmax.bf16 %v1598_v42, %v7491_v24  ;;  %v6507_v33 = vrot.slane %v2280_v35, 11  ;;  %v9951_v19 = vld [vmem:[#allocation17_spill] sm:$0xff] }
 0x1d6   : > { %v7564_v25 = vmax.bf16 %v1157_v22, %v9949_v56  ;;  %v1839_v1 = vmax.bf16 %v1608_v27, %v7497_v6  ;;  %v2193_v8 = vsel %vm7327_vm12, %v2191_v47, %v2192_v40  ;;  %v9950_v57 = vmax.bf16 %v7302_v7, %v7293_v55  ;;  %v9953_v56 = vld [vmem:[#allocation18_spill] sm:$0xff] }
 0x1d7   : > { %v2281_v63 = vmax.bf16 %v2127_v28, %v2022_v46  ;;  %v2282_v2 = vmax.bf16 %v2130_v49, %v2023_v38  ;;  %v1940_v3 = vrot.slane %v1838_v45, 5  ;;  %v9952_v47 = vshrl.u32 %v9951_v19, 16 }
 0x1d8   : > { %v7575_v32 = vmax.bf16 %v1158_v9, %v9950_v57  ;;  %v1345_v30 = vshll.u32 %v7564_v25, 16  ;;  %v1942_v21 = vrot.slane %v1839_v1, 5  ;;  %v1349_v34 = vshrl.u32 %v7564_v25, 16 }
 0x1d9   : > { %v2385_v48 = vrot.slane %v2281_v63, 7  ;;  %v2388_v22 = vrot.slane %v2282_v2, 7  ;;  %v1941_v40 = vrot.slane %v1940_v3, 4  ;;  %v2048_v5 = vmax.bf16 %v1940_v3, %v1837_v41  ;;  %v918_v3 = vld [vmem:[#allocation2 + $0xd0] sm:$0xf] }
 0x1da   : > { %v1355_v24 = vshll.u32 %v7575_v32, 16  ;;  %v1359_v6 = vshrl.u32 %v7575_v32, 16  ;;  %v1944_v13 = vrot.slane %v1942_v21, 4  ;;  %v1347_v55 = vrot.slane %v1345_v30, 5  ;;  %v991_v30 = vld [vmem:[#allocation2 + $0xe0] sm:$0xf] }
 0x1db   : > { %v1351_v10 = vrot.slane %v1349_v34, 4  ;;  %v2386_v28 = vsel %vm7422_vm0, %v6507_v33, %v2385_v48  ;;  %v2387_v49 = vrot.slane %v2385_v48, 4  ;;  %v1943_v12 = vsel %vm7386_vm15, %v1941_v40, %v1942_v21  ;;  %v921_v48 = vld [vmem:[#allocation2 + $0xdc] sm:$0x1] }
 0x1dc   : > { %v1357_v15 = vrot.slane %v1355_v24, 5  ;;  %v2307_v37 = vmax.bf16 %v2187_v62, %v2048_v5  ;;  %2522 = vst.msk [vmem:[#allocation2 + $0x34] sm:$0xf] %vm669_vm2, %v2386_v28  ;;  %v2049_v20 = vmax.bf16 %v1943_v12, %v1838_v45  ;;  %v2050_v14 = vmax.bf16 %v1944_v13, %v1839_v1  ;;  %v993_v13 = vld [vmem:[#allocation2 + $0xe8] sm:$0xf] }
 0x1dd   : > { %v1348_v41 = vsel %vm7311_vm9, %v9952_v47, %v1347_v55  ;;  %v1352_v9 = vor.u32 %v1351_v10, %v1347_v55  ;;  %v2389_v4 = vsel %vm7422_vm0, %v2387_v49, %v2388_v22  ;;  %v1361_v42 = vrot.slane %v1359_v6, 4  ;;  %v919_v49 = vld [vmem:[#allocation2 + $0xd4] sm:$0xf]  ;;  %v994_v12 = vld [vmem:[#allocation2 + $0xec] sm:$0x1] }
 0x1de   : > { %v6516_v35 = vrot.slane %v2307_v37, 11  ;;  %v9954_v46 = vshll.u32 %v9953_v56, 16  ;;  %2523 = vst.msk [vmem:[#allocation2 + $0x38] sm:$0xf] %vm669_vm2, %v2389_v4  ;;  %v6572_v62 = vcombine.low %v2386_v28, %v2389_v4  ;;  %v2308_v27 = vmax.bf16 %v2190_v39, %v2049_v20  ;;  %v992_v39 = vld [vmem:[#allocation2 + $0xe4] sm:$0xf] }
 0x1df   : > { %v2309_v45 = vmax.bf16 %v2193_v8, %v2050_v14  ;;  %v1353_v33 = vrot.slane %v1352_v9, 4  ;;  %v1362_v1 = vor.u32 %v1361_v42, %v1357_v15  ;;  %v1813_v57 = vmax.bf16 %v1348_v41, %v9951_v19  ;;  %v920_v14 = vld [vmem:[#allocation2 + $0xd8] sm:$0xf]  ;;  %v962_v42 = vld [vmem:[#allocation2 + $0x6c] sm:$0x1] }
 0x1e0   : > { %v1367_v38 = vrot.slane %v9954_v46, 5  ;;  %v2131_v63 = vrot.slane %v7564_v25, 6  ;;  %v2133_v2 = vrot.slane %v7575_v32, 6  ;;  %v5731_v21 = vsel %vm5723_vm5, %v6572_v62, 0 }
 0x1e1   : > { %v2448_v34 = vrot.slane %v2308_v27, 7  ;;  %v2451_v24 = vrot.slane %v2309_v45, 7  ;;  %v1358_v6 = vsel %vm7311_vm9, %v1353_v33, %v1357_v15  ;;  %6697 = vmatpush3.bf16.xpose.msra.mxu1 %v5731_v21  ;;  %v1363_v8 = vrot.slane %v1362_v1, 4  ;;  %v1192_v27 = vld [vmem:[#allocation2 + $0xf0] sm:$0xf]  ;;  %v9955_v33 = vld [vmem:[#allocation8_spill] sm:$0xff] }
 0x1e2   : > { %v1814_v22 = vmax.bf16 %v1358_v6, %v7564_v25  ;;  %v2132_v40 = vrot.slane %v2131_v63, 4  ;;  %v2135_v5 = vrot.slane %v2133_v2, 4  ;;  %v2136_v28 = vrot.slane %v9953_v56, 6  ;;  %v9956_v21 = vld [vmem:[#allocation9_spill] sm:$0xff]  ;;  %v9957_v6 = vld [vmem:[#allocation6_spill] sm:$0xff] }
 0x1e3   : > { %v2449_v55 = vsel %vm7422_vm0, %v6516_v35, %v2448_v34  ;;  %v2450_v10 = vrot.slane %v2448_v34, 4  ;;  %v7605_v37 = vmax.bf16 %v991_v30, %v918_v3  ;;  %v1368_v15 = vsel %vm7311_vm9, %v1363_v8, %v1367_v38  ;;  %v889_v35 = vld [vmem:[#allocation2 + $0x5c] sm:$0x1]  ;;  %v1193_v34 = vld [vmem:[#allocation2 + $0xf4] sm:$0xf] }
 0x1e4   : > { %2540 = vst.msk [vmem:[#allocation2 + $0xc4] sm:$0xf] %vm669_vm2, %v2449_v55  ;;  %v1900_v20 = vrot.slane %v1814_v22, 5  ;;  %v2134_v25 = vsel %vm7327_vm12, %v2132_v40, %v2133_v2  ;;  %v7612_v19 = vmax.bf16 %v992_v39, %v919_v49  ;;  %v1815_v41 = vmax.bf16 %v1368_v15, %v7575_v32  ;;  %v1195_v3 = vld [vmem:[#allocation2 + $0xfc] sm:$0x1] }
 0x1e5   : > { %v2452_v47 = vsel %vm7422_vm0, %v2450_v10, %v2451_v24  ;;  %v2137_v9 = vsel %vm7327_vm12, %v2135_v5, %v2136_v28  ;;  %v7619_v4 = vmax.bf16 %v993_v13, %v920_v14  ;;  %v7622_v62 = vmax.bf16 %v994_v12, %v921_v48  ;;  %v9958_v48 = vld [vmem:[#allocation20_spill] sm:$0xff]  ;;  %v1194_v40 = vld [vmem:[#allocation2 + $0xf8] sm:$0xf] }
 0x1e6   : > { %2541 = vst.msk [vmem:[#allocation2 + $0xc8] sm:$0xf] %vm669_vm2, %v2452_v47  ;;  %v6581_v56 = vcombine.low %v2449_v55, %v2452_v47  ;;  %v1901_v46 = vrot.slane %v1900_v20, 4  ;;  %v2024_v38 = vmax.bf16 %v1900_v20, %v1813_v57  ;;  %v1902_v45 = vrot.slane %v1815_v41, 5 }
 0x1e7   : > { %v1127_v1 = vmax.bf16 %v7605_v37, %v9955_v33  ;;  %v1128_v32 = vmax.bf16 %v7612_v19, %v7242_v50  ;;  %v1129_v2 = vmax.bf16 %v7619_v4, %v7244_v26  ;;  %v1130_v57 = vmax.bf16 %v7622_v62, %v9956_v21 }
 0x1e8   : > { %6803 = vmatprep.subr.msk.bf16.mxu1 %vm5723_vm5, %v6581_v56  ;;  %v2283_v30 = vmax.bf16 %v2131_v63, %v2024_v38  ;;  %v7633_v24 = vmax.bf16 %v962_v42, %v889_v35  ;;  %v1095_v39 = vmax.bf16 %v9958_v48, %v9957_v6  ;;  %v1903_v8 = vsel %vm7386_vm15, %v1901_v46, %v1902_v45 }
 0x1e9   : > { %v1904_v50 = vrot.slane %v1902_v45, 4  ;;  %v7639_v5 = vmax.bf16 %v1192_v27, %v1127_v1  ;;  %v7641_v26 = vmax.bf16 %v1193_v34, %v1128_v32  ;;  %v2025_v13 = vmax.bf16 %v1903_v8, %v1814_v22 }
 0x1ea   : > { %v6508_v63 = vrot.slane %v2283_v30, 11  ;;  %v1258_v55 = vmax.bf16 %v1194_v40, %v1129_v2  ;;  %v1259_v10 = vmax.bf16 %v1195_v3, %v1130_v57  ;;  %v1160_v3 = vld [vmem:[#allocation2 + $0x70] sm:$0xf]  ;;  %v1161_v57 = vld [vmem:[#allocation2 + $0x74] sm:$0xf] }
 0x1eb   : > { %v2026_v28 = vmax.bf16 %v1904_v50, %v1815_v41  ;;  %v1610_v49 = vshrl.u32 %v7639_v5, 16  ;;  %v1615_v12 = vshll.u32 %v7641_v26, 16  ;;  %v1619_v15 = vshrl.u32 %v7641_v26, 16  ;;  %v9959_v50 = vld [vmem:[#allocation7_spill] sm:$0xff] }
 0x1ec   : > { %v2284_v20 = vmax.bf16 %v2134_v25, %v2025_v13  ;;  %v1625_v14 = vshll.u32 %v1258_v55, 16  ;;  %v1629_v47 = vshrl.u32 %v1258_v55, 16  ;;  %v1635_v35 = vshll.u32 %v1259_v10, 16  ;;  %v1163_v13 = vld [vmem:[#allocation2 + $0x7c] sm:$0x1] }
 0x1ed   : > { %v2285_v42 = vmax.bf16 %v2137_v9, %v2026_v28  ;;  %v1617_v56 = vrot.slane %v1615_v12, 5  ;;  %v1621_v46 = vrot.slane %v1619_v15, 4  ;;  %v2194_v38 = vrot.slane %v7641_v26, 6 }
 0x1ee   : > { %v2392_v22 = vrot.slane %v2284_v20, 7  ;;  %v1627_v27 = vrot.slane %v1625_v14, 5  ;;  %v1631_v45 = vrot.slane %v1629_v47, 4  ;;  %v1637_v33 = vrot.slane %v1635_v35, 5  ;;  %v1162_v14 = vld [vmem:[#allocation2 + $0x78] sm:$0xf] }
 0x1ef   : > { %v2395_v41 = vrot.slane %v2285_v42, 7  ;;  %v1618_v1 = vsel %vm7311_vm9, %v1610_v49, %v1617_v56  ;;  %v1622_v32 = vor.u32 %v1621_v46, %v1617_v56  ;;  %v2195_v2 = vrot.slane %v2194_v38, 4 }
 0x1f0   : > { %v2393_v25 = vsel %vm7422_vm0, %v6508_v63, %v2392_v22  ;;  %v2394_v30 = vrot.slane %v2392_v22, 4  ;;  %v1632_v9 = vor.u32 %v1631_v45, %v1627_v27  ;;  %v1840_v21 = vmax.bf16 %v1618_v1, %v7639_v5 }
 0x1f1   : > { %2524 = vst.msk [vmem:[#allocation2 + $0x44] sm:$0xf] %vm669_vm2, %v2393_v25  ;;  %v1623_v34 = vrot.slane %v1622_v32, 4  ;;  %v2196_v6 = vrot.slane %v1258_v55, 6  ;;  %v2199_v8 = vrot.slane %v1259_v10, 6  ;;  %v1098_v40 = vmax.bf16 %v7633_v24, %v9959_v50 }
 0x1f2   : > { %v2396_v28 = vsel %vm7422_vm0, %v2394_v30, %v2395_v41  ;;  %v1633_v49 = vrot.slane %v1632_v9, 4  ;;  %v7657_v12 = vmax.bf16 %v1160_v3, %v1095_v39  ;;  %v7662_v5 = vmax.bf16 %v1161_v57, %v1096_v36 }
 0x1f3   : > { %2525 = vst.msk [vmem:[#allocation2 + $0x48] sm:$0xf] %vm669_vm2, %v2396_v28  ;;  %v6573_v63 = vcombine.low %v2393_v25, %v2396_v28  ;;  %v1628_v10 = vsel %vm7311_vm9, %v1623_v34, %v1627_v27  ;;  %v2197_v15 = vsel %vm7327_vm12, %v2195_v2, %v2196_v6  ;;  %v2198_v20 = vrot.slane %v2196_v6, 4 }
 0x1f4   : > { %v1638_v39 = vsel %vm7311_vm9, %v1633_v49, %v1637_v33  ;;  %v1841_v47 = vmax.bf16 %v1628_v10, %v7641_v26  ;;  %v1226_v11 = vmax.bf16 %v1162_v14, %v1097_v53  ;;  %v1227_v36 = vmax.bf16 %v1163_v13, %v1098_v40  ;;  %v923_v49 = vld [vmem:[#allocation2 + $0xe4] sm:$0xf] }
 0x1f5   : > { %v5734_v35 = vsel %vm5723_vm5, %v6573_v63, 0  ;;  %v1842_v42 = vmax.bf16 %v1638_v39, %v1258_v55  ;;  %v2200_v56 = vsel %vm7327_vm12, %v2198_v20, %v2199_v8  ;;  %v1370_v46 = vshrl.u32 %v7657_v12, 16  ;;  %v995_v63 = vld [vmem:[#allocation2 + $0xf0] sm:$0xf] }
 0x1f6   : > { %6699 = vmatpush3.bf16.xpose.msra.mxu1 %v5734_v35  ;;  %v1945_v22 = vrot.slane %v1841_v47, 5  ;;  %v1375_v27 = vshll.u32 %v7662_v5, 16  ;;  %v1379_v45 = vshrl.u32 %v7662_v5, 16  ;;  %v1385_v26 = vshll.u32 %v1226_v11, 16  ;;  %v996_v35 = vld [vmem:[#allocation2 + $0xf4] sm:$0xf] }
 0x1f7   : > { %v1947_v33 = vrot.slane %v1842_v42, 5  ;;  %v1389_v41 = vshrl.u32 %v1226_v11, 16  ;;  %v1395_v43 = vshll.u32 %v1227_v36, 16  ;;  %v2138_v53 = vrot.slane %v7662_v5, 6 }
 0x1f8   : > { %v1946_v1 = vrot.slane %v1945_v22, 4  ;;  %v2051_v32 = vmax.bf16 %v1945_v22, %v1840_v21  ;;  %v1377_v55 = vrot.slane %v1375_v27, 5  ;;  %v1381_v2 = vrot.slane %v1379_v45, 4  ;;  %v922_v21 = vld [vmem:[#allocation2 + $0xe0] sm:$0xf] }
 0x1f9   : > { %v1949_v3 = vrot.slane %v1947_v33, 4  ;;  %v1387_v25 = vrot.slane %v1385_v26, 5  ;;  %v1391_v30 = vrot.slane %v1389_v41, 4  ;;  %v1397_v9 = vrot.slane %v1395_v43, 5  ;;  %v924_v45 = vld [vmem:[#allocation2 + $0xe8] sm:$0xf] }
 0x1fa   : > { %v1948_v57 = vsel %vm7386_vm15, %v1946_v1, %v1947_v33  ;;  %v2310_v34 = vmax.bf16 %v2194_v38, %v2051_v32  ;;  %v1378_v6 = vsel %vm7311_vm9, %v1370_v46, %v1377_v55  ;;  %v1382_v8 = vor.u32 %v1381_v2, %v1377_v55  ;;  %v925_v33 = vld [vmem:[#allocation2 + $0xec] sm:$0x1]  ;;  %v998_v41 = vld [vmem:[#allocation2 + $0xfc] sm:$0x1] }
 0x1fb   : > { %v2052_v50 = vmax.bf16 %v1948_v57, %v1841_v47  ;;  %v2053_v40 = vmax.bf16 %v1949_v3, %v1842_v42  ;;  %v1392_v13 = vor.u32 %v1391_v30, %v1387_v25  ;;  %v1816_v28 = vmax.bf16 %v1378_v6, %v7657_v12  ;;  %v997_v47 = vld [vmem:[#allocation2 + $0xf8] sm:$0xf]  ;;  %v1196_v6 = vld [vmem:[#allocation2 + $0x100] sm:$0xf] }
 0x1fc   : > { %v6517_v10 = vrot.slane %v2310_v34, 11  ;;  %v1383_v20 = vrot.slane %v1382_v8, 4  ;;  %v2139_v14 = vrot.slane %v2138_v53, 4  ;;  %v2140_v39 = vrot.slane %v1226_v11, 6  ;;  %v1197_v8 = vld [vmem:[#allocation2 + $0x104] sm:$0xf] }
 0x1fd   : > { %v2311_v38 = vmax.bf16 %v2197_v15, %v2052_v50  ;;  %v2312_v22 = vmax.bf16 %v2200_v56, %v2053_v40  ;;  %v1393_v27 = vrot.slane %v1392_v13, 4  ;;  %v2143_v46 = vrot.slane %v1227_v36, 6 }
 0x1fe   : > { %v1388_v42 = vsel %vm7311_vm9, %v1383_v20, %v1387_v25  ;;  %v2141_v12 = vsel %vm7327_vm12, %v2139_v14, %v2140_v39  ;;  %v2142_v26 = vrot.slane %v2140_v39, 4  ;;  %v7693_v43 = vmax.bf16 %v995_v63, %v922_v21  ;;  %v1198_v21 = vld [vmem:[#allocation2 + $0x108] sm:$0xf] }
 0x1ff   : > { %v2455_v1 = vrot.slane %v2311_v38, 7  ;;  %v2458_v32 = vrot.slane %v2312_v22, 7  ;;  %v1398_v15 = vsel %vm7311_vm9, %v1393_v27, %v1397_v9  ;;  %v1817_v36 = vmax.bf16 %v1388_v42, %v7662_v5 }
 0x200   : > { %v1818_v56 = vmax.bf16 %v1398_v15, %v1226_v11  ;;  %v2144_v55 = vsel %vm7327_vm12, %v2142_v26, %v2143_v46  ;;  %v7700_v2 = vmax.bf16 %v996_v35, %v923_v49  ;;  %v7702_v3 = vmax.bf16 %v997_v47, %v924_v45  ;;  %v9960_v11 = vld [vmem:[#allocation10_spill] sm:$0xff]  ;;  %v1199_v49 = vld [vmem:[#allocation2 + $0x10c] sm:$0x1] }
 0x201   : > { %v2456_v25 = vsel %vm7422_vm0, %v6517_v10, %v2455_v1  ;;  %v2457_v30 = vrot.slane %v2455_v1, 4  ;;  %v1905_v57 = vrot.slane %v1817_v36, 5  ;;  %v7706_v34 = vmax.bf16 %v998_v41, %v925_v33 }
 0x202   : > { %2542 = vst.msk [vmem:[#allocation2 + $0xd4] sm:$0xf] %vm669_vm2, %v2456_v25  ;;  %v1907_v9 = vrot.slane %v1818_v56, 5  ;;  %v1131_v50 = vmax.bf16 %v7693_v43, %v9960_v11  ;;  %v1132_v40 = vmax.bf16 %v7700_v2, %v7249_v52  ;;  %v1133_v13 = vmax.bf16 %v7702_v3, %v7251_v29 }
 0x203   : > { %v2459_v63 = vsel %vm7422_vm0, %v2457_v30, %v2458_v32  ;;  %v1906_v10 = vrot.slane %v1905_v57, 4  ;;  %v2027_v20 = vmax.bf16 %v1905_v57, %v1816_v28  ;;  %v1134_v14 = vmax.bf16 %v7706_v34, %v7041_v51 }
 0x204   : > { %2543 = vst.msk [vmem:[#allocation2 + $0xd8] sm:$0xf] %vm669_vm2, %v2459_v63  ;;  %v6582_v39 = vcombine.low %v2456_v25, %v2459_v63  ;;  %v1909_v35 = vrot.slane %v1907_v9, 4  ;;  %v7720_v38 = vmax.bf16 %v1196_v6, %v1131_v50  ;;  %v7722_v52 = vmax.bf16 %v1197_v8, %v1132_v40  ;;  %v891_v25 = vld [vmem:[#allocation2 + $0x64] sm:$0xf] }
 0x205   : > { %v1908_v29 = vsel %vm7386_vm15, %v1906_v10, %v1907_v9  ;;  %v2286_v22 = vmax.bf16 %v2138_v53, %v2027_v20  ;;  %v1262_v27 = vmax.bf16 %v1198_v21, %v1133_v13  ;;  %v1263_v46 = vmax.bf16 %v1199_v49, %v1134_v14  ;;  %v890_v53 = vld [vmem:[#allocation2 + $0x60] sm:$0xf]  ;;  %v963_v8 = vld [vmem:[#allocation2 + $0x70] sm:$0xf]  ;;  %v964_v13 = vld [vmem:[#allocation2 + $0x74] sm:$0xf] }
 0x206   : > { %6804 = vmatprep.subr.msk.bf16.mxu1 %vm5723_vm5, %v6582_v39  ;;  %v2028_v28 = vmax.bf16 %v1908_v29, %v1817_v36  ;;  %v2029_v51 = vmax.bf16 %v1909_v35, %v1818_v56  ;;  %v1640_v45 = vshrl.u32 %v7720_v38, 16  ;;  %v1645_v47 = vshll.u32 %v7722_v52, 16  ;;  %v892_v56 = vld [vmem:[#allocation2 + $0x68] sm:$0xf]  ;;  %v893_v63 = vld [vmem:[#allocation2 + $0x6c] sm:$0x1] }
 0x207   : > { %v6509_v42 = vrot.slane %v2286_v22, 11  ;;  %v1649_v26 = vshrl.u32 %v7722_v52, 16  ;;  %v1655_v33 = vshll.u32 %v1262_v27, 16  ;;  %v1659_v41 = vshrl.u32 %v1262_v27, 16  ;;  %v965_v10 = vld [vmem:[#allocation2 + $0x78] sm:$0xf] }
 0x208   : > { %v2287_v1 = vmax.bf16 %v2141_v12, %v2028_v28  ;;  %v2288_v32 = vmax.bf16 %v2144_v55, %v2029_v51  ;;  %v1647_v15 = vrot.slane %v1645_v47, 5  ;;  %v1665_v5 = vshll.u32 %v1263_v46, 16  ;;  %v966_v29 = vld [vmem:[#allocation2 + $0x7c] sm:$0x1] }
 0x209   : > { %v1651_v30 = vrot.slane %v1649_v26, 4  ;;  %v1657_v57 = vrot.slane %v1655_v33, 5  ;;  %v1661_v6 = vrot.slane %v1659_v41, 4  ;;  %v2201_v36 = vrot.slane %v7722_v52, 6  ;;  %v1164_v33 = vld [vmem:[#allocation2 + $0x80] sm:$0xf] }
 0x20a   : > { %v2399_v9 = vrot.slane %v2287_v1, 7  ;;  %v2402_v11 = vrot.slane %v2288_v32, 7  ;;  %v1648_v50 = vsel %vm7311_vm9, %v1640_v45, %v1647_v15  ;;  %v1667_v40 = vrot.slane %v1665_v5, 5  ;;  %v926_v5 = vld [vmem:[#allocation2 + $0xf0] sm:$0xf] }
 0x20b   : > { %v1652_v12 = vor.u32 %v1651_v30, %v1647_v15  ;;  %v1662_v55 = vor.u32 %v1661_v6, %v1657_v57  ;;  %v1843_v21 = vmax.bf16 %v1648_v50, %v7720_v38  ;;  %v2202_v49 = vrot.slane %v2201_v36, 4  ;;  %v1165_v15 = vld [vmem:[#allocation2 + $0x84] sm:$0xf] }
 0x20c   : > { %v2400_v20 = vsel %vm7422_vm0, %v6509_v42, %v2399_v9  ;;  %v2401_v14 = vrot.slane %v2399_v9, 4  ;;  %v2203_v39 = vrot.slane %v1262_v27, 6  ;;  %v2206_v35 = vrot.slane %v1263_v46, 6  ;;  %v1166_v9 = vld [vmem:[#allocation2 + $0x88] sm:$0xf] }
 0x20d   : > { %2526 = vst.msk [vmem:[#allocation2 + $0x54] sm:$0xf] %vm669_vm2, %v2400_v20  ;;  %v1653_v22 = vrot.slane %v1652_v12, 4  ;;  %v1663_v28 = vrot.slane %v1662_v55, 4  ;;  %v7741_v51 = vmax.bf16 %v963_v8, %v890_v53  ;;  %v7743_v45 = vmax.bf16 %v964_v13, %v891_v25  ;;  %v999_v53 = vld [vmem:[#allocation2 + $0x100] sm:$0xf] }
 0x20e   : > { %v2403_v38 = vsel %vm7422_vm0, %v2401_v14, %v2402_v11  ;;  %v2204_v47 = vsel %vm7327_vm12, %v2202_v49, %v2203_v39  ;;  %v2205_v26 = vrot.slane %v2203_v39, 4  ;;  %v7749_v42 = vmax.bf16 %v965_v10, %v892_v56  ;;  %v9961_v56 = vld [vmem:[#allocation13_spill] sm:$0xff]  ;;  %v1167_v11 = vld [vmem:[#allocation2 + $0x8c] sm:$0x1]  ;;  %v9962_v12 = vld [vmem:[#allocation15_spill] sm:$0xff] }
 0x20f   : > { %2527 = vst.msk [vmem:[#allocation2 + $0x58] sm:$0xf] %vm669_vm2, %v2403_v38  ;;  %v6574_v46 = vcombine.low %v2400_v20, %v2403_v38  ;;  %v1658_v41 = vsel %vm7311_vm9, %v1653_v22, %v1657_v57  ;;  %v1668_v1 = vsel %vm7311_vm9, %v1663_v28, %v1667_v40  ;;  %v7756_v32 = vmax.bf16 %v966_v29, %v893_v63  ;;  %v1000_v57 = vld [vmem:[#allocation2 + $0x104] sm:$0xf]  ;;  %v927_v10 = vld [vmem:[#allocation2 + $0xf4] sm:$0xf] }
 0x210   : > { %v1844_v25 = vmax.bf16 %v1658_v41, %v7722_v52  ;;  %v1845_v30 = vmax.bf16 %v1668_v1, %v1262_v27  ;;  %v2207_v6 = vsel %vm7327_vm12, %v2205_v26, %v2206_v35  ;;  %v1099_v8 = vmax.bf16 %v7741_v51, %v9961_v56  ;;  %v1002_v52 = vld [vmem:[#allocation2 + $0x10c] sm:$0x1] }
 0x211   : > { %v5737_v50 = vsel %vm5723_vm5, %v6574_v46, 0  ;;  %v1100_v40 = vmax.bf16 %v7743_v45, %v7300_v16  ;;  %v1101_v13 = vmax.bf16 %v7749_v42, %v7302_v7  ;;  %v1102_v27 = vmax.bf16 %v7756_v32, %v9962_v12 }
 0x212   : > { %6701 = vmatpush3.bf16.xpose.msra.mxu1 %v5737_v50  ;;  %v1950_v55 = vrot.slane %v1844_v25, 5  ;;  %v1952_v49 = vrot.slane %v1845_v30, 5  ;;  %v7770_v63 = vmax.bf16 %v1164_v33, %v1099_v8  ;;  %v7772_v20 = vmax.bf16 %v999_v53, %v926_v5 }
 0x213   : > { %v7774_v14 = vmax.bf16 %v1165_v15, %v1100_v40  ;;  %v1230_v39 = vmax.bf16 %v1166_v9, %v1101_v13  ;;  %v1231_v35 = vmax.bf16 %v1167_v11, %v1102_v27  ;;  %v7776_v29 = vmax.bf16 %v1000_v57, %v927_v10  ;;  %v929_v40 = vld [vmem:[#allocation2 + $0xfc] sm:$0x1] }
 0x214   : > { %v1951_v16 = vrot.slane %v1950_v55, 4  ;;  %v1954_v22 = vrot.slane %v1952_v49, 4  ;;  %v2054_v7 = vmax.bf16 %v1950_v55, %v1843_v21  ;;  %v1400_v28 = vshrl.u32 %v7770_v63, 16  ;;  %v1001_v55 = vld [vmem:[#allocation2 + $0x108] sm:$0xf] }
 0x215   : > { %v1405_v38 = vshll.u32 %v7774_v14, 16  ;;  %v1409_v26 = vshrl.u32 %v7774_v14, 16  ;;  %v1415_v33 = vshll.u32 %v1230_v39, 16  ;;  %v1419_v46 = vshrl.u32 %v1230_v39, 16 }
 0x216   : > { %v1953_v41 = vsel %vm7386_vm15, %v1951_v16, %v1952_v49  ;;  %v2056_v1 = vmax.bf16 %v1954_v22, %v1845_v30  ;;  %v2313_v15 = vmax.bf16 %v2201_v36, %v2054_v7  ;;  %v1425_v5 = vshll.u32 %v1231_v35, 16 }
 0x217   : > { %v2055_v53 = vmax.bf16 %v1953_v41, %v1844_v25  ;;  %v1407_v56 = vrot.slane %v1405_v38, 5  ;;  %v1411_v8 = vrot.slane %v1409_v26, 4  ;;  %v1417_v21 = vrot.slane %v1415_v33, 5  ;;  %v928_v38 = vld [vmem:[#allocation2 + $0xf8] sm:$0xf] }
 0x218   : > { %v2315_v9 = vmax.bf16 %v2207_v6, %v2056_v1  ;;  %v6518_v11 = vrot.slane %v2313_v15, 11  ;;  %v1421_v57 = vrot.slane %v1419_v46, 4  ;;  %v1427_v50 = vrot.slane %v1425_v5, 5  ;;  %v1200_v15 = vld [vmem:[#allocation2 + $0x110] sm:$0xf] }
 0x219   : > { %v2314_v13 = vmax.bf16 %v2204_v47, %v2055_v53  ;;  %v1408_v12 = vsel %vm7311_vm9, %v1400_v28, %v1407_v56  ;;  %v1412_v27 = vor.u32 %v1411_v8, %v1407_v56  ;;  %v2145_v30 = vrot.slane %v7774_v14, 6  ;;  %v894_v8 = vld [vmem:[#allocation2 + $0x70] sm:$0xf] }
 0x21a   : > { %v2465_v36 = vrot.slane %v2315_v9, 7  ;;  %v1422_v49 = vor.u32 %v1421_v57, %v1417_v21  ;;  %v1819_v25 = vmax.bf16 %v1408_v12, %v7770_v63  ;;  %v2147_v10 = vrot.slane %v1230_v39, 6  ;;  %v967_v9 = vld [vmem:[#allocation2 + $0x80] sm:$0xf]  ;;  %v1201_v12 = vld [vmem:[#allocation2 + $0x114] sm:$0xf] }
 0x21b   : > { %v2462_v16 = vrot.slane %v2314_v13, 7  ;;  %v1413_v6 = vrot.slane %v1412_v27, 4  ;;  %v2146_v22 = vrot.slane %v2145_v30, 4  ;;  %v2150_v7 = vrot.slane %v1231_v35, 6  ;;  %v1202_v27 = vld [vmem:[#allocation2 + $0x118] sm:$0xf] }
 0x21c   : > { %v1423_v26 = vrot.slane %v1422_v49, 4  ;;  %v2149_v47 = vrot.slane %v2147_v10, 4  ;;  %v7789_v33 = vmax.bf16 %v1001_v55, %v928_v38  ;;  %v7791_v28 = vmax.bf16 %v1002_v52, %v929_v40  ;;  %v1203_v40 = vld [vmem:[#allocation2 + $0x11c] sm:$0x1] }
 0x21d   : > { %v2463_v46 = vsel %vm7422_vm0, %v6518_v11, %v2462_v16  ;;  %v2464_v41 = vrot.slane %v2462_v16, 4  ;;  %v1418_v1 = vsel %vm7311_vm9, %v1413_v6, %v1417_v21  ;;  %v2148_v63 = vsel %vm7327_vm12, %v2146_v22, %v2147_v10 }
 0x21e   : > { %2544 = vst.msk [vmem:[#allocation2 + $0xe4] sm:$0xf] %vm669_vm2, %v2463_v46  ;;  %v1428_v35 = vsel %vm7311_vm9, %v1423_v26, %v1427_v50  ;;  %v1820_v5 = vmax.bf16 %v1418_v1, %v7774_v14  ;;  %v2151_v53 = vsel %vm7327_vm12, %v2149_v47, %v2150_v7  ;;  %v1135_v56 = vmax.bf16 %v7772_v20, %v7605_v37 }
 0x21f   : > { %v2466_v21 = vsel %vm7422_vm0, %v2464_v41, %v2465_v36  ;;  %v1821_v11 = vmax.bf16 %v1428_v35, %v1230_v39  ;;  %v1136_v57 = vmax.bf16 %v7776_v29, %v7612_v19  ;;  %v1137_v50 = vmax.bf16 %v7789_v33, %v7619_v4 }
 0x220   : > { %2545 = vst.msk [vmem:[#allocation2 + $0xe8] sm:$0xf] %vm669_vm2, %v2466_v21  ;;  %v6583_v14 = vcombine.low %v2463_v46, %v2466_v21  ;;  %v1910_v13 = vrot.slane %v1820_v5, 5  ;;  %v1138_v37 = vmax.bf16 %v7791_v28, %v7622_v62  ;;  %v7816_v55 = vmax.bf16 %v1200_v15, %v1135_v56 }
 0x221   : > { %v1912_v52 = vrot.slane %v1821_v11, 5  ;;  %v7818_v39 = vmax.bf16 %v1201_v12, %v1136_v57  ;;  %v1266_v36 = vmax.bf16 %v1202_v27, %v1137_v50  ;;  %v7820_v19 = vmax.bf16 %v967_v9, %v894_v8  ;;  %v896_v12 = vld [vmem:[#allocation2 + $0x78] sm:$0xf]  ;;  %v897_v27 = vld [vmem:[#allocation2 + $0x7c] sm:$0x1] }
 0x222   : > { %6805 = vmatprep.subr.msk.bf16.mxu1 %vm5723_vm5, %v6583_v14  ;;  %v1911_v4 = vrot.slane %v1910_v13, 4  ;;  %v2030_v49 = vmax.bf16 %v1910_v13, %v1819_v25  ;;  %v1267_v10 = vmax.bf16 %v1203_v40, %v1138_v37  ;;  %v1670_v16 = vshrl.u32 %v7816_v55, 16  ;;  %v895_v14 = vld [vmem:[#allocation2 + $0x74] sm:$0xf]  ;;  %v968_v13 = vld [vmem:[#allocation2 + $0x84] sm:$0xf] }
 0x223   : > { %v1914_v6 = vrot.slane %v1912_v52, 4  ;;  %v1675_v62 = vshll.u32 %v7818_v39, 16  ;;  %v1679_v22 = vshrl.u32 %v7818_v39, 16  ;;  %v1685_v7 = vshll.u32 %v1266_v36, 16 }
 0x224   : > { %v1913_v38 = vsel %vm7386_vm15, %v1911_v4, %v1912_v52  ;;  %v2289_v26 = vmax.bf16 %v2145_v30, %v2030_v49  ;;  %v1689_v47 = vshrl.u32 %v1266_v36, 16  ;;  %v1695_v46 = vshll.u32 %v1267_v10, 16  ;;  %v969_v52 = vld [vmem:[#allocation2 + $0x88] sm:$0xf] }
 0x225   : > { %v2031_v41 = vmax.bf16 %v1913_v38, %v1820_v5  ;;  %v2032_v1 = vmax.bf16 %v1914_v6, %v1821_v11  ;;  %v1677_v15 = vrot.slane %v1675_v62, 5  ;;  %v1681_v35 = vrot.slane %v1679_v22, 4 }
 0x226   : > { %v6510_v25 = vrot.slane %v2289_v26, 11  ;;  %v1687_v56 = vrot.slane %v1685_v7, 5  ;;  %v1691_v8 = vrot.slane %v1689_v47, 4  ;;  %v1697_v9 = vrot.slane %v1695_v46, 5 }
 0x227   : > { %v2290_v21 = vmax.bf16 %v2148_v63, %v2031_v41  ;;  %v2291_v57 = vmax.bf16 %v2151_v53, %v2032_v1  ;;  %v1678_v50 = vsel %vm7311_vm9, %v1670_v16, %v1677_v15  ;;  %v1682_v40 = vor.u32 %v1681_v35, %v1677_v15  ;;  %v970_v53 = vld [vmem:[#allocation2 + $0x8c] sm:$0x1]  ;;  %v1168_v35 = vld [vmem:[#allocation2 + $0x90] sm:$0xf] }
 0x228   : > { %v1692_v37 = vor.u32 %v1691_v8, %v1687_v56  ;;  %v1846_v30 = vmax.bf16 %v1678_v50, %v7816_v55  ;;  %v2208_v5 = vrot.slane %v7818_v39, 6  ;;  %v2210_v11 = vrot.slane %v1266_v36, 6  ;;  %v6570_v55 = vld [vmem:[%s9814_s3 + $0x4] sm:$0xf] }
 0x229   : > { %v2406_v4 = vrot.slane %v2290_v21, 7  ;;  %v2409_v49 = vrot.slane %v2291_v57, 7  ;;  %v1683_v6 = vrot.slane %v1682_v40, 4  ;;  %v2213_v63 = vrot.slane %v1267_v10, 6  ;;  %6710 = vmatprep.mubr.msk.bf16.mxu1 %vm5723_vm5, %v6570_v55 }
 0x22a   : > { %v1693_v62 = vrot.slane %v1692_v37, 4  ;;  %v2209_v22 = vrot.slane %v2208_v5, 4  ;;  %v2212_v16 = vrot.slane %v2210_v11, 4  ;;  %v7832_v7 = vmax.bf16 %v968_v13, %v895_v14  ;;  %v1171_v13 = vld [vmem:[#allocation2 + $0x9c] sm:$0x1] }
 0x22b   : > { %v2407_v38 = vsel %vm7422_vm0, %v6510_v25, %v2406_v4  ;;  %v2408_v26 = vrot.slane %v2406_v4, 4  ;;  %v1688_v47 = vsel %vm7311_vm9, %v1683_v6, %v1687_v56  ;;  %v7841_v46 = vmax.bf16 %v969_v52, %v896_v12  ;;  %v7852_v25 = vld [vmem:[#allocation2 + $0x100] sm:$0xf]  ;;  %v7854_v56 = vld [vmem:[#allocation2 + $0x110] sm:$0xf] }
 0x22c   : > { %2528 = vst.msk [vmem:[#allocation2 + $0x64] sm:$0xf] %vm669_vm2, %v2407_v38  ;;  %v1698_v10 = vsel %vm7311_vm9, %v1693_v62, %v1697_v9  ;;  %v1847_v41 = vmax.bf16 %v1688_v47, %v7818_v39  ;;  %v2211_v1 = vsel %vm7327_vm12, %v2209_v22, %v2210_v11  ;;  %v2214_v15 = vsel %vm7327_vm12, %v2212_v16, %v2213_v63  ;;  %v1169_v11 = vld [vmem:[#allocation2 + $0x94] sm:$0xf] }
 0x22d   : > { %v2410_v8 = vsel %vm7422_vm0, %v2408_v26, %v2409_v49  ;;  %v1848_v21 = vmax.bf16 %v1698_v10, %v1266_v36  ;;  %v7858_v57 = vmax.bf16 %v970_v53, %v897_v27  ;;  %v1103_v39 = vmax.bf16 %v7820_v19, %v9958_v48  ;;  %v1170_v49 = vld [vmem:[#allocation2 + $0x98] sm:$0xf] }
 0x22e   : > { %2529 = vst.msk [vmem:[#allocation2 + $0x68] sm:$0xf] %vm669_vm2, %v2410_v8  ;;  %v6575_v9 = vcombine.low %v2407_v38, %v2410_v8  ;;  %v1955_v50 = vrot.slane %v1847_v41, 5  ;;  %v1104_v40 = vmax.bf16 %v7832_v7, %v7455_v44  ;;  %v1105_v14 = vmax.bf16 %v7841_v46, %v7458_v60 }
 0x22f   : > { %v1957_v37 = vrot.slane %v1848_v21, 5  ;;  %v1106_v36 = vmax.bf16 %v7858_v57, %v7633_v24  ;;  %v7869_v12 = vmax.bf16 %v1168_v35, %v1103_v39  ;;  %v1075_v48 = vmax.bf16 %v7854_v56, %v7852_v25 }
 0x230   : > { %v5740_v27 = vsel %vm5723_vm5, %v6575_v9, 0  ;;  %v1956_v52 = vrot.slane %v1955_v50, 4  ;;  %v2057_v4 = vmax.bf16 %v1955_v50, %v1846_v30  ;;  %v7874_v44 = vmax.bf16 %v1169_v11, %v1104_v40 }
 0x231   : > { %6703 = vmatpush3.bf16.xpose.msra.mxu1 %v5740_v27  ;;  %v1959_v60 = vrot.slane %v1957_v37, 4  ;;  %v1234_v6 = vmax.bf16 %v1170_v49, %v1105_v14  ;;  %v1235_v63 = vmax.bf16 %v1171_v13, %v1106_v36  ;;  %v1430_v53 = vshrl.u32 %v7869_v12, 16  ;;  %v931_v14 = vld [vmem:[#allocation2 + $0x104] sm:$0xf]  ;;  %v933_v49 = vld [vmem:[#allocation2 + $0x10c] sm:$0x1] }
 0x232   : > { %v1958_v24 = vsel %vm7386_vm15, %v1956_v52, %v1957_v37  ;;  %v2316_v62 = vmax.bf16 %v2208_v5, %v2057_v4  ;;  %v1435_v22 = vshll.u32 %v7874_v44, 16  ;;  %v1439_v16 = vshrl.u32 %v7874_v44, 16 }
 0x233   : > { %v2058_v55 = vmax.bf16 %v1958_v24, %v1847_v41  ;;  %v2059_v38 = vmax.bf16 %v1959_v60, %v1848_v21  ;;  %v1445_v30 = vshll.u32 %v1234_v6, 16  ;;  %v1449_v26 = vshrl.u32 %v1234_v6, 16  ;;  %v932_v41 = vld [vmem:[#allocation2 + $0x108] sm:$0xf]  ;;  %v1004_v21 = vld [vmem:[#allocation2 + $0x114] sm:$0xf] }
 0x234   : > { %v6519_v47 = vrot.slane %v2316_v62, 11  ;;  %v1437_v10 = vrot.slane %v1435_v22, 5  ;;  %v1441_v35 = vrot.slane %v1439_v16, 4  ;;  %v1455_v8 = vshll.u32 %v1235_v63, 16  ;;  %v1006_v22 = vld [vmem:[#allocation2 + $0x11c] sm:$0x1] }
 0x235   : > { %v2317_v39 = vmax.bf16 %v2211_v1, %v2058_v55  ;;  %v2318_v9 = vmax.bf16 %v2214_v15, %v2059_v38  ;;  %v1447_v50 = vrot.slane %v1445_v30, 5  ;;  %v1451_v40 = vrot.slane %v1449_v26, 4  ;;  %v1005_v1 = vld [vmem:[#allocation2 + $0x118] sm:$0xf] }
 0x236   : > { %v1438_v5 = vsel %vm7311_vm9, %v1430_v53, %v1437_v10  ;;  %v1442_v13 = vor.u32 %v1441_v35, %v1437_v10  ;;  %v1457_v37 = vrot.slane %v1455_v8, 5  ;;  %v2152_v36 = vrot.slane %v7874_v44, 6 }
 0x237   : > { %v2469_v11 = vrot.slane %v2317_v39, 7  ;;  %v2472_v27 = vrot.slane %v2318_v9, 7  ;;  %v1452_v52 = vor.u32 %v1451_v40, %v1447_v50  ;;  %v1822_v4 = vmax.bf16 %v1438_v5, %v7869_v12  ;;  %v1204_v39 = vld [vmem:[#allocation2 + $0x120] sm:$0xf]  ;;  %v1205_v5 = vld [vmem:[#allocation2 + $0x124] sm:$0xf] }
 0x238   : > { %v1443_v15 = vrot.slane %v1442_v13, 4  ;;  %v2153_v60 = vrot.slane %v2152_v36, 4  ;;  %v2154_v24 = vrot.slane %v1234_v6, 6  ;;  %v2157_v62 = vrot.slane %v1235_v63, 6  ;;  %v1206_v13 = vld [vmem:[#allocation2 + $0x128] sm:$0xf] }
 0x239   : > { %v2470_v53 = vsel %vm7422_vm0, %v6519_v47, %v2469_v11  ;;  %v2471_v16 = vrot.slane %v2469_v11, 4  ;;  %v1453_v55 = vrot.slane %v1452_v52, 4  ;;  %v1076_v38 = vmax.bf16 %v1004_v21, %v931_v14  ;;  %v1207_v11 = vld [vmem:[#allocation2 + $0x12c] sm:$0x1]  ;;  %v9963_v52 = vld [vmem:[#allocation5_spill] sm:$0xff] }
 0x23a   : > { %2546 = vst.msk [vmem:[#allocation2 + $0xf4] sm:$0xf] %vm669_vm2, %v2470_v53  ;;  %v1448_v30 = vsel %vm7311_vm9, %v1443_v15, %v1447_v50  ;;  %v2155_v12 = vsel %vm7327_vm12, %v2153_v60, %v2154_v24  ;;  %v2156_v26 = vrot.slane %v2154_v24, 4  ;;  %v1077_v10 = vmax.bf16 %v1005_v1, %v932_v41  ;;  %v9965_v60 = vld [vmem:[#allocation25_spill] sm:$0xff] }
 0x23b   : > { %v2473_v63 = vsel %vm7422_vm0, %v2471_v16, %v2472_v27  ;;  %v1458_v35 = vsel %vm7311_vm9, %v1453_v55, %v1457_v37  ;;  %v1823_v47 = vmax.bf16 %v1448_v30, %v7874_v44  ;;  %v1078_v8 = vmax.bf16 %v1006_v22, %v933_v49 }
 0x23c   : > { %2547 = vst.msk [vmem:[#allocation2 + $0xf8] sm:$0xf] %vm669_vm2, %v2473_v63  ;;  %v6584_v9 = vcombine.low %v2470_v53, %v2473_v63  ;;  %v1824_v40 = vmax.bf16 %v1458_v35, %v1234_v6  ;;  %v2158_v50 = vsel %vm7327_vm12, %v2156_v26, %v2157_v62  ;;  %v1139_v14 = vmax.bf16 %v1075_v48, %v7693_v43  ;;  %v9964_v43 = vld [vmem:[#allocation24_spill] sm:$0xff] }
 0x23d   : > { %v1915_v41 = vrot.slane %v1823_v47, 5  ;;  %v1140_v37 = vmax.bf16 %v1076_v38, %v7700_v2  ;;  %v1141_v44 = vmax.bf16 %v1077_v10, %v7702_v3  ;;  %v1142_v21 = vmax.bf16 %v1078_v8, %v7706_v34 }
 0x23e   : > { %6806 = vmatprep.subr.msk.bf16.mxu1 %vm5723_vm5, %v6584_v9  ;;  %v1917_v6 = vrot.slane %v1824_v40, 5  ;;  %v7908_v27 = vmax.bf16 %v1204_v39, %v1139_v14  ;;  %v1107_v49 = vmax.bf16 %v9963_v52, %v7741_v51  ;;  %v1108_v25 = vmax.bf16 %v9964_v43, %v7743_v45  ;;  %v9966_v52 = vld [vmem:[#allocation4_spill] sm:$0xff] }
 0x23f   : > { %v1916_v56 = vrot.slane %v1915_v41, 4  ;;  %v2033_v48 = vmax.bf16 %v1915_v41, %v1822_v4  ;;  %v7914_v1 = vmax.bf16 %v1205_v5, %v1140_v37  ;;  %v1270_v2 = vmax.bf16 %v1206_v13, %v1141_v44  ;;  %v1172_v41 = vld [vmem:[#allocation2 + $0xa0] sm:$0xf] }
 0x240   : > { %v1919_v3 = vrot.slane %v1917_v6, 4  ;;  %v1271_v15 = vmax.bf16 %v1207_v11, %v1142_v21  ;;  %v1700_v34 = vshrl.u32 %v7908_v27, 16  ;;  %v1109_v24 = vmax.bf16 %v9965_v60, %v7749_v42 }
 0x241   : > { %v1918_v62 = vsel %vm7386_vm15, %v1916_v56, %v1917_v6  ;;  %v2292_v22 = vmax.bf16 %v2152_v36, %v2033_v48  ;;  %v1705_v51 = vshll.u32 %v7914_v1, 16  ;;  %v1709_v45 = vshrl.u32 %v7914_v1, 16 }
 0x242   : > { %v2034_v53 = vmax.bf16 %v1918_v62, %v1823_v47  ;;  %v2035_v4 = vmax.bf16 %v1919_v3, %v1824_v40  ;;  %v1715_v16 = vshll.u32 %v1270_v2, 16  ;;  %v1719_v55 = vshrl.u32 %v1270_v2, 16  ;;  %v1175_v3 = vld [vmem:[#allocation2 + $0xac] sm:$0x1] }
 0x243   : > { %v6511_v38 = vrot.slane %v2292_v22, 11  ;;  %v1707_v30 = vrot.slane %v1705_v51, 5  ;;  %v1711_v26 = vrot.slane %v1709_v45, 4  ;;  %v1725_v10 = vshll.u32 %v1271_v15, 16 }
 0x244   : > { %v2293_v63 = vmax.bf16 %v2155_v12, %v2034_v53  ;;  %v2294_v35 = vmax.bf16 %v2158_v50, %v2035_v4  ;;  %v1717_v8 = vrot.slane %v1715_v16, 5  ;;  %v1721_v42 = vrot.slane %v1719_v55, 4 }
 0x245   : > { %v1708_v39 = vsel %vm7311_vm9, %v1700_v34, %v1707_v30  ;;  %v1712_v36 = vor.u32 %v1711_v26, %v1707_v30  ;;  %v1727_v9 = vrot.slane %v1725_v10, 5  ;;  %v2215_v14 = vrot.slane %v7914_v1, 6 }
 0x246   : > { %v2413_v5 = vrot.slane %v2293_v63, 7  ;;  %v2416_v47 = vrot.slane %v2294_v35, 7  ;;  %v1722_v40 = vor.u32 %v1721_v42, %v1717_v8  ;;  %v1849_v13 = vmax.bf16 %v1708_v39, %v7908_v27 }
 0x247   : > { %v1713_v37 = vrot.slane %v1712_v36, 4  ;;  %v2216_v44 = vrot.slane %v2215_v14, 4  ;;  %v2217_v21 = vrot.slane %v1270_v2, 6  ;;  %v2220_v12 = vrot.slane %v1271_v15, 6 }
 0x248   : > { %v2414_v50 = vsel %vm7422_vm0, %v6511_v38, %v2413_v5  ;;  %v2415_v11 = vrot.slane %v2413_v5, 4  ;;  %v1723_v6 = vrot.slane %v1722_v40, 4  ;;  %v1110_v43 = vmax.bf16 %v9966_v52, %v7756_v32 }
 0x249   : > { %2530 = vst.msk [vmem:[#allocation2 + $0x74] sm:$0xf] %vm669_vm2, %v2414_v50  ;;  %v1718_v56 = vsel %vm7311_vm9, %v1713_v37, %v1717_v8  ;;  %v2218_v27 = vsel %vm7327_vm12, %v2216_v44, %v2217_v21  ;;  %v2219_v48 = vrot.slane %v2217_v21, 4  ;;  %v7936_v34 = vmax.bf16 %v1172_v41, %v1107_v49  ;;  %v934_v41 = vld [vmem:[#allocation2 + $0x110] sm:$0xf] }
 0x24a   : > { %v2417_v15 = vsel %vm7422_vm0, %v2415_v11, %v2416_v47  ;;  %v1728_v60 = vsel %vm7311_vm9, %v1723_v6, %v1727_v9  ;;  %v1850_v32 = vmax.bf16 %v1718_v56, %v7914_v1  ;;  %v7944_v62 = vmax.bf16 %v7426_v0, %v1108_v25  ;;  %v1008_v11 = vld [vmem:[#allocation2 + $0x124] sm:$0xf]  ;;  %v936_v56 = vld [vmem:[#allocation2 + $0x118] sm:$0xf] }
 0x24b   : > { %2531 = vst.msk [vmem:[#allocation2 + $0x78] sm:$0xf] %vm669_vm2, %v2417_v15  ;;  %v6576_v22 = vcombine.low %v2414_v50, %v2417_v15  ;;  %v1851_v51 = vmax.bf16 %v1728_v60, %v1270_v2  ;;  %v2221_v45 = vsel %vm7327_vm12, %v2219_v48, %v2220_v12  ;;  %v1238_v49 = vmax.bf16 %v7434_v58, %v1109_v24  ;;  %v935_v50 = vld [vmem:[#allocation2 + $0x114] sm:$0xf]  ;;  %v1009_v48 = vld [vmem:[#allocation2 + $0x128] sm:$0xf] }
 0x24c   : > { %v1960_v53 = vrot.slane %v1850_v32, 5  ;;  %v1239_v4 = vmax.bf16 %v1175_v3, %v1110_v43  ;;  %v1460_v16 = vshrl.u32 %v7936_v34, 16  ;;  %v1465_v55 = vshll.u32 %v7944_v62, 16 }
 0x24d   : > { %v5743_v1 = vsel %vm5723_vm5, %v6576_v22, 0  ;;  %v1962_v38 = vrot.slane %v1851_v51, 5  ;;  %v1469_v0 = vshrl.u32 %v7944_v62, 16  ;;  %v1475_v25 = vshll.u32 %v1238_v49, 16 }
 0x24e   : > { %6705 = vmatpush3.bf16.xpose.msra.mxu1 %v5743_v1  ;;  %v1961_v30 = vrot.slane %v1960_v53, 4  ;;  %v2060_v2 = vmax.bf16 %v1960_v53, %v1849_v13  ;;  %v1467_v26 = vrot.slane %v1465_v55, 5  ;;  %v1479_v10 = vshrl.u32 %v1238_v49, 16  ;;  %v1007_v13 = vld [vmem:[#allocation2 + $0x120] sm:$0xf] }
 0x24f   : > { %v1964_v63 = vrot.slane %v1962_v38, 4  ;;  %v1471_v35 = vrot.slane %v1469_v0, 4  ;;  %v1477_v58 = vrot.slane %v1475_v25, 5  ;;  %v1485_v24 = vshll.u32 %v1239_v4, 16  ;;  %v1010_v55 = vld [vmem:[#allocation2 + $0x12c] sm:$0x1] }
 0x250   : > { %v1963_v8 = vsel %vm7386_vm15, %v1961_v30, %v1962_v38  ;;  %v2319_v42 = vmax.bf16 %v2215_v14, %v2060_v2  ;;  %v1468_v39 = vsel %vm7311_vm9, %v1460_v16, %v1467_v26  ;;  %v1481_v36 = vrot.slane %v1479_v10, 4 }
 0x251   : > { %v2061_v9 = vmax.bf16 %v1963_v8, %v1850_v32  ;;  %v2062_v5 = vmax.bf16 %v1964_v63, %v1851_v51  ;;  %v1472_v47 = vor.u32 %v1471_v35, %v1467_v26  ;;  %v1487_v40 = vrot.slane %v1485_v24, 5  ;;  %v937_v32 = vld [vmem:[#allocation2 + $0x11c] sm:$0x1]  ;;  %v1209_v35 = vld [vmem:[#allocation2 + $0x134] sm:$0xf] }
 0x252   : > { %v6520_v37 = vrot.slane %v2319_v42, 11  ;;  %v1482_v44 = vor.u32 %v1481_v36, %v1477_v58  ;;  %v1825_v21 = vmax.bf16 %v1468_v39, %v7936_v34  ;;  %v2159_v12 = vrot.slane %v7944_v62, 6  ;;  %v1210_v42 = vld [vmem:[#allocation2 + $0x138] sm:$0xf] }
 0x253   : > { %v2320_v6 = vmax.bf16 %v2218_v27, %v2061_v9  ;;  %v2321_v14 = vmax.bf16 %v2221_v45, %v2062_v5  ;;  %v1473_v52 = vrot.slane %v1472_v47, 4  ;;  %v2161_v43 = vrot.slane %v1238_v49, 6 }
 0x254   : > { %v1483_v3 = vrot.slane %v1482_v44, 4  ;;  %v2160_v15 = vrot.slane %v2159_v12, 4  ;;  %v2164_v60 = vrot.slane %v1239_v4, 6  ;;  %v1079_v22 = vmax.bf16 %v1007_v13, %v934_v41 }
 0x255   : > { %v2476_v51 = vrot.slane %v2320_v6, 7  ;;  %v2479_v53 = vrot.slane %v2321_v14, 7  ;;  %v1478_v34 = vsel %vm7311_vm9, %v1473_v52, %v1477_v58  ;;  %v2163_v16 = vrot.slane %v2161_v43, 4 }
 0x256   : > { %v1488_v27 = vsel %vm7311_vm9, %v1483_v3, %v1487_v40  ;;  %v1826_v45 = vmax.bf16 %v1478_v34, %v7944_v62  ;;  %v2162_v1 = vsel %vm7327_vm12, %v2160_v15, %v2161_v43  ;;  %v1080_v38 = vmax.bf16 %v1008_v11, %v935_v50  ;;  %v1208_v62 = vld [vmem:[#allocation2 + $0x130] sm:$0xf] }
 0x257   : > { %v2477_v4 = vsel %vm7422_vm0, %v6520_v37, %v2476_v51  ;;  %v2478_v0 = vrot.slane %v2476_v51, 4  ;;  %v1827_v25 = vmax.bf16 %v1488_v27, %v1238_v49  ;;  %v2165_v30 = vsel %vm7327_vm12, %v2163_v16, %v2164_v60  ;;  %v9967_v49 = vld [vmem:[#allocation11_spill] sm:$0xff] }
 0x258   : > { %2548 = vst.msk [vmem:[#allocation2 + $0x104] sm:$0xf] %vm669_vm2, %v2477_v4  ;;  %v1920_v2 = vrot.slane %v1826_v45, 5  ;;  %v1081_v26 = vmax.bf16 %v1009_v48, %v936_v56  ;;  %v1082_v10 = vmax.bf16 %v1010_v55, %v937_v32  ;;  %v1143_v63 = vmax.bf16 %v1079_v22, %v7772_v20  ;;  %v1211_v20 = vld [vmem:[#allocation2 + $0x13c] sm:$0x1] }
 0x259   : > { %v2480_v58 = vsel %vm7422_vm0, %v2478_v0, %v2479_v53  ;;  %v1922_v24 = vrot.slane %v1827_v25, 5  ;;  %v1144_v8 = vmax.bf16 %v1080_v38, %v7776_v29  ;;  %v1111_v39 = vmax.bf16 %v9967_v49, %v7820_v19  ;;  %v1176_v0 = vld [vmem:[#allocation2 + $0xb0] sm:$0xf] }
 0x25a   : > { %2549 = vst.msk [vmem:[#allocation2 + $0x108] sm:$0xf] %vm669_vm2, %v2480_v58  ;;  %v6585_v36 = vcombine.low %v2477_v4, %v2480_v58  ;;  %v1921_v9 = vrot.slane %v1920_v2, 4  ;;  %v2036_v5 = vmax.bf16 %v1920_v2, %v1825_v21  ;;  %v1145_v47 = vmax.bf16 %v1081_v26, %v7789_v33  ;;  %v9969_v58 = vld [vmem:[#allocation12_spill] sm:$0xff] }
 0x25b   : > { %v1924_v40 = vrot.slane %v1922_v24, 4  ;;  %v1146_v41 = vmax.bf16 %v1082_v10, %v7791_v28  ;;  %v7981_v13 = vmax.bf16 %v1208_v62, %v1143_v63  ;;  %v7983_v37 = vmax.bf16 %v1209_v35, %v1144_v8  ;;  %v9968_v62 = vld [vmem:[#allocation26_spill] sm:$0xff] }
 0x25c   : > { %6807 = vmatprep.subr.msk.bf16.mxu1 %vm5723_vm5, %v6585_v36  ;;  %v1923_v29 = vsel %vm7386_vm15, %v1921_v9, %v1922_v24  ;;  %v2295_v19 = vmax.bf16 %v2159_v12, %v2036_v5  ;;  %v1274_v44 = vmax.bf16 %v1210_v42, %v1145_v47  ;;  %v1112_v21 = vmax.bf16 %v7204_v31, %v7832_v7  ;;  %v1179_v8 = vld [vmem:[#allocation2 + $0xbc] sm:$0x1] }
 0x25d   : > { %v2037_v50 = vmax.bf16 %v1923_v29, %v1826_v45  ;;  %v2038_v33 = vmax.bf16 %v1924_v40, %v1827_v25  ;;  %v1275_v11 = vmax.bf16 %v1211_v20, %v1146_v41  ;;  %v1730_v6 = vshrl.u32 %v7981_v13, 16 }
 0x25e   : > { %v6512_v28 = vrot.slane %v2295_v19, 11  ;;  %v1735_v14 = vshll.u32 %v7983_v37, 16  ;;  %v1739_v52 = vshrl.u32 %v7983_v37, 16  ;;  %v1745_v43 = vshll.u32 %v1274_v44, 16 }
 0x25f   : > { %v2296_v56 = vmax.bf16 %v2162_v1, %v2037_v50  ;;  %v2297_v48 = vmax.bf16 %v2165_v30, %v2038_v33  ;;  %v1749_v3 = vshrl.u32 %v1274_v44, 16  ;;  %v1755_v15 = vshll.u32 %v1275_v11, 16 }
 0x260   : > { %v1737_v12 = vrot.slane %v1735_v14, 5  ;;  %v1741_v60 = vrot.slane %v1739_v52, 4  ;;  %v1747_v32 = vrot.slane %v1745_v43, 5  ;;  %v2222_v31 = vrot.slane %v7983_v37, 6 }
 0x261   : > { %v2420_v7 = vrot.slane %v2296_v56, 7  ;;  %v2423_v22 = vrot.slane %v2297_v48, 7  ;;  %v1751_v51 = vrot.slane %v1749_v3, 4  ;;  %v1757_v53 = vrot.slane %v1755_v15, 5 }
 0x262   : > { %v1738_v34 = vsel %vm7311_vm9, %v1730_v6, %v1737_v12  ;;  %v1742_v16 = vor.u32 %v1741_v60, %v1737_v12  ;;  %v2223_v55 = vrot.slane %v2222_v31, 4  ;;  %v2224_v27 = vrot.slane %v1274_v44, 6 }
 0x263   : > { %v2421_v45 = vsel %vm7422_vm0, %v6512_v28, %v2420_v7  ;;  %v2422_v1 = vrot.slane %v2420_v7, 4  ;;  %v1752_v38 = vor.u32 %v1751_v51, %v1747_v32  ;;  %v1852_v4 = vmax.bf16 %v1738_v34, %v7981_v13  ;;  %v2648_v51 = vld [vmem:[#allocation2 + $0x70] sm:$0xf] }
 0x264   : > { %2532 = vst.msk [vmem:[#allocation2 + $0x84] sm:$0xf] %vm669_vm2, %v2421_v45  ;;  %v1743_v25 = vrot.slane %v1742_v16, 4  ;;  %v2225_v30 = vsel %vm7327_vm12, %v2223_v55, %v2224_v27  ;;  %v2226_v2 = vrot.slane %v2224_v27, 4  ;;  %v2227_v26 = vrot.slane %v1275_v11, 6 }
 0x265   : > { %v2424_v10 = vsel %vm7422_vm0, %v2422_v1, %v2423_v22  ;;  %v1753_v63 = vrot.slane %v1752_v38, 4  ;;  %v1113_v35 = vmax.bf16 %v9968_v62, %v7841_v46  ;;  %v1114_v24 = vmax.bf16 %v9969_v58, %v7858_v57  ;;  %v2576_v22 = vld [vmem:[#allocation2 + $0x60] sm:$0xf]  ;;  %v2579_v27 = vld [vmem:[#allocation2 + $0x6c] sm:$0x1] }
 0x266   : > { %2533 = vst.msk [vmem:[#allocation2 + $0x88] sm:$0xf] %vm669_vm2, %v2424_v10  ;;  %v6577_v42 = vcombine.low %v2421_v45, %v2424_v10  ;;  %v1748_v49 = vsel %vm7311_vm9, %v1743_v25, %v1747_v32  ;;  %v2228_v36 = vsel %vm7327_vm12, %v2226_v2, %v2227_v26  ;;  %v8013_v9 = vmax.bf16 %v1176_v0, %v1111_v39  ;;  %v2651_v45 = vld [vmem:[#allocation2 + $0x7c] sm:$0x1]  ;;  %v2584_v25 = vld [vmem:[#allocation2 + $0x80] sm:$0xf] }
 0x267   : > { %v1758_v5 = vsel %vm7311_vm9, %v1753_v63, %v1757_v53  ;;  %v1853_v46 = vmax.bf16 %v1748_v49, %v7983_v37  ;;  %v8019_v47 = vmax.bf16 %v7507_v23, %v1112_v21  ;;  %v8022_v57 = vmax.bf16 %v7519_v17, %v1113_v35  ;;  %v5672_v53 = vld [vmem:[%s9814_s3] sm:$0xf]  ;;  %v2587_v2 = vld [vmem:[#allocation2 + $0x8c] sm:$0x1]  ;;  %v2649_v10 = vld [vmem:[#allocation2 + $0x74] sm:$0xf] }
 0x268   : > { %v5746_v20 = vsel %vm5723_vm5, %v6577_v42, 0  ;;  %v1854_v40 = vmax.bf16 %v1758_v5, %v1274_v44  ;;  %v8025_v41 = vmax.bf16 %v1179_v8, %v1114_v24  ;;  %v1490_v13 = vshrl.u32 %v8013_v9, 16  ;;  %6728 = vmatprep.mubr.msk.bf16.mxu0 %vm5723_vm5, %v5672_v53  ;;  %v2592_v26 = vld [vmem:[#allocation2 + $0xa0] sm:$0xf]  ;;  %v2650_v63 = vld [vmem:[#allocation2 + $0x78] sm:$0xf] }
 0x269   : > { %6707 = vmatpush3.bf16.xpose.msra.mxu1 %v5746_v20  ;;  %v1965_v39 = vrot.slane %v1853_v46, 5  ;;  %v1495_v29 = vshll.u32 %v8019_v47, 16  ;;  %v1499_v19 = vshrl.u32 %v8019_v47, 16  ;;  %v1505_v37 = vshll.u32 %v8022_v57, 16  ;;  %v2656_v62 = vld [vmem:[#allocation2 + $0x90] sm:$0xf]  ;;  %6729 = vmatmul.mubr.msk.bf16.vlgmr.msra.gmra.mrb[32].mxu0 %vm5723_vm5, %v5672_v53 }
 0x26a   : > { %v1967_v23 = vrot.slane %v1854_v40, 5  ;;  %v1509_v21 = vshrl.u32 %v8022_v57, 16  ;;  %v1515_v17 = vshll.u32 %v8025_v41, 16  ;;  %v2166_v50 = vrot.slane %v8019_v47, 6  ;;  %v2659_v24 = vld [vmem:[#allocation2 + $0x9c] sm:$0x1] }
 0x26b   : > { %v1966_v44 = vrot.slane %v1965_v39, 4  ;;  %v2063_v33 = vmax.bf16 %v1965_v39, %v1852_v4  ;;  %v1497_v11 = vrot.slane %v1495_v29, 5  ;;  %v1501_v6 = vrot.slane %v1499_v19, 4  ;;  %v2664_v8 = vld [vmem:[#allocation2 + $0xb0] sm:$0xf] }
 0x26c   : > { %v1969_v28 = vrot.slane %v1967_v23, 4  ;;  %v1507_v14 = vrot.slane %v1505_v37, 5  ;;  %v1511_v52 = vrot.slane %v1509_v21, 4  ;;  %v1517_v43 = vrot.slane %v1515_v17, 5  ;;  %v2578_v20 = vld [vmem:[#allocation2 + $0x68] sm:$0xf] }
 0x26d   : > { %v1968_v56 = vsel %vm7386_vm15, %v1966_v44, %v1967_v23  ;;  %v2322_v48 = vmax.bf16 %v2222_v31, %v2063_v33  ;;  %v1498_v3 = vsel %vm7311_vm9, %v1490_v13, %v1497_v11  ;;  %v1502_v15 = vor.u32 %v1501_v6, %v1497_v11  ;;  %v2595_v13 = vld [vmem:[#allocation2 + $0xac] sm:$0x1]  ;;  %v2665_v39 = vld [vmem:[#allocation2 + $0xb4] sm:$0xf]  ;;  %v2666_v17 = vld [vmem:[#allocation2 + $0xb8] sm:$0xf] }
 0x26e   : > { %v2064_v12 = vmax.bf16 %v1968_v56, %v1853_v46  ;;  %v2065_v60 = vmax.bf16 %v1969_v28, %v1854_v40  ;;  %v1512_v32 = vor.u32 %v1511_v52, %v1507_v14  ;;  %v1828_v7 = vmax.bf16 %v1498_v3, %v8013_v9  ;;  %v2577_v46 = vld [vmem:[#allocation2 + $0x64] sm:$0xf]  ;;  %v2667_v44 = vld [vmem:[#allocation2 + $0xbc] sm:$0x1]  ;;  %v8073_v52 = vld [vmem:[#allocation2] sm:$0xf] }
 0x26f   : > { %v6521_v34 = vrot.slane %v2322_v48, 11  ;;  %v1503_v16 = vrot.slane %v1502_v15, 4  ;;  %v2167_v31 = vrot.slane %v2166_v50, 4  ;;  %v2168_v55 = vrot.slane %v8022_v57, 6  ;;  %v2593_v11 = vld [vmem:[#allocation2 + $0xa4] sm:$0xf] }
 0x270   : > { %v2323_v1 = vmax.bf16 %v2225_v30, %v2064_v12  ;;  %v2324_v38 = vmax.bf16 %v2228_v36, %v2065_v60  ;;  %v1513_v4 = vrot.slane %v1512_v32, 4  ;;  %v2171_v0 = vrot.slane %v8025_v41, 6  ;;  %v2594_v3 = vld [vmem:[#allocation2 + $0xa8] sm:$0xf]  ;;  %v8079_v12 = vld [vmem:[#allocation2 + $0x10] sm:$0xf] }
 0x271   : > { %v1508_v35 = vsel %vm7311_vm9, %v1503_v16, %v1507_v14  ;;  %v8052_v58 = vsel %vm7327_vm12, %v2167_v31, %v2168_v55  ;;  %v2170_v30 = vrot.slane %v2168_v55, 4  ;;  %v8054_v42 = vmax.bf16 %v2648_v51, %v2576_v22  ;;  %v2856_v53 = vld [vmem:[#allocation2 + $0xa0] sm:$0xf] }
 0x272   : > { %v2483_v49 = vrot.slane %v2323_v1, 7  ;;  %v2486_v36 = vrot.slane %v2324_v38, 7  ;;  %v1518_v9 = vsel %vm7311_vm9, %v1513_v4, %v1517_v43  ;;  %v1829_v5 = vmax.bf16 %v1508_v35, %v8019_v47  ;;  %v8092_v1 = vld [vmem:[#allocation2 + $0x4] sm:$0xf]  ;;  %v8099_v47 = vld [vmem:[#allocation2 + $0xc] sm:$0x1] }
 0x273   : > { %9970 = vst [vmem:[#allocation3_spill] sm:$0xff] %v8054_v42  ;;  %v1830_v40 = vmax.bf16 %v1518_v9, %v8022_v57  ;;  %v2172_v41 = vsel %vm7327_vm12, %v2170_v30, %v2171_v0  ;;  %v8062_v29 = vmax.bf16 %v2649_v10, %v2577_v46  ;;  %v8064_v19 = vmax.bf16 %v2650_v63, %v2578_v20  ;;  %v2626_v35 = vld [vmem:[#allocation2 + $0x18] sm:$0xf]  ;;  %v2627_v30 = vld [vmem:[#allocation2 + $0x1c] sm:$0x1] }
 0x274   : > { %v2484_v37 = vsel %vm7422_vm0, %v6521_v34, %v2483_v49  ;;  %v2485_v23 = vrot.slane %v2483_v49, 4  ;;  %v1925_v21 = vrot.slane %v1829_v5, 5  ;;  %v8068_v33 = vmax.bf16 %v2651_v45, %v2579_v27  ;;  %v2859_v34 = vld [vmem:[#allocation2 + $0xac] sm:$0x1]  ;;  %v2864_v27 = vld [vmem:[#allocation2 + $0xc0] sm:$0xf] }
 0x275   : > { %9971 = vst [vmem:[#allocation14_spill] sm:$0xff] %v8062_v29  ;;  %9972 = vst [vmem:[#allocation21_spill] sm:$0xff] %v8064_v19  ;;  %v1927_v57 = vrot.slane %v1830_v40, 5  ;;  %v2728_v6 = vmax.bf16 %v2656_v62, %v2584_v25  ;;  %v2731_v28 = vmax.bf16 %v2659_v24, %v2587_v2  ;;  %v8071_v14 = vmax.bf16 %v2664_v8, %v2592_v26  ;;  %v2867_v45 = vld [vmem:[#allocation2 + $0xcc] sm:$0x1] }
 0x276   : > { %9973 = vst [vmem:[#allocation16_spill] sm:$0xff] %v8068_v33  ;;  %2550 = vst.msk [vmem:[#allocation2 + $0x114] sm:$0xf] %vm669_vm2, %v2484_v37  ;;  %v2487_v43 = vsel %vm7422_vm0, %v2485_v23, %v2486_v36  ;;  %v1926_v56 = vrot.slane %v1925_v21, 4  ;;  %v2039_v48 = vmax.bf16 %v1925_v21, %v1828_v7  ;;  %v8077_v15 = vmax.bf16 %v2665_v39, %v2593_v11  ;;  %v8097_v2 = vld [vmem:[#allocation2 + $0x8] sm:$0xf] }
 0x277   : > { %2551 = vst.msk [vmem:[#allocation2 + $0x118] sm:$0xf] %vm669_vm2, %v2487_v43  ;;  %v6586_v60 = vcombine.low %v2484_v37, %v2487_v43  ;;  %v1929_v32 = vrot.slane %v1927_v57, 4  ;;  %v8082_v22 = vmax.bf16 %v2666_v17, %v2594_v3  ;;  %v8084_v51 = vmax.bf16 %v2667_v44, %v2595_v13  ;;  %v2560_v62 = vld [vmem:[#allocation2 + $0x20] sm:$0xf] }
 0x278   : > { %v1928_v16 = vsel %vm7386_vm15, %v1926_v56, %v1927_v57  ;;  %v2298_v7 = vmax.bf16 %v2166_v50, %v2039_v48  ;;  %v2792_v31 = vmax.bf16 %v2728_v6, %v8054_v42  ;;  %v2795_v55 = vmax.bf16 %v2731_v28, %v8068_v33  ;;  %v8101_v50 = vld [vmem:[#allocation2 + $0x14] sm:$0xf]  ;;  %v2632_v46 = vld [vmem:[#allocation2 + $0x30] sm:$0xf]  ;;  %v2635_v13 = vld [vmem:[#allocation2 + $0x3c] sm:$0x1] }
 0x279   : > { %9974 = vst [vmem:[#allocation19_spill] sm:$0xff] %v8082_v22  ;;  %9975 = vst [vmem:[#allocation23_spill] sm:$0xff] %v8084_v51  ;;  %6808 = vmatprep.subr.msk.bf16.mxu1 %vm5723_vm5, %v6586_v60  ;;  %v2040_v38 = vmax.bf16 %v1928_v16, %v1829_v5  ;;  %v2041_v4 = vmax.bf16 %v1929_v32, %v1830_v40  ;;  %v2800_v0 = vmax.bf16 %v8071_v14, %v2728_v6  ;;  %v2563_v5 = vld [vmem:[#allocation2 + $0x2c] sm:$0x1]  ;;  %v2633_v20 = vld [vmem:[#allocation2 + $0x34] sm:$0xf] }
 0x27a   : > { %v2803_v25 = vmax.bf16 %v8084_v51, %v2731_v28  ;;  %v6513_v26 = vrot.slane %v2298_v7, 11  ;;  %v8103_v10 = vmax.bf16 %v2856_v53, %v2792_v31  ;;  %v8105_v63 = vmax.bf16 %v2859_v34, %v2795_v55  ;;  %v2634_v40 = vld [vmem:[#allocation2 + $0x38] sm:$0xf]  ;;  %v2561_v11 = vld [vmem:[#allocation2 + $0x24] sm:$0xf] }
 0x27b   : > { %v2696_v24 = vmax.bf16 %v8079_v12, %v8073_v52  ;;  %v2299_v8 = vmax.bf16 %v8052_v58, %v2040_v38  ;;  %v2300_v49 = vmax.bf16 %v2172_v41, %v2041_v4  ;;  %v8110_v36 = vmax.bf16 %v2864_v27, %v2800_v0  ;;  %v2580_v58 = vld [vmem:[#allocation2 + $0x70] sm:$0xf]  ;;  %v2562_v6 = vld [vmem:[#allocation2 + $0x28] sm:$0xf]  ;;  %v2652_v28 = vld [vmem:[#allocation2 + $0x80] sm:$0xf] }
 0x27c   : > { %v8112_v9 = vmax.bf16 %v2867_v45, %v2803_v25  ;;  %v3141_v39 = vshrl.u32 %v8103_v10, 16  ;;  %v3166_v37 = vshll.u32 %v8105_v63, 16  ;;  %v2697_v21 = vmax.bf16 %v8101_v50, %v8092_v1  ;;  %v2832_v3 = vld [vmem:[#allocation2 + $0x40] sm:$0xf]  ;;  %v2583_v12 = vld [vmem:[#allocation2 + $0x7c] sm:$0x1] }
 0x27d   : > { %v2427_v41 = vrot.slane %v2299_v8, 7  ;;  %v2430_v17 = vrot.slane %v2300_v49, 7  ;;  %v2698_v56 = vmax.bf16 %v2626_v35, %v8097_v2  ;;  %v2699_v48 = vmax.bf16 %v2627_v30, %v8099_v47  ;;  %v2588_v60 = vld [vmem:[#allocation2 + $0x90] sm:$0xf]  ;;  %v2591_v32 = vld [vmem:[#allocation2 + $0x9c] sm:$0x1] }
 0x27e   : > { %v3226_v57 = vshll.u32 %v8112_v9, 16  ;;  %v8121_v52 = vrot.slane %v3166_v37, 5  ;;  %v2653_v53 = vld [vmem:[#allocation2 + $0x84] sm:$0xf]  ;;  %v2654_v34 = vld [vmem:[#allocation2 + $0x88] sm:$0xf]  ;;  %v8130_v55 = vmax.bf16 %v2632_v46, %v2560_v62  ;;  %v8133_v38 = vmax.bf16 %v2633_v20, %v2561_v11 }
 0x27f   : > { %v2428_v16 = vsel %vm7422_vm0, %v6513_v26, %v2427_v41  ;;  %v2429_v7 = vrot.slane %v2427_v41, 4  ;;  %v2833_v27 = vld [vmem:[#allocation2 + $0x44] sm:$0xf]  ;;  %v2655_v45 = vld [vmem:[#allocation2 + $0x8c] sm:$0x1]  ;;  %v8135_v4 = vmax.bf16 %v2634_v40, %v2562_v6  ;;  %v8137_v0 = vmax.bf16 %v2635_v13, %v2563_v5 }
 0x280   : > { %v8128_v31 = vrot.slane %v3226_v57, 5  ;;  %9976 = vst [vmem:[#allocation22_spill] sm:$0xff] %v8130_v55  ;;  %v2660_v1 = vld [vmem:[#allocation2 + $0xa0] sm:$0xf]  ;;  %2534 = vst.msk [vmem:[#allocation2 + $0x94] sm:$0xf] %vm669_vm2, %v2428_v16  ;;  %v8139_v50 = vmax.bf16 %v2652_v28, %v2580_v58  ;;  %v2768_v62 = vmax.bf16 %v8130_v55, %v2696_v24  ;;  %v2769_v20 = vmax.bf16 %v8133_v38, %v2697_v21 }
 0x281   : > { %9977 = vst [vmem:[#allocation17_spill] sm:$0xff] %v8133_v38  ;;  %9978 = vst [vmem:[#allocation18_spill] sm:$0xff] %v8135_v4  ;;  %v2581_v25 = vld [vmem:[#allocation2 + $0x74] sm:$0xf]  ;;  %v2582_v2 = vld [vmem:[#allocation2 + $0x78] sm:$0xf]  ;;  %v2431_v26 = vsel %vm7422_vm0, %v2429_v7, %v2430_v17  ;;  %v2770_v40 = vmax.bf16 %v8135_v4, %v2698_v56  ;;  %v2771_v13 = vmax.bf16 %v8137_v0, %v2699_v48 }
 0x282   : > { %9979 = vst [vmem:[#allocation8_spill] sm:$0xff] %v8137_v0  ;;  %v2663_v47 = vld [vmem:[#allocation2 + $0xac] sm:$0x1]  ;;  %9980 = vst [vmem:[#allocation9_spill] sm:$0xff] %v8139_v50  ;;  %v2834_v35 = vld [vmem:[#allocation2 + $0x48] sm:$0xf]  ;;  %v8144_v49 = vmax.bf16 %v2653_v53, %v2581_v25  ;;  %v8146_v46 = vmax.bf16 %v2654_v34, %v2582_v2  ;;  %v6578_v5 = vcombine.low %v2428_v16, %v2431_v26 }
 0x283   : > { %v2835_v30 = vld [vmem:[#allocation2 + $0x4c] sm:$0x1]  ;;  %v2596_v8 = vld [vmem:[#allocation2 + $0xb0] sm:$0xf]  ;;  %2535 = vst.msk [vmem:[#allocation2 + $0x98] sm:$0xf] %vm669_vm2, %v2431_v26  ;;  %v8152_v24 = vmax.bf16 %v2832_v3, %v2768_v62  ;;  %v8154_v11 = vmax.bf16 %v2655_v45, %v2583_v12  ;;  %v8156_v6 = vmax.bf16 %v2660_v1, %v2588_v60  ;;  %v8158_v28 = vmax.bf16 %v2663_v47, %v2591_v32 }
 0x284   : > { %9981 = vst [vmem:[#allocation6_spill] sm:$0xff] %v8144_v49  ;;  %9982 = vst [vmem:[#allocation20_spill] sm:$0xff] %v8146_v46  ;;  %v2668_v37 = vld [vmem:[#allocation2 + $0xc0] sm:$0xf]  ;;  %v2669_v58 = vld [vmem:[#allocation2 + $0xc4] sm:$0xf]  ;;  %v8161_v21 = vmax.bf16 %v2833_v27, %v2769_v20  ;;  %v8163_v56 = vmax.bf16 %v2834_v35, %v2770_v40  ;;  %v8165_v48 = vmax.bf16 %v2835_v30, %v2771_v13 }
 0x285   : > { %v2670_v41 = vld [vmem:[#allocation2 + $0xc8] sm:$0xf]  ;;  %v2597_v17 = vld [vmem:[#allocation2 + $0xb4] sm:$0xf]  ;;  %v2598_v57 = vld [vmem:[#allocation2 + $0xb8] sm:$0xf]  ;;  %v8168_v7 = vmax.bf16 %v2668_v37, %v2596_v8 }
 0x286   : > { %9983 = vst [vmem:[#allocation7_spill] sm:$0xff] %v8154_v11  ;;  %v5749_v53 = vsel %vm5723_vm5, %v6578_v5, 0  ;;  %v2599_v34 = vld [vmem:[#allocation2 + $0xbc] sm:$0x1]  ;;  %v2671_v16 = vld [vmem:[#allocation2 + $0xcc] sm:$0x1]  ;;  %v8170_v12 = vmax.bf16 %v2669_v58, %v2597_v17  ;;  %v8172_v60 = vmax.bf16 %v2670_v41, %v2598_v57 }
 0x287   : > { %6709 = vmatpush3.bf16.xpose.msra.mxu1 %v5749_v53  ;;  %v2961_v3 = vshrl.u32 %v8152_v24, 16  ;;  %v2966_v32 = vshll.u32 %v8161_v21, 16  ;;  %v2970_v27 = vshrl.u32 %v8161_v21, 16  ;;  %v2976_v45 = vshll.u32 %v8163_v56, 16  ;;  %v2661_v25 = vld [vmem:[#allocation2 + $0xa4] sm:$0xf] }
 0x288   : > { %v2980_v1 = vshrl.u32 %v8163_v56, 16  ;;  %v2585_v2 = vld [vmem:[#allocation2 + $0x84] sm:$0xf]  ;;  %v2657_v47 = vld [vmem:[#allocation2 + $0x94] sm:$0xf]  ;;  %v2986_v35 = vshll.u32 %v8165_v48, 16  ;;  %v8180_v8 = vmax.bf16 %v2671_v16, %v2599_v34 }
 0x289   : > { %v2857_v26 = vld [vmem:[#allocation2 + $0xa4] sm:$0xf]  ;;  %v9844_v30 = vrot.slane %v8161_v21, 6  ;;  %v2729_v20 = vmax.bf16 %v2657_v47, %v2585_v2  ;;  %v2968_v40 = vrot.slane %v2966_v32, 5  ;;  %v2972_v13 = vrot.slane %v2970_v27, 4 }
 0x28a   : > { %v2865_v62 = vld [vmem:[#allocation2 + $0xc4] sm:$0xf]  ;;  %v8184_v37 = vrot.slane %v2976_v45, 5  ;;  %v2589_v58 = vld [vmem:[#allocation2 + $0x94] sm:$0xf]  ;;  %v2982_v57 = vrot.slane %v2980_v1, 4 }
 0x28b   : > { %v2586_v41 = vld [vmem:[#allocation2 + $0x88] sm:$0xf]  ;;  %v2658_v17 = vld [vmem:[#allocation2 + $0x98] sm:$0xf]  ;;  %v8186_v53 = vrot.slane %v2986_v35, 5  ;;  %v8188_v43 = vmax.bf16 %v2661_v25, %v2589_v58  ;;  %v2793_v23 = vmax.bf16 %v2729_v20, %v8062_v29  ;;  %v2801_v2 = vmax.bf16 %v8077_v15, %v2729_v20 }
 0x28c   : > { %v2730_v16 = vmax.bf16 %v2658_v17, %v2586_v41  ;;  %v8196_v32 = vsel %vm7311_vm9, %v2961_v3, %v2968_v40  ;;  %v2858_v27 = vld [vmem:[#allocation2 + $0xa8] sm:$0xf]  ;;  %v2973_v47 = vor.u32 %v2972_v13, %v2968_v40  ;;  %v2983_v1 = vor.u32 %v2982_v57, %v8184_v37  ;;  %v6845_v40 = vld [vmem:[%s9814_s3 + $0x4] sm:$0xf] }
 0x28d   : > { %v2866_v45 = vld [vmem:[#allocation2 + $0xc8] sm:$0xf]  ;;  %v8203_v35 = vrot.slane %v9844_v30, 4  ;;  %v8207_v41 = vmax.bf16 %v2857_v26, %v2793_v23  ;;  %v8209_v3 = vmax.bf16 %v2865_v62, %v2801_v2  ;;  %v9984_v29 = vshrl.u32 %v8110_v36, 16 }
 0x28e   : > { %v2794_v58 = vmax.bf16 %v2730_v16, %v8064_v19  ;;  %v2802_v20 = vmax.bf16 %v8082_v22, %v2730_v16  ;;  %6711 = vmatmul.mubr.msk.bf16.vlgmr.msra.gmra.mrb[0].mxu1 %vm5723_vm5, %v6845_v40  ;;  %v8215_v13 = vrot.slane %v2973_v47, 4  ;;  %v8217_v17 = vrot.slane %v2983_v1, 4 }
 0x28f   : > { %v3146_v23 = vshll.u32 %v8207_v41, 16  ;;  %v3150_v26 = vshrl.u32 %v8207_v41, 16  ;;  %v3206_v62 = vshll.u32 %v8209_v3, 16  ;;  %v3210_v2 = vshrl.u32 %v8209_v3, 16 }
 0x290   : > { %v2922_v5 = vmax.bf16 %v2858_v27, %v2794_v58  ;;  %v2930_v16 = vmax.bf16 %v2866_v45, %v2802_v20  ;;  %v3834_v40 = vrot.slane %v8207_v41, 6  ;;  %v3848_v47 = vrot.slane %v8209_v3, 6 }
 0x291   : > { %v3148_v1 = vrot.slane %v3146_v23, 5  ;;  %v3152_v30 = vrot.slane %v3150_v26, 4  ;;  %v3208_v44 = vrot.slane %v3206_v62, 5  ;;  %v3212_v34 = vrot.slane %v3210_v2, 4 }
 0x292   : > { %v3156_v25 = vshll.u32 %v2922_v5, 16  ;;  %v3160_v57 = vshrl.u32 %v2922_v5, 16  ;;  %v3216_v27 = vshll.u32 %v2930_v16, 16  ;;  %v3220_v45 = vshrl.u32 %v2930_v16, 16 }
 0x293   : > { %v3149_v58 = vsel %vm7311_vm9, %v3141_v39, %v3148_v1  ;;  %v3153_v20 = vor.u32 %v3152_v30, %v3148_v1  ;;  %v3209_v23 = vsel %vm7311_vm9, %v9984_v29, %v3208_v44  ;;  %v3213_v26 = vor.u32 %v3212_v34, %v3208_v44 }
 0x294   : > { %v3158_v33 = vrot.slane %v3156_v25, 5  ;;  %v3162_v19 = vrot.slane %v3160_v57, 4  ;;  %v3218_v42 = vrot.slane %v3216_v27, 5  ;;  %v3222_v0 = vrot.slane %v3220_v45, 4 }
 0x295   : > { %v3154_v62 = vrot.slane %v3153_v20, 4  ;;  %v3506_v4 = vmax.bf16 %v3149_v58, %v8103_v10  ;;  %v3512_v38 = vmax.bf16 %v3209_v23, %v8110_v36  ;;  %v3214_v55 = vrot.slane %v3213_v26, 4 }
 0x296   : > { %v3163_v2 = vor.u32 %v3162_v19, %v3158_v33  ;;  %v3223_v51 = vor.u32 %v3222_v0, %v3218_v42  ;;  %v3835_v39 = vrot.slane %v3834_v40, 4  ;;  %v3836_v30 = vrot.slane %v2922_v5, 6 }
 0x297   : > { %v3159_v25 = vsel %vm7311_vm9, %v3154_v62, %v3158_v33  ;;  %v3849_v1 = vrot.slane %v3848_v47, 4  ;;  %v3850_v22 = vrot.slane %v2930_v16, 6  ;;  %v3219_v29 = vsel %vm7311_vm9, %v3214_v55, %v3218_v42 }
 0x298   : > { %v3164_v57 = vrot.slane %v3163_v2, 4  ;;  %v3224_v44 = vrot.slane %v3223_v51, 4  ;;  %v3507_v19 = vmax.bf16 %v3159_v25, %v8207_v41  ;;  %v3837_v10 = vsel %vm7327_vm12, %v3835_v39, %v3836_v30 }
 0x299   : > { %v3513_v0 = vmax.bf16 %v3219_v29, %v8209_v3  ;;  %v3838_v34 = vrot.slane %v3836_v30, 4  ;;  %v3851_v33 = vsel %vm7327_vm12, %v3849_v1, %v3850_v22  ;;  %v3852_v41 = vrot.slane %v3850_v22, 4 }
 0x29a   : > { %v3169_v36 = vsel %vm7311_vm9, %v3164_v57, %v8121_v52  ;;  %v3229_v42 = vsel %vm7311_vm9, %v3224_v44, %v8128_v31  ;;  %v3598_v55 = vrot.slane %v3507_v19, 5  ;;  %v9985_v58 = vrot.slane %v8105_v63, 6 }
 0x29b   : > { %v3508_v51 = vmax.bf16 %v3169_v36, %v2922_v5  ;;  %v3514_v27 = vmax.bf16 %v3229_v42, %v2930_v16  ;;  %v3608_v45 = vrot.slane %v3513_v0, 5  ;;  %v2979_v3 = vsel %vm7311_vm9, %v8215_v13, %v8184_v37 }
 0x29c   : > { %v3840_v52 = vsel %vm7327_vm12, %v3838_v34, %v9985_v58  ;;  %v3599_v20 = vrot.slane %v3598_v55, 4  ;;  %v3714_v26 = vmax.bf16 %v3598_v55, %v3506_v4  ;;  %v9986_v31 = vrot.slane %v8112_v9, 6 }
 0x29d   : > { %v3600_v23 = vrot.slane %v3508_v51, 5  ;;  %v3609_v5 = vrot.slane %v3608_v45, 4  ;;  %v3610_v16 = vrot.slane %v3514_v27, 5  ;;  %v3720_v62 = vmax.bf16 %v3608_v45, %v3512_v38 }
 0x29e   : > { %v3854_v22 = vsel %vm7327_vm12, %v3852_v41, %v9986_v31  ;;  %v2989_v63 = vsel %vm7311_vm9, %v8217_v17, %v8186_v53  ;;  %v3970_v13 = vmax.bf16 %v3834_v40, %v3714_v26  ;;  %v3489_v4 = vmax.bf16 %v2979_v3, %v8161_v21 }
 0x29f   : > { %v3601_v2 = vsel %vm7386_vm15, %v3599_v20, %v3600_v23  ;;  %v3602_v37 = vrot.slane %v3600_v23, 4  ;;  %v3611_v9 = vsel %vm7386_vm15, %v3609_v5, %v3610_v16  ;;  %v3612_v39 = vrot.slane %v3610_v16, 4  ;;  %v8285_v20 = vld [vmem:[#allocation2 + $0x84] sm:$0xf]  ;;  %v2590_v16 = vld [vmem:[#allocation2 + $0x98] sm:$0xf] }
 0x2a0   : > { %v3715_v30 = vmax.bf16 %v3601_v2, %v3507_v19  ;;  %v3976_v25 = vmax.bf16 %v3848_v47, %v3720_v62  ;;  %v3721_v38 = vmax.bf16 %v3611_v9, %v3513_v0  ;;  %v6544_v1 = vrot.slane %v3970_v13, 11  ;;  %v2860_v9 = vld [vmem:[#allocation2 + $0xb0] sm:$0xf] }
 0x2a1   : > { %v3716_v57 = vmax.bf16 %v3602_v37, %v3508_v51  ;;  %v3490_v29 = vmax.bf16 %v2989_v63, %v8163_v56  ;;  %v3722_v44 = vmax.bf16 %v3612_v39, %v3514_v27  ;;  %v3568_v36 = vrot.slane %v3489_v4, 5  ;;  %v2662_v27 = vld [vmem:[#allocation2 + $0xa8] sm:$0xf] }
 0x2a2   : > { %v3971_v53 = vmax.bf16 %v3837_v10, %v3715_v30  ;;  %v6546_v17 = vrot.slane %v3976_v25, 11  ;;  %v3977_v42 = vmax.bf16 %v3851_v33, %v3721_v38  ;;  %v9987_v55 = vrot.slane %v8163_v56, 6  ;;  %v8297_v56 = vld [vmem:[#allocation2 + $0x88] sm:$0xf]  ;;  %v2861_v38 = vld [vmem:[#allocation2 + $0xb4] sm:$0xf] }
 0x2a3   : > { %v3972_v34 = vmax.bf16 %v3840_v52, %v3716_v57  ;;  %v3570_v40 = vrot.slane %v3490_v29, 5  ;;  %v3978_v19 = vmax.bf16 %v3854_v22, %v3722_v44  ;;  %v3569_v51 = vrot.slane %v3568_v36, 4 }
 0x2a4   : > { %v3795_v41 = vsel %vm7327_vm12, %v8203_v35, %v9987_v55  ;;  %v4092_v47 = vrot.slane %v3971_v53, 7  ;;  %v9988_v0 = vmax.bf16 %v8196_v32, %v8152_v24  ;;  %v4106_v58 = vrot.slane %v3977_v42, 7 }
 0x2a5   : > { %v4095_v10 = vrot.slane %v3972_v34, 7  ;;  %v3572_v3 = vrot.slane %v3570_v40, 4  ;;  %v9989_v33 = vmov %v9987_v55  ;;  %v4109_v26 = vrot.slane %v3978_v19, 7  ;;  %v2871_v19 = vld [vmem:[#allocation2 + $0xdc] sm:$0x1] }
 0x2a6   : > { %v3696_v45 = vmax.bf16 %v3568_v36, %v9988_v0  ;;  %v3796_v52 = vrot.slane %v9989_v33, 4  ;;  %v8289_v23 = vsel %vm7422_vm0, %v6544_v1, %v4092_v47  ;;  %v4094_v35 = vrot.slane %v4092_v47, 4  ;;  %v2863_v1 = vld [vmem:[#allocation2 + $0xbc] sm:$0x1]  ;;  %v2869_v36 = vld [vmem:[#allocation2 + $0xd4] sm:$0xf] }
 0x2a7   : > { %9990 = vst [vmem:[#allocation10_spill] sm:$0xff] %v8289_v23  ;;  %v3571_v31 = vsel %vm7386_vm15, %v3569_v51, %v3570_v40  ;;  %v4107_v24 = vsel %vm7422_vm0, %v6546_v17, %v4106_v58  ;;  %v4108_v32 = vrot.slane %v4106_v58, 4  ;;  %v3698_v5 = vmax.bf16 %v3572_v3, %v3490_v29  ;;  %4204 = vst.msk [vmem:[#allocation2 + $0x84] sm:$0xf] %vm669_vm2, %v8289_v23  ;;  %v2868_v17 = vld [vmem:[#allocation2 + $0xd0] sm:$0xf] }
 0x2a8   : > { %v3697_v22 = vmax.bf16 %v3571_v31, %v3489_v4  ;;  %v8301_v62 = vsel %vm7422_vm0, %v4094_v35, %v4095_v10  ;;  %v9992_v63 = vrot.slane %v8165_v48, 6  ;;  %v9993_v37 = vrot.slane %v8161_v21, 6  ;;  %4208 = vst.msk [vmem:[#allocation2 + $0xa4] sm:$0xf] %vm669_vm2, %v4107_v24  ;;  %v2862_v48 = vld [vmem:[#allocation2 + $0xb8] sm:$0xf] }
 0x2a9   : > { %9991 = vst [vmem:[#allocation13_spill] sm:$0xff] %v8301_v62  ;;  %v2734_v4 = vmax.bf16 %v2662_v27, %v2590_v16  ;;  %v4110_v39 = vsel %vm7422_vm0, %v4108_v32, %v4109_v26  ;;  %v2797_v57 = vmax.bf16 %v8188_v43, %v8144_v49  ;;  %4205 = vst.msk [vmem:[#allocation2 + $0x88] sm:$0xf] %vm669_vm2, %v8301_v62  ;;  %v8335_v10 = vld [vmem:[#allocation2 + $0x24] sm:$0xf] }
 0x2aa   : > { %v3798_v2 = vsel %vm7327_vm12, %v3796_v52, %v9992_v63  ;;  %v3952_v13 = vmax.bf16 %v9993_v37, %v3696_v45  ;;  %v3953_v30 = vmax.bf16 %v3795_v41, %v3697_v22  ;;  %4209 = vst.msk [vmem:[#allocation2 + $0xa8] sm:$0xf] %vm669_vm2, %v4110_v39  ;;  %v6598_v21 = vcombine.low %v4107_v24, %v4110_v39  ;;  %v2870_v41 = vld [vmem:[#allocation2 + $0xd8] sm:$0xf]  ;;  %v8354_v24 = vld [vmem:[#allocation2 + $0x28] sm:$0xf] }
 0x2ab   : > { %v3954_v25 = vmax.bf16 %v3798_v2, %v3698_v5  ;;  %v2798_v44 = vmax.bf16 %v2734_v4, %v8146_v46  ;;  %v2804_v53 = vmax.bf16 %v8168_v7, %v8156_v6  ;;  %v2805_v40 = vmax.bf16 %v8170_v12, %v8188_v43 }
 0x2ac   : > { %v6538_v29 = vrot.slane %v3952_v13, 11  ;;  %v4050_v34 = vrot.slane %v3953_v30, 7  ;;  %v2806_v55 = vmax.bf16 %v8172_v60, %v2734_v4  ;;  %6817 = vmatprep.subr.msk.bf16.mxu1 %vm5723_vm5, %v6598_v21  ;;  %v2807_v47 = vmax.bf16 %v8180_v8, %v8158_v28 }
 0x2ad   : > { %v4053_v42 = vrot.slane %v3954_v25, 7  ;;  %v9994_v51 = vmax.bf16 %v8156_v6, %v8139_v50  ;;  %v8331_v45 = vmax.bf16 %v2861_v38, %v2797_v57  ;;  %v8333_v27 = vmax.bf16 %v2862_v48, %v2798_v44 }
 0x2ae   : > { %v4051_v43 = vsel %vm7422_vm0, %v6538_v29, %v4050_v34  ;;  %v4052_v58 = vrot.slane %v4050_v34, 4  ;;  %v9995_v3 = vmax.bf16 %v8158_v28, %v8154_v11  ;;  %v8344_v52 = vmax.bf16 %v2868_v17, %v2804_v53 }
 0x2af   : > { %v8329_v0 = vmax.bf16 %v2860_v9, %v9994_v51  ;;  %4192 = vst.msk [vmem:[#allocation2 + $0x24] sm:$0xf] %vm669_vm2, %v4051_v43  ;;  %v8347_v6 = vmax.bf16 %v2869_v36, %v2805_v40  ;;  %v8349_v35 = vmax.bf16 %v2870_v41, %v2806_v55  ;;  %v8351_v26 = vmax.bf16 %v2871_v19, %v2807_v47 }
 0x2b0   : > { %v8342_v33 = vmax.bf16 %v2863_v1, %v9995_v3  ;;  %v4054_v32 = vsel %vm7422_vm0, %v4052_v58, %v4053_v42  ;;  %v3176_v28 = vshll.u32 %v8331_v45, 16  ;;  %v3180_v22 = vshrl.u32 %v8331_v45, 16 }
 0x2b1   : > { %v3171_v31 = vshrl.u32 %v8329_v0, 16  ;;  %v3186_v5 = vshll.u32 %v8333_v27, 16  ;;  %4193 = vst.msk [vmem:[#allocation2 + $0x28] sm:$0xf] %vm669_vm2, %v4054_v32  ;;  %v6590_v16 = vcombine.low %v4051_v43, %v4054_v32  ;;  %v3190_v63 = vshrl.u32 %v8333_v27, 16 }
 0x2b2   : > { %v3196_v2 = vshll.u32 %v8342_v33, 16  ;;  %v3231_v37 = vshrl.u32 %v8344_v52, 16  ;;  %v3178_v13 = vrot.slane %v3176_v28, 5  ;;  %v3182_v4 = vrot.slane %v3180_v22, 4 }
 0x2b3   : > { %v3188_v9 = vrot.slane %v3186_v5, 5  ;;  %v3236_v39 = vshll.u32 %v8347_v6, 16  ;;  %v5962_v30 = vsel %vm5723_vm5, %v6590_v16, 0  ;;  %v3192_v25 = vrot.slane %v3190_v63, 4 }
 0x2b4   : > { %v3198_v57 = vrot.slane %v3196_v2, 5  ;;  %v3240_v38 = vshrl.u32 %v8347_v6, 16  ;;  %6731 = vmatpush3.bf16.xpose.msra.mxu1 %v5962_v30  ;;  %v3179_v48 = vsel %vm7311_vm9, %v3171_v31, %v3178_v13  ;;  %v3183_v1 = vor.u32 %v3182_v4, %v3178_v13 }
 0x2b5   : > { %v3238_v21 = vrot.slane %v3236_v39, 5  ;;  %v3246_v29 = vshll.u32 %v8349_v35, 16  ;;  %v3193_v44 = vor.u32 %v3192_v25, %v3188_v9  ;;  %v3250_v17 = vshrl.u32 %v8349_v35, 16  ;;  %v8396_v25 = vld [vmem:[#allocation2 + $0x20] sm:$0xf] }
 0x2b6   : > { %v3242_v53 = vrot.slane %v3240_v38, 4  ;;  %v3256_v36 = vshll.u32 %v8351_v26, 16  ;;  %v3184_v34 = vrot.slane %v3183_v1, 4  ;;  %v3509_v55 = vmax.bf16 %v3179_v48, %v8329_v0 }
 0x2b7   : > { %v3239_v42 = vsel %vm7311_vm9, %v3231_v37, %v3238_v21  ;;  %v3248_v40 = vrot.slane %v3246_v29, 5  ;;  %v3194_v41 = vrot.slane %v3193_v44, 4  ;;  %v3252_v47 = vrot.slane %v3250_v17, 4 }
 0x2b8   : > { %v3243_v19 = vor.u32 %v3242_v53, %v3238_v21  ;;  %v3258_v51 = vrot.slane %v3256_v36, 5  ;;  %v3189_v43 = vsel %vm7311_vm9, %v3184_v34, %v3188_v9  ;;  %v3515_v58 = vmax.bf16 %v3239_v42, %v8344_v52 }
 0x2b9   : > { %v3841_v3 = vrot.slane %v8331_v45, 6  ;;  %v3843_v31 = vrot.slane %v8333_v27, 6  ;;  %v3199_v32 = vsel %vm7311_vm9, %v3194_v41, %v3198_v57  ;;  %v3253_v22 = vor.u32 %v3252_v47, %v3248_v40  ;;  %v2557_v41 = vld [vmem:[#allocation2 + $0x14] sm:$0xf] }
 0x2ba   : > { %v3244_v28 = vrot.slane %v3243_v19, 4  ;;  %v3510_v0 = vmax.bf16 %v3189_v43, %v8331_v45  ;;  %v3511_v5 = vmax.bf16 %v3199_v32, %v8333_v27  ;;  %v3846_v2 = vrot.slane %v8342_v33, 6  ;;  %v8394_v27 = vld [vmem:[#allocation2 + $0x10] sm:$0xf]  ;;  %v2558_v19 = vld [vmem:[#allocation2 + $0x18] sm:$0xf] }
 0x2bb   : > { %v3842_v16 = vrot.slane %v3841_v3, 4  ;;  %v3845_v63 = vrot.slane %v3843_v31, 4  ;;  %v3254_v37 = vrot.slane %v3253_v22, 4  ;;  %v3855_v4 = vrot.slane %v8347_v6, 6  ;;  %v2636_v32 = vld [vmem:[#allocation2 + $0x40] sm:$0xf] }
 0x2bc   : > { %v3249_v52 = vsel %vm7311_vm9, %v3244_v28, %v3248_v40  ;;  %v3603_v13 = vrot.slane %v3510_v0, 5  ;;  %v3605_v39 = vrot.slane %v3511_v5, 5  ;;  %v3857_v29 = vrot.slane %v8349_v35, 6 }
 0x2bd   : > { %v3516_v9 = vmax.bf16 %v3249_v52, %v8347_v6  ;;  %v3844_v30 = vsel %vm7327_vm12, %v3842_v16, %v3843_v31  ;;  %v3847_v45 = vsel %vm7327_vm12, %v3845_v63, %v3846_v2  ;;  %v3259_v33 = vsel %vm7311_vm9, %v3254_v37, %v3258_v51  ;;  %v2564_v31 = vld [vmem:[#allocation2 + $0x30] sm:$0xf]  ;;  %v2559_v16 = vld [vmem:[#allocation2 + $0x1c] sm:$0x1]  ;;  %v2631_v63 = vld [vmem:[#allocation2 + $0x2c] sm:$0x1] }
 0x2be   : > { %v3604_v57 = vrot.slane %v3603_v13, 4  ;;  %v3717_v38 = vmax.bf16 %v3603_v13, %v3509_v55  ;;  %v3856_v48 = vrot.slane %v3855_v4, 4  ;;  %v3517_v1 = vmax.bf16 %v3259_v33, %v8349_v35  ;;  %v2565_v2 = vld [vmem:[#allocation2 + $0x34] sm:$0xf]  ;;  %v2637_v52 = vld [vmem:[#allocation2 + $0x44] sm:$0xf] }
 0x2bf   : > { %v3607_v6 = vrot.slane %v3605_v39, 4  ;;  %v3613_v21 = vrot.slane %v3516_v9, 5  ;;  %v3860_v53 = vrot.slane %v8351_v26, 6  ;;  %v2700_v36 = vmax.bf16 %v8396_v25, %v8394_v27  ;;  %v2638_v37 = vld [vmem:[#allocation2 + $0x48] sm:$0xf] }
 0x2c0   : > { %v3606_v44 = vsel %vm7386_vm15, %v3604_v57, %v3605_v39  ;;  %v3973_v17 = vmax.bf16 %v3841_v3, %v3717_v38  ;;  %v3615_v42 = vrot.slane %v3517_v1, 5  ;;  %v3858_v51 = vsel %vm7327_vm12, %v3856_v48, %v3857_v29  ;;  %v2566_v33 = vld [vmem:[#allocation2 + $0x38] sm:$0xf]  ;;  %v2567_v57 = vld [vmem:[#allocation2 + $0x3c] sm:$0x1] }
 0x2c1   : > { %v3614_v34 = vrot.slane %v3613_v21, 4  ;;  %v3718_v40 = vmax.bf16 %v3606_v44, %v3510_v0  ;;  %v3719_v55 = vmax.bf16 %v3607_v6, %v3511_v5  ;;  %v3723_v47 = vmax.bf16 %v3613_v21, %v3515_v58  ;;  %v2639_v38 = vld [vmem:[#allocation2 + $0x4c] sm:$0x1]  ;;  %v2836_v21 = vld [vmem:[#allocation2 + $0x50] sm:$0xf] }
 0x2c2   : > { %v3859_v35 = vrot.slane %v3857_v29, 4  ;;  %v6545_v43 = vrot.slane %v3973_v17, 11  ;;  %v3617_v3 = vrot.slane %v3615_v42, 4  ;;  %v2701_v13 = vmax.bf16 %v8335_v10, %v2557_v41  ;;  %v2600_v29 = vld [vmem:[#allocation2 + $0xc0] sm:$0xf] }
 0x2c3   : > { %v3616_v26 = vsel %vm7386_vm15, %v3614_v34, %v3615_v42  ;;  %v3974_v28 = vmax.bf16 %v3844_v30, %v3718_v40  ;;  %v3975_v22 = vmax.bf16 %v3847_v45, %v3719_v55  ;;  %v3979_v58 = vmax.bf16 %v3855_v4, %v3723_v47  ;;  %v2837_v4 = vld [vmem:[#allocation2 + $0x54] sm:$0xf]  ;;  %v2672_v44 = vld [vmem:[#allocation2 + $0xd0] sm:$0xf]  ;;  %v2839_v42 = vld [vmem:[#allocation2 + $0x5c] sm:$0x1] }
 0x2c4   : > { %v3724_v0 = vmax.bf16 %v3616_v26, %v3516_v9  ;;  %v3861_v5 = vsel %vm7327_vm12, %v3859_v35, %v3860_v53  ;;  %v3725_v39 = vmax.bf16 %v3617_v3, %v3517_v1  ;;  %v2702_v30 = vmax.bf16 %v8354_v24, %v2558_v19  ;;  %v8417_v53 = vld [vmem:[#allocation2 + $0x94] sm:$0xf]  ;;  %v2838_v24 = vld [vmem:[#allocation2 + $0x58] sm:$0xf]  ;;  %v2603_v40 = vld [vmem:[#allocation2 + $0xcc] sm:$0x1] }
 0x2c5   : > { %v4099_v27 = vrot.slane %v3974_v28, 7  ;;  %v4102_v25 = vrot.slane %v3975_v22, 7  ;;  %v6547_v48 = vrot.slane %v3979_v58, 11  ;;  %v2703_v9 = vmax.bf16 %v2631_v63, %v2559_v16  ;;  %9996 = vst [vmem:[#allocation15_spill] sm:$0xff] %v8417_v53  ;;  %v2674_v35 = vld [vmem:[#allocation2 + $0xd8] sm:$0xf] }
 0x2c6   : > { %v3980_v45 = vmax.bf16 %v3858_v51, %v3724_v0  ;;  %v8415_v6 = vmax.bf16 %v2636_v32, %v2564_v31  ;;  %v3981_v10 = vmax.bf16 %v3861_v5, %v3725_v39  ;;  %v8423_v34 = vmax.bf16 %v2637_v52, %v2565_v2  ;;  %v2673_v51 = vld [vmem:[#allocation2 + $0xd4] sm:$0xf]  ;;  %v2675_v3 = vld [vmem:[#allocation2 + $0xdc] sm:$0x1]  ;;  %v2601_v0 = vld [vmem:[#allocation2 + $0xc4] sm:$0xf] }
 0x2c7   : > { %v8421_v1 = vsel %vm7422_vm0, %v6545_v43, %v4099_v27  ;;  %v4101_v17 = vrot.slane %v4099_v27, 4  ;;  %v8427_v41 = vmax.bf16 %v2638_v37, %v2566_v33  ;;  %v8429_v19 = vmax.bf16 %v2639_v38, %v2567_v57  ;;  %v8432_v43 = vld [vmem:[#allocation2 + $0x98] sm:$0xf]  ;;  %v2602_v5 = vld [vmem:[#allocation2 + $0xc8] sm:$0xf] }
 0x2c8   : > { %9997 = vst [vmem:[#allocation5_spill] sm:$0xff] %v8421_v1  ;;  %v4113_v55 = vrot.slane %v3980_v45, 7  ;;  %4206 = vst.msk [vmem:[#allocation2 + $0x94] sm:$0xf] %vm669_vm2, %v8421_v1  ;;  %v2772_v47 = vmax.bf16 %v8415_v6, %v2700_v36  ;;  %v4116_v32 = vrot.slane %v3981_v10, 7  ;;  %v2773_v26 = vmax.bf16 %v8423_v34, %v2701_v13 }
 0x2c9   : > { %9998 = vst [vmem:[#allocation24_spill] sm:$0xff] %v8432_v43  ;;  %v8436_v31 = vsel %vm7422_vm0, %v4101_v17, %v4102_v25  ;;  %v8439_v28 = vmax.bf16 %v2672_v44, %v2600_v29  ;;  %v2774_v36 = vmax.bf16 %v8427_v41, %v2702_v30  ;;  %v2775_v63 = vmax.bf16 %v8429_v19, %v2703_v9  ;;  %v2568_v17 = vld [vmem:[#allocation2 + $0x40] sm:$0xf] }
 0x2ca   : > { %9999 = vst [vmem:[#allocation25_spill] sm:$0xff] %v8436_v31  ;;  %v4114_v22 = vsel %vm7422_vm0, %v6547_v48, %v4113_v55  ;;  %v4115_v16 = vrot.slane %v4113_v55, 4  ;;  %4207 = vst.msk [vmem:[#allocation2 + $0x98] sm:$0xf] %vm669_vm2, %v8436_v31  ;;  %v8448_v58 = vmax.bf16 %v2836_v21, %v2772_v47  ;;  %v8450_v2 = vmax.bf16 %v2837_v4, %v2773_v26  ;;  %v2640_v47 = vld [vmem:[#allocation2 + $0x50] sm:$0xf] }
 0x2cb   : > { %4210 = vst.msk [vmem:[#allocation2 + $0xb4] sm:$0xf] %vm669_vm2, %v4114_v22  ;;  %v8452_v52 = vmax.bf16 %v2673_v51, %v2601_v0  ;;  %v8454_v37 = vmax.bf16 %v2674_v35, %v2602_v5  ;;  %v2902_v39 = vmax.bf16 %v2838_v24, %v2774_v36  ;;  %v2903_v27 = vmax.bf16 %v2839_v42, %v2775_v63  ;;  %v2874_v5 = vld [vmem:[#allocation2 + $0xe8] sm:$0xf] }
 0x2cc   : > { %v4117_v13 = vsel %vm7422_vm0, %v4115_v16, %v4116_v32  ;;  %v8458_v25 = vmax.bf16 %v2675_v3, %v2603_v40  ;;  %v2991_v57 = vshrl.u32 %v8448_v58, 16  ;;  %v2996_v38 = vshll.u32 %v8450_v2, 16  ;;  %v2872_v3 = vld [vmem:[#allocation2 + $0xe0] sm:$0xf] }
 0x2cd   : > { %4211 = vst.msk [vmem:[#allocation2 + $0xb8] sm:$0xf] %vm669_vm2, %v4117_v13  ;;  %v6599_v33 = vcombine.low %v4114_v22, %v4117_v13  ;;  %v3000_v30 = vshrl.u32 %v8450_v2, 16  ;;  %v3006_v45 = vshll.u32 %v2902_v39, 16  ;;  %v3010_v48 = vshrl.u32 %v2902_v39, 16 }
 0x2ce   : > { %v3016_v9 = vshll.u32 %v2903_v27, 16  ;;  %v3799_v21 = vrot.slane %v8450_v2, 6  ;;  %v2998_v4 = vrot.slane %v2996_v38, 5  ;;  %v3801_v44 = vrot.slane %v2902_v39, 6  ;;  %v2873_v22 = vld [vmem:[#allocation2 + $0xe4] sm:$0xf] }
 0x2cf   : > { %6818 = vmatprep.subr.msk.bf16.mxu1 %vm5723_vm5, %v6599_v33  ;;  %v3002_v29 = vrot.slane %v3000_v30, 4  ;;  %v3804_v10 = vrot.slane %v2903_v27, 6  ;;  %v3008_v24 = vrot.slane %v3006_v45, 5  ;;  %v3012_v42 = vrot.slane %v3010_v48, 4  ;;  %v2875_v13 = vld [vmem:[#allocation2 + $0xec] sm:$0x1] }
 0x2d0   : > { %v3018_v40 = vrot.slane %v3016_v9, 5  ;;  %v3800_v55 = vrot.slane %v3799_v21, 4  ;;  %v2999_v51 = vsel %vm7311_vm9, %v2991_v57, %v2998_v4  ;;  %v3803_v32 = vrot.slane %v3801_v44, 4  ;;  %v2641_v27 = vld [vmem:[#allocation2 + $0x54] sm:$0xf]  ;;  %v10000_v38 = vld [vmem:[#allocation19_spill] sm:$0xff] }
 0x2d1   : > { %v3003_v35 = vor.u32 %v3002_v29, %v2998_v4  ;;  %v2808_v26 = vmax.bf16 %v8439_v28, %v8071_v14  ;;  %v3013_v16 = vor.u32 %v3012_v42, %v3008_v24  ;;  %v3491_v36 = vmax.bf16 %v2999_v51, %v8448_v58  ;;  %v10001_v30 = vld [vmem:[#allocation23_spill] sm:$0xff] }
 0x2d2   : > { %v3802_v63 = vsel %vm7327_vm12, %v3800_v55, %v3801_v44  ;;  %v2809_v0 = vmax.bf16 %v8452_v52, %v8077_v15  ;;  %v3805_v57 = vsel %vm7327_vm12, %v3803_v32, %v3804_v10  ;;  %v2810_v14 = vmax.bf16 %v8454_v37, %v10000_v38  ;;  %v2569_v4 = vld [vmem:[#allocation2 + $0x44] sm:$0xf] }
 0x2d3   : > { %v3004_v33 = vrot.slane %v3003_v35, 4  ;;  %v2811_v45 = vmax.bf16 %v8458_v25, %v10001_v30  ;;  %v3014_v58 = vrot.slane %v3013_v16, 4  ;;  %v8483_v48 = vmax.bf16 %v2872_v3, %v2808_v26 }
 0x2d4   : > { %v8485_v9 = vmax.bf16 %v2873_v22, %v2809_v0  ;;  %v8487_v15 = vmax.bf16 %v2640_v47, %v2568_v17  ;;  %v2938_v44 = vmax.bf16 %v2874_v5, %v2810_v14  ;;  %v8491_v10 = vmax.bf16 %v2641_v27, %v2569_v4 }
 0x2d5   : > { %v3009_v29 = vsel %vm7311_vm9, %v3004_v33, %v3008_v24  ;;  %v2939_v42 = vmax.bf16 %v2875_v13, %v2811_v45  ;;  %v3019_v55 = vsel %vm7311_vm9, %v3014_v58, %v3018_v40  ;;  %v3261_v35 = vshrl.u32 %v8483_v48, 16 }
 0x2d6   : > { %v3492_v51 = vmax.bf16 %v3009_v29, %v8450_v2  ;;  %v3266_v32 = vshll.u32 %v8485_v9, 16  ;;  %v3493_v26 = vmax.bf16 %v3019_v55, %v2902_v39  ;;  %v3270_v17 = vshrl.u32 %v8485_v9, 16 }
 0x2d7   : > { %v3276_v47 = vshll.u32 %v2938_v44, 16  ;;  %v3280_v3 = vshrl.u32 %v2938_v44, 16  ;;  %v3286_v16 = vshll.u32 %v2939_v42, 16  ;;  %v3862_v0 = vrot.slane %v8485_v9, 6 }
 0x2d8   : > { %v3573_v22 = vrot.slane %v3492_v51, 5  ;;  %v3268_v24 = vrot.slane %v3266_v32, 5  ;;  %v3575_v5 = vrot.slane %v3493_v26, 5  ;;  %v3272_v13 = vrot.slane %v3270_v17, 4 }
 0x2d9   : > { %v3278_v27 = vrot.slane %v3276_v47, 5  ;;  %v3282_v40 = vrot.slane %v3280_v3, 4  ;;  %v3288_v30 = vrot.slane %v3286_v16, 5  ;;  %v3863_v32 = vrot.slane %v3862_v0, 4  ;;  %v2642_v16 = vld [vmem:[#allocation2 + $0x58] sm:$0xf] }
 0x2da   : > { %v3574_v33 = vrot.slane %v3573_v22, 4  ;;  %v3699_v38 = vmax.bf16 %v3573_v22, %v3491_v36  ;;  %v3269_v14 = vsel %vm7311_vm9, %v3261_v35, %v3268_v24  ;;  %v3577_v39 = vrot.slane %v3575_v5, 4  ;;  %v2571_v22 = vld [vmem:[#allocation2 + $0x4c] sm:$0x1] }
 0x2db   : > { %v3273_v45 = vor.u32 %v3272_v13, %v3268_v24  ;;  %v3283_v58 = vor.u32 %v3282_v40, %v3278_v27  ;;  %v3518_v4 = vmax.bf16 %v3269_v14, %v8483_v48  ;;  %v3864_v17 = vrot.slane %v2938_v44, 6 }
 0x2dc   : > { %v3576_v29 = vsel %vm7386_vm15, %v3574_v33, %v3575_v5  ;;  %v3955_v55 = vmax.bf16 %v3799_v21, %v3699_v38  ;;  %v3701_v47 = vmax.bf16 %v3577_v39, %v3493_v26  ;;  %v3867_v40 = vrot.slane %v2939_v42, 6  ;;  %v2643_v5 = vld [vmem:[#allocation2 + $0x5c] sm:$0x1]  ;;  %v2570_v26 = vld [vmem:[#allocation2 + $0x48] sm:$0xf] }
 0x2dd   : > { %v3700_v36 = vmax.bf16 %v3576_v29, %v3492_v51  ;;  %v3274_v3 = vrot.slane %v3273_v45, 4  ;;  %v3284_v35 = vrot.slane %v3283_v58, 4  ;;  %v3865_v48 = vsel %vm7327_vm12, %v3863_v32, %v3864_v17  ;;  %v2840_v58 = vld [vmem:[#allocation2 + $0x60] sm:$0xf] }
 0x2de   : > { %v6539_v24 = vrot.slane %v3955_v55, 11  ;;  %v3866_v13 = vrot.slane %v3864_v17, 4  ;;  %v3957_v2 = vmax.bf16 %v3805_v57, %v3701_v47  ;;  %v8518_v45 = vmax.bf16 %v2642_v16, %v2570_v26  ;;  %v10002_v57 = vld [vmem:[#allocation22_spill] sm:$0xff]  ;;  %v2841_v55 = vld [vmem:[#allocation2 + $0x64] sm:$0xf]  ;;  %v10003_v17 = vld [vmem:[#allocation17_spill] sm:$0xff] }
 0x2df   : > { %v3956_v33 = vmax.bf16 %v3802_v63, %v3700_v36  ;;  %v3279_v21 = vsel %vm7311_vm9, %v3274_v3, %v3278_v27  ;;  %v3289_v51 = vsel %vm7311_vm9, %v3284_v35, %v3288_v30  ;;  %v8520_v63 = vmax.bf16 %v2643_v5, %v2571_v22  ;;  %v2842_v3 = vld [vmem:[#allocation2 + $0x68] sm:$0xf]  ;;  %v2843_v35 = vld [vmem:[#allocation2 + $0x6c] sm:$0x1] }
 0x2e0   : > { %v3519_v38 = vmax.bf16 %v3279_v21, %v8485_v9  ;;  %v3520_v14 = vmax.bf16 %v3289_v51, %v2938_v44  ;;  %v3868_v39 = vsel %vm7327_vm12, %v3866_v13, %v3867_v40  ;;  %v4060_v29 = vrot.slane %v3957_v2, 7  ;;  %v10004_v44 = vld [vmem:[#allocation18_spill] sm:$0xff]  ;;  %v10005_v22 = vld [vmem:[#allocation8_spill] sm:$0xff] }
 0x2e1   : > { %v4057_v42 = vrot.slane %v3956_v33, 7  ;;  %v2776_v27 = vmax.bf16 %v8487_v15, %v10002_v57  ;;  %v2777_v36 = vmax.bf16 %v8491_v10, %v10003_v17  ;;  %v2778_v47 = vmax.bf16 %v8518_v45, %v10004_v44 }
 0x2e2   : > { %v3618_v32 = vrot.slane %v3519_v38, 5  ;;  %v3620_v30 = vrot.slane %v3520_v14, 5  ;;  %v2779_v40 = vmax.bf16 %v8520_v63, %v10005_v22 }
 0x2e3   : > { %v4058_v16 = vsel %vm7422_vm0, %v6539_v24, %v4057_v42  ;;  %v4059_v13 = vrot.slane %v4057_v42, 4  ;;  %v8532_v5 = vmax.bf16 %v2840_v58, %v2776_v27  ;;  %v8535_v51 = vmax.bf16 %v2841_v55, %v2777_v36 }
 0x2e4   : > { %4194 = vst.msk [vmem:[#allocation2 + $0x34] sm:$0xf] %vm669_vm2, %v4058_v16  ;;  %v3619_v33 = vrot.slane %v3618_v32, 4  ;;  %v3622_v2 = vrot.slane %v3620_v30, 4  ;;  %v3726_v21 = vmax.bf16 %v3618_v32, %v3518_v4  ;;  %v8539_v57 = vmax.bf16 %v2842_v3, %v2778_v47 }
 0x2e5   : > { %v4061_v26 = vsel %vm7422_vm0, %v4059_v13, %v4060_v29  ;;  %v2907_v17 = vmax.bf16 %v2843_v35, %v2779_v40  ;;  %v3021_v24 = vshrl.u32 %v8532_v5, 16  ;;  %v3026_v32 = vshll.u32 %v8535_v51, 16 }
 0x2e6   : > { %4195 = vst.msk [vmem:[#allocation2 + $0x38] sm:$0xf] %vm669_vm2, %v4061_v26  ;;  %v6591_v42 = vcombine.low %v4058_v16, %v4061_v26  ;;  %v3621_v58 = vsel %vm7386_vm15, %v3619_v33, %v3620_v30  ;;  %v3728_v27 = vmax.bf16 %v3622_v2, %v3520_v14  ;;  %v3982_v4 = vmax.bf16 %v3862_v0, %v3726_v21  ;;  %v2604_v21 = vld [vmem:[#allocation2 + $0xd0] sm:$0xf]  ;;  %v2676_v26 = vld [vmem:[#allocation2 + $0xe0] sm:$0xf] }
 0x2e7   : > { %v3727_v55 = vmax.bf16 %v3621_v58, %v3519_v38  ;;  %v3030_v29 = vshrl.u32 %v8535_v51, 16  ;;  %v3036_v36 = vshll.u32 %v8539_v57, 16  ;;  %v3040_v35 = vshrl.u32 %v8539_v57, 16 }
 0x2e8   : > { %v5965_v44 = vsel %vm5723_vm5, %v6591_v42, 0  ;;  %v3984_v47 = vmax.bf16 %v3868_v39, %v3728_v27  ;;  %v6548_v3 = vrot.slane %v3982_v4, 11  ;;  %v3028_v30 = vrot.slane %v3026_v32, 5  ;;  %v2605_v4 = vld [vmem:[#allocation2 + $0xd4] sm:$0xf] }
 0x2e9   : > { %6733 = vmatpush3.bf16.xpose.msra.mxu1 %v5965_v44  ;;  %v3983_v16 = vmax.bf16 %v3865_v48, %v3727_v55  ;;  %v3032_v14 = vrot.slane %v3030_v29, 4  ;;  %v3038_v13 = vrot.slane %v3036_v36, 5  ;;  %v3042_v0 = vrot.slane %v3040_v35, 4  ;;  %v2677_v55 = vld [vmem:[#allocation2 + $0xe4] sm:$0xf] }
 0x2ea   : > { %v4123_v9 = vrot.slane %v3984_v47, 7  ;;  %v3046_v38 = vshll.u32 %v2907_v17, 16  ;;  %v9855_v22 = vrot.slane %v8535_v51, 6  ;;  %v3029_v33 = vsel %vm7311_vm9, %v3021_v24, %v3028_v30  ;;  %v2678_v32 = vld [vmem:[#allocation2 + $0xe8] sm:$0xf] }
 0x2eb   : > { %v4120_v40 = vrot.slane %v3983_v16, 7  ;;  %v3033_v2 = vor.u32 %v3032_v14, %v3028_v30  ;;  %v3808_v39 = vrot.slane %v8539_v57, 6  ;;  %v3043_v42 = vor.u32 %v3042_v0, %v3038_v13  ;;  %v2606_v47 = vld [vmem:[#allocation2 + $0xd8] sm:$0xf]  ;;  %v2607_v30 = vld [vmem:[#allocation2 + $0xdc] sm:$0x1] }
 0x2ec   : > { %v3048_v58 = vrot.slane %v3046_v38, 5  ;;  %v3494_v48 = vmax.bf16 %v3029_v33, %v8532_v5  ;;  %v3807_v27 = vrot.slane %v9855_v22, 4  ;;  %v3811_v5 = vrot.slane %v2907_v17, 6  ;;  %v2679_v14 = vld [vmem:[#allocation2 + $0xec] sm:$0x1] }
 0x2ed   : > { %v4121_v29 = vsel %vm7422_vm0, %v6548_v3, %v4120_v40  ;;  %v4122_v36 = vrot.slane %v4120_v40, 4  ;;  %v3034_v24 = vrot.slane %v3033_v2, 4  ;;  %v3810_v44 = vrot.slane %v3808_v39, 4  ;;  %v4256_v2 = vld [vmem:[#allocation2 + $0x80] sm:$0xf] }
 0x2ee   : > { %4212 = vst.msk [vmem:[#allocation2 + $0xc4] sm:$0xf] %vm669_vm2, %v4121_v29  ;;  %v3044_v35 = vrot.slane %v3043_v42, 4  ;;  %v3809_v16 = vsel %vm7327_vm12, %v3807_v27, %v3808_v39  ;;  %v8564_v0 = vmax.bf16 %v2676_v26, %v2604_v21  ;;  %v8570_v40 = vmax.bf16 %v2677_v55, %v2605_v4  ;;  %v4328_v42 = vld [vmem:[#allocation2 + $0x90] sm:$0xf] }
 0x2ef   : > { %v4124_v38 = vsel %vm7422_vm0, %v4122_v36, %v4123_v9  ;;  %v3039_v3 = vsel %vm7311_vm9, %v3034_v24, %v3038_v13  ;;  %v8572_v33 = vmax.bf16 %v2678_v32, %v2606_v47  ;;  %v4329_v22 = vld [vmem:[#allocation2 + $0x94] sm:$0xf]  ;;  %v3812_v9 = vsel %vm7327_vm12, %v3810_v44, %v3811_v5  ;;  %v2876_v26 = vld [vmem:[#allocation2 + $0xf0] sm:$0xf]  ;;  %v4257_v36 = vld [vmem:[#allocation2 + $0x84] sm:$0xf] }
 0x2f0   : > { %4213 = vst.msk [vmem:[#allocation2 + $0xc8] sm:$0xf] %vm669_vm2, %v4124_v38  ;;  %v6600_v17 = vcombine.low %v4121_v29, %v4124_v38  ;;  %v3049_v39 = vsel %vm7311_vm9, %v3044_v35, %v3048_v58  ;;  %v3495_v21 = vmax.bf16 %v3039_v3, %v8535_v51  ;;  %v2877_v13 = vld [vmem:[#allocation2 + $0xf4] sm:$0xf]  ;;  %v8581_v4 = vmax.bf16 %v2679_v14, %v2607_v30  ;;  %v2878_v29 = vld [vmem:[#allocation2 + $0xf8] sm:$0xf] }
 0x2f1   : > { %v3496_v27 = vmax.bf16 %v3049_v39, %v8539_v57  ;;  %v2812_v55 = vmax.bf16 %v8564_v0, %v8168_v7  ;;  %v2813_v32 = vmax.bf16 %v8570_v40, %v8170_v12  ;;  %v4330_v58 = vld [vmem:[#allocation2 + $0x98] sm:$0xf]  ;;  %v2814_v44 = vmax.bf16 %v8572_v33, %v8172_v60  ;;  %v2879_v47 = vld [vmem:[#allocation2 + $0xfc] sm:$0x1]  ;;  %v4258_v14 = vld [vmem:[#allocation2 + $0x88] sm:$0xf] }
 0x2f2   : > { %6819 = vmatprep.subr.msk.bf16.mxu1 %vm5723_vm5, %v6600_v17  ;;  %v3578_v24 = vrot.slane %v3495_v21, 5  ;;  %v8590_v35 = vmax.bf16 %v4328_v42, %v4256_v2  ;;  %v8592_v57 = vmax.bf16 %v4329_v22, %v4257_v36  ;;  %v2815_v7 = vmax.bf16 %v8581_v4, %v8180_v8  ;;  %v4306_v46 = vld [vmem:[#allocation2 + $0x38] sm:$0xf] }
 0x2f3   : > { %v3580_v5 = vrot.slane %v3496_v27, 5  ;;  %v8596_v30 = vmax.bf16 %v2876_v26, %v2812_v55  ;;  %v8598_v12 = vmax.bf16 %v2877_v13, %v2813_v32  ;;  %v2942_v17 = vmax.bf16 %v2878_v29, %v2814_v44 }
 0x2f4   : > { %10006 = vst [vmem:[#allocation4_spill] sm:$0xff] %v8590_v35  ;;  %10007 = vst [vmem:[#allocation11_spill] sm:$0xff] %v8592_v57  ;;  %v3579_v38 = vrot.slane %v3578_v24, 4  ;;  %v3702_v3 = vmax.bf16 %v3578_v24, %v3494_v48  ;;  %v8600_v39 = vmax.bf16 %v4330_v58, %v4258_v14  ;;  %v2943_v1 = vmax.bf16 %v2879_v47, %v2815_v7 }
 0x2f5   : > { %v3582_v60 = vrot.slane %v3580_v5, 4  ;;  %v3291_v2 = vshrl.u32 %v8596_v30, 16  ;;  %v3296_v22 = vshll.u32 %v8598_v12, 16  ;;  %v10009_v8 = vrot.slane %v8535_v51, 6  ;;  %v4331_v51 = vld [vmem:[#allocation2 + $0x9c] sm:$0x1] }
 0x2f6   : > { %10008 = vst [vmem:[#allocation26_spill] sm:$0xff] %v8600_v39  ;;  %v3581_v42 = vsel %vm7386_vm15, %v3579_v38, %v3580_v5  ;;  %v3300_v13 = vshrl.u32 %v8598_v12, 16  ;;  %v3306_v55 = vshll.u32 %v2942_v17, 16  ;;  %v3310_v36 = vshrl.u32 %v2942_v17, 16  ;;  %v4259_v38 = vld [vmem:[#allocation2 + $0x8c] sm:$0x1] }
 0x2f7   : > { %v3958_v26 = vmax.bf16 %v10009_v8, %v3702_v3  ;;  %v3703_v32 = vmax.bf16 %v3581_v42, %v3495_v21  ;;  %v3704_v48 = vmax.bf16 %v3582_v60, %v3496_v27  ;;  %v3298_v29 = vrot.slane %v3296_v22, 5  ;;  %v4264_v27 = vld [vmem:[#allocation2 + $0xa0] sm:$0xf]  ;;  %v4336_v60 = vld [vmem:[#allocation2 + $0xb0] sm:$0xf] }
 0x2f8   : > { %v3302_v24 = vrot.slane %v3300_v13, 4  ;;  %v3308_v44 = vrot.slane %v3306_v55, 5  ;;  %v3316_v47 = vshll.u32 %v2943_v1, 16  ;;  %v3312_v5 = vrot.slane %v3310_v36, 4  ;;  %v4339_v55 = vld [vmem:[#allocation2 + $0xbc] sm:$0x1] }
 0x2f9   : > { %v6540_v58 = vrot.slane %v3958_v26, 11  ;;  %v3959_v7 = vmax.bf16 %v3809_v16, %v3703_v32  ;;  %v3960_v14 = vmax.bf16 %v3812_v9, %v3704_v48  ;;  %v3299_v31 = vsel %vm7311_vm9, %v3291_v2, %v3298_v29  ;;  %v4267_v16 = vld [vmem:[#allocation2 + $0xac] sm:$0x1]  ;;  %v4337_v9 = vld [vmem:[#allocation2 + $0xb4] sm:$0xf] }
 0x2fa   : > { %v3303_v3 = vor.u32 %v3302_v24, %v3298_v29  ;;  %v3318_v8 = vrot.slane %v3316_v47, 5  ;;  %v3521_v23 = vmax.bf16 %v3299_v31, %v8596_v30  ;;  %v3869_v21 = vrot.slane %v8598_v12, 6  ;;  %v4265_v36 = vld [vmem:[#allocation2 + $0xa4] sm:$0xf]  ;;  %v4338_v47 = vld [vmem:[#allocation2 + $0xb8] sm:$0xf] }
 0x2fb   : > { %v4064_v22 = vrot.slane %v3959_v7, 7  ;;  %v4067_v42 = vrot.slane %v3960_v14, 7  ;;  %v3313_v26 = vor.u32 %v3312_v5, %v3308_v44  ;;  %v3871_v13 = vrot.slane %v2942_v17, 6 }
 0x2fc   : > { %v3304_v32 = vrot.slane %v3303_v3, 4  ;;  %v3870_v2 = vrot.slane %v3869_v21, 4  ;;  %v3874_v48 = vrot.slane %v2943_v1, 6  ;;  %v8613_v62 = vmax.bf16 %v4331_v51, %v4259_v38  ;;  %v8626_v38 = vld [vmem:[#allocation2] sm:$0xf] }
 0x2fd   : > { %v4065_v31 = vsel %vm7422_vm0, %v6540_v58, %v4064_v22  ;;  %v4066_v30 = vrot.slane %v4064_v22, 4  ;;  %v3314_v29 = vrot.slane %v3313_v26, 4  ;;  %v3873_v24 = vrot.slane %v3871_v13, 4  ;;  %v8628_v51 = vld [vmem:[#allocation2 + $0x10] sm:$0xf] }
 0x2fe   : > { %10010 = vst [vmem:[#allocation12_spill] sm:$0xff] %v8613_v62  ;;  %4196 = vst.msk [vmem:[#allocation2 + $0x44] sm:$0xf] %vm669_vm2, %v4065_v31  ;;  %v3309_v7 = vsel %vm7311_vm9, %v3304_v32, %v3308_v44  ;;  %v3872_v14 = vsel %vm7327_vm12, %v3870_v2, %v3871_v13  ;;  %v8622_v5 = vmax.bf16 %v4336_v60, %v4264_v27  ;;  %v4266_v26 = vld [vmem:[#allocation2 + $0xa8] sm:$0xf] }
 0x2ff   : > { %v8624_v1 = vmax.bf16 %v4337_v9, %v4265_v36  ;;  %v4068_v58 = vsel %vm7422_vm0, %v4066_v30, %v4067_v42  ;;  %v3319_v3 = vsel %vm7311_vm9, %v3314_v29, %v3318_v8  ;;  %v3522_v22 = vmax.bf16 %v3309_v7, %v8598_v12  ;;  %v8637_v27 = vld [vmem:[#allocation2 + $0x4] sm:$0xf]  ;;  %v4536_v42 = vld [vmem:[#allocation2 + $0xc0] sm:$0xf]  ;;  %v8644_v36 = vld [vmem:[#allocation2 + $0x14] sm:$0xf] }
 0x300   : > { %v3875_v44 = vsel %vm7327_vm12, %v3873_v24, %v3874_v48  ;;  %4197 = vst.msk [vmem:[#allocation2 + $0x48] sm:$0xf] %vm669_vm2, %v4068_v58  ;;  %v6592_v60 = vcombine.low %v4065_v31, %v4068_v58  ;;  %v3523_v13 = vmax.bf16 %v3319_v3, %v2942_v17  ;;  %v8640_v9 = vmax.bf16 %v4338_v47, %v4266_v26  ;;  %v4537_v2 = vld [vmem:[#allocation2 + $0xc4] sm:$0xf]  ;;  %v4538_v30 = vld [vmem:[#allocation2 + $0xc8] sm:$0xf] }
 0x301   : > { %v8642_v32 = vmax.bf16 %v4339_v55, %v4267_v16  ;;  %v3623_v8 = vrot.slane %v3522_v22, 5  ;;  %v4472_v12 = vmax.bf16 %v8622_v5, %v8590_v35  ;;  %v4473_v48 = vmax.bf16 %v8624_v1, %v8592_v57  ;;  %v4539_v29 = vld [vmem:[#allocation2 + $0xcc] sm:$0x1] }
 0x302   : > { %v5968_v31 = vsel %vm5723_vm5, %v6592_v60, 0  ;;  %v3625_v16 = vrot.slane %v3523_v13, 5  ;;  %v4474_v55 = vmax.bf16 %v8640_v9, %v8600_v39 }
 0x303   : > { %v4475_v24 = vmax.bf16 %v8642_v32, %v8613_v62  ;;  %6735 = vmatpush3.bf16.xpose.msra.mxu1 %v5968_v31  ;;  %v3624_v47 = vrot.slane %v3623_v8, 4  ;;  %v3729_v7 = vmax.bf16 %v3623_v8, %v3521_v23  ;;  %v8657_v58 = vmax.bf16 %v4536_v42, %v4472_v12 }
 0x304   : > { %v8659_v3 = vmax.bf16 %v4537_v2, %v4473_v48  ;;  %v3627_v26 = vrot.slane %v3625_v16, 4  ;;  %v8661_v57 = vmax.bf16 %v4538_v30, %v4474_v55 }
 0x305   : > { %v8663_v17 = vmax.bf16 %v4539_v29, %v4475_v24  ;;  %v3626_v39 = vsel %vm7386_vm15, %v3624_v47, %v3625_v16  ;;  %v3985_v35 = vmax.bf16 %v3869_v21, %v3729_v7  ;;  %v4873_v31 = vshrl.u32 %v8657_v58, 16  ;;  %v4226_v47 = vld [vmem:[#allocation2 + $0x8] sm:$0xf]  ;;  %v4227_v7 = vld [vmem:[#allocation2 + $0xc] sm:$0x1] }
 0x306   : > { %v4878_v23 = vshll.u32 %v8659_v3, 16  ;;  %v3730_v42 = vmax.bf16 %v3626_v39, %v3522_v22  ;;  %v3731_v8 = vmax.bf16 %v3627_v26, %v3523_v13  ;;  %v4882_v2 = vshrl.u32 %v8659_v3, 16 }
 0x307   : > { %v4888_v12 = vshll.u32 %v8661_v57, 16  ;;  %v6549_v48 = vrot.slane %v3985_v35, 11  ;;  %v4892_v29 = vshrl.u32 %v8661_v57, 16  ;;  %v4898_v55 = vshll.u32 %v8663_v17, 16  ;;  %v4232_v35 = vld [vmem:[#allocation2 + $0x20] sm:$0xf] }
 0x308   : > { %v4880_v30 = vrot.slane %v4878_v23, 5  ;;  %v3986_v24 = vmax.bf16 %v3872_v14, %v3730_v42  ;;  %v3987_v60 = vmax.bf16 %v3875_v44, %v3731_v8  ;;  %v4884_v16 = vrot.slane %v4882_v2, 4  ;;  %v4298_v23 = vld [vmem:[#allocation2 + $0x18] sm:$0xf]  ;;  %v4299_v44 = vld [vmem:[#allocation2 + $0x1c] sm:$0x1] }
 0x309   : > { %v4890_v21 = vrot.slane %v4888_v12, 5  ;;  %v4894_v22 = vrot.slane %v4892_v29, 4  ;;  %v4900_v13 = vrot.slane %v4898_v55, 5  ;;  %v9865_v26 = vrot.slane %v8659_v3, 6  ;;  %v4304_v42 = vld [vmem:[#allocation2 + $0x30] sm:$0xf] }
 0x30a   : > { %v8677_v39 = vsel %vm7311_vm9, %v4873_v31, %v4880_v30  ;;  %v4127_v62 = vrot.slane %v3986_v24, 7  ;;  %v4130_v43 = vrot.slane %v3987_v60, 7  ;;  %v4885_v53 = vor.u32 %v4884_v16, %v4880_v30  ;;  %v4305_v29 = vld [vmem:[#allocation2 + $0x34] sm:$0xf]  ;;  %v4235_v30 = vld [vmem:[#allocation2 + $0x2c] sm:$0x1] }
 0x30b   : > { %v5184_v14 = vmax.bf16 %v8677_v39, %v8657_v58  ;;  %v4895_v8 = vor.u32 %v4894_v22, %v4890_v21  ;;  %v5521_v2 = vrot.slane %v9865_v26, 4  ;;  %v5522_v31 = vrot.slane %v8661_v57, 6  ;;  %v4307_v16 = vld [vmem:[#allocation2 + $0x3c] sm:$0x1]  ;;  %v4233_v26 = vld [vmem:[#allocation2 + $0x24] sm:$0xf] }
 0x30c   : > { %v5525_v12 = vrot.slane %v8663_v17, 6  ;;  %v4128_v55 = vsel %vm7422_vm0, %v6549_v48, %v4127_v62  ;;  %v4129_v24 = vrot.slane %v4127_v62, 4  ;;  %v4886_v60 = vrot.slane %v4885_v53, 4 }
 0x30d   : > { %v4370_v11 = vmax.bf16 %v4298_v23, %v4226_v47  ;;  %4214 = vst.msk [vmem:[#allocation2 + $0xd4] sm:$0xf] %vm669_vm2, %v4128_v55  ;;  %v4896_v58 = vrot.slane %v4895_v8, 4  ;;  %v5523_v39 = vsel %vm7327_vm12, %v5521_v2, %v5522_v31  ;;  %v5524_v22 = vrot.slane %v5522_v31, 4  ;;  %v4260_v47 = vld [vmem:[#allocation2 + $0x90] sm:$0xf] }
 0x30e   : > { %v4371_v49 = vmax.bf16 %v4299_v44, %v4227_v7  ;;  %v4131_v17 = vsel %vm7422_vm0, %v4129_v24, %v4130_v43  ;;  %v4891_v62 = vsel %vm7311_vm9, %v4886_v60, %v4890_v21  ;;  %v8695_v53 = vmax.bf16 %v4304_v42, %v4232_v35  ;;  %v4332_v23 = vld [vmem:[#allocation2 + $0xa0] sm:$0xf]  ;;  %v4333_v8 = vld [vmem:[#allocation2 + $0xa4] sm:$0xf]  ;;  %v4234_v44 = vld [vmem:[#allocation2 + $0x28] sm:$0xf] }
 0x30f   : > { %v8697_v48 = vmax.bf16 %v4305_v29, %v4233_v26  ;;  %4215 = vst.msk [vmem:[#allocation2 + $0xd8] sm:$0xf] %vm669_vm2, %v4131_v17  ;;  %v6601_v2 = vcombine.low %v4128_v55, %v4131_v17  ;;  %v4901_v31 = vsel %vm7311_vm9, %v4896_v58, %v4900_v13  ;;  %v5185_v7 = vmax.bf16 %v4891_v62, %v8659_v3  ;;  %v4504_v21 = vld [vmem:[#allocation2 + $0x40] sm:$0xf]  ;;  %v4505_v24 = vld [vmem:[#allocation2 + $0x44] sm:$0xf] }
 0x310   : > { %v5526_v43 = vsel %vm7327_vm12, %v5524_v22, %v5525_v12  ;;  %v5186_v35 = vmax.bf16 %v4901_v31, %v8661_v57  ;;  %v8706_v26 = vmax.bf16 %v4306_v46, %v4234_v44  ;;  %v8708_v42 = vmax.bf16 %v4307_v16, %v4235_v30  ;;  %v4261_v13 = vld [vmem:[#allocation2 + $0x94] sm:$0xf]  ;;  %v4334_v60 = vld [vmem:[#allocation2 + $0xa8] sm:$0xf]  ;;  %v4507_v22 = vld [vmem:[#allocation2 + $0x4c] sm:$0x1] }
 0x311   : > { %10011 = vst [vmem:[#allocation19_spill] sm:$0xff] %v8697_v48  ;;  %v10014_v29 = vmax.bf16 %v8628_v51, %v8626_v38  ;;  %6820 = vmatprep.subr.msk.bf16.mxu1 %vm5723_vm5, %v6601_v2  ;;  %v5280_v58 = vrot.slane %v5185_v7, 5  ;;  %v10015_v12 = vmax.bf16 %v8644_v36, %v8637_v27  ;;  %v4506_v46 = vld [vmem:[#allocation2 + $0x48] sm:$0xf]  ;;  %v8719_v30 = vmax.bf16 %v4332_v23, %v4260_v47  ;;  %v4262_v2 = vld [vmem:[#allocation2 + $0x98] sm:$0xf] }
 0x312   : > { %10012 = vst [vmem:[#allocation23_spill] sm:$0xff] %v8706_v26  ;;  %10013 = vst [vmem:[#allocation22_spill] sm:$0xff] %v8708_v42  ;;  %v8721_v16 = vmax.bf16 %v4333_v8, %v4261_v13  ;;  %v5282_v38 = vrot.slane %v5186_v35, 5  ;;  %v4442_v51 = vmax.bf16 %v8706_v26, %v4370_v11  ;;  %v4443_v17 = vmax.bf16 %v8708_v42, %v4371_v49  ;;  %v2573_v26 = vld [vmem:[#allocation2 + $0x54] sm:$0xf] }
 0x313   : > { %v4440_v55 = vmax.bf16 %v8695_v53, %v10014_v29  ;;  %v4441_v57 = vmax.bf16 %v8697_v48, %v10015_v12  ;;  %10016 = vst [vmem:[#allocation17_spill] sm:$0xff] %v8719_v30  ;;  %v5281_v31 = vrot.slane %v5280_v58, 4  ;;  %v5392_v44 = vmax.bf16 %v5280_v58, %v5184_v14 }
 0x314   : > { %10017 = vst [vmem:[#allocation18_spill] sm:$0xff] %v8721_v16  ;;  %v8729_v27 = vmax.bf16 %v4334_v60, %v4262_v2  ;;  %v5284_v36 = vrot.slane %v5282_v38, 4  ;;  %v4570_v12 = vmax.bf16 %v4506_v46, %v4442_v51  ;;  %v4571_v47 = vmax.bf16 %v4507_v22, %v4443_v17 }
 0x315   : > { %v8725_v62 = vmax.bf16 %v4504_v21, %v4440_v55  ;;  %v8727_v29 = vmax.bf16 %v4505_v24, %v4441_v57  ;;  %v5283_v8 = vsel %vm7386_vm15, %v5281_v31, %v5282_v38  ;;  %v10019_v11 = vrot.slane %v8659_v3, 6 }
 0x316   : > { %10018 = vst [vmem:[#allocation8_spill] sm:$0xff] %v8729_v27  ;;  %v5393_v14 = vmax.bf16 %v5283_v8, %v5185_v7  ;;  %v5394_v24 = vmax.bf16 %v5284_v36, %v5186_v35  ;;  %v4648_v13 = vshll.u32 %v4570_v12, 16  ;;  %v4652_v60 = vshrl.u32 %v4570_v12, 16  ;;  %v4335_v7 = vld [vmem:[#allocation2 + $0xac] sm:$0x1] }
 0x317   : > { %v4633_v23 = vshrl.u32 %v8725_v62, 16  ;;  %v5648_v49 = vmax.bf16 %v10019_v11, %v5392_v44  ;;  %v4638_v21 = vshll.u32 %v8727_v29, 16  ;;  %v4642_v55 = vshrl.u32 %v8727_v29, 16  ;;  %v4263_v11 = vld [vmem:[#allocation2 + $0x9c] sm:$0x1] }
 0x318   : > { %v4658_v22 = vshll.u32 %v4571_v47, 16  ;;  %v5649_v51 = vmax.bf16 %v5523_v39, %v5393_v14  ;;  %v5650_v17 = vmax.bf16 %v5526_v43, %v5394_v24  ;;  %v4650_v2 = vrot.slane %v4648_v13, 5 }
 0x319   : > { %v6615_v58 = vrot.slane %v5648_v49, 11  ;;  %v4640_v57 = vrot.slane %v4638_v21, 5  ;;  %v4644_v46 = vrot.slane %v4642_v55, 4  ;;  %v4654_v50 = vrot.slane %v4652_v60, 4  ;;  %v4268_v21 = vld [vmem:[#allocation2 + $0xb0] sm:$0xf] }
 0x31a   : > { %v4660_v31 = vrot.slane %v4658_v22, 5  ;;  %v9869_v44 = vrot.slane %v8727_v29, 6  ;;  %v6158_v35 = vrot.slane %v5649_v51, 7  ;;  %v6161_v36 = vrot.slane %v5650_v17, 7  ;;  %v4340_v55 = vld [vmem:[#allocation2 + $0xc0] sm:$0xf] }
 0x31b   : > { %v4641_v3 = vsel %vm7311_vm9, %v4633_v23, %v4640_v57  ;;  %v4645_v38 = vor.u32 %v4644_v46, %v4640_v57  ;;  %v4655_v8 = vor.u32 %v4654_v50, %v4650_v2  ;;  %v5466_v14 = vrot.slane %v4570_v12, 6  ;;  %v4341_v23 = vld [vmem:[#allocation2 + $0xc4] sm:$0xf]  ;;  %v4271_v46 = vld [vmem:[#allocation2 + $0xbc] sm:$0x1] }
 0x31c   : > { %v5160_v49 = vmax.bf16 %v4641_v3, %v8725_v62  ;;  %v5465_v43 = vrot.slane %v9869_v44, 4  ;;  %v5469_v24 = vrot.slane %v4571_v47, 6  ;;  %v6159_v13 = vsel %vm7422_vm0, %v6615_v58, %v6158_v35  ;;  %v4342_v22 = vld [vmem:[#allocation2 + $0xc8] sm:$0xf]  ;;  %v2645_v50 = vld [vmem:[#allocation2 + $0x64] sm:$0xf] }
 0x31d   : > { %v4646_v39 = vrot.slane %v4645_v38, 4  ;;  %v6160_v60 = vrot.slane %v6158_v35, 4  ;;  %v4656_v57 = vrot.slane %v4655_v8, 4  ;;  %v8746_v51 = vmax.bf16 %v4335_v7, %v4263_v11  ;;  %v4269_v38 = vld [vmem:[#allocation2 + $0xb4] sm:$0xf] }
 0x31e   : > { %v5467_v17 = vsel %vm7327_vm12, %v5465_v43, %v5466_v14  ;;  %v5468_v3 = vrot.slane %v5466_v14, 4  ;;  %v4343_v47 = vld [vmem:[#allocation2 + $0xcc] sm:$0x1]  ;;  %v8752_v44 = vmax.bf16 %v4340_v55, %v4268_v21  ;;  %v4270_v7 = vld [vmem:[#allocation2 + $0xb8] sm:$0xf]  ;;  %v8759_v8 = vmax.bf16 %v4341_v23, %v4269_v38 }
 0x31f   : > { %10020 = vst [vmem:[#allocation27_spill] sm:$0xff] %v8746_v51  ;;  %v4651_v62 = vsel %vm7311_vm9, %v4646_v39, %v4650_v2  ;;  %v6162_v58 = vsel %vm7422_vm0, %v6160_v60, %v6161_v36  ;;  %v4661_v35 = vsel %vm7311_vm9, %v4656_v57, %v4660_v31  ;;  %v2572_v2 = vld [vmem:[#allocation2 + $0x50] sm:$0xf]  ;;  %v2644_v39 = vld [vmem:[#allocation2 + $0x60] sm:$0xf]  ;;  %v8763_v21 = vmax.bf16 %v4342_v22, %v4270_v7 }
 0x320   : > { %v5161_v11 = vmax.bf16 %v4651_v62, %v8727_v29  ;;  %v6632_v42 = vcombine.low %v6159_v13, %v6162_v58  ;;  %v5162_v43 = vmax.bf16 %v4661_v35, %v4570_v12  ;;  %v5470_v14 = vsel %vm7327_vm12, %v5468_v3, %v5469_v24  ;;  %v4540_v55 = vld [vmem:[#allocation2 + $0xd0] sm:$0xf]  ;;  %v2646_v36 = vld [vmem:[#allocation2 + $0x68] sm:$0xf]  ;;  %v4541_v57 = vld [vmem:[#allocation2 + $0xd4] sm:$0xf] }
 0x321   : > { %v8765_v48 = vmax.bf16 %v4343_v47, %v4271_v46  ;;  %v4476_v31 = vmax.bf16 %v8752_v44, %v8719_v30  ;;  %v4477_v23 = vmax.bf16 %v8759_v8, %v8721_v16  ;;  %v4542_v13 = vld [vmem:[#allocation2 + $0xd8] sm:$0xf]  ;;  %v4478_v24 = vmax.bf16 %v8763_v21, %v8729_v27  ;;  %v4543_v22 = vld [vmem:[#allocation2 + $0xdc] sm:$0x1] }
 0x322   : > { %v5240_v60 = vrot.slane %v5161_v11, 5  ;;  %6825 = vmatprep.subr.msk.bf16.mxu0 %vm5723_vm5, %v6632_v42  ;;  %v5242_v12 = vrot.slane %v5162_v43, 5  ;;  %v8774_v62 = vmax.bf16 %v2644_v39, %v2572_v2  ;;  %v8776_v3 = vmax.bf16 %v2645_v50, %v2573_v26  ;;  %v2574_v35 = vld [vmem:[#allocation2 + $0x58] sm:$0xf] }
 0x323   : > { %10021 = vst [vmem:[#allocation28_spill] sm:$0xff] %v8765_v48  ;;  %v4479_v47 = vmax.bf16 %v8765_v48, %v8746_v51  ;;  %v8780_v58 = vmax.bf16 %v4540_v55, %v4476_v31  ;;  %v8782_v16 = vmax.bf16 %v4541_v57, %v4477_v23  ;;  %v4606_v42 = vmax.bf16 %v4542_v13, %v4478_v24 }
 0x324   : > { %10022 = vst [vmem:[#allocation29_spill] sm:$0xff] %v8776_v3  ;;  %v5241_v46 = vrot.slane %v5240_v60, 4  ;;  %v5368_v38 = vmax.bf16 %v5240_v60, %v5160_v49  ;;  %v5244_v7 = vrot.slane %v5242_v12, 4  ;;  %v8784_v30 = vmax.bf16 %v2646_v36, %v2574_v35 }
 0x325   : > { %v10024_v26 = vrot.slane %v8727_v29, 6  ;;  %v4607_v39 = vmax.bf16 %v4543_v22, %v4479_v47  ;;  %v4903_v49 = vshrl.u32 %v8780_v58, 16  ;;  %v4908_v55 = vshll.u32 %v8782_v16, 16 }
 0x326   : > { %10023 = vst [vmem:[#allocation30_spill] sm:$0xff] %v8784_v30  ;;  %v5243_v2 = vsel %vm7386_vm15, %v5241_v46, %v5242_v12  ;;  %v5370_v51 = vmax.bf16 %v5244_v7, %v5162_v43  ;;  %v4912_v31 = vshrl.u32 %v8782_v16, 16  ;;  %v4918_v57 = vshll.u32 %v4606_v42, 16 }
 0x327   : > { %v5624_v50 = vmax.bf16 %v10024_v26, %v5368_v38  ;;  %v5369_v60 = vmax.bf16 %v5243_v2, %v5161_v11  ;;  %v4922_v13 = vshrl.u32 %v4606_v42, 16  ;;  %v4928_v36 = vshll.u32 %v4607_v39, 16  ;;  %v2575_v2 = vld [vmem:[#allocation2 + $0x5c] sm:$0x1]  ;;  %v2647_v26 = vld [vmem:[#allocation2 + $0x6c] sm:$0x1] }
 0x328   : > { %v5626_v35 = vmax.bf16 %v5470_v14, %v5370_v51  ;;  %v4910_v27 = vrot.slane %v4908_v55, 5  ;;  %v4914_v12 = vrot.slane %v4912_v31, 4  ;;  %v4920_v46 = vrot.slane %v4918_v57, 5 }
 0x329   : > { %v6607_v23 = vrot.slane %v5624_v50, 11  ;;  %v5625_v24 = vmax.bf16 %v5467_v17, %v5369_v60  ;;  %v4924_v29 = vrot.slane %v4922_v13, 4  ;;  %v4930_v38 = vrot.slane %v4928_v36, 5 }
 0x32a   : > { %v5527_v22 = vrot.slane %v8782_v16, 6  ;;  %v6105_v11 = vrot.slane %v5626_v35, 7  ;;  %v4911_v43 = vsel %vm7311_vm9, %v4903_v49, %v4910_v27  ;;  %v4915_v7 = vor.u32 %v4914_v12, %v4910_v27  ;;  %v2844_v27 = vld [vmem:[#allocation2 + $0x70] sm:$0xf]  ;;  %v2845_v35 = vld [vmem:[#allocation2 + $0x74] sm:$0xf] }
 0x32b   : > { %v6102_v47 = vrot.slane %v5625_v24, 7  ;;  %v4925_v50 = vor.u32 %v4924_v29, %v4920_v46  ;;  %v5187_v48 = vmax.bf16 %v4911_v43, %v8780_v58  ;;  %v5529_v51 = vrot.slane %v4606_v42, 6  ;;  %v2608_v12 = vld [vmem:[#allocation2 + $0xe0] sm:$0xf]  ;;  %v2680_v29 = vld [vmem:[#allocation2 + $0xf0] sm:$0xf] }
 0x32c   : > { %v5528_v17 = vrot.slane %v5527_v22, 4  ;;  %v4916_v55 = vrot.slane %v4915_v7, 4  ;;  %v5532_v31 = vrot.slane %v4607_v39, 6  ;;  %v8801_v49 = vmax.bf16 %v2647_v26, %v2575_v2  ;;  %v2846_v2 = vld [vmem:[#allocation2 + $0x78] sm:$0xf] }
 0x32d   : > { %v6103_v14 = vsel %vm7422_vm0, %v6607_v23, %v6102_v47  ;;  %v6104_v60 = vrot.slane %v6102_v47, 4  ;;  %v4926_v57 = vrot.slane %v4925_v50, 4  ;;  %v5531_v36 = vrot.slane %v5529_v51, 4 }
 0x32e   : > { %v5530_v13 = vsel %vm7327_vm12, %v5528_v17, %v5529_v51  ;;  %10025 = vst [vmem:[#allocation31_spill] sm:$0xff] %v8801_v49  ;;  %v4921_v58 = vsel %vm7311_vm9, %v4916_v55, %v4920_v46  ;;  %v2780_v23 = vmax.bf16 %v8774_v62, %v8415_v6  ;;  %v2781_v39 = vmax.bf16 %v8776_v3, %v8423_v34  ;;  %v2847_v46 = vld [vmem:[#allocation2 + $0x7c] sm:$0x1] }
 0x32f   : > { %v6106_v24 = vsel %vm7422_vm0, %v6104_v60, %v6105_v11  ;;  %v4931_v43 = vsel %vm7311_vm9, %v4926_v57, %v4930_v38  ;;  %v5188_v7 = vmax.bf16 %v4921_v58, %v8782_v16  ;;  %v5533_v11 = vsel %vm7327_vm12, %v5531_v36, %v5532_v31 }
 0x330   : > { %v6624_v47 = vcombine.low %v6103_v14, %v6106_v24  ;;  %v5189_v26 = vmax.bf16 %v4931_v43, %v4606_v42  ;;  %v2782_v6 = vmax.bf16 %v8784_v30, %v8427_v41  ;;  %v2783_v34 = vmax.bf16 %v8801_v49, %v8429_v19 }
 0x331   : > { %v8820_v50 = vmax.bf16 %v2844_v27, %v2780_v23  ;;  %v5285_v51 = vrot.slane %v5188_v7, 5  ;;  %v8823_v38 = vmax.bf16 %v2845_v35, %v2781_v39  ;;  %v8825_v16 = vmax.bf16 %v2680_v29, %v2608_v12 }
 0x332   : > { %v6266_v17 = vsel %vm5723_vm5, %v6624_v47, 0  ;;  %v5287_v14 = vrot.slane %v5189_v26, 5  ;;  %v2910_v60 = vmax.bf16 %v2846_v2, %v2782_v6  ;;  %v2911_v55 = vmax.bf16 %v2847_v46, %v2783_v34 }
 0x333   : > { %6749 = vmatpush3.bf16.xpose.msra.mxu0 %v6266_v17  ;;  %v3051_v42 = vshrl.u32 %v8820_v50, 16  ;;  %v5286_v31 = vrot.slane %v5285_v51, 4  ;;  %v5395_v41 = vmax.bf16 %v5285_v51, %v5187_v48  ;;  %v3056_v57 = vshll.u32 %v8823_v38, 16  ;;  %v2681_v17 = vld [vmem:[#allocation2 + $0xf4] sm:$0xf] }
 0x334   : > { %v3060_v19 = vshrl.u32 %v8823_v38, 16  ;;  %v5289_v36 = vrot.slane %v5287_v14, 4  ;;  %v3066_v27 = vshll.u32 %v2910_v60, 16  ;;  %v3070_v24 = vshrl.u32 %v2910_v60, 16 }
 0x335   : > { %v3076_v58 = vshll.u32 %v2911_v55, 16  ;;  %v5288_v23 = vsel %vm7386_vm15, %v5286_v31, %v5287_v14  ;;  %v5651_v39 = vmax.bf16 %v5527_v22, %v5395_v41  ;;  %v3058_v35 = vrot.slane %v3056_v57, 5  ;;  %v2609_v14 = vld [vmem:[#allocation2 + $0xe4] sm:$0xf]  ;;  %v2610_v22 = vld [vmem:[#allocation2 + $0xe8] sm:$0xf] }
 0x336   : > { %v3062_v12 = vrot.slane %v3060_v19, 4  ;;  %v5396_v29 = vmax.bf16 %v5288_v23, %v5188_v7  ;;  %v5397_v47 = vmax.bf16 %v5289_v36, %v5189_v26  ;;  %v3068_v43 = vrot.slane %v3066_v27, 5  ;;  %v2682_v31 = vld [vmem:[#allocation2 + $0xf8] sm:$0xf]  ;;  %v2611_v19 = vld [vmem:[#allocation2 + $0xec] sm:$0x1] }
 0x337   : > { %v3072_v2 = vrot.slane %v3070_v24, 4  ;;  %v6616_v46 = vrot.slane %v5651_v39, 11  ;;  %v3059_v48 = vsel %vm7311_vm9, %v3051_v42, %v3058_v35  ;;  %v3078_v34 = vrot.slane %v3076_v58, 5  ;;  %v2683_v24 = vld [vmem:[#allocation2 + $0xfc] sm:$0x1] }
 0x338   : > { %v3063_v6 = vor.u32 %v3062_v12, %v3058_v35  ;;  %v5652_v51 = vmax.bf16 %v5530_v13, %v5396_v29  ;;  %v5653_v49 = vmax.bf16 %v5533_v11, %v5397_v47  ;;  %v3497_v3 = vmax.bf16 %v3059_v48, %v8820_v50 }
 0x339   : > { %v3073_v30 = vor.u32 %v3072_v2, %v3068_v43  ;;  %v3813_v7 = vrot.slane %v8823_v38, 6  ;;  %v3815_v26 = vrot.slane %v2910_v60, 6  ;;  %v3818_v57 = vrot.slane %v2911_v55, 6  ;;  %v2883_v2 = vld [vmem:[#allocation2 + $0x10c] sm:$0x1] }
 0x33a   : > { %v3064_v41 = vrot.slane %v3063_v6, 4  ;;  %v6165_v36 = vrot.slane %v5652_v51, 7  ;;  %v6168_v27 = vrot.slane %v5653_v49, 7  ;;  %v8836_v58 = vmax.bf16 %v2681_v17, %v2609_v14 }
 0x33b   : > { %v3074_v42 = vrot.slane %v3073_v30, 4  ;;  %v3814_v11 = vrot.slane %v3813_v7, 4  ;;  %v3817_v50 = vrot.slane %v3815_v26, 4  ;;  %v8840_v23 = vmax.bf16 %v2682_v31, %v2610_v22  ;;  %v2881_v31 = vld [vmem:[#allocation2 + $0x104] sm:$0xf] }
 0x33c   : > { %v3069_v13 = vsel %vm7311_vm9, %v3064_v41, %v3068_v43  ;;  %v6166_v39 = vsel %vm7422_vm0, %v6616_v46, %v6165_v36  ;;  %v6167_v35 = vrot.slane %v6165_v36, 4  ;;  %v8851_v47 = vmax.bf16 %v2683_v24, %v2611_v19  ;;  %v2880_v43 = vld [vmem:[#allocation2 + $0x100] sm:$0xf] }
 0x33d   : > { %v3079_v55 = vsel %vm7311_vm9, %v3074_v42, %v3078_v34  ;;  %v3498_v49 = vmax.bf16 %v3069_v13, %v8823_v38  ;;  %v3816_v12 = vsel %vm7327_vm12, %v3814_v11, %v3815_v26  ;;  %v3819_v29 = vsel %vm7327_vm12, %v3817_v50, %v3818_v57  ;;  %v8861_v34 = vld [vmem:[#allocation2 + $0x20] sm:$0xf]  ;;  %v2882_v57 = vld [vmem:[#allocation2 + $0x108] sm:$0xf] }
 0x33e   : > { %v3499_v30 = vmax.bf16 %v3079_v55, %v2910_v60  ;;  %v6169_v46 = vsel %vm7422_vm0, %v6167_v35, %v6168_v27  ;;  %v2816_v6 = vmax.bf16 %v8825_v16, %v8439_v28  ;;  %v2817_v38 = vmax.bf16 %v8836_v58, %v8452_v52  ;;  %v8859_v60 = vld [vmem:[#allocation2 + $0x10] sm:$0xf] }
 0x33f   : > { %v3583_v48 = vrot.slane %v3498_v49, 5  ;;  %v6633_v17 = vcombine.low %v6166_v39, %v6169_v46  ;;  %v2818_v14 = vmax.bf16 %v8840_v23, %v8454_v37  ;;  %v2819_v22 = vmax.bf16 %v8851_v47, %v8458_v25  ;;  %v8886_v46 = vld [vmem:[#allocation2 + $0x14] sm:$0xf] }
 0x340   : > { %v3585_v51 = vrot.slane %v3499_v30, 5  ;;  %v8867_v28 = vmax.bf16 %v2880_v43, %v2816_v6  ;;  %v8869_v19 = vmax.bf16 %v2881_v31, %v2817_v38  ;;  %v4372_v37 = vmax.bf16 %v8861_v34, %v8859_v60  ;;  %v4274_v60 = vld [vmem:[#allocation2 + $0xc8] sm:$0xf] }
 0x341   : > { %v3584_v41 = vrot.slane %v3583_v48, 4  ;;  %v3705_v26 = vmax.bf16 %v3583_v48, %v3497_v3  ;;  %6826 = vmatprep.subr.msk.bf16.mxu0 %vm5723_vm5, %v6633_v17  ;;  %v8872_v36 = vmax.bf16 %v2882_v57, %v2818_v14  ;;  %v8874_v27 = vmax.bf16 %v2883_v2, %v2819_v22  ;;  %v8888_v48 = vld [vmem:[#allocation2 + $0x24] sm:$0xf] }
 0x342   : > { %v3587_v52 = vrot.slane %v3585_v51, 4  ;;  %v3321_v3 = vshrl.u32 %v8867_v28, 16  ;;  %v3326_v24 = vshll.u32 %v8869_v19, 16  ;;  %v3330_v50 = vshrl.u32 %v8869_v19, 16 }
 0x343   : > { %v3586_v25 = vsel %vm7386_vm15, %v3584_v41, %v3585_v51  ;;  %v3961_v42 = vmax.bf16 %v3813_v7, %v3705_v26  ;;  %v3336_v39 = vshll.u32 %v8872_v36, 16  ;;  %v3340_v43 = vshrl.u32 %v8872_v36, 16  ;;  %v4231_v41 = vld [vmem:[#allocation2 + $0x1c] sm:$0x1] }
 0x344   : > { %v3706_v13 = vmax.bf16 %v3586_v25, %v3498_v49  ;;  %v3707_v11 = vmax.bf16 %v3587_v52, %v3499_v30  ;;  %v3328_v55 = vrot.slane %v3326_v24, 5  ;;  %v3346_v2 = vshll.u32 %v8874_v27, 16  ;;  %v4230_v49 = vld [vmem:[#allocation2 + $0x18] sm:$0xf]  ;;  %v4302_v30 = vld [vmem:[#allocation2 + $0x28] sm:$0xf] }
 0x345   : > { %v6541_v35 = vrot.slane %v3961_v42, 11  ;;  %v3332_v38 = vrot.slane %v3330_v50, 4  ;;  %v3338_v17 = vrot.slane %v3336_v39, 5  ;;  %v3342_v14 = vrot.slane %v3340_v43, 4  ;;  %v4303_v25 = vld [vmem:[#allocation2 + $0x2c] sm:$0x1] }
 0x346   : > { %v3962_v7 = vmax.bf16 %v3816_v12, %v3706_v13  ;;  %v3963_v6 = vmax.bf16 %v3819_v29, %v3707_v11  ;;  %v8892_v51 = vsel %vm7311_vm9, %v3321_v3, %v3328_v55  ;;  %v3348_v22 = vrot.slane %v3346_v2, 5  ;;  %v4236_v29 = vld [vmem:[#allocation2 + $0x30] sm:$0xf]  ;;  %v4308_v11 = vld [vmem:[#allocation2 + $0x40] sm:$0xf] }
 0x347   : > { %v9881_v31 = vrot.slane %v8869_v19, 6  ;;  %v3333_v52 = vor.u32 %v3332_v38, %v3328_v55  ;;  %v3524_v12 = vmax.bf16 %v8892_v51, %v8867_v28  ;;  %v3343_v42 = vor.u32 %v3342_v14, %v3338_v17  ;;  %v4239_v55 = vld [vmem:[#allocation2 + $0x3c] sm:$0x1]  ;;  %v4311_v2 = vld [vmem:[#allocation2 + $0x4c] sm:$0x1] }
 0x348   : > { %v4071_v26 = vrot.slane %v3962_v7, 7  ;;  %v4074_v57 = vrot.slane %v3963_v6, 7  ;;  %v3878_v3 = vrot.slane %v8872_v36, 6  ;;  %v3881_v13 = vrot.slane %v8874_v27, 6  ;;  %v4309_v51 = vld [vmem:[#allocation2 + $0x44] sm:$0xf] }
 0x349   : > { %v3877_v24 = vrot.slane %v9881_v31, 4  ;;  %v3334_v43 = vrot.slane %v3333_v52, 4  ;;  %v4373_v28 = vmax.bf16 %v8888_v48, %v8886_v46  ;;  %v3344_v7 = vrot.slane %v3343_v42, 4  ;;  %v4310_v27 = vld [vmem:[#allocation2 + $0x48] sm:$0xf] }
 0x34a   : > { %v4072_v50 = vsel %vm7422_vm0, %v6541_v35, %v4071_v26  ;;  %v4073_v39 = vrot.slane %v4071_v26, 4  ;;  %v3880_v38 = vrot.slane %v3878_v3, 4  ;;  %v4374_v14 = vmax.bf16 %v4302_v30, %v4230_v49  ;;  %v4272_v46 = vld [vmem:[#allocation2 + $0xc0] sm:$0xf]  ;;  %v4344_v48 = vld [vmem:[#allocation2 + $0xd0] sm:$0xf] }
 0x34b   : > { %4198 = vst.msk [vmem:[#allocation2 + $0x54] sm:$0xf] %vm669_vm2, %v4072_v50  ;;  %v3879_v6 = vsel %vm7327_vm12, %v3877_v24, %v3878_v3  ;;  %v3339_v26 = vsel %vm7311_vm9, %v3334_v43, %v3338_v17  ;;  %v4375_v52 = vmax.bf16 %v4303_v25, %v4231_v41  ;;  %v8912_v31 = vmax.bf16 %v4308_v11, %v4236_v29  ;;  %v4237_v30 = vld [vmem:[#allocation2 + $0x34] sm:$0xf]  ;;  %v4511_v11 = vld [vmem:[#allocation2 + $0x5c] sm:$0x1] }
 0x34c   : > { %v4075_v35 = vsel %vm7422_vm0, %v4073_v39, %v4074_v57  ;;  %v3349_v24 = vsel %vm7311_vm9, %v3344_v7, %v3348_v22  ;;  %v3525_v3 = vmax.bf16 %v3339_v26, %v8869_v19  ;;  %v3882_v49 = vsel %vm7327_vm12, %v3880_v38, %v3881_v13  ;;  %v4238_v57 = vld [vmem:[#allocation2 + $0x38] sm:$0xf]  ;;  %v4508_v39 = vld [vmem:[#allocation2 + $0x50] sm:$0xf]  ;;  %v4345_v43 = vld [vmem:[#allocation2 + $0xd4] sm:$0xf] }
 0x34d   : > { %4199 = vst.msk [vmem:[#allocation2 + $0x58] sm:$0xf] %vm669_vm2, %v4075_v35  ;;  %v6593_v42 = vcombine.low %v4072_v50, %v4075_v35  ;;  %v3526_v17 = vmax.bf16 %v3349_v24, %v8872_v36  ;;  %v8921_v41 = vmax.bf16 %v4309_v51, %v4237_v30  ;;  %v8923_v29 = vmax.bf16 %v4310_v27, %v4238_v57  ;;  %v4275_v50 = vld [vmem:[#allocation2 + $0xcc] sm:$0x1]  ;;  %v4346_v38 = vld [vmem:[#allocation2 + $0xd8] sm:$0xf] }
 0x34e   : > { %v8925_v25 = vmax.bf16 %v4311_v2, %v4239_v55  ;;  %v3628_v7 = vrot.slane %v3525_v3, 5  ;;  %v4444_v13 = vmax.bf16 %v8912_v31, %v4372_v37  ;;  %v4347_v35 = vld [vmem:[#allocation2 + $0xdc] sm:$0x1]  ;;  %v8932_v36 = vmax.bf16 %v4344_v48, %v4272_v46  ;;  %v4273_v26 = vld [vmem:[#allocation2 + $0xc4] sm:$0xf] }
 0x34f   : > { %v5971_v22 = vsel %vm5723_vm5, %v6593_v42, 0  ;;  %v3630_v51 = vrot.slane %v3526_v17, 5  ;;  %v4445_v55 = vmax.bf16 %v8921_v41, %v4373_v28  ;;  %v4446_v2 = vmax.bf16 %v8923_v29, %v4374_v14 }
 0x350   : > { %10026 = vst [vmem:[#allocation32_spill] sm:$0xff] %v8925_v25  ;;  %6737 = vmatpush3.bf16.xpose.msra.mxu1 %v5971_v22  ;;  %v4447_v27 = vmax.bf16 %v8925_v25, %v4375_v52  ;;  %v3629_v42 = vrot.slane %v3628_v7, 4  ;;  %v3732_v24 = vmax.bf16 %v3628_v7, %v3524_v12  ;;  %v8937_v30 = vmax.bf16 %v4508_v39, %v4444_v13 }
 0x351   : > { %v8939_v34 = vmax.bf16 %v4345_v43, %v4273_v26  ;;  %v3632_v37 = vrot.slane %v3630_v51, 4  ;;  %v8941_v48 = vmax.bf16 %v4346_v38, %v4274_v60  ;;  %v8943_v22 = vmax.bf16 %v4347_v35, %v4275_v50 }
 0x352   : > { %v4509_v57 = vld [vmem:[#allocation2 + $0x54] sm:$0xf]  ;;  %v4575_v46 = vmax.bf16 %v4511_v11, %v4447_v27  ;;  %v3631_v28 = vsel %vm7386_vm15, %v3629_v42, %v3630_v51  ;;  %v10027_v14 = vrot.slane %v8869_v19, 6  ;;  %v4663_v12 = vshrl.u32 %v8937_v30, 16 }
 0x353   : > { %v8949_v25 = vmax.bf16 %v4509_v57, %v4445_v55  ;;  %v3733_v39 = vmax.bf16 %v3631_v28, %v3525_v3  ;;  %v3734_v43 = vmax.bf16 %v3632_v37, %v3526_v17 }
 0x354   : > { %v3988_v52 = vmax.bf16 %v10027_v14, %v3732_v24  ;;  %v4510_v7 = vld [vmem:[#allocation2 + $0x58] sm:$0xf]  ;;  %v4688_v13 = vshll.u32 %v4575_v46, 16  ;;  %v5476_v26 = vrot.slane %v4575_v46, 6 }
 0x355   : > { %v4574_v38 = vmax.bf16 %v4510_v7, %v4446_v2  ;;  %v4668_v50 = vshll.u32 %v8949_v25, 16  ;;  %v4672_v35 = vshrl.u32 %v8949_v25, 16  ;;  %v3989_v27 = vmax.bf16 %v3879_v6, %v3733_v39 }
 0x356   : > { %v6550_v11 = vrot.slane %v3988_v52, 11  ;;  %v3990_v51 = vmax.bf16 %v3882_v49, %v3734_v43  ;;  %v4690_v42 = vrot.slane %v4688_v13, 5  ;;  %v5471_v19 = vrot.slane %v8949_v25, 6 }
 0x357   : > { %v4670_v55 = vrot.slane %v4668_v50, 5  ;;  %v4674_v24 = vrot.slane %v4672_v35, 4  ;;  %v4678_v60 = vshll.u32 %v4574_v38, 16  ;;  %v4682_v57 = vshrl.u32 %v4574_v38, 16  ;;  %v4544_v35 = vld [vmem:[#allocation2 + $0xe0] sm:$0xf] }
 0x358   : > { %v4134_v3 = vrot.slane %v3989_v27, 7  ;;  %v4137_v17 = vrot.slane %v3990_v51, 7  ;;  %v5472_v37 = vrot.slane %v5471_v19, 4  ;;  %v5473_v46 = vrot.slane %v4574_v38, 6  ;;  %v4547_v27 = vld [vmem:[#allocation2 + $0xec] sm:$0x1] }
 0x359   : > { %v4671_v2 = vsel %vm7311_vm9, %v4663_v12, %v4670_v55  ;;  %v4675_v28 = vor.u32 %v4674_v24, %v4670_v55  ;;  %v4680_v14 = vrot.slane %v4678_v60, 5  ;;  %v4684_v6 = vrot.slane %v4682_v57, 4 }
 0x35a   : > { %v4135_v49 = vsel %vm7422_vm0, %v6550_v11, %v4134_v3  ;;  %v4136_v52 = vrot.slane %v4134_v3, 4  ;;  %v5163_v39 = vmax.bf16 %v4671_v2, %v8937_v30  ;;  %v5474_v43 = vsel %vm7327_vm12, %v5472_v37, %v5473_v46  ;;  %v10029_v2 = vld [vmem:[#allocation14_spill] sm:$0xff] }
 0x35b   : > { %4216 = vst.msk [vmem:[#allocation2 + $0xe4] sm:$0xf] %vm669_vm2, %v4135_v49  ;;  %v4676_v7 = vrot.slane %v4675_v28, 4  ;;  %v4685_v13 = vor.u32 %v4684_v6, %v4680_v14  ;;  %v5475_v50 = vrot.slane %v5473_v46, 4  ;;  %v4480_v12 = vmax.bf16 %v8932_v36, %v8622_v5  ;;  %v10031_v6 = vld [vmem:[#allocation16_spill] sm:$0xff] }
 0x35c   : > { %v4138_v51 = vsel %vm7422_vm0, %v4136_v52, %v4137_v17  ;;  %v4481_v11 = vmax.bf16 %v8939_v34, %v8624_v1  ;;  %v4482_v30 = vmax.bf16 %v8941_v48, %v8640_v9  ;;  %v4483_v55 = vmax.bf16 %v8943_v22, %v8642_v32  ;;  %v10028_v9 = vld [vmem:[#allocation3_spill] sm:$0xff] }
 0x35d   : > { %4217 = vst.msk [vmem:[#allocation2 + $0xe8] sm:$0xf] %vm669_vm2, %v4138_v51  ;;  %v6602_v24 = vcombine.low %v4135_v49, %v4138_v51  ;;  %v4681_v5 = vsel %vm7311_vm9, %v4676_v7, %v4680_v14  ;;  %v4686_v60 = vrot.slane %v4685_v13, 4  ;;  %v5477_v57 = vsel %vm7327_vm12, %v5475_v50, %v5476_v26  ;;  %v2848_v32 = vld [vmem:[#allocation2 + $0x80] sm:$0xf]  ;;  %v10030_v26 = vld [vmem:[#allocation21_spill] sm:$0xff] }
 0x35e   : > { %v5164_v3 = vmax.bf16 %v4681_v5, %v8949_v25  ;;  %v8981_v17 = vmax.bf16 %v4544_v35, %v4480_v12  ;;  %v8983_v1 = vmax.bf16 %v4547_v27, %v4483_v55  ;;  %v2784_v37 = vmax.bf16 %v10028_v9, %v8487_v15  ;;  %v2851_v50 = vld [vmem:[#allocation2 + $0x8c] sm:$0x1] }
 0x35f   : > { %6821 = vmatprep.subr.msk.bf16.mxu1 %vm5723_vm5, %v6602_v24  ;;  %v4691_v46 = vsel %vm7311_vm9, %v4686_v60, %v4690_v42  ;;  %v2785_v28 = vmax.bf16 %v10029_v2, %v8491_v10  ;;  %v2786_v14 = vmax.bf16 %v10030_v26, %v8518_v45  ;;  %v2787_v49 = vmax.bf16 %v10031_v6, %v8520_v63 }
 0x360   : > { %v5165_v52 = vmax.bf16 %v4691_v46, %v4574_v38  ;;  %v5245_v7 = vrot.slane %v5164_v3, 5  ;;  %v4933_v13 = vshrl.u32 %v8981_v17, 16  ;;  %v4958_v15 = vshll.u32 %v8983_v1, 16 }
 0x361   : > { %v5539_v12 = vrot.slane %v8983_v1, 6  ;;  %v8999_v35 = vmax.bf16 %v2848_v32, %v2784_v37  ;;  %v9002_v42 = vmax.bf16 %v8285_v20, %v2785_v28  ;;  %v9005_v10 = vmax.bf16 %v8297_v56, %v2786_v14 }
 0x362   : > { %v5246_v45 = vrot.slane %v5245_v7, 4  ;;  %v5247_v27 = vrot.slane %v5165_v52, 5  ;;  %v5371_v63 = vmax.bf16 %v5245_v7, %v5163_v39  ;;  %v4545_v38 = vld [vmem:[#allocation2 + $0xe4] sm:$0xf]  ;;  %v4960_v51 = vrot.slane %v4958_v15, 5 }
 0x363   : > { %v9007_v55 = vmax.bf16 %v4545_v38, %v4481_v11  ;;  %v9009_v24 = vmax.bf16 %v2851_v50, %v2787_v49  ;;  %v3081_v5 = vshrl.u32 %v8999_v35, 16  ;;  %v3086_v60 = vshll.u32 %v9002_v42, 16 }
 0x364   : > { %v5248_v20 = vsel %vm7386_vm15, %v5246_v45, %v5247_v27  ;;  %v5249_v1 = vrot.slane %v5247_v27, 4  ;;  %v5627_v56 = vmax.bf16 %v5471_v19, %v5371_v63  ;;  %v4546_v9 = vld [vmem:[#allocation2 + $0xe8] sm:$0xf]  ;;  %v3090_v39 = vshrl.u32 %v9002_v42, 16 }
 0x365   : > { %v5372_v37 = vmax.bf16 %v5248_v20, %v5164_v3  ;;  %v4610_v32 = vmax.bf16 %v4546_v9, %v4482_v30  ;;  %v4938_v11 = vshll.u32 %v9007_v55, 16  ;;  %v4942_v46 = vshrl.u32 %v9007_v55, 16 }
 0x366   : > { %v5373_v2 = vmax.bf16 %v5249_v1, %v5165_v52  ;;  %v6608_v28 = vrot.slane %v5627_v56, 11  ;;  %v5534_v26 = vrot.slane %v9007_v55, 6  ;;  %v3088_v14 = vrot.slane %v3086_v60, 5 }
 0x367   : > { %v5628_v6 = vmax.bf16 %v5474_v43, %v5372_v37  ;;  %v4940_v49 = vrot.slane %v4938_v11, 5  ;;  %v4944_v7 = vrot.slane %v4942_v46, 4  ;;  %v4948_v15 = vshll.u32 %v4610_v32, 16 }
 0x368   : > { %v5629_v25 = vmax.bf16 %v5477_v57, %v5373_v2  ;;  %v4952_v19 = vshrl.u32 %v4610_v32, 16  ;;  %v5535_v50 = vrot.slane %v5534_v26, 4  ;;  %v5536_v45 = vrot.slane %v4610_v32, 6 }
 0x369   : > { %v6109_v27 = vrot.slane %v5628_v6, 7  ;;  %v4941_v30 = vsel %vm7311_vm9, %v4933_v13, %v4940_v49  ;;  %v4945_v3 = vor.u32 %v4944_v7, %v4940_v49  ;;  %v4950_v63 = vrot.slane %v4948_v15, 5 }
 0x36a   : > { %v6112_v38 = vrot.slane %v5629_v25, 7  ;;  %v4954_v52 = vrot.slane %v4952_v19, 4  ;;  %v5190_v20 = vmax.bf16 %v4941_v30, %v8981_v17  ;;  %v9026_v43 = vsel %vm7327_vm12, %v5535_v50, %v5536_v45 }
 0x36b   : > { %v6110_v57 = vsel %vm7422_vm0, %v6608_v28, %v6109_v27  ;;  %v6111_v60 = vrot.slane %v6109_v27, 4  ;;  %v4946_v1 = vrot.slane %v4945_v3, 4  ;;  %v5538_v56 = vrot.slane %v5536_v45, 4 }
 0x36c   : > { %v4955_v9 = vor.u32 %v4954_v52, %v4950_v63  ;;  %v3089_v13 = vsel %vm7311_vm9, %v3081_v5, %v3088_v14  ;;  %v3092_v37 = vrot.slane %v3090_v39, 4  ;;  %v3096_v11 = vshll.u32 %v9005_v10, 16 }
 0x36d   : > { %v6113_v17 = vsel %vm7422_vm0, %v6111_v60, %v6112_v38  ;;  %v4951_v46 = vsel %vm7311_vm9, %v4946_v1, %v4950_v63  ;;  %v5540_v2 = vsel %vm7327_vm12, %v5538_v56, %v5539_v12  ;;  %v3100_v28 = vshrl.u32 %v9005_v10, 16  ;;  %v2684_v38 = vld [vmem:[#allocation2 + $0x100] sm:$0xf] }
 0x36e   : > { %v6625_v6 = vcombine.low %v6110_v57, %v6113_v17  ;;  %v4956_v49 = vrot.slane %v4955_v9, 4  ;;  %v5191_v7 = vmax.bf16 %v4951_v46, %v9007_v55  ;;  %v3093_v15 = vor.u32 %v3092_v37, %v3088_v14  ;;  %v2612_v14 = vld [vmem:[#allocation2 + $0xf0] sm:$0xf]  ;;  %v2614_v17 = vld [vmem:[#allocation2 + $0xf8] sm:$0xf] }
 0x36f   : > { %v3098_v5 = vrot.slane %v3096_v11, 5  ;;  %v3102_v39 = vrot.slane %v3100_v28, 4  ;;  %v3106_v25 = vshll.u32 %v9009_v24, 16  ;;  %v3500_v19 = vmax.bf16 %v3089_v13, %v8999_v35  ;;  %v2613_v11 = vld [vmem:[#allocation2 + $0xf4] sm:$0xf] }
 0x370   : > { %v6269_v50 = vsel %vm5723_vm5, %v6625_v6, 0  ;;  %v4961_v45 = vsel %vm7311_vm9, %v4956_v49, %v4960_v51  ;;  %v5290_v27 = vrot.slane %v5191_v7, 5  ;;  %v3094_v12 = vrot.slane %v3093_v15, 4  ;;  %v2685_v15 = vld [vmem:[#allocation2 + $0x104] sm:$0xf] }
 0x371   : > { %6751 = vmatpush3.bf16.xpose.msra.mxu0 %v6269_v50  ;;  %v5192_v30 = vmax.bf16 %v4961_v45, %v4610_v32  ;;  %v3103_v3 = vor.u32 %v3102_v39, %v3098_v5  ;;  %v3108_v63 = vrot.slane %v3106_v25, 5  ;;  %v3820_v55 = vrot.slane %v9002_v42, 6  ;;  %v2615_v25 = vld [vmem:[#allocation2 + $0xfc] sm:$0x1]  ;;  %v2687_v50 = vld [vmem:[#allocation2 + $0x10c] sm:$0x1] }
 0x372   : > { %v5291_v52 = vrot.slane %v5290_v27, 4  ;;  %v5398_v57 = vmax.bf16 %v5290_v27, %v5190_v20  ;;  %v3099_v35 = vsel %vm7311_vm9, %v3094_v12, %v3098_v5  ;;  %v3822_v60 = vrot.slane %v9005_v10, 6  ;;  %v2686_v5 = vld [vmem:[#allocation2 + $0x108] sm:$0xf] }
 0x373   : > { %v5292_v1 = vrot.slane %v5192_v30, 5  ;;  %v3104_v56 = vrot.slane %v3103_v3, 4  ;;  %v3501_v51 = vmax.bf16 %v3099_v35, %v9002_v42  ;;  %v3821_v9 = vrot.slane %v3820_v55, 4 }
 0x374   : > { %v5654_v13 = vmax.bf16 %v5534_v26, %v5398_v57  ;;  %v3824_v32 = vrot.slane %v3822_v60, 4  ;;  %v3825_v37 = vrot.slane %v9009_v24, 6  ;;  %v9052_v46 = vmax.bf16 %v2684_v38, %v2612_v14 }
 0x375   : > { %v5293_v20 = vsel %vm7386_vm15, %v5291_v52, %v5292_v1  ;;  %v5294_v28 = vrot.slane %v5292_v1, 4  ;;  %v3109_v6 = vsel %vm7311_vm9, %v3104_v56, %v3108_v63  ;;  %v3588_v49 = vrot.slane %v3501_v51, 5  ;;  %v2884_v1 = vld [vmem:[#allocation2 + $0x110] sm:$0xf]  ;;  %v2887_v56 = vld [vmem:[#allocation2 + $0x11c] sm:$0x1] }
 0x376   : > { %v5399_v42 = vmax.bf16 %v5293_v20, %v5191_v7  ;;  %v6617_v39 = vrot.slane %v5654_v13, 11  ;;  %v3502_v26 = vmax.bf16 %v3109_v6, %v9005_v10  ;;  %v3823_v24 = vsel %vm7327_vm12, %v3821_v9, %v3822_v60 }
 0x377   : > { %v5400_v45 = vmax.bf16 %v5294_v28, %v5192_v30  ;;  %v3589_v27 = vrot.slane %v3588_v49, 4  ;;  %v3708_v12 = vmax.bf16 %v3588_v49, %v3500_v19  ;;  %v3826_v3 = vsel %vm7327_vm12, %v3824_v32, %v3825_v37  ;;  %v4312_v37 = vld [vmem:[#allocation2 + $0x50] sm:$0xf]  ;;  %v2885_v28 = vld [vmem:[#allocation2 + $0x114] sm:$0xf] }
 0x378   : > { %v5655_v63 = vmax.bf16 %v9026_v43, %v5399_v42  ;;  %v3590_v14 = vrot.slane %v3502_v26, 5  ;;  %v9064_v38 = vmax.bf16 %v2685_v15, %v2613_v11  ;;  %v9066_v7 = vmax.bf16 %v2686_v5, %v2614_v17 }
 0x379   : > { %v5656_v52 = vmax.bf16 %v5540_v2, %v5400_v45  ;;  %v3964_v10 = vmax.bf16 %v3820_v55, %v3708_v12  ;;  %v9068_v57 = vmax.bf16 %v2687_v50, %v2615_v25  ;;  %v2820_v35 = vmax.bf16 %v9052_v46, %v8564_v0  ;;  %v4240_v55 = vld [vmem:[#allocation2 + $0x40] sm:$0xf] }
 0x37a   : > { %v6172_v30 = vrot.slane %v5655_v63, 7  ;;  %v3591_v19 = vsel %vm7386_vm15, %v3589_v27, %v3590_v14  ;;  %v3592_v60 = vrot.slane %v3590_v14, 4  ;;  %v2821_v43 = vmax.bf16 %v9064_v38, %v8570_v40  ;;  %v2886_v40 = vld [vmem:[#allocation2 + $0x118] sm:$0xf] }
 0x37b   : > { %v6175_v9 = vrot.slane %v5656_v52, 7  ;;  %v3709_v13 = vmax.bf16 %v3591_v19, %v3501_v51  ;;  %v6542_v32 = vrot.slane %v3964_v10, 11  ;;  %v2822_v2 = vmax.bf16 %v9066_v7, %v8572_v33 }
 0x37c   : > { %v6173_v0 = vsel %vm7422_vm0, %v6617_v39, %v6172_v30  ;;  %v6174_v11 = vrot.slane %v6172_v30, 4  ;;  %v3710_v17 = vmax.bf16 %v3592_v60, %v3502_v26  ;;  %v2823_v20 = vmax.bf16 %v9068_v57, %v8581_v4  ;;  %v4313_v60 = vld [vmem:[#allocation2 + $0x54] sm:$0xf] }
 0x37d   : > { %v3965_v6 = vmax.bf16 %v3823_v24, %v3709_v13  ;;  %v9082_v49 = vmax.bf16 %v2884_v1, %v2820_v35  ;;  %v9084_v51 = vmax.bf16 %v2885_v28, %v2821_v43  ;;  %v2950_v15 = vmax.bf16 %v2886_v40, %v2822_v2  ;;  %v4241_v13 = vld [vmem:[#allocation2 + $0x44] sm:$0xf] }
 0x37e   : > { %v6176_v33 = vsel %vm7422_vm0, %v6174_v11, %v6175_v9  ;;  %v3966_v5 = vmax.bf16 %v3826_v3, %v3710_v17  ;;  %v2951_v42 = vmax.bf16 %v2887_v56, %v2823_v20  ;;  %v9088_v25 = vmax.bf16 %v4312_v37, %v4240_v55  ;;  %v4242_v11 = vld [vmem:[#allocation2 + $0x48] sm:$0xf]  ;;  %v4243_v17 = vld [vmem:[#allocation2 + $0x4c] sm:$0x1]  ;;  %v4315_v20 = vld [vmem:[#allocation2 + $0x5c] sm:$0x1] }
 0x37f   : > { %v6634_v39 = vcombine.low %v6173_v0, %v6176_v33  ;;  %v4078_v26 = vrot.slane %v3965_v6, 7  ;;  %v3351_v50 = vshrl.u32 %v9082_v49, 16  ;;  %v3356_v4 = vshll.u32 %v9084_v51, 16 }
 0x380   : > { %v4081_v45 = vrot.slane %v3966_v5, 7  ;;  %v3360_v24 = vshrl.u32 %v9084_v51, 16  ;;  %v3366_v27 = vshll.u32 %v2950_v15, 16  ;;  %v3370_v12 = vshrl.u32 %v2950_v15, 16  ;;  %v4512_v5 = vld [vmem:[#allocation2 + $0x60] sm:$0xf] }
 0x381   : > { %6827 = vmatprep.subr.msk.bf16.mxu0 %vm5723_vm5, %v6634_v39  ;;  %v4079_v63 = vsel %vm7422_vm0, %v6542_v32, %v4078_v26  ;;  %v4080_v3 = vrot.slane %v4078_v26, 4  ;;  %v3358_v14 = vrot.slane %v3356_v4, 5  ;;  %v3376_v52 = vshll.u32 %v2951_v42, 16  ;;  %v4314_v32 = vld [vmem:[#allocation2 + $0x58] sm:$0xf] }
 0x382   : > { %4200 = vst.msk [vmem:[#allocation2 + $0x64] sm:$0xf] %vm669_vm2, %v4079_v63  ;;  %v3362_v10 = vrot.slane %v3360_v24, 4  ;;  %v3368_v35 = vrot.slane %v3366_v27, 5  ;;  %v3372_v30 = vrot.slane %v3370_v12, 4  ;;  %v3883_v19 = vrot.slane %v9084_v51, 6 }
 0x383   : > { %v4082_v43 = vsel %vm7422_vm0, %v4080_v3, %v4081_v45  ;;  %v3359_v1 = vsel %vm7311_vm9, %v3351_v50, %v3358_v14  ;;  %v3378_v56 = vrot.slane %v3376_v52, 5  ;;  %v3885_v9 = vrot.slane %v2950_v15, 6  ;;  %v4276_v45 = vld [vmem:[#allocation2 + $0xd0] sm:$0xf]  ;;  %v4348_v12 = vld [vmem:[#allocation2 + $0xe0] sm:$0xf] }
 0x384   : > { %4201 = vst.msk [vmem:[#allocation2 + $0x68] sm:$0xf] %vm669_vm2, %v4082_v43  ;;  %v6594_v2 = vcombine.low %v4079_v63, %v4082_v43  ;;  %v3363_v55 = vor.u32 %v3362_v10, %v3358_v14  ;;  %v3373_v37 = vor.u32 %v3372_v30, %v3368_v35  ;;  %v3527_v0 = vmax.bf16 %v3359_v1, %v9082_v49  ;;  %v4349_v63 = vld [vmem:[#allocation2 + $0xe4] sm:$0xf]  ;;  %v4350_v3 = vld [vmem:[#allocation2 + $0xe8] sm:$0xf] }
 0x385   : > { %v3884_v28 = vrot.slane %v3883_v19, 4  ;;  %v3887_v40 = vrot.slane %v3885_v9, 4  ;;  %v3888_v6 = vrot.slane %v2951_v42, 6  ;;  %v9106_v33 = vmax.bf16 %v4313_v60, %v4241_v13  ;;  %v10033_v10 = vld [vmem:[#allocation19_spill] sm:$0xff]  ;;  %v4515_v1 = vld [vmem:[#allocation2 + $0x6c] sm:$0x1] }
 0x386   : > { %v5974_v39 = vsel %vm5723_vm5, %v6594_v2, 0  ;;  %v3364_v26 = vrot.slane %v3363_v55, 4  ;;  %v3374_v50 = vrot.slane %v3373_v37, 4  ;;  %v9109_v4 = vmax.bf16 %v4314_v32, %v4242_v11  ;;  %v10034_v60 = vld [vmem:[#allocation23_spill] sm:$0xff]  ;;  %v4278_v37 = vld [vmem:[#allocation2 + $0xd8] sm:$0xf] }
 0x387   : > { %6739 = vmatpush3.bf16.xpose.msra.mxu1 %v5974_v39  ;;  %v3886_v49 = vsel %vm7327_vm12, %v3884_v28, %v3885_v9  ;;  %v3889_v24 = vsel %vm7327_vm12, %v3887_v40, %v3888_v6  ;;  %v9115_v27 = vmax.bf16 %v4315_v20, %v4243_v17  ;;  %v4448_v42 = vmax.bf16 %v9088_v25, %v8695_v53  ;;  %v10035_v53 = vld [vmem:[#allocation22_spill] sm:$0xff] }
 0x388   : > { %v3369_v14 = vsel %vm7311_vm9, %v3364_v26, %v3368_v35  ;;  %v3379_v52 = vsel %vm7311_vm9, %v3374_v50, %v3378_v56  ;;  %v4449_v30 = vmax.bf16 %v9106_v33, %v10033_v10  ;;  %v4450_v43 = vmax.bf16 %v9109_v4, %v10034_v60  ;;  %v4277_v35 = vld [vmem:[#allocation2 + $0xd4] sm:$0xf] }
 0x389   : > { %10032 = vst [vmem:[#allocation3_spill] sm:$0xff] %v9115_v27  ;;  %v3528_v9 = vmax.bf16 %v3369_v14, %v9084_v51  ;;  %v3529_v13 = vmax.bf16 %v3379_v52, %v2950_v15  ;;  %v4451_v32 = vmax.bf16 %v9115_v27, %v10035_v53  ;;  %v4513_v2 = vld [vmem:[#allocation2 + $0x64] sm:$0xf]  ;;  %v9130_v55 = vmax.bf16 %v4512_v5, %v4448_v42 }
 0x38a   : > { %v9132_v11 = vmax.bf16 %v4513_v2, %v4449_v30  ;;  %v9134_v56 = vmax.bf16 %v4348_v12, %v4276_v45  ;;  %v9136_v17 = vmax.bf16 %v4349_v63, %v4277_v35  ;;  %v9138_v20 = vmax.bf16 %v4350_v3, %v4278_v37 }
 0x38b   : > { %v3633_v28 = vrot.slane %v3528_v9, 5  ;;  %v3635_v40 = vrot.slane %v3529_v13, 5  ;;  %v4514_v6 = vld [vmem:[#allocation2 + $0x68] sm:$0xf]  ;;  %v4579_v15 = vmax.bf16 %v4515_v1, %v4451_v32  ;;  %v4693_v39 = vshrl.u32 %v9130_v55, 16 }
 0x38c   : > { %v4578_v26 = vmax.bf16 %v4514_v6, %v4450_v43  ;;  %v4698_v5 = vshll.u32 %v9132_v11, 16  ;;  %v4702_v50 = vshrl.u32 %v9132_v11, 16 }
 0x38d   : > { %v3634_v14 = vrot.slane %v3633_v28, 4  ;;  %v3637_v45 = vrot.slane %v3635_v40, 4  ;;  %v3735_v12 = vmax.bf16 %v3633_v28, %v3527_v0  ;;  %v4718_v63 = vshll.u32 %v4579_v15, 16  ;;  %v4279_v0 = vld [vmem:[#allocation2 + $0xdc] sm:$0x1] }
 0x38e   : > { %v4700_v52 = vrot.slane %v4698_v5, 5  ;;  %v4704_v3 = vrot.slane %v4702_v50, 4  ;;  %v4708_v10 = vshll.u32 %v4578_v26, 16  ;;  %v4712_v30 = vshrl.u32 %v4578_v26, 16  ;;  %v4351_v28 = vld [vmem:[#allocation2 + $0xec] sm:$0x1] }
 0x38f   : > { %v3636_v60 = vsel %vm7386_vm15, %v3634_v14, %v3635_v40  ;;  %v3737_v1 = vmax.bf16 %v3637_v45, %v3529_v13  ;;  %v3991_v43 = vmax.bf16 %v3883_v19, %v3735_v12  ;;  %v4720_v53 = vrot.slane %v4718_v63, 5 }
 0x390   : > { %v3736_v32 = vmax.bf16 %v3636_v60, %v3528_v9  ;;  %v4701_v2 = vsel %vm7311_vm9, %v4693_v39, %v4700_v52  ;;  %v4705_v35 = vor.u32 %v4704_v3, %v4700_v52  ;;  %v4710_v37 = vrot.slane %v4708_v10, 5 }
 0x391   : > { %v3993_v6 = vmax.bf16 %v3889_v24, %v3737_v1  ;;  %v6551_v5 = vrot.slane %v3991_v43, 11  ;;  %v4714_v50 = vrot.slane %v4712_v30, 4  ;;  %v5166_v42 = vmax.bf16 %v4701_v2, %v9130_v55  ;;  %v4548_v55 = vld [vmem:[#allocation2 + $0xf0] sm:$0xf]  ;;  %v4551_v43 = vld [vmem:[#allocation2 + $0xfc] sm:$0x1] }
 0x392   : > { %v3992_v27 = vmax.bf16 %v3886_v49, %v3736_v32  ;;  %v4706_v40 = vrot.slane %v4705_v35, 4  ;;  %v10036_v13 = vrot.slane %v9132_v11, 6  ;;  %v5480_v19 = vrot.slane %v4578_v26, 6  ;;  %v10037_v2 = vld [vmem:[#allocation28_spill] sm:$0xff] }
 0x393   : > { %v4144_v14 = vrot.slane %v3993_v6, 7  ;;  %v4715_v9 = vor.u32 %v4714_v50, %v4710_v37  ;;  %v5483_v45 = vrot.slane %v4579_v15, 6  ;;  %v9153_v12 = vmax.bf16 %v4351_v28, %v4279_v0  ;;  %v10038_v28 = vld [vmem:[#allocation9_spill] sm:$0xff] }
 0x394   : > { %v5479_v51 = vrot.slane %v10036_v13, 4  ;;  %v4141_v39 = vrot.slane %v3992_v27, 7  ;;  %v4711_v63 = vsel %vm7311_vm9, %v4706_v40, %v4710_v37  ;;  %v5482_v52 = vrot.slane %v5480_v19, 4  ;;  %v2852_v40 = vld [vmem:[#allocation2 + $0x90] sm:$0xf] }
 0x395   : > { %v4716_v49 = vrot.slane %v4715_v9, 4  ;;  %v5167_v3 = vmax.bf16 %v4711_v63, %v9132_v11  ;;  %v4484_v10 = vmax.bf16 %v9134_v56, %v8752_v44  ;;  %v4485_v15 = vmax.bf16 %v9136_v17, %v8759_v8  ;;  %v10043_v63 = vld [vmem:[#allocation31_spill] sm:$0xff] }
 0x396   : > { %v5481_v24 = vsel %vm7327_vm12, %v5479_v51, %v5480_v19  ;;  %v4142_v27 = vsel %vm7422_vm0, %v6551_v5, %v4141_v39  ;;  %v4143_v30 = vrot.slane %v4141_v39, 4  ;;  %v5484_v60 = vsel %vm7327_vm12, %v5482_v52, %v5483_v45  ;;  %v10040_v5 = vld [vmem:[#allocation6_spill] sm:$0xff]  ;;  %v10044_v52 = vld [vmem:[#allocation7_spill] sm:$0xff] }
 0x397   : > { %v4486_v1 = vmax.bf16 %v9138_v20, %v8763_v21  ;;  %4218 = vst.msk [vmem:[#allocation2 + $0xf4] sm:$0xf] %vm669_vm2, %v4142_v27  ;;  %v4721_v32 = vsel %vm7311_vm9, %v4716_v49, %v4720_v53  ;;  %v5250_v44 = vrot.slane %v5167_v3, 5  ;;  %v4487_v8 = vmax.bf16 %v9153_v12, %v10037_v2  ;;  %v10039_v21 = vld [vmem:[#allocation29_spill] sm:$0xff]  ;;  %v10041_v39 = vld [vmem:[#allocation30_spill] sm:$0xff] }
 0x398   : > { %v9175_v35 = vmax.bf16 %v4548_v55, %v4484_v10  ;;  %v4145_v37 = vsel %vm7422_vm0, %v4143_v30, %v4144_v14  ;;  %v5168_v0 = vmax.bf16 %v4721_v32, %v4578_v26  ;;  %v2788_v6 = vmax.bf16 %v10038_v28, %v8774_v62  ;;  %v10042_v14 = vld [vmem:[#allocation20_spill] sm:$0xff]  ;;  %v2855_v55 = vld [vmem:[#allocation2 + $0x9c] sm:$0x1] }
 0x399   : > { %v2789_v50 = vmax.bf16 %v10040_v5, %v10039_v21  ;;  %4219 = vst.msk [vmem:[#allocation2 + $0xf8] sm:$0xf] %vm669_vm2, %v4145_v37  ;;  %v6603_v53 = vcombine.low %v4142_v27, %v4145_v37  ;;  %v5251_v13 = vrot.slane %v5250_v44, 4  ;;  %v5374_v51 = vmax.bf16 %v5250_v44, %v5166_v42  ;;  %v10046_v44 = vld [vmem:[#allocation15_spill] sm:$0xff] }
 0x39a   : > { %v9184_v19 = vmax.bf16 %v4551_v43, %v4487_v8  ;;  %v5252_v9 = vrot.slane %v5168_v0, 5  ;;  %v4963_v45 = vshrl.u32 %v9175_v35, 16  ;;  %v2790_v26 = vmax.bf16 %v10042_v14, %v10041_v39  ;;  %v10047_v8 = vld [vmem:[#allocation24_spill] sm:$0xff] }
 0x39b   : > { %v2791_v62 = vmax.bf16 %v10044_v52, %v10043_v63  ;;  %6822 = vmatprep.subr.msk.bf16.mxu1 %vm5723_vm5, %v6603_v53  ;;  %v10045_v49 = vrot.slane %v9132_v11, 6  ;;  %v9196_v30 = vmax.bf16 %v2852_v40, %v2788_v6  ;;  %v9201_v2 = vmax.bf16 %v10046_v44, %v2789_v50 }
 0x39c   : > { %v4988_v27 = vshll.u32 %v9184_v19, 16  ;;  %v5546_v42 = vrot.slane %v9184_v19, 6  ;;  %v5253_v43 = vsel %vm7386_vm15, %v5251_v13, %v5252_v9  ;;  %v5254_v32 = vrot.slane %v5252_v9, 4 }
 0x39d   : > { %v5630_v10 = vmax.bf16 %v10045_v49, %v5374_v51  ;;  %v9204_v37 = vmax.bf16 %v10047_v8, %v2790_v26  ;;  %v5375_v28 = vmax.bf16 %v5253_v43, %v5167_v3  ;;  %v9208_v5 = vmax.bf16 %v2855_v55, %v2791_v62 }
 0x39e   : > { %v9206_v11 = vrot.slane %v4988_v27, 5  ;;  %v5376_v53 = vmax.bf16 %v5254_v32, %v5168_v0  ;;  %v4549_v51 = vld [vmem:[#allocation2 + $0xf4] sm:$0xf]  ;;  %v3111_v6 = vshrl.u32 %v9196_v30, 16  ;;  %v3116_v40 = vshll.u32 %v9201_v2, 16 }
 0x39f   : > { %v6609_v21 = vrot.slane %v5630_v10, 11  ;;  %v3120_v13 = vshrl.u32 %v9201_v2, 16  ;;  %v5631_v19 = vmax.bf16 %v5481_v24, %v5375_v28  ;;  %v9213_v50 = vmax.bf16 %v4549_v51, %v4485_v15 }
 0x3a0   : > { %v3126_v9 = vshll.u32 %v9204_v37, 16  ;;  %v3130_v3 = vshrl.u32 %v9204_v37, 16  ;;  %v5632_v39 = vmax.bf16 %v5484_v60, %v5376_v53  ;;  %v4550_v14 = vld [vmem:[#allocation2 + $0xf8] sm:$0xf]  ;;  %v3118_v26 = vrot.slane %v3116_v40, 5 }
 0x3a1   : > { %v3122_v63 = vrot.slane %v3120_v13, 4  ;;  %v3136_v0 = vshll.u32 %v9208_v5, 16  ;;  %v6116_v52 = vrot.slane %v5631_v19, 7  ;;  %v4614_v62 = vmax.bf16 %v4550_v14, %v4486_v1 }
 0x3a2   : > { %v4968_v55 = vshll.u32 %v9213_v50, 16  ;;  %v4972_v49 = vshrl.u32 %v9213_v50, 16  ;;  %v6119_v10 = vrot.slane %v5632_v39, 7  ;;  %v9884_v24 = vrot.slane %v9213_v50, 6 }
 0x3a3   : > { %v3119_v15 = vsel %vm7311_vm9, %v3111_v6, %v3118_v26  ;;  %v3123_v27 = vor.u32 %v3122_v63, %v3118_v26  ;;  %v6117_v60 = vsel %vm7422_vm0, %v6609_v21, %v6116_v52  ;;  %v6118_v43 = vrot.slane %v6116_v52, 4 }
 0x3a4   : > { %v4970_v32 = vrot.slane %v4968_v55, 5  ;;  %v4974_v44 = vrot.slane %v4972_v49, 4  ;;  %v4978_v8 = vshll.u32 %v4614_v62, 16  ;;  %v4982_v28 = vshrl.u32 %v4614_v62, 16  ;;  %v2616_v49 = vld [vmem:[#allocation2 + $0x100] sm:$0xf] }
 0x3a5   : > { %v5542_v1 = vrot.slane %v9884_v24, 4  ;;  %v5543_v53 = vrot.slane %v4614_v62, 6  ;;  %v6120_v51 = vsel %vm7422_vm0, %v6118_v43, %v6119_v10  ;;  %v3124_v13 = vrot.slane %v3123_v27, 4 }
 0x3a6   : > { %v4971_v40 = vsel %vm7311_vm9, %v4963_v45, %v4970_v32  ;;  %v4975_v6 = vor.u32 %v4974_v44, %v4970_v32  ;;  %v6626_v19 = vcombine.low %v6117_v60, %v6120_v51  ;;  %v4980_v39 = vrot.slane %v4978_v8, 5  ;;  %v2688_v32 = vld [vmem:[#allocation2 + $0x110] sm:$0xf] }
 0x3a7   : > { %v4984_v21 = vrot.slane %v4982_v28, 4  ;;  %v5193_v14 = vmax.bf16 %v4971_v40, %v9175_v35  ;;  %v9234_v63 = vsel %vm7327_vm12, %v5542_v1, %v5543_v53  ;;  %v5545_v52 = vrot.slane %v5543_v53, 4  ;;  %v2689_v1 = vld [vmem:[#allocation2 + $0x114] sm:$0xf] }
 0x3a8   : > { %v4976_v26 = vrot.slane %v4975_v6, 4  ;;  %v3128_v55 = vrot.slane %v3126_v9, 5  ;;  %v6272_v10 = vsel %vm5723_vm5, %v6626_v19, 0  ;;  %v3132_v24 = vrot.slane %v3130_v3, 4 }
 0x3a9   : > { %v4985_v43 = vor.u32 %v4984_v21, %v4980_v39  ;;  %v3138_v45 = vrot.slane %v3136_v0, 5  ;;  %6753 = vmatpush3.bf16.xpose.msra.mxu0 %v6272_v10  ;;  %v5547_v35 = vsel %vm7327_vm12, %v5545_v52, %v5546_v42  ;;  %v3503_v44 = vmax.bf16 %v3119_v15, %v9196_v30  ;;  %v2617_v0 = vld [vmem:[#allocation2 + $0x104] sm:$0xf]  ;;  %v2618_v42 = vld [vmem:[#allocation2 + $0x108] sm:$0xf] }
 0x3aa   : > { %v4981_v27 = vsel %vm7311_vm9, %v4976_v26, %v4980_v39  ;;  %v3129_v60 = vsel %vm7311_vm9, %v3124_v13, %v3128_v55  ;;  %v3133_v28 = vor.u32 %v3132_v24, %v3128_v55  ;;  %v3827_v53 = vrot.slane %v9201_v2, 6  ;;  %v2619_v24 = vld [vmem:[#allocation2 + $0x10c] sm:$0x1]  ;;  %v2690_v52 = vld [vmem:[#allocation2 + $0x118] sm:$0xf] }
 0x3ab   : > { %v4986_v9 = vrot.slane %v4985_v43, 4  ;;  %v5194_v8 = vmax.bf16 %v4981_v27, %v9213_v50  ;;  %v3504_v3 = vmax.bf16 %v3129_v60, %v9201_v2  ;;  %v3829_v51 = vrot.slane %v9204_v37, 6  ;;  %v2691_v55 = vld [vmem:[#allocation2 + $0x11c] sm:$0x1] }
 0x3ac   : > { %v3832_v40 = vrot.slane %v9208_v5, 6  ;;  %v2760_v6 = vmax.bf16 %v2688_v32, %v2616_v49  ;;  %v3134_v13 = vrot.slane %v3133_v28, 4  ;;  %v3828_v21 = vrot.slane %v3827_v53, 4 }
 0x3ad   : > { %v4991_v30 = vsel %vm7311_vm9, %v4986_v9, %v9206_v11  ;;  %v5295_v15 = vrot.slane %v5194_v8, 5  ;;  %v3593_v19 = vrot.slane %v3504_v3, 5  ;;  %v3831_v26 = vrot.slane %v3829_v51, 4 }
 0x3ae   : > { %v5195_v39 = vmax.bf16 %v4991_v30, %v4614_v62  ;;  %v2761_v2 = vmax.bf16 %v2689_v1, %v2617_v0  ;;  %v3139_v5 = vsel %vm7311_vm9, %v3134_v13, %v3138_v45  ;;  %v3830_v60 = vsel %vm7327_vm12, %v3828_v21, %v3829_v51 }
 0x3af   : > { %v5296_v10 = vrot.slane %v5295_v15, 4  ;;  %v5401_v43 = vmax.bf16 %v5295_v15, %v5193_v14  ;;  %v3594_v49 = vrot.slane %v3593_v19, 4  ;;  %v3505_v27 = vmax.bf16 %v3139_v5, %v9204_v37 }
 0x3b0   : > { %v5297_v32 = vrot.slane %v5195_v39, 5  ;;  %v3711_v11 = vmax.bf16 %v3593_v19, %v3503_v44  ;;  %v10048_v62 = vrot.slane %v9213_v50, 6  ;;  %v3833_v28 = vsel %vm7327_vm12, %v3831_v26, %v3832_v40  ;;  %v2888_v19 = vld [vmem:[#allocation2 + $0x120] sm:$0xf]  ;;  %v2889_v50 = vld [vmem:[#allocation2 + $0x124] sm:$0xf] }
 0x3b1   : > { %v2762_v0 = vmax.bf16 %v2690_v52, %v2618_v42  ;;  %v2763_v1 = vmax.bf16 %v2691_v55, %v2619_v24  ;;  %v3595_v30 = vrot.slane %v3505_v27, 5  ;;  %v2824_v44 = vmax.bf16 %v2760_v6, %v8825_v16  ;;  %v2890_v26 = vld [vmem:[#allocation2 + $0x128] sm:$0xf]  ;;  %v2891_v52 = vld [vmem:[#allocation2 + $0x12c] sm:$0x1] }
 0x3b2   : > { %v5657_v9 = vmax.bf16 %v10048_v62, %v5401_v43  ;;  %v5298_v14 = vsel %vm7386_vm15, %v5296_v10, %v5297_v32  ;;  %v5299_v45 = vrot.slane %v5297_v32, 4  ;;  %v3967_v15 = vmax.bf16 %v3827_v53, %v3711_v11 }
 0x3b3   : > { %v5402_v13 = vmax.bf16 %v5298_v14, %v5194_v8  ;;  %v2825_v51 = vmax.bf16 %v2761_v2, %v8836_v58  ;;  %v3596_v40 = vsel %vm7386_vm15, %v3594_v49, %v3595_v30  ;;  %v3597_v42 = vrot.slane %v3595_v30, 4  ;;  %v4244_v30 = vld [vmem:[#allocation2 + $0x50] sm:$0xf] }
 0x3b4   : > { %v6618_v37 = vrot.slane %v5657_v9, 11  ;;  %v5403_v21 = vmax.bf16 %v5299_v45, %v5195_v39  ;;  %v6543_v24 = vrot.slane %v3967_v15, 11  ;;  %v3712_v10 = vmax.bf16 %v3596_v40, %v3504_v3 }
 0x3b5   : > { %v5658_v55 = vmax.bf16 %v9234_v63, %v5402_v13  ;;  %v2826_v8 = vmax.bf16 %v2762_v0, %v8840_v23  ;;  %v2827_v53 = vmax.bf16 %v2763_v1, %v8851_v47  ;;  %v3713_v6 = vmax.bf16 %v3597_v42, %v3505_v27 }
 0x3b6   : > { %v5659_v16 = vmax.bf16 %v5547_v35, %v5403_v21  ;;  %v9270_v58 = vmax.bf16 %v2888_v19, %v2824_v44  ;;  %v9272_v2 = vmax.bf16 %v2889_v50, %v2825_v51  ;;  %v3968_v43 = vmax.bf16 %v3830_v60, %v3712_v10  ;;  %v4316_v51 = vld [vmem:[#allocation2 + $0x60] sm:$0xf]  ;;  %v9297_v19 = vld [vmem:[%s9814_s3 + $0x8] sm:$0xf] }
 0x3b7   : > { %v6179_v39 = vrot.slane %v5658_v55, 7  ;;  %v9274_v5 = vmax.bf16 %v2890_v26, %v2826_v8  ;;  %v9276_v49 = vmax.bf16 %v2891_v52, %v2827_v53  ;;  %v3969_v11 = vmax.bf16 %v3833_v28, %v3713_v6  ;;  %v4319_v26 = vld [vmem:[#allocation2 + $0x6c] sm:$0x1]  ;;  %6746 = vmatprep.mubr.msk.bf16.mxu1 %vm5723_vm5, %v9297_v19  ;;  %v4245_v53 = vld [vmem:[#allocation2 + $0x54] sm:$0xf] }
 0x3b8   : > { %v6182_v32 = vrot.slane %v5659_v16, 7  ;;  %v3381_v63 = vshrl.u32 %v9270_v58, 16  ;;  %v3386_v23 = vshll.u32 %v9272_v2, 16  ;;  %v4085_v3 = vrot.slane %v3968_v43, 7  ;;  %v4317_v16 = vld [vmem:[#allocation2 + $0x64] sm:$0xf] }
 0x3b9   : > { %v6180_v47 = vsel %vm7422_vm0, %v6618_v37, %v6179_v39  ;;  %v6181_v35 = vrot.slane %v6179_v39, 4  ;;  %v3390_v27 = vshrl.u32 %v9272_v2, 16  ;;  %v4088_v62 = vrot.slane %v3969_v11, 7  ;;  %v4318_v6 = vld [vmem:[#allocation2 + $0x68] sm:$0xf] }
 0x3ba   : > { %v3388_v9 = vrot.slane %v3386_v23, 5  ;;  %v3396_v60 = vshll.u32 %v9274_v5, 16  ;;  %v3400_v0 = vshrl.u32 %v9274_v5, 16  ;;  %v4086_v1 = vsel %vm7422_vm0, %v6543_v24, %v4085_v3  ;;  %v4247_v24 = vld [vmem:[#allocation2 + $0x5c] sm:$0x1] }
 0x3bb   : > { %v6183_v28 = vsel %vm7422_vm0, %v6181_v35, %v6182_v32  ;;  %v4087_v14 = vrot.slane %v4085_v3, 4  ;;  %v3392_v45 = vrot.slane %v3390_v27, 4  ;;  %4202 = vst.msk [vmem:[#allocation2 + $0x74] sm:$0xf] %vm669_vm2, %v4086_v1  ;;  %v3406_v40 = vshll.u32 %v9276_v49, 16 }
 0x3bc   : > { %v6635_v15 = vcombine.low %v6180_v47, %v6183_v28  ;;  %v9292_v13 = vsel %vm7311_vm9, %v3381_v63, %v3388_v9  ;;  %v3398_v37 = vrot.slane %v3396_v60, 5  ;;  %v3402_v44 = vrot.slane %v3400_v0, 4  ;;  %v4246_v32 = vld [vmem:[#allocation2 + $0x58] sm:$0xf]  ;;  %v4280_v3 = vld [vmem:[#allocation2 + $0xe0] sm:$0xf] }
 0x3bd   : > { %v4089_v50 = vsel %vm7422_vm0, %v4087_v14, %v4088_v62  ;;  %v3393_v21 = vor.u32 %v3392_v45, %v3388_v9  ;;  %v3530_v42 = vmax.bf16 %v9292_v13, %v9270_v58  ;;  %v3890_v10 = vrot.slane %v9272_v2, 6  ;;  %v4352_v0 = vld [vmem:[#allocation2 + $0xf0] sm:$0xf]  ;;  %v4353_v28 = vld [vmem:[#allocation2 + $0xf4] sm:$0xf] }
 0x3be   : > { %6828 = vmatprep.subr.msk.bf16.mxu0 %vm5723_vm5, %v6635_v15  ;;  %4203 = vst.msk [vmem:[#allocation2 + $0x78] sm:$0xf] %vm669_vm2, %v4089_v50  ;;  %v6595_v52 = vcombine.low %v4086_v1, %v4089_v50  ;;  %v3403_v55 = vor.u32 %v3402_v44, %v3398_v37  ;;  %v3892_v8 = vrot.slane %v9274_v5, 6  ;;  %v3408_v58 = vrot.slane %v3406_v40, 5  ;;  %v4516_v15 = vld [vmem:[#allocation2 + $0x70] sm:$0xf] }
 0x3bf   : > { %v3394_v39 = vrot.slane %v3393_v21, 4  ;;  %v3895_v43 = vrot.slane %v9276_v49, 6  ;;  %v9311_v11 = vmax.bf16 %v4316_v51, %v4244_v30  ;;  %v3891_v47 = vrot.slane %v3890_v10, 4  ;;  %v4281_v49 = vld [vmem:[#allocation2 + $0xe4] sm:$0xf] }
 0x3c0   : > { %v5977_v63 = vsel %vm5723_vm5, %v6595_v52, 0  ;;  %v3404_v23 = vrot.slane %v3403_v55, 4  ;;  %v3894_v35 = vrot.slane %v3892_v8, 4  ;;  %v9316_v62 = vmax.bf16 %v4317_v16, %v4245_v53  ;;  %v4282_v13 = vld [vmem:[#allocation2 + $0xe8] sm:$0xf] }
 0x3c1   : > { %6741 = vmatpush3.bf16.xpose.msra.mxu1 %v5977_v63  ;;  %v3399_v27 = vsel %vm7311_vm9, %v3394_v39, %v3398_v37  ;;  %v9318_v9 = vmax.bf16 %v4318_v6, %v4246_v32  ;;  %v9320_v60 = vmax.bf16 %v4319_v26, %v4247_v24  ;;  %v3893_v45 = vsel %vm7327_vm12, %v3891_v47, %v3892_v8  ;;  %v4354_v37 = vld [vmem:[#allocation2 + $0xf8] sm:$0xf]  ;;  %v4519_v40 = vld [vmem:[#allocation2 + $0x7c] sm:$0x1]  ;;  %v10049_v26 = vld [vmem:[#allocation32_spill] sm:$0xff] }
 0x3c2   : > { %v3409_v1 = vsel %vm7311_vm9, %v3404_v23, %v3408_v58  ;;  %v3531_v14 = vmax.bf16 %v3399_v27, %v9272_v2  ;;  %v3896_v30 = vsel %vm7327_vm12, %v3894_v35, %v3895_v43  ;;  %v4452_v51 = vmax.bf16 %v9311_v11, %v8912_v31  ;;  %v4517_v21 = vld [vmem:[#allocation2 + $0x74] sm:$0xf] }
 0x3c3   : > { %v3532_v44 = vmax.bf16 %v3409_v1, %v9274_v5  ;;  %v4453_v50 = vmax.bf16 %v9316_v62, %v8921_v41  ;;  %v4454_v2 = vmax.bf16 %v9318_v9, %v8923_v29  ;;  %v4455_v52 = vmax.bf16 %v9320_v60, %v10049_v26 }
 0x3c4   : > { %v3638_v24 = vrot.slane %v3531_v14, 5  ;;  %v9338_v55 = vmax.bf16 %v4352_v0, %v4280_v3  ;;  %v9340_v8 = vmax.bf16 %v4353_v28, %v4281_v49  ;;  %v9342_v16 = vmax.bf16 %v4516_v15, %v4452_v51 }
 0x3c5   : > { %v3640_v5 = vrot.slane %v3532_v44, 5  ;;  %v4518_v53 = vld [vmem:[#allocation2 + $0x78] sm:$0xf]  ;;  %v9344_v31 = vmax.bf16 %v4517_v21, %v4453_v50  ;;  %v9346_v41 = vmax.bf16 %v4354_v37, %v4282_v13  ;;  %v4583_v58 = vmax.bf16 %v4519_v40, %v4455_v52  ;;  %v4283_v40 = vld [vmem:[#allocation2 + $0xec] sm:$0x1] }
 0x3c6   : > { %v3639_v6 = vrot.slane %v3638_v24, 4  ;;  %v3738_v29 = vmax.bf16 %v3638_v24, %v3530_v42  ;;  %v4582_v39 = vmax.bf16 %v4518_v53, %v4454_v2  ;;  %v4723_v32 = vshrl.u32 %v9342_v16, 16  ;;  %v4355_v24 = vld [vmem:[#allocation2 + $0xfc] sm:$0x1] }
 0x3c7   : > { %v3642_v43 = vrot.slane %v3640_v5, 4  ;;  %v4728_v63 = vshll.u32 %v9344_v31, 16  ;;  %v4732_v23 = vshrl.u32 %v9344_v31, 16  ;;  %v4748_v37 = vshll.u32 %v4583_v58, 16 }
 0x3c8   : > { %v3641_v47 = vsel %vm7386_vm15, %v3639_v6, %v3640_v5  ;;  %v3994_v35 = vmax.bf16 %v3890_v10, %v3738_v29  ;;  %v4738_v3 = vshll.u32 %v4582_v39, 16  ;;  %v4742_v27 = vshrl.u32 %v4582_v39, 16 }
 0x3c9   : > { %v3739_v49 = vmax.bf16 %v3641_v47, %v3531_v14  ;;  %v3740_v0 = vmax.bf16 %v3642_v43, %v3532_v44  ;;  %v4730_v28 = vrot.slane %v4728_v63, 5  ;;  %v4734_v1 = vrot.slane %v4732_v23, 4 }
 0x3ca   : > { %v6552_v42 = vrot.slane %v3994_v35, 11  ;;  %v4740_v15 = vrot.slane %v4738_v3, 5  ;;  %v4744_v13 = vrot.slane %v4742_v27, 4  ;;  %v4750_v10 = vrot.slane %v4748_v37, 5  ;;  %v4552_v27 = vld [vmem:[#allocation2 + $0x100] sm:$0xf] }
 0x3cb   : > { %v3995_v51 = vmax.bf16 %v3893_v45, %v3739_v49  ;;  %v3996_v50 = vmax.bf16 %v3896_v30, %v3740_v0  ;;  %v4731_v2 = vsel %vm7311_vm9, %v4723_v32, %v4730_v28  ;;  %v4735_v21 = vor.u32 %v4734_v1, %v4730_v28  ;;  %v2620_v49 = vld [vmem:[#allocation2 + $0x110] sm:$0xf]  ;;  %v2692_v0 = vld [vmem:[#allocation2 + $0x120] sm:$0xf]  ;;  %v2693_v37 = vld [vmem:[#allocation2 + $0x124] sm:$0xf] }
 0x3cc   : > { %v4745_v26 = vor.u32 %v4744_v13, %v4740_v15  ;;  %v5169_v52 = vmax.bf16 %v4731_v2, %v9342_v16  ;;  %v5485_v14 = vrot.slane %v9344_v31, 6  ;;  %v5487_v6 = vrot.slane %v4582_v39, 6  ;;  %v2621_v13 = vld [vmem:[#allocation2 + $0x114] sm:$0xf] }
 0x3cd   : > { %v4148_v44 = vrot.slane %v3995_v51, 7  ;;  %v4151_v5 = vrot.slane %v3996_v50, 7  ;;  %v4736_v53 = vrot.slane %v4735_v21, 4  ;;  %v5490_v45 = vrot.slane %v4583_v58, 6  ;;  %v2694_v21 = vld [vmem:[#allocation2 + $0x128] sm:$0xf] }
 0x3ce   : > { %v4746_v29 = vrot.slane %v4745_v26, 4  ;;  %v5486_v43 = vrot.slane %v5485_v14, 4  ;;  %v9357_v30 = vmax.bf16 %v4355_v24, %v4283_v40  ;;  %v5489_v47 = vrot.slane %v5487_v6, 4  ;;  %v10050_v26 = vld [vmem:[#allocation13_spill] sm:$0xff] }
 0x3cf   : > { %v4149_v32 = vsel %vm7422_vm0, %v6552_v42, %v4148_v44  ;;  %v4150_v63 = vrot.slane %v4148_v44, 4  ;;  %v4741_v23 = vsel %vm7311_vm9, %v4736_v53, %v4740_v15  ;;  %v4488_v3 = vmax.bf16 %v9338_v55, %v8932_v36 }
 0x3d0   : > { %4220 = vst.msk [vmem:[#allocation2 + $0x104] sm:$0xf] %vm669_vm2, %v4149_v32  ;;  %v4751_v16 = vsel %vm7311_vm9, %v4746_v29, %v4750_v10  ;;  %v5170_v35 = vmax.bf16 %v4741_v23, %v9344_v31  ;;  %v5488_v58 = vsel %vm7327_vm12, %v5486_v43, %v5487_v6  ;;  %v5491_v42 = vsel %vm7327_vm12, %v5489_v47, %v5490_v45  ;;  %v4555_v31 = vld [vmem:[#allocation2 + $0x10c] sm:$0x1]  ;;  %v2623_v29 = vld [vmem:[#allocation2 + $0x11c] sm:$0x1] }
 0x3d1   : > { %v4152_v28 = vsel %vm7422_vm0, %v4150_v63, %v4151_v5  ;;  %v5171_v1 = vmax.bf16 %v4751_v16, %v4582_v39  ;;  %v4489_v15 = vmax.bf16 %v9340_v8, %v8939_v34  ;;  %v4490_v50 = vmax.bf16 %v9346_v41, %v8941_v48  ;;  %v2622_v39 = vld [vmem:[#allocation2 + $0x118] sm:$0xf]  ;;  %v2695_v43 = vld [vmem:[#allocation2 + $0x12c] sm:$0x1] }
 0x3d2   : > { %4221 = vst.msk [vmem:[#allocation2 + $0x108] sm:$0xf] %vm669_vm2, %v4152_v28  ;;  %v6604_v51 = vcombine.low %v4149_v32, %v4152_v28  ;;  %v5255_v36 = vrot.slane %v5170_v35, 5  ;;  %v4491_v2 = vmax.bf16 %v9357_v30, %v8943_v22  ;;  %v9382_v24 = vmax.bf16 %v4552_v27, %v4488_v3  ;;  %v10051_v34 = vld [vmem:[#allocation10_spill] sm:$0xff] }
 0x3d3   : > { %v5257_v40 = vrot.slane %v5171_v1, 5  ;;  %v6596_v10 = vcombine.low %v10051_v34, %v10050_v26  ;;  %v2764_v44 = vmax.bf16 %v2692_v0, %v2620_v49  ;;  %v2765_v48 = vmax.bf16 %v2693_v37, %v2621_v13 }
 0x3d4   : > { %6823 = vmatprep.subr.msk.bf16.mxu1 %vm5723_vm5, %v6604_v51  ;;  %v5256_v5 = vrot.slane %v5255_v36, 4  ;;  %v5377_v53 = vmax.bf16 %v5255_v36, %v5169_v52  ;;  %v4619_v6 = vmax.bf16 %v4555_v31, %v4491_v2  ;;  %v4993_v22 = vshrl.u32 %v9382_v24, 16  ;;  %v2892_v36 = vld [vmem:[#allocation2 + $0x130] sm:$0xf]  ;;  %v2893_v2 = vld [vmem:[#allocation2 + $0x134] sm:$0xf] }
 0x3d5   : > { %v5259_v45 = vrot.slane %v5257_v40, 4  ;;  %v5980_v32 = vsel %vm5723_vm5, %v6596_v10, 0  ;;  %v2766_v63 = vmax.bf16 %v2694_v21, %v2622_v39  ;;  %v2767_v0 = vmax.bf16 %v2695_v43, %v2623_v29  ;;  %v2894_v29 = vld [vmem:[#allocation2 + $0x138] sm:$0xf] }
 0x3d6   : > { %v5258_v23 = vsel %vm7386_vm15, %v5256_v5, %v5257_v40  ;;  %v5633_v47 = vmax.bf16 %v5485_v14, %v5377_v53  ;;  %v5018_v16 = vshll.u32 %v4619_v6, 16  ;;  %v5553_v3 = vrot.slane %v4619_v6, 6  ;;  %6743 = vmatpush3.bf16.xpose.msra.mxu1 %v5980_v32 }
 0x3d7   : > { %v5378_v27 = vmax.bf16 %v5258_v23, %v5170_v35  ;;  %v5379_v49 = vmax.bf16 %v5259_v45, %v5171_v1  ;;  %v4553_v52 = vld [vmem:[#allocation2 + $0x104] sm:$0xf]  ;;  %v2828_v28 = vmax.bf16 %v2764_v44, %v9052_v46  ;;  %v2829_v51 = vmax.bf16 %v2765_v48, %v9064_v38 }
 0x3d8   : > { %v6610_v31 = vrot.slane %v5633_v47, 11  ;;  %v9392_v13 = vmax.bf16 %v4553_v52, %v4489_v15  ;;  %v5020_v37 = vrot.slane %v5018_v16, 5  ;;  %v2830_v40 = vmax.bf16 %v2766_v63, %v9066_v7  ;;  %v2895_v63 = vld [vmem:[#allocation2 + $0x13c] sm:$0x1] }
 0x3d9   : > { %v5634_v39 = vmax.bf16 %v5488_v58, %v5378_v27  ;;  %v5635_v21 = vmax.bf16 %v5491_v42, %v5379_v49  ;;  %v4554_v14 = vld [vmem:[#allocation2 + $0x108] sm:$0xf]  ;;  %v2831_v35 = vmax.bf16 %v2767_v0, %v9068_v57  ;;  %v9400_v44 = vmax.bf16 %v2892_v36, %v2828_v28 }
 0x3da   : > { %v4618_v1 = vmax.bf16 %v4554_v14, %v4490_v50  ;;  %v4998_v26 = vshll.u32 %v9392_v13, 16  ;;  %v5002_v46 = vshrl.u32 %v9392_v13, 16  ;;  %v5548_v15 = vrot.slane %v9392_v13, 6 }
 0x3db   : > { %v6123_v34 = vrot.slane %v5634_v39, 7  ;;  %v6126_v10 = vrot.slane %v5635_v21, 7  ;;  %v9402_v38 = vmax.bf16 %v2893_v2, %v2829_v51  ;;  %v9415_v28 = vmax.bf16 %v2894_v29, %v2830_v40  ;;  %v4248_v29 = vld [vmem:[#allocation2 + $0x60] sm:$0xf] }
 0x3dc   : > { %v5000_v58 = vrot.slane %v4998_v26, 5  ;;  %v5004_v42 = vrot.slane %v5002_v46, 4  ;;  %v5008_v5 = vshll.u32 %v4618_v1, 16  ;;  %v5012_v53 = vshrl.u32 %v4618_v1, 16 }
 0x3dd   : > { %v6124_v7 = vsel %vm7422_vm0, %v6610_v31, %v6123_v34  ;;  %v6125_v57 = vrot.slane %v6123_v34, 4  ;;  %v5549_v50 = vrot.slane %v5548_v15, 4  ;;  %v5550_v6 = vrot.slane %v4618_v1, 6 }
 0x3de   : > { %v5001_v43 = vsel %vm7311_vm9, %v4993_v22, %v5000_v58  ;;  %v5005_v48 = vor.u32 %v5004_v42, %v5000_v58  ;;  %v5010_v45 = vrot.slane %v5008_v5, 5  ;;  %v5014_v32 = vrot.slane %v5012_v53, 4 }
 0x3df   : > { %v6127_v23 = vsel %vm7422_vm0, %v6125_v57, %v6126_v10  ;;  %v5196_v47 = vmax.bf16 %v5001_v43, %v9382_v24  ;;  %v5551_v16 = vsel %vm7327_vm12, %v5549_v50, %v5550_v6  ;;  %v5552_v27 = vrot.slane %v5550_v6, 4  ;;  %v4320_v43 = vld [vmem:[#allocation2 + $0x70] sm:$0xf] }
 0x3e0   : > { %v6627_v49 = vcombine.low %v6124_v7, %v6127_v23  ;;  %v5006_v52 = vrot.slane %v5005_v48, 4  ;;  %v5015_v0 = vor.u32 %v5014_v32, %v5010_v45  ;;  %v9419_v31 = vmax.bf16 %v2895_v63, %v2831_v35  ;;  %v6623_v7 = vld [vmem:[%s9814_s3 + $0xc] sm:$0xf] }
 0x3e1   : > { %v5554_v22 = vsel %vm7327_vm12, %v5552_v27, %v5553_v3  ;;  %v3411_v51 = vshrl.u32 %v9400_v44, 16  ;;  %v3416_v36 = vshll.u32 %v9402_v38, 16  ;;  %v3420_v21 = vshrl.u32 %v9402_v38, 16  ;;  %6764 = vmatprep.mubr.msk.bf16.mxu0 %vm5723_vm5, %v6623_v7  ;;  %v9464_v7 = vpop.f32.mrb[32].mxu0 }
 0x3e2   : > { %v6275_v24 = vsel %vm5723_vm5, %v6627_v49, 0  ;;  %v5011_v2 = vsel %vm7311_vm9, %v5006_v52, %v5010_v45  ;;  %v5016_v39 = vrot.slane %v5015_v0, 4  ;;  %v3426_v3 = vshll.u32 %v9415_v28, 16 }
 0x3e3   : > { %6755 = vmatpush3.bf16.xpose.msra.mxu0 %v6275_v24  ;;  %v5197_v14 = vmax.bf16 %v5011_v2, %v9392_v13  ;;  %v3418_v40 = vrot.slane %v3416_v36, 5  ;;  %v3430_v35 = vshrl.u32 %v9415_v28, 16  ;;  %v3422_v46 = vrot.slane %v3420_v21, 4  ;;  %v4322_v36 = vld [vmem:[#allocation2 + $0x78] sm:$0xf] }
 0x3e4   : > { %v5021_v26 = vsel %vm7311_vm9, %v5016_v39, %v5020_v37  ;;  %v3436_v34 = vshll.u32 %v9419_v31, 16  ;;  %v3897_v10 = vrot.slane %v9402_v38, 6  ;;  %v3428_v53 = vrot.slane %v3426_v3, 5 }
 0x3e5   : > { %v5198_v58 = vmax.bf16 %v5021_v26, %v4618_v1  ;;  %v5300_v42 = vrot.slane %v5197_v14, 5  ;;  %v3419_v5 = vsel %vm7311_vm9, %v3411_v51, %v3418_v40  ;;  %v3423_v57 = vor.u32 %v3422_v46, %v3418_v40  ;;  %v4321_v51 = vld [vmem:[#allocation2 + $0x74] sm:$0xf]  ;;  %v4323_v40 = vld [vmem:[#allocation2 + $0x7c] sm:$0x1] }
 0x3e6   : > { %v3432_v50 = vrot.slane %v3430_v35, 4  ;;  %v3438_v6 = vrot.slane %v3436_v34, 5  ;;  %v3533_v37 = vmax.bf16 %v3419_v5, %v9400_v44  ;;  %v3898_v32 = vrot.slane %v3897_v10, 4  ;;  %v4250_v46 = vld [vmem:[#allocation2 + $0x68] sm:$0xf] }
 0x3e7   : > { %v5301_v48 = vrot.slane %v5300_v42, 4  ;;  %v5302_v1 = vrot.slane %v5198_v58, 5  ;;  %v5404_v45 = vmax.bf16 %v5300_v42, %v5196_v47  ;;  %v3424_v63 = vrot.slane %v3423_v57, 4 }
 0x3e8   : > { %v3433_v23 = vor.u32 %v3432_v50, %v3428_v53  ;;  %v3899_v27 = vrot.slane %v9415_v28, 6  ;;  %v3902_v49 = vrot.slane %v9419_v31, 6  ;;  %v9449_v24 = vmax.bf16 %v4320_v43, %v4248_v29  ;;  %v4251_v31 = vld [vmem:[#allocation2 + $0x6c] sm:$0x1]  ;;  %v4520_v43 = vld [vmem:[#allocation2 + $0x80] sm:$0xf] }
 0x3e9   : > { %v5303_v52 = vsel %vm7386_vm15, %v5301_v48, %v5302_v1  ;;  %v5304_v44 = vrot.slane %v5302_v1, 4  ;;  %v5660_v0 = vmax.bf16 %v5548_v15, %v5404_v45  ;;  %v3429_v2 = vsel %vm7311_vm9, %v3424_v63, %v3428_v53  ;;  %v4249_v15 = vld [vmem:[#allocation2 + $0x64] sm:$0xf]  ;;  %v9462_v53 = vpop.f32.mrb[0].mxu1 }
 0x3ea   : > { %v5405_v47 = vmax.bf16 %v5303_v52, %v5197_v14  ;;  %v3434_v39 = vrot.slane %v3433_v23, 4  ;;  %v3900_v21 = vsel %vm7327_vm12, %v3898_v32, %v3899_v27  ;;  %v3534_v26 = vmax.bf16 %v3429_v2, %v9402_v38  ;;  %v9469_v48 = vpop.f32.mrb[1].mxu1 }
 0x3eb   : > { %v5406_v3 = vmax.bf16 %v5304_v44, %v5198_v58  ;;  %v6619_v35 = vrot.slane %v5660_v0, 11  ;;  %v3901_v13 = vrot.slane %v3899_v27, 4  ;;  %v9458_v42 = vmax.bf16 %v4321_v51, %v4249_v15  ;;  %v5813_v63 = vpop.f32.mrb[2].mxu1 }
 0x3ec   : > { %v5661_v34 = vmax.bf16 %v5551_v16, %v5405_v47  ;;  %v3439_v14 = vsel %vm7311_vm9, %v3434_v39, %v3438_v6  ;;  %v9460_v5 = vmax.bf16 %v4322_v36, %v4250_v46  ;;  %v3643_v50 = vrot.slane %v3534_v26, 5  ;;  %v4521_v16 = vld [vmem:[#allocation2 + $0x84] sm:$0xf]  ;;  %v9471_v6 = vpop.f32.mrb[33].mxu0  ;;  %v5814_v0 = vpop.f32.mrb[3].mxu1 }
 0x3ed   : > { %v5662_v57 = vmax.bf16 %v5554_v22, %v5406_v3  ;;  %v3535_v58 = vmax.bf16 %v3439_v14, %v9415_v28  ;;  %v3903_v29 = vsel %vm7327_vm12, %v3901_v13, %v3902_v49  ;;  %v9473_v45 = vmax.bf16 %v4323_v40, %v4251_v31  ;;  %v4522_v28 = vld [vmem:[#allocation2 + $0x88] sm:$0xf]  ;;  %v5905_v23 = vpop.f32.mrb[34].mxu0  ;;  %v4287_v0 = vld [vmem:[#allocation2 + $0xfc] sm:$0x1] }
 0x3ee   : > { %v6186_v1 = vrot.slane %v5661_v34, 7  ;;  %v4456_v32 = vmax.bf16 %v9449_v24, %v9088_v25  ;;  %v4457_v22 = vmax.bf16 %v9458_v42, %v9106_v33  ;;  %v3644_v49 = vrot.slane %v3643_v50, 4  ;;  %v5906_v51 = vpop.f32.mrb[35].mxu0  ;;  %v10052_v25 = vld [vmem:[#allocation3_spill] sm:$0xff]  ;;  %v4523_v33 = vld [vmem:[#allocation2 + $0x8c] sm:$0x1] }
 0x3ef   : > { %v6189_v27 = vrot.slane %v5662_v57, 7  ;;  %v3645_v52 = vrot.slane %v3535_v58, 5  ;;  %v3741_v44 = vmax.bf16 %v3643_v50, %v3533_v37  ;;  %v4458_v2 = vmax.bf16 %v9460_v5, %v9109_v4  ;;  %v4359_v51 = vld [vmem:[#allocation2 + $0x10c] sm:$0x1] }
 0x3f0   : > { %v6187_v36 = vsel %vm7422_vm0, %v6619_v35, %v6186_v1  ;;  %v6188_v47 = vrot.slane %v6186_v1, 4  ;;  %v4459_v39 = vmax.bf16 %v9473_v45, %v10052_v25  ;;  %v9489_v3 = vmax.bf16 %v4520_v43, %v4456_v32  ;;  %v4286_v25 = vld [vmem:[#allocation2 + $0xf8] sm:$0xf] }
 0x3f1   : > { %v3646_v31 = vsel %vm7386_vm15, %v3644_v49, %v3645_v52  ;;  %v3647_v40 = vrot.slane %v3645_v52, 4  ;;  %v3997_v37 = vmax.bf16 %v3897_v10, %v3741_v44  ;;  %v9493_v15 = vmax.bf16 %v4521_v16, %v4457_v22  ;;  %v4284_v16 = vld [vmem:[#allocation2 + $0xf0] sm:$0xf]  ;;  %v4285_v44 = vld [vmem:[#allocation2 + $0xf4] sm:$0xf] }
 0x3f2   : > { %v6190_v35 = vsel %vm7422_vm0, %v6188_v47, %v6189_v27  ;;  %v3742_v13 = vmax.bf16 %v3646_v31, %v3534_v26  ;;  %v4586_v4 = vmax.bf16 %v4522_v28, %v4458_v2  ;;  %v4587_v57 = vmax.bf16 %v4523_v33, %v4459_v39  ;;  %v4356_v27 = vld [vmem:[#allocation2 + $0x100] sm:$0xf]  ;;  %v4357_v39 = vld [vmem:[#allocation2 + $0x104] sm:$0xf] }
 0x3f3   : > { %v6636_v46 = vcombine.low %v6187_v36, %v6190_v35  ;;  %v3743_v34 = vmax.bf16 %v3647_v40, %v3535_v58  ;;  %v6553_v14 = vrot.slane %v3997_v37, 11  ;;  %v4753_v1 = vshrl.u32 %v9489_v3, 16  ;;  %v4358_v35 = vld [vmem:[#allocation2 + $0x108] sm:$0xf] }
 0x3f4   : > { %v3998_v50 = vmax.bf16 %v3900_v21, %v3742_v13  ;;  %v4758_v63 = vshll.u32 %v9493_v15, 16  ;;  %v4762_v38 = vshrl.u32 %v9493_v15, 16  ;;  %v4768_v43 = vshll.u32 %v4586_v4, 16 }
 0x3f5   : > { %6829 = vmatprep.subr.msk.bf16.mxu0 %vm5723_vm5, %v6636_v46  ;;  %v3999_v10 = vmax.bf16 %v3903_v29, %v3743_v34  ;;  %v4772_v32 = vshrl.u32 %v4586_v4, 16  ;;  %v4778_v26 = vshll.u32 %v4587_v57, 16  ;;  %v5492_v58 = vrot.slane %v9493_v15, 6 }
 0x3f6   : > { %v4155_v22 = vrot.slane %v3998_v50, 7  ;;  %v4760_v28 = vrot.slane %v4758_v63, 5  ;;  %v4764_v23 = vrot.slane %v4762_v38, 4  ;;  %v4770_v49 = vrot.slane %v4768_v43, 5 }
 0x3f7   : > { %v4158_v21 = vrot.slane %v3999_v10, 7  ;;  %v4774_v52 = vrot.slane %v4772_v32, 4  ;;  %v4780_v31 = vrot.slane %v4778_v26, 5  ;;  %v5493_v40 = vrot.slane %v5492_v58, 4 }
 0x3f8   : > { %v4156_v36 = vsel %vm7422_vm0, %v6553_v14, %v4155_v22  ;;  %v4157_v29 = vrot.slane %v4155_v22, 4  ;;  %v4761_v47 = vsel %vm7311_vm9, %v4753_v1, %v4760_v28  ;;  %v4765_v2 = vor.u32 %v4764_v23, %v4760_v28  ;;  %v4556_v22 = vld [vmem:[#allocation2 + $0x110] sm:$0xf] }
 0x3f9   : > { %4222 = vst.msk [vmem:[#allocation2 + $0x114] sm:$0xf] %vm669_vm2, %v4156_v36  ;;  %v4775_v33 = vor.u32 %v4774_v52, %v4770_v49  ;;  %v5494_v37 = vrot.slane %v4586_v4, 6  ;;  %v5497_v34 = vrot.slane %v4587_v57, 6  ;;  %v9509_v14 = vmax.bf16 %v4356_v27, %v4284_v16  ;;  %v4325_v57 = vld [vmem:[#allocation2 + $0x84] sm:$0xf] }
 0x3fa   : > { %v4159_v13 = vsel %vm7422_vm0, %v4157_v29, %v4158_v21  ;;  %v4766_v46 = vrot.slane %v4765_v2, 4  ;;  %v5172_v63 = vmax.bf16 %v4761_v47, %v9489_v3  ;;  %v9515_v43 = vmax.bf16 %v4357_v39, %v4285_v44  ;;  %v4559_v27 = vld [vmem:[#allocation2 + $0x11c] sm:$0x1]  ;;  %v4252_v21 = vld [vmem:[#allocation2 + $0x70] sm:$0xf] }
 0x3fb   : > { %4223 = vst.msk [vmem:[#allocation2 + $0x118] sm:$0xf] %vm669_vm2, %v4159_v13  ;;  %v6605_v50 = vcombine.low %v4156_v36, %v4159_v13  ;;  %v4776_v1 = vrot.slane %v4775_v33, 4  ;;  %v5496_v38 = vrot.slane %v5494_v37, 4  ;;  %v9517_v32 = vmax.bf16 %v4358_v35, %v4286_v25  ;;  %v4326_v36 = vld [vmem:[#allocation2 + $0x88] sm:$0xf] }
 0x3fc   : > { %v4771_v10 = vsel %vm7311_vm9, %v4766_v46, %v4770_v49  ;;  %v9519_v26 = vmax.bf16 %v4359_v51, %v4287_v0  ;;  %v5495_v3 = vsel %vm7327_vm12, %v5493_v40, %v5494_v37  ;;  %v4492_v23 = vmax.bf16 %v9509_v14, %v9134_v56  ;;  %v4324_v49 = vld [vmem:[#allocation2 + $0x80] sm:$0xf]  ;;  %v10053_v56 = vld [vmem:[#allocation25_spill] sm:$0xff]  ;;  %v4254_v37 = vld [vmem:[#allocation2 + $0x78] sm:$0xf] }
 0x3fd   : > { %6824 = vmatprep.subr.msk.bf16.mxu1 %vm5723_vm5, %v6605_v50  ;;  %v4781_v16 = vsel %vm7311_vm9, %v4776_v1, %v4780_v31  ;;  %v5173_v28 = vmax.bf16 %v4771_v10, %v9493_v15  ;;  %v5498_v44 = vsel %vm7327_vm12, %v5496_v38, %v5497_v34  ;;  %v4493_v0 = vmax.bf16 %v9515_v43, %v9136_v17  ;;  %v10054_v25 = vld [vmem:[#allocation5_spill] sm:$0xff] }
 0x3fe   : > { %v5174_v52 = vmax.bf16 %v4781_v16, %v4586_v4  ;;  %v4495_v51 = vmax.bf16 %v9519_v26, %v9153_v12  ;;  %v4494_v47 = vmax.bf16 %v9517_v32, %v9138_v20  ;;  %v9537_v2 = vmax.bf16 %v4556_v22, %v4492_v23  ;;  %v4253_v4 = vld [vmem:[#allocation2 + $0x74] sm:$0xf] }
 0x3ff   : > { %v5260_v29 = vrot.slane %v5173_v28, 5  ;;  %v6597_v39 = vcombine.low %v10054_v25, %v10053_v56  ;;  %v9543_v17 = vmax.bf16 %v4324_v49, %v4252_v21  ;;  %v9545_v35 = vmax.bf16 %v4325_v57, %v4253_v4  ;;  %v4255_v4 = vld [vmem:[#allocation2 + $0x7c] sm:$0x1] }
 0x400   : > { %v5262_v33 = vrot.slane %v5174_v52, 5  ;;  %v4557_v31 = vld [vmem:[#allocation2 + $0x114] sm:$0xf]  ;;  %v9541_v40 = vmax.bf16 %v4559_v27, %v4495_v51  ;;  %v9549_v20 = vmax.bf16 %v4326_v36, %v4254_v37  ;;  %v5023_v1 = vshrl.u32 %v9537_v2, 16 }
 0x401   : > { %v5261_v12 = vrot.slane %v5260_v29, 4  ;;  %v5380_v13 = vmax.bf16 %v5260_v29, %v5172_v63  ;;  %v9547_v46 = vmax.bf16 %v4557_v31, %v4493_v0  ;;  %v5983_v10 = vsel %vm5723_vm5, %v6597_v39, 0 }
 0x402   : > { %v5264_v34 = vrot.slane %v5262_v33, 4  ;;  %v4558_v50 = vld [vmem:[#allocation2 + $0x118] sm:$0xf]  ;;  %v5048_v38 = vshll.u32 %v9541_v40, 16  ;;  %v5560_v63 = vrot.slane %v9541_v40, 6  ;;  %6745 = vmatpush3.bf16.xpose.msra.mxu1 %v5983_v10 }
 0x403   : > { %v5263_v22 = vsel %vm7386_vm15, %v5261_v12, %v5262_v33  ;;  %v4622_v16 = vmax.bf16 %v4558_v50, %v4494_v47  ;;  %v5028_v57 = vshll.u32 %v9547_v46, 16  ;;  %v5636_v21 = vmax.bf16 %v5492_v58, %v5380_v13  ;;  %v4327_v33 = vld [vmem:[#allocation2 + $0x8c] sm:$0x1] }
 0x404   : > { %v5381_v23 = vmax.bf16 %v5263_v22, %v5173_v28  ;;  %v5382_v27 = vmax.bf16 %v5264_v34, %v5174_v52  ;;  %v5032_v49 = vshrl.u32 %v9547_v46, 16  ;;  %v5050_v29 = vrot.slane %v5048_v38, 5 }
 0x405   : > { %v5030_v0 = vrot.slane %v5028_v57, 5  ;;  %v5038_v51 = vshll.u32 %v4622_v16, 16  ;;  %v5042_v36 = vshrl.u32 %v4622_v16, 16  ;;  %v5555_v47 = vrot.slane %v9547_v46, 6 }
 0x406   : > { %v5637_v56 = vmax.bf16 %v5495_v3, %v5381_v23  ;;  %v5638_v25 = vmax.bf16 %v5498_v44, %v5382_v27  ;;  %v5034_v39 = vrot.slane %v5032_v49, 4  ;;  %v5557_v15 = vrot.slane %v4622_v16, 6  ;;  %v4526_v49 = vld [vmem:[#allocation2 + $0x98] sm:$0xf] }
 0x407   : > { %v5031_v28 = vsel %vm7311_vm9, %v5023_v1, %v5030_v0  ;;  %v5040_v52 = vrot.slane %v5038_v51, 5  ;;  %v5044_v31 = vrot.slane %v5042_v36, 4  ;;  %v6611_v58 = vrot.slane %v5636_v21, 11  ;;  %v4524_v1 = vld [vmem:[#allocation2 + $0x90] sm:$0xf] }
 0x408   : > { %v6130_v40 = vrot.slane %v5637_v56, 7  ;;  %v6133_v37 = vrot.slane %v5638_v25, 7  ;;  %v5035_v12 = vor.u32 %v5034_v39, %v5030_v0  ;;  %v5199_v34 = vmax.bf16 %v5031_v28, %v9537_v2  ;;  %v4525_v21 = vld [vmem:[#allocation2 + $0x94] sm:$0xf]  ;;  %v4527_v36 = vld [vmem:[#allocation2 + $0x9c] sm:$0x1] }
 0x409   : > { %v5045_v13 = vor.u32 %v5044_v31, %v5040_v52  ;;  %v5556_v3 = vrot.slane %v5555_v47, 4  ;;  %v9565_v44 = vmax.bf16 %v4327_v33, %v4255_v4  ;;  %v5559_v10 = vrot.slane %v5557_v15, 4  ;;  %6747 = vmatmul.mubr.msk.bf16.vlgmr.msra.gmra.mrb[4].mxu1 %vm5723_vm5, %v9297_v19 }
 0x40a   : > { %v6132_v50 = vrot.slane %v6130_v40, 4  ;;  %v5036_v38 = vrot.slane %v5035_v12, 4  ;;  %v4460_v22 = vmax.bf16 %v9543_v17, %v9311_v11  ;;  %v6131_v57 = vsel %vm7422_vm0, %v6611_v58, %v6130_v40  ;;  %v4288_v58 = vld [vmem:[#allocation2 + $0x100] sm:$0xf] }
 0x40b   : > { %v5046_v23 = vrot.slane %v5045_v13, 4  ;;  %v5558_v2 = vsel %vm7327_vm12, %v5556_v3, %v5557_v15  ;;  %v4461_v27 = vmax.bf16 %v9545_v35, %v9316_v62  ;;  %v4462_v19 = vmax.bf16 %v9549_v20, %v9318_v9 }
 0x40c   : > { %v6134_v0 = vsel %vm7422_vm0, %v6132_v50, %v6133_v37  ;;  %v5041_v11 = vsel %vm7311_vm9, %v5036_v38, %v5040_v52  ;;  %v4463_v51 = vmax.bf16 %v9565_v44, %v9320_v60  ;;  %v9588_v39 = vmax.bf16 %v4524_v1, %v4460_v22  ;;  %v4360_v37 = vld [vmem:[#allocation2 + $0x110] sm:$0xf] }
 0x40d   : > { %v6628_v56 = vcombine.low %v6131_v57, %v6134_v0  ;;  %v5051_v25 = vsel %vm7311_vm9, %v5046_v23, %v5050_v29  ;;  %v5200_v62 = vmax.bf16 %v5041_v11, %v9547_v46  ;;  %v5561_v33 = vsel %vm7327_vm12, %v5559_v10, %v5560_v63 }
 0x40e   : > { %v5201_v4 = vmax.bf16 %v5051_v25, %v4622_v16  ;;  %v9592_v28 = vmax.bf16 %v4525_v21, %v4461_v27  ;;  %v4590_v52 = vmax.bf16 %v4526_v49, %v4462_v19  ;;  %v9595_v60 = vmax.bf16 %v4527_v36, %v4463_v51  ;;  %v4289_v19 = vld [vmem:[#allocation2 + $0x104] sm:$0xf]  ;;  %v4361_v51 = vld [vmem:[#allocation2 + $0x114] sm:$0xf] }
 0x40f   : > { %v6278_v9 = vsel %vm5723_vm5, %v6628_v56, 0  ;;  %v5305_v31 = vrot.slane %v5200_v62, 5  ;;  %v4783_v15 = vshrl.u32 %v9588_v39, 16  ;;  %v4432_v27 = vmax.bf16 %v4360_v37, %v4288_v58 }
 0x410   : > { %6757 = vmatpush3.bf16.xpose.msra.mxu0 %v6278_v9  ;;  %v5307_v29 = vrot.slane %v5201_v4, 5  ;;  %v4788_v46 = vshll.u32 %v9592_v28, 16  ;;  %v4792_v16 = vshrl.u32 %v9592_v28, 16  ;;  %v4798_v40 = vshll.u32 %v4590_v52, 16 }
 0x411   : > { %v5306_v63 = vrot.slane %v5305_v31, 4  ;;  %v5407_v12 = vmax.bf16 %v5305_v31, %v5199_v34  ;;  %v4802_v13 = vshrl.u32 %v4590_v52, 16  ;;  %v4808_v3 = vshll.u32 %v9595_v60, 16 }
 0x412   : > { %v5309_v50 = vrot.slane %v5307_v29, 4  ;;  %v4790_v38 = vrot.slane %v4788_v46, 5  ;;  %v4794_v10 = vrot.slane %v4792_v16, 4  ;;  %v4800_v22 = vrot.slane %v4798_v40, 5  ;;  %v4362_v16 = vld [vmem:[#allocation2 + $0x118] sm:$0xf] }
 0x413   : > { %v5308_v1 = vsel %vm7386_vm15, %v5306_v63, %v5307_v29  ;;  %v5663_v57 = vmax.bf16 %v5555_v47, %v5407_v12  ;;  %v4804_v23 = vrot.slane %v4802_v13, 4  ;;  %v4810_v11 = vrot.slane %v4808_v3, 5  ;;  %v4290_v47 = vld [vmem:[#allocation2 + $0x108] sm:$0xf]  ;;  %v4291_v40 = vld [vmem:[#allocation2 + $0x10c] sm:$0x1] }
 0x414   : > { %v5408_v21 = vmax.bf16 %v5308_v1, %v5200_v62  ;;  %v5409_v49 = vmax.bf16 %v5309_v50, %v5201_v4  ;;  %v4795_v0 = vor.u32 %v4794_v10, %v4790_v38  ;;  %v4791_v36 = vsel %vm7311_vm9, %v4783_v15, %v4790_v38  ;;  %v4363_v3 = vld [vmem:[#allocation2 + $0x11c] sm:$0x1] }
 0x415   : > { %v6620_v34 = vrot.slane %v5663_v57, 11  ;;  %v4805_v56 = vor.u32 %v4804_v23, %v4800_v22  ;;  %v5499_v25 = vrot.slane %v9592_v28, 6  ;;  %v5501_v29 = vrot.slane %v4590_v52, 6  ;;  %v4561_v23 = vld [vmem:[#allocation2 + $0x124] sm:$0xf] }
 0x416   : > { %v5664_v9 = vmax.bf16 %v5558_v2, %v5408_v21  ;;  %v5665_v31 = vmax.bf16 %v5561_v33, %v5409_v49  ;;  %v4796_v46 = vrot.slane %v4795_v0, 4  ;;  %v5504_v4 = vrot.slane %v9595_v60, 6 }
 0x417   : > { %v4806_v58 = vrot.slane %v4805_v56, 4  ;;  %v5500_v62 = vrot.slane %v5499_v25, 4  ;;  %v4433_v37 = vmax.bf16 %v4361_v51, %v4289_v19  ;;  %v5503_v13 = vrot.slane %v5501_v29, 4 }
 0x418   : > { %v6193_v63 = vrot.slane %v5664_v9, 7  ;;  %v6196_v12 = vrot.slane %v5665_v31, 7  ;;  %v4801_v15 = vsel %vm7311_vm9, %v4796_v46, %v4800_v22  ;;  %v5175_v33 = vmax.bf16 %v4791_v36, %v9588_v39  ;;  %v4562_v39 = vld [vmem:[#allocation2 + $0x128] sm:$0xf] }
 0x419   : > { %v4811_v2 = vsel %vm7311_vm9, %v4806_v58, %v4810_v11  ;;  %v5176_v50 = vmax.bf16 %v4801_v15, %v9592_v28  ;;  %v4434_v38 = vmax.bf16 %v4362_v16, %v4290_v47  ;;  %v5502_v57 = vsel %vm7327_vm12, %v5500_v62, %v5501_v29  ;;  %v4560_v11 = vld [vmem:[#allocation2 + $0x120] sm:$0xf] }
 0x41a   : > { %v6194_v60 = vsel %vm7422_vm0, %v6620_v34, %v6193_v63  ;;  %v6195_v10 = vrot.slane %v6193_v63, 4  ;;  %v5177_v1 = vmax.bf16 %v4811_v2, %v4590_v52  ;;  %v4435_v21 = vmax.bf16 %v4363_v3, %v4291_v40  ;;  %v4563_v34 = vld [vmem:[#allocation2 + $0x12c] sm:$0x1]  ;;  %v10056_v15 = vld [vmem:[#allocation11_spill] sm:$0xff] }
 0x41b   : > { %v5265_v22 = vrot.slane %v5176_v50, 5  ;;  %v4496_v49 = vmax.bf16 %v4432_v27, %v9338_v55  ;;  %v4497_v0 = vmax.bf16 %v4433_v37, %v9340_v8  ;;  %v5505_v51 = vsel %vm7327_vm12, %v5503_v13, %v5504_v4 }
 0x41c   : > { %v6197_v28 = vsel %vm7422_vm0, %v6195_v10, %v6196_v12  ;;  %v5267_v19 = vrot.slane %v5177_v1, 5  ;;  %v4498_v52 = vmax.bf16 %v4434_v38, %v9346_v41  ;;  %v4499_v31 = vmax.bf16 %v4435_v21, %v9357_v30  ;;  %v10055_v41 = vld [vmem:[#allocation4_spill] sm:$0xff] }
 0x41d   : > { %v6637_v36 = vcombine.low %v6194_v60, %v6197_v28  ;;  %v5266_v56 = vrot.slane %v5265_v22, 4  ;;  %v5383_v9 = vmax.bf16 %v5265_v22, %v5175_v33  ;;  %v9625_v27 = vmax.bf16 %v4560_v11, %v4496_v49 }
 0x41e   : > { %v5269_v55 = vrot.slane %v5267_v19, 4  ;;  %v9627_v8 = vmax.bf16 %v4561_v23, %v4497_v0  ;;  %v4626_v46 = vmax.bf16 %v4562_v39, %v4498_v52  ;;  %v9632_v16 = vmax.bf16 %v4563_v34, %v4499_v31 }
 0x41f   : > { %6830 = vmatprep.subr.msk.bf16.mxu0 %vm5723_vm5, %v6637_v36  ;;  %v5268_v29 = vsel %vm7386_vm15, %v5266_v56, %v5267_v19  ;;  %v5639_v47 = vmax.bf16 %v5499_v25, %v5383_v9  ;;  %v4464_v58 = vmax.bf16 %v10055_v41, %v9449_v24  ;;  %v5053_v30 = vshrl.u32 %v9625_v27, 16  ;;  %v10057_v36 = vld [vmem:[#allocation26_spill] sm:$0xff]  ;;  %v10058_v9 = vld [vmem:[#allocation12_spill] sm:$0xff] }
 0x420   : > { %v5384_v62 = vmax.bf16 %v5268_v29, %v5176_v50  ;;  %v5385_v4 = vmax.bf16 %v5269_v55, %v5177_v1  ;;  %v5058_v40 = vshll.u32 %v9627_v8, 16  ;;  %v5062_v37 = vshrl.u32 %v9627_v8, 16  ;;  %v4530_v55 = vld [vmem:[#allocation2 + $0xa8] sm:$0xf] }
 0x421   : > { %v5068_v63 = vshll.u32 %v4626_v46, 16  ;;  %v5072_v12 = vshrl.u32 %v4626_v46, 16  ;;  %v4465_v13 = vmax.bf16 %v10056_v15, %v9458_v42  ;;  %v5078_v33 = vshll.u32 %v9632_v16, 16 }
 0x422   : > { %v5640_v3 = vmax.bf16 %v5502_v57, %v5384_v62  ;;  %v5641_v25 = vmax.bf16 %v5505_v51, %v5385_v4  ;;  %v5060_v2 = vrot.slane %v5058_v40, 5  ;;  %v5064_v38 = vrot.slane %v5062_v37, 4  ;;  %v4528_v57 = vld [vmem:[#allocation2 + $0xa0] sm:$0xf]  ;;  %v4529_v51 = vld [vmem:[#allocation2 + $0xa4] sm:$0xf] }
 0x423   : > { %v5070_v24 = vrot.slane %v5068_v63, 5  ;;  %v5074_v50 = vrot.slane %v5072_v12, 4  ;;  %v5562_v60 = vrot.slane %v9627_v8, 6  ;;  %v6612_v10 = vrot.slane %v5639_v47, 11 }
 0x424   : > { %v6137_v1 = vrot.slane %v5640_v3, 7  ;;  %v6140_v23 = vrot.slane %v5641_v25, 7  ;;  %v5061_v22 = vsel %vm7311_vm9, %v5053_v30, %v5060_v2  ;;  %v5065_v21 = vor.u32 %v5064_v38, %v5060_v2 }
 0x425   : > { %v5075_v49 = vor.u32 %v5074_v50, %v5070_v24  ;;  %v5080_v0 = vrot.slane %v5078_v33, 5  ;;  %v5563_v42 = vrot.slane %v5562_v60, 4  ;;  %v5202_v28 = vmax.bf16 %v5061_v22, %v9625_v27  ;;  %v4531_v27 = vld [vmem:[#allocation2 + $0xac] sm:$0x1] }
 0x426   : > { %v6138_v11 = vsel %vm7422_vm0, %v6612_v10, %v6137_v1  ;;  %v6139_v39 = vrot.slane %v6137_v1, 4  ;;  %v5564_v19 = vrot.slane %v4626_v46, 6  ;;  %v5066_v52 = vrot.slane %v5065_v21, 4 }
 0x427   : > { %v5076_v34 = vrot.slane %v5075_v49, 4  ;;  %v4466_v56 = vmax.bf16 %v10057_v36, %v9460_v5  ;;  %v4467_v31 = vmax.bf16 %v10058_v9, %v9473_v45  ;;  %v5567_v41 = vrot.slane %v9632_v16, 6  ;;  %v4365_v9 = vld [vmem:[#allocation2 + $0x124] sm:$0xf] }
 0x428   : > { %v6141_v29 = vsel %vm7422_vm0, %v6139_v39, %v6140_v23  ;;  %v5565_v47 = vsel %vm7327_vm12, %v5563_v42, %v5564_v19  ;;  %v9657_v62 = vmax.bf16 %v4528_v57, %v4464_v58  ;;  %v5071_v30 = vsel %vm7311_vm9, %v5066_v52, %v5070_v24 }
 0x429   : > { %v6629_v4 = vcombine.low %v6138_v11, %v6141_v29  ;;  %v5081_v5 = vsel %vm7311_vm9, %v5076_v34, %v5080_v0  ;;  %v9663_v45 = vmax.bf16 %v4529_v51, %v4465_v13  ;;  %v5203_v40 = vmax.bf16 %v5071_v30, %v9627_v8  ;;  %v4364_v51 = vld [vmem:[#allocation2 + $0x120] sm:$0xf] }
 0x42a   : > { %v5204_v37 = vmax.bf16 %v5081_v5, %v4626_v46  ;;  %v5566_v63 = vrot.slane %v5564_v19, 4  ;;  %v4594_v12 = vmax.bf16 %v4530_v55, %v4466_v56  ;;  %v9667_v16 = vmax.bf16 %v4531_v27, %v4467_v31  ;;  %v4292_v19 = vld [vmem:[#allocation2 + $0x110] sm:$0xf]  ;;  %v4295_v56 = vld [vmem:[#allocation2 + $0x11c] sm:$0x1] }
 0x42b   : > { %v6281_v15 = vsel %vm5723_vm5, %v6629_v4, 0  ;;  %v4813_v58 = vshrl.u32 %v9657_v62, 16  ;;  %v4818_v3 = vshll.u32 %v9663_v45, 16  ;;  %v5310_v25 = vrot.slane %v5203_v40, 5  ;;  %v4293_v27 = vld [vmem:[#allocation2 + $0x114] sm:$0xf] }
 0x42c   : > { %6759 = vmatpush3.bf16.xpose.msra.mxu0 %v6281_v15  ;;  %v5312_v2 = vrot.slane %v5204_v37, 5  ;;  %v4822_v33 = vshrl.u32 %v9663_v45, 16  ;;  %v4828_v13 = vshll.u32 %v4594_v12, 16  ;;  %v4832_v24 = vshrl.u32 %v4594_v12, 16  ;;  %v4366_v4 = vld [vmem:[#allocation2 + $0x128] sm:$0xf] }
 0x42d   : > { %v4820_v38 = vrot.slane %v4818_v3, 5  ;;  %v4838_v8 = vshll.u32 %v9667_v16, 16  ;;  %v5506_v46 = vrot.slane %v9663_v45, 6  ;;  %v5311_v50 = vrot.slane %v5310_v25, 4 }
 0x42e   : > { %v5314_v10 = vrot.slane %v5312_v2, 4  ;;  %v5410_v1 = vmax.bf16 %v5310_v25, %v5202_v28  ;;  %v4824_v23 = vrot.slane %v4822_v33, 4  ;;  %v5568_v22 = vsel %vm7327_vm12, %v5566_v63, %v5567_v41  ;;  %v4367_v63 = vld [vmem:[#allocation2 + $0x12c] sm:$0x1] }
 0x42f   : > { %v4821_v21 = vsel %vm7311_vm9, %v4813_v58, %v4820_v38  ;;  %v4830_v49 = vrot.slane %v4828_v13, 5  ;;  %v4834_v0 = vrot.slane %v4832_v24, 4  ;;  %v5313_v42 = vsel %vm7386_vm15, %v5311_v50, %v5312_v2  ;;  %v4564_v50 = vld [vmem:[#allocation2 + $0x130] sm:$0xf] }
 0x430   : > { %v5412_v57 = vmax.bf16 %v5314_v10, %v5204_v37  ;;  %v5666_v11 = vmax.bf16 %v5562_v60, %v5410_v1  ;;  %v4825_v39 = vor.u32 %v4824_v23, %v4820_v38  ;;  %v5411_v52 = vmax.bf16 %v5313_v42, %v5203_v40  ;;  %v4294_v37 = vld [vmem:[#allocation2 + $0x118] sm:$0xf] }
 0x431   : > { %v4835_v34 = vor.u32 %v4834_v0, %v4830_v49  ;;  %v4840_v28 = vrot.slane %v4838_v8, 5  ;;  %v5507_v36 = vrot.slane %v5506_v46, 4  ;;  %v5178_v29 = vmax.bf16 %v4821_v21, %v9657_v62  ;;  %v4566_v21 = vld [vmem:[#allocation2 + $0x138] sm:$0xf] }
 0x432   : > { %v5668_v31 = vmax.bf16 %v5568_v22, %v5412_v57  ;;  %v4826_v55 = vrot.slane %v4825_v39, 4  ;;  %v5508_v41 = vrot.slane %v4594_v12, 6  ;;  %v5667_v30 = vmax.bf16 %v5565_v47, %v5411_v52  ;;  %v4567_v57 = vld [vmem:[#allocation2 + $0x13c] sm:$0x1] }
 0x433   : > { %v6621_v60 = vrot.slane %v5666_v11, 11  ;;  %v4836_v5 = vrot.slane %v4835_v34, 4  ;;  %v4436_v40 = vmax.bf16 %v4364_v51, %v4292_v19  ;;  %v5511_v25 = vrot.slane %v9667_v16, 6  ;;  %v4565_v16 = vld [vmem:[#allocation2 + $0x134] sm:$0xf] }
 0x434   : > { %v6203_v15 = vrot.slane %v5668_v31, 7  ;;  %v4831_v58 = vsel %vm7311_vm9, %v4826_v55, %v4830_v49  ;;  %v5509_v3 = vsel %vm7327_vm12, %v5507_v36, %v5508_v41  ;;  %v6200_v2 = vrot.slane %v5667_v30, 7 }
 0x435   : > { %v4841_v62 = vsel %vm7311_vm9, %v4836_v5, %v4840_v28  ;;  %v5179_v47 = vmax.bf16 %v4831_v58, %v9663_v45  ;;  %v4437_v33 = vmax.bf16 %v4365_v9, %v4293_v27  ;;  %v5510_v38 = vrot.slane %v5508_v41, 4 }
 0x436   : > { %v5180_v13 = vmax.bf16 %v4841_v62, %v4594_v12  ;;  %v4438_v24 = vmax.bf16 %v4366_v4, %v4294_v37  ;;  %v4439_v8 = vmax.bf16 %v4367_v63, %v4295_v56  ;;  %v6201_v10 = vsel %vm7422_vm0, %v6621_v60, %v6200_v2 }
 0x437   : > { %v6202_v1 = vrot.slane %v6200_v2, 4  ;;  %v5270_v23 = vrot.slane %v5179_v47, 5  ;;  %v4500_v22 = vmax.bf16 %v4436_v40, %v9509_v14  ;;  %v4501_v0 = vmax.bf16 %v4437_v33, %v9515_v43 }
 0x438   : > { %v5272_v49 = vrot.slane %v5180_v13, 5  ;;  %v4502_v42 = vmax.bf16 %v4438_v24, %v9517_v32  ;;  %v4503_v12 = vmax.bf16 %v4439_v8, %v9519_v26  ;;  %v5512_v32 = vsel %vm7327_vm12, %v5510_v38, %v5511_v25 }
 0x439   : > { %v6204_v11 = vsel %vm7422_vm0, %v6202_v1, %v6203_v15  ;;  %v5271_v39 = vrot.slane %v5270_v23, 4  ;;  %v5386_v19 = vmax.bf16 %v5270_v23, %v5178_v29  ;;  %v9699_v51 = vmax.bf16 %v4564_v50, %v4500_v22  ;;  %v4533_v23 = vld [vmem:[#allocation2 + $0xb4] sm:$0xf] }
 0x43a   : > { %v6638_v52 = vcombine.low %v6201_v10, %v6204_v11  ;;  %v5274_v34 = vrot.slane %v5272_v49, 4  ;;  %v9701_v14 = vmax.bf16 %v4565_v16, %v4501_v0  ;;  %v9703_v28 = vmax.bf16 %v4566_v21, %v4502_v42  ;;  %v10059_v10 = vld [vmem:[#allocation17_spill] sm:$0xff]  ;;  %v10060_v21 = vld [vmem:[#allocation18_spill] sm:$0xff]  ;;  %v10061_v0 = vld [vmem:[#allocation8_spill] sm:$0xff] }
 0x43b   : > { %v5273_v43 = vsel %vm7386_vm15, %v5271_v39, %v5272_v49  ;;  %v9709_v26 = vmax.bf16 %v4567_v57, %v4503_v12  ;;  %v5083_v36 = vshrl.u32 %v9699_v51, 16  ;;  %v5642_v29 = vmax.bf16 %v5506_v46, %v5386_v19  ;;  %v4534_v12 = vld [vmem:[#allocation2 + $0xb8] sm:$0xf]  ;;  %v4532_v19 = vld [vmem:[#allocation2 + $0xb0] sm:$0xf] }
 0x43c   : > { %6831 = vmatprep.subr.msk.bf16.mxu0 %vm5723_vm5, %v6638_v52  ;;  %v5387_v56 = vmax.bf16 %v5273_v43, %v5179_v47  ;;  %v5388_v9 = vmax.bf16 %v5274_v34, %v5180_v13  ;;  %v5088_v31 = vshll.u32 %v9701_v14, 16  ;;  %v5092_v55 = vshrl.u32 %v9701_v14, 16  ;;  %v10062_v43 = vld [vmem:[#allocation27_spill] sm:$0xff] }
 0x43d   : > { %v5098_v41 = vshll.u32 %v9703_v28, 16  ;;  %v5102_v27 = vshrl.u32 %v9703_v28, 16  ;;  %v5108_v4 = vshll.u32 %v9709_v26, 16  ;;  %v5569_v15 = vrot.slane %v9701_v14, 6 }
 0x43e   : > { %v5643_v30 = vmax.bf16 %v5509_v3, %v5387_v56  ;;  %v5644_v60 = vmax.bf16 %v5512_v32, %v5388_v9  ;;  %v5090_v5 = vrot.slane %v5088_v31, 5  ;;  %v5094_v37 = vrot.slane %v5092_v55, 4 }
 0x43f   : > { %v5100_v63 = vrot.slane %v5098_v41, 5  ;;  %v5104_v40 = vrot.slane %v5102_v27, 4  ;;  %v6613_v2 = vrot.slane %v5642_v29, 11  ;;  %v5110_v47 = vrot.slane %v5108_v4, 5 }
 0x440   : > { %v6144_v58 = vrot.slane %v5643_v30, 7  ;;  %v6147_v25 = vrot.slane %v5644_v60, 7  ;;  %v5091_v45 = vsel %vm7311_vm9, %v5083_v36, %v5090_v5  ;;  %v5095_v46 = vor.u32 %v5094_v37, %v5090_v5 }
 0x441   : > { %v5105_v62 = vor.u32 %v5104_v40, %v5100_v63  ;;  %v5205_v3 = vmax.bf16 %v5091_v45, %v9699_v51  ;;  %v5571_v38 = vrot.slane %v9703_v28, 6  ;;  %v5570_v50 = vrot.slane %v5569_v15, 4  ;;  %v4535_v51 = vld [vmem:[#allocation2 + $0xbc] sm:$0x1] }
 0x442   : > { %v6146_v33 = vrot.slane %v6144_v58, 4  ;;  %v5096_v13 = vrot.slane %v5095_v46, 4  ;;  %v6145_v24 = vsel %vm7422_vm0, %v6613_v2, %v6144_v58  ;;  %v4468_v1 = vmax.bf16 %v10059_v10, %v9543_v17 }
 0x443   : > { %v5106_v8 = vrot.slane %v5105_v62, 4  ;;  %v4469_v49 = vmax.bf16 %v10060_v21, %v9545_v35  ;;  %v4470_v42 = vmax.bf16 %v10061_v0, %v9549_v20  ;;  %v5574_v39 = vrot.slane %v9709_v26, 6  ;;  %v6356_v20 = vld [vmem:[%s9815_s4] sm:$0xff] }
 0x444   : > { %v6148_v22 = vsel %vm7422_vm0, %v6146_v33, %v6147_v25  ;;  %v5101_v16 = vsel %vm7311_vm9, %v5096_v13, %v5100_v63  ;;  %v5573_v34 = vrot.slane %v5571_v38, 4  ;;  %v4471_v35 = vmax.bf16 %v10062_v43, %v9565_v44 }
 0x445   : > { %v6630_v57 = vcombine.low %v6145_v24, %v6148_v22  ;;  %v5111_v11 = vsel %vm7311_vm9, %v5106_v8, %v5110_v47  ;;  %v5206_v17 = vmax.bf16 %v5101_v16, %v9701_v14  ;;  %v9746_v32 = vmax.bf16 %v4533_v23, %v4469_v49 }
 0x446   : > { %v5207_v52 = vmax.bf16 %v5111_v11, %v9703_v28  ;;  %v9752_v9 = vmax.bf16 %v4534_v12, %v4470_v42  ;;  %v4596_v31 = vmax.bf16 %v4532_v19, %v4468_v1  ;;  %v9754_v55 = vmax.bf16 %v4535_v51, %v4471_v35 }
 0x447   : > { %v6284_v36 = vsel %vm5723_vm5, %v6630_v57, 0  ;;  %v5315_v56 = vrot.slane %v5206_v17, 5  ;;  %v4848_v28 = vshll.u32 %v9746_v32, 16  ;;  %v6856_v29 = vmov 0  }
 0x448   : > { %6761 = vmatpush3.bf16.xpose.msra.mxu0 %v6284_v36  ;;  %v5317_v26 = vrot.slane %v5207_v52, 5  ;;  %6843 = vset.pattern.permute.xlu1 %v6856_v29  ;;  %v4852_v27 = vshrl.u32 %v9746_v32, 16  ;;  %v4858_v4 = vshll.u32 %v9752_v9, 16  ;;  %v4862_v5 = vshrl.u32 %v9752_v9, 16 }
 0x449   : > { %v5316_v44 = vrot.slane %v5315_v56, 4  ;;  %v5413_v41 = vmax.bf16 %v5315_v56, %v5205_v3  ;;  %6359 = vperm.xlu1 %6843, %v6356_v20   ;;  %6844 = vset.pattern.permute.xlu0 %v6856_v29  ;;  %v4850_v60 = vrot.slane %v4848_v28, 5  ;;  %v4868_v37 = vshll.u32 %v9754_v55, 16 }
 0x44a   : > { %v5319_v30 = vrot.slane %v5317_v26, 4  ;;  %v4854_v40 = vrot.slane %v4852_v27, 4  ;;  %v4860_v58 = vrot.slane %v4858_v4, 5  ;;  %v4843_v46 = vshrl.u32 %v4596_v31, 16 }
 0x44b   : > { %v5318_v63 = vsel %vm7386_vm15, %v5316_v44, %v5317_v26  ;;  %v4864_v2 = vrot.slane %v4862_v5, 4  ;;  %v5572_v62 = vsel %vm7327_vm12, %v5570_v50, %v5571_v38  ;;  %v5575_v47 = vsel %vm7327_vm12, %v5573_v34, %v5574_v39 }
 0x44c   : > { %v5414_v25 = vmax.bf16 %v5318_v63, %v5206_v17  ;;  %v5415_v45 = vmax.bf16 %v5319_v30, %v5207_v52  ;;  %v5669_v33 = vmax.bf16 %v5569_v15, %v5413_v41  ;;  %v4855_v13 = vor.u32 %v4854_v40, %v4850_v60 }
 0x44d   : > { %v4865_v8 = vor.u32 %v4864_v2, %v4860_v58  ;;  %v4870_v10 = vrot.slane %v4868_v37, 5  ;;  %v5902_v23 = vadd.f32 %v9464_v7, %v9462_v53  ;;  %v4851_v38 = vsel %vm7311_vm9, %v4843_v46, %v4850_v60 }
 0x44e   : > { %v5670_v3 = vmax.bf16 %v5572_v62, %v5414_v25  ;;  %v5671_v24 = vmax.bf16 %v5575_v47, %v5415_v45  ;;  %v4856_v1 = vrot.slane %v4855_v13, 4  ;;  %v6622_v21 = vrot.slane %v5669_v33, 11 }
 0x44f   : > { %v4866_v50 = vrot.slane %v4865_v8, 4  ;;  %v5513_v15 = vrot.slane %v9746_v32, 6  ;;  %v5904_v49 = vadd.f32 %v9471_v6, %v9469_v48  ;;  %v5515_v7 = vrot.slane %v9752_v9, 6 }
 0x450   : > { %v6207_v22 = vrot.slane %v5670_v3, 7  ;;  %v6210_v16 = vrot.slane %v5671_v24, 7  ;;  %v4861_v14 = vsel %vm7311_vm9, %v4856_v1, %v4860_v58  ;;  %v5181_v19 = vmax.bf16 %v4851_v38, %v4596_v31 }
 0x451   : > { %v4871_v42 = vsel %vm7311_vm9, %v4866_v50, %v4870_v10  ;;  %v5182_v53 = vmax.bf16 %v4861_v14, %v9746_v32  ;;  %v5514_v51 = vrot.slane %v5513_v15, 4  ;;  %v5517_v59 = vrot.slane %v5515_v7, 4 }
 0x452   : > { %v6209_v0 = vrot.slane %v6207_v22, 4  ;;  %v5183_v12 = vmax.bf16 %v4871_v42, %v9752_v9  ;;  %v6208_v57 = vsel %vm7422_vm0, %v6622_v21, %v6207_v22  ;;  %v5518_v52 = vrot.slane %v9754_v55, 6 }
 0x453   : > { %v5275_v17 = vrot.slane %v5182_v53, 5  ;;  %v5516_v36 = vsel %vm7327_vm12, %v5514_v51, %v5515_v7 }
 0x454   : > { %v6211_v11 = vsel %vm7422_vm0, %v6209_v0, %v6210_v16  ;;  %v5277_v48 = vrot.slane %v5183_v12, 5  ;;  %v5519_v56 = vsel %vm7327_vm12, %v5517_v59, %v5518_v52 }
 0x455   : > { %v6639_v39 = vcombine.low %v6208_v57, %v6211_v11  ;;  %v5276_v6 = vrot.slane %v5275_v17, 4  ;;  %v5389_v43 = vmax.bf16 %v5275_v17, %v5181_v19 }
 0x456   : > { %v5279_v34 = vrot.slane %v5277_v48, 4 }
 0x457   : > { %6832 = vmatprep.subr.msk.bf16.mxu0 %vm5723_vm5, %v6639_v39  ;;  %v5278_v35 = vsel %vm7386_vm15, %v5276_v6, %v5277_v48  ;;  %v5645_v9 = vmax.bf16 %v5513_v15, %v5389_v43 }
 0x458   : > { %v5390_v32 = vmax.bf16 %v5278_v35, %v5182_v53  ;;  %v5391_v20 = vmax.bf16 %v5279_v34, %v5183_v12 }
 0x459   : > { %v6614_v29 = vrot.slane %v5645_v9, 11 }
 0x45a   : > { %v5646_v26 = vmax.bf16 %v5516_v36, %v5390_v32  ;;  %v5647_v31 = vmax.bf16 %v5519_v56, %v5391_v20 }
 0x45c   : > { %v6151_v28 = vrot.slane %v5646_v26, 7  ;;  %v6154_v55 = vrot.slane %v5647_v31, 7 }
 0x45e   : > { %v6153_v44 = vrot.slane %v6151_v28, 4  ;;  %v6152_v41 = vsel %vm7422_vm0, %v6614_v29, %v6151_v28 }
 0x460   : > { %v6155_v18 = vsel %vm7422_vm0, %v6153_v44, %v6154_v55 }
 0x461   : > { %v6631_v27 = vcombine.low %v6152_v41, %v6155_v18 }
 0x463   : > { %v6287_v4 = vsel %vm5723_vm5, %v6631_v27, 0 }
 0x464   : > { %6763 = vmatpush3.bf16.xpose.msra.mxu0 %v6287_v4 }
 0x46b   : > { %6765 = vmatmul.mubr.msk.bf16.vlgmr.msra.gmra.mrb[36].mxu0 %vm5723_vm5, %v6846_v54 }
 0x4c8   : > { %v6360_v61 = vpop.permute.xlu1 %6359 }
 0x4dc   : > { %v6043_v30 = vpop.f32.mrb[4].mxu1 }
 0x4dd   : > { %v6050_v60 = vadd.f32 %v6043_v30, %v5902_v23  ;;  %v6045_v5 = vpop.f32.mrb[5].mxu1 }
 0x4de   : > { %v6051_v37 = vadd.f32 %v6045_v5, %v5904_v49  ;;  %v6047_v63 = vpop.f32.mrb[6].mxu1 }
 0x4df   : > { %v6048_v40 = vpop.f32.mrb[7].mxu1 }
 0x53e   : > { %v6347_v58 = vpop.f32.mrb[36].mxu0 }
 0x53f   : > { %v6354_v25 = vadd.f32 %v6347_v58, %v6050_v60  ;;  %v6349_v45 = vpop.f32.mrb[37].mxu0 }
 0x540   : > { %v6355_v46 = vadd.f32 %v6349_v45, %v6051_v37  ;;  %v6351_v2 = vpop.f32.mrb[38].mxu0 }
 0x541   : > { %v6362_v62 = vadd.f32 %v6360_v61, %v6354_v25  ;;  %v6352_v47 = vpop.f32.mrb[39].mxu0 }
 0x542   : > { %v6363_v33 = vadd.f32 %v6360_v61, %v6355_v46 }
 0x543   : > { %v6364_v13 = vadd.f32 3.0, %v6362_v62 }
 0x544   : > { %v6365_v3 = vadd.f32 3.0, %v6363_v33 }
 0x545   : > { %v6366_v24 = vmax.f32 %v6364_v13, 0.0 }
 0x546   : > { %v6367_v8 = vmax.f32 %v6365_v3, 0.0 }
 0x547   : > { %v6368_v10 = vmin.f32 %v6366_v24, 6.0 }
 0x548   : > { %v6369_v1 = vmin.f32 %v6367_v8, 6.0 }
 0x549   : > { %v6370_v23 = vmul.f32 %v6368_v10, %v6362_v62 }
 0x54a   : > { %v6371_v22 = vmul.f32 %v6369_v1, %v6363_v33 }
 0x54b   : > { %v6372_v16 = vmul.f32 0.16666667, %v6370_v23 }
 0x54c   : > { %v6373_v38 = vmul.f32 0.16666667, %v6371_v22 }
 0x54d   : > { %6374 = vst [vmem:[%s224_s22] sm:$0xff] %v6372_v16 }
 0x54e   : > { %6375 = vst [vmem:[%s224_s22 + $0x8] sm:$0xff] %v6373_v38 }
 0x54f PF: > { %s15_s18 = sadd.s32 1, %s6853_s18  }
 0x550   : > { %p12_p4 = scmp.ge.s32.totalorder %s15_s18, 4  }
 0x552   :  { %14 = sbr.rel (!%p12_p4) target bundleno = 1 (0x1), region = 77 }

</bundles_post_ra>
